<compile_context>
chip_gen: v5e
topology: v5e:2x2
jax: 0.10.0
libtpu: 0.0.40
codegen_flags: <defaults>
</compile_context>

<pallas_src>
import jax
import jax.numpy as jnp
from jax import lax
from jax.experimental import pallas as pl
from jax.experimental.pallas import tpu as pltpu

# ----------------------------------------------------------------------------
# Hyper-parameters (kernel sizes 9/27/40/65 force maxlen large enough so that
# every ConvBlock has a positive output length).
# ----------------------------------------------------------------------------
MAXLEN = 340          # sequence length == embedding vocab size (as in the module)
EMBED_DIM = 16
RNN_SIZE = 16
CNN_SIZE = 16
KERNELS = (9, 27, 40, 65)
OUTPUT_CNT = 8
BATCH = 2

H = RNN_SIZE
G = 3 * H                                     # 48 gates per direction
C_IN = EMBED_DIM + 2 * RNN_SIZE               # 48 conv input channels
NPACK = len(KERNELS) * CNN_SIZE               # 64 packed conv output channels
FEAT = 2 * NPACK                              # 128 fc1 input features
KMAX = max(KERNELS)                           # 65
LPAD = ((MAXLEN + KMAX - 1 + 7) // 8) * 8     # 408 zero-padded conv input length
LPOOL = MAXLEN // 4                           # 85 pooled rows computed per block

L1S = [MAXLEN - k + 1 for k in KERNELS]             # conv1 valid lengths
L2S = [l1 // 4 for l1 in L1S]                       # after MaxPool1d(4)
L3S = [l2 - k + 1 for l2, k in zip(L2S, KERNELS)]   # conv2 valid lengths
M2 = max(L3S)                                       # 75 conv2 rows computed
POOL_PAD = ((M2 + KMAX - 1 + 7) // 8) * 8           # 144 padded pooled scratch rows
assert max(L2S) <= LPOOL and min(L3S) > 0

VMEM_LIMIT = 32 * 1024 * 1024


# ----------------------------------------------------------------------------
# Single fused Pallas kernel: GRU stack + ConvBlocks + pooling + MLP head.
# ----------------------------------------------------------------------------
def _byte_rcnn_kernel(
        emb_ref, wiT1_ref, bi1_ref, wiT2_ref, bi2_ref, whh_ref, bhh_ref,
        w1_ref, b1_ref, w2_ref, b2_ref, l3_ref, il3_ref,
        fc1w_ref, fc1b_ref, fc2w_ref, fc2b_ref, ow_ref, ob_ref,
        o_ref,
        gi1f, gi1b, gi2f, gi2b, hs1f, hs1b, hs2f, hs2b,
        conv_in, acc_ref, pool_ref):
    B = emb_ref.shape[0]

    # ---------------- GRU stack: two bidirectional layers ----------------
    # PyTorch gate order [r, z, n]; both b_ih and b_hh applied.
    wiT1 = wiT1_ref[...]
    bi1 = bi1_ref[...]
    for b in range(B):
        g = jnp.dot(emb_ref[b], wiT1, preferred_element_type=jnp.float32) + bi1
        gi1f[b] = g[:, 0:G]
        gi1b[b] = g[:, G:2 * G]

    def make_step(gif, gib, hf_out, hb_out, whh_blk, bhh_cat):
        # One block-diagonal (B,2H)@(2H,6H) matmul serves both directions.
        def step(t, h_cat):
            gf = gif[:, pl.ds(t, 1), :].reshape(B, G)
            gb = gib[:, pl.ds(MAXLEN - 1 - t, 1), :].reshape(B, G)
            gh = jnp.dot(h_cat, whh_blk, preferred_element_type=jnp.float32) + bhh_cat

            def upd(gx, ghx, hx):
                r = jax.nn.sigmoid(gx[:, 0:H] + ghx[:, 0:H])
                z = jax.nn.sigmoid(gx[:, H:2 * H] + ghx[:, H:2 * H])
                n = jnp.tanh(gx[:, 2 * H:G] + r * ghx[:, 2 * H:G])
                return (1.0 - z) * n + z * hx

            hf_new = upd(gf, gh[:, 0:G], h_cat[:, 0:H])
            hb_new = upd(gb, gh[:, G:2 * G], h_cat[:, H:2 * H])
            hf_out[:, pl.ds(t, 1), :] = hf_new.reshape(B, 1, H)
            hb_out[:, pl.ds(MAXLEN - 1 - t, 1), :] = hb_new.reshape(B, 1, H)
            return jnp.concatenate([hf_new, hb_new], axis=1)
        return step

    h0 = jnp.zeros((B, 2 * H), jnp.float32)
    lax.fori_loop(0, MAXLEN,
                  make_step(gi1f, gi1b, hs1f, hs1b, whh_ref[0], bhh_ref[0]), h0)

    wiT2 = wiT2_ref[...]
    bi2 = bi2_ref[...]
    for b in range(B):
        x2 = jnp.concatenate([hs1f[b], hs1b[b]], axis=1)           # (L, 2H)
        g = jnp.dot(x2, wiT2, preferred_element_type=jnp.float32) + bi2
        gi2f[b] = g[:, 0:G]
        gi2b[b] = g[:, G:2 * G]

    lax.fori_loop(0, MAXLEN,
                  make_step(gi2f, gi2b, hs2f, hs2b, whh_ref[1], bhh_ref[1]), h0)

    # ------ zero-padded channels-last conv input slab [emb | ctx_f | ctx_b] ------
    for b in range(B):
        feats = jnp.concatenate([emb_ref[b], hs2f[b], hs2b[b]], axis=1)       # (L, C_IN)
        conv_in[b] = jnp.concatenate(
            [feats, jnp.zeros((LPAD - MAXLEN, C_IN), jnp.float32)], axis=0)   # (LPAD, C_IN)

    # ------ 4 fused ConvBlocks (output channels packed along 64 lanes) ------
    # conv1/conv2 = per-tap shifted-slice matmuls (bf16 operands, f32 acc);
    # MaxPool1d(4) = max over 4 phase slices with bias + LeakyReLU(0.3) hoisted
    # after the max; conv2 uses block-diagonal packed weights; global max/avg
    # pooling masked per block to its valid conv2 length.
    b1 = b1_ref[...]
    b2 = b2_ref[...]
    l3 = l3_ref[...]
    il3 = il3_ref[...]
    pos = lax.broadcasted_iota(jnp.int32, (M2, NPACK), 0)
    valid = pos < l3

    feat_rows = []
    for b in range(B):
        acc_ref[...] = jnp.zeros_like(acc_ref)

        @pl.loop(0, KMAX)
        def _(k):
            xk = conv_in[b, pl.ds(k, MAXLEN), :].astype(jnp.bfloat16)   # (L, C_IN)
            acc_ref[...] += jnp.dot(xk, w1_ref[k], preferred_element_type=jnp.float32)

        m01 = jnp.maximum(acc_ref[pl.ds(0, LPOOL, 4), :], acc_ref[pl.ds(1, LPOOL, 4), :])
        m23 = jnp.maximum(acc_ref[pl.ds(2, LPOOL, 4), :], acc_ref[pl.ds(3, LPOOL, 4), :])
        pooled = jnp.maximum(m01, m23) + b1
        pooled = jnp.where(pooled > 0, pooled, 0.3 * pooled)            # (LPOOL, 64)

        # zero-padded pooled activation so every conv2 tap slice stays in bounds
        pool_ref[...] = jnp.concatenate(
            [pooled, jnp.zeros((POOL_PAD - LPOOL, NPACK), jnp.float32)], axis=0)

        def conv2_tap(k, acc2):
            pk = pool_ref[pl.ds(k, M2), :].astype(jnp.bfloat16)          # (M2, 64)
            return acc2 + jnp.dot(pk, w2_ref[k], preferred_element_type=jnp.float32)

        y2 = lax.fori_loop(0, KMAX, conv2_tap, jnp.zeros((M2, NPACK), jnp.float32))
        y2 = y2 + b2

        mx = jnp.max(jnp.where(valid, y2, -jnp.inf), axis=0, keepdims=True)
        av = jnp.sum(jnp.where(valid, y2, 0.0), axis=0, keepdims=True) * il3
        feat_rows.append(jnp.concatenate([mx, av], axis=1))              # (1, 128)

    feat = jnp.concatenate(feat_rows, axis=0)                            # (B, 128)

    # ---------------------------- MLP head ----------------------------
    # TODO(synk): F.dropout(0.1) between fc1 and fc2 treated as identity (inference).
    h1 = jnp.dot(feat.astype(jnp.bfloat16), fc1w_ref[...],
                 preferred_element_type=jnp.float32) + fc1b_ref[...]
    h1 = jnp.maximum(h1, 0.0)
    h2 = jnp.dot(h1.astype(jnp.bfloat16), fc2w_ref[...],
                 preferred_element_type=jnp.float32) + fc2b_ref[...]
    h2 = jnp.maximum(h2, 0.0)
    o_ref[...] = jnp.dot(h2.astype(jnp.bfloat16), ow_ref[...],
                         preferred_element_type=jnp.float32) + ob_ref[...]


def byte_rcnn_pallas(emb, wiT1, bi1, wiT2, bi2, whh, bhh,
                     w1cat, b1cat, w2cat, b2cat, l3i, il3,
                     fc1w, fc1b, fc2w, fc2b, ow, ob):
    B = emb.shape[0]

    def full_spec(shape):
        return pl.BlockSpec(shape, lambda *_: (0,) * len(shape))

    in_specs = [
        full_spec((B, MAXLEN, EMBED_DIM)),
        full_spec((EMBED_DIM, 2 * G)),
        full_spec((1, 2 * G)),
        full_spec((2 * H, 2 * G)),
        full_spec((1, 2 * G)),
        full_spec((2, 2 * H, 2 * G)),
        full_spec((2, 1, 2 * G)),
        full_spec((KMAX, C_IN, NPACK)),
        full_spec((1, NPACK)),
        full_spec((KMAX, NPACK, NPACK)),
        full_spec((1, NPACK)),
        full_spec((1, NPACK)),
        full_spec((1, NPACK)),
        full_spec((FEAT, 1024)),
        full_spec((1, 1024)),
        full_spec((1024, 512)),
        full_spec((1, 512)),
        full_spec((512, OUTPUT_CNT)),
        full_spec((1, OUTPUT_CNT)),
    ]

    return pl.pallas_call(
        _byte_rcnn_kernel,
        out_shape=jax.ShapeDtypeStruct((B, OUTPUT_CNT), jnp.float32),
        grid=(1,),
        in_specs=in_specs,
        out_specs=full_spec((B, OUTPUT_CNT)),
        scratch_shapes=[
            pltpu.VMEM((B, MAXLEN, G), jnp.float32),      # gi layer1 fwd
            pltpu.VMEM((B, MAXLEN, G), jnp.float32),      # gi layer1 bwd
            pltpu.VMEM((B, MAXLEN, G), jnp.float32),      # gi layer2 fwd
            pltpu.VMEM((B, MAXLEN, G), jnp.float32),      # gi layer2 bwd
            pltpu.VMEM((B, MAXLEN, H), jnp.float32),      # layer1 fwd states
            pltpu.VMEM((B, MAXLEN, H), jnp.float32),      # layer1 bwd states
            pltpu.VMEM((B, MAXLEN, H), jnp.float32),      # layer2 fwd states
            pltpu.VMEM((B, MAXLEN, H), jnp.float32),      # layer2 bwd states
            pltpu.VMEM((B, LPAD, C_IN), jnp.float32),     # zero-padded conv input slab
            pltpu.VMEM((MAXLEN, NPACK), jnp.float32),     # conv1 accumulator
            pltpu.VMEM((POOL_PAD, NPACK), jnp.float32),   # padded pooled activation
        ],
        compiler_params=pltpu.CompilerParams(
            dimension_semantics=("arbitrary",),
            vmem_limit_bytes=VMEM_LIMIT,
        ),
    )(emb, wiT1, bi1, wiT2, bi2, whh, bhh,
      w1cat, b1cat, w2cat, b2cat, l3i, il3,
      fc1w, fc1b, fc2w, fc2b, ow, ob)


# ----------------------------------------------------------------------------
# Parameter packing (PyTorch layouts -> kernel layouts).
# ----------------------------------------------------------------------------
def pack_gru(p1, p2):
    wiT1 = jnp.concatenate([p1["wih_f"].T, p1["wih_b"].T], axis=1)        # (E, 2G)
    bi1 = jnp.concatenate([p1["bih_f"], p1["bih_b"]]).reshape(1, -1)
    wiT2 = jnp.concatenate([p2["wih_f"].T, p2["wih_b"].T], axis=1)        # (2H, 2G)
    bi2 = jnp.concatenate([p2["bih_f"], p2["bih_b"]]).reshape(1, -1)

    def blockdiag(p):
        w = jnp.zeros((2 * H, 2 * G), jnp.float32)
        w = w.at[0:H, 0:G].set(p["whh_f"].T)
        w = w.at[H:2 * H, G:2 * G].set(p["whh_b"].T)
        return w

    whh = jnp.stack([blockdiag(p1), blockdiag(p2)])                       # (2, 2H, 2G)
    bhh = jnp.stack([jnp.concatenate([p1["bhh_f"], p1["bhh_b"]]),
                     jnp.concatenate([p2["bhh_f"], p2["bhh_b"]])])[:, None, :]  # (2, 1, 2G)
    return wiT1, bi1, wiT2, bi2, whh, bhh


def pack_convs(params):
    w1cat = jnp.zeros((KMAX, C_IN, NPACK), jnp.float32)
    w2cat = jnp.zeros((KMAX, NPACK, NPACK), jnp.float32)
    b1s, b2s = [], []
    for bi, K in enumerate(KERNELS):
        cp = params[f"conv{K}"]
        lo, hi = bi * CNN_SIZE, (bi + 1) * CNN_SIZE
        # torch conv weight (Cout, Cin, K) -> per-tap (Cin, Cout) slices
        w1cat = w1cat.at[:K, :, lo:hi].set(jnp.transpose(cp["w1"], (2, 1, 0)))
        w2cat = w2cat.at[:K, lo:hi, lo:hi].set(jnp.transpose(cp["w2"], (2, 1, 0)))
        b1s.append(cp["b1"])
        b2s.append(cp["b2"])
    b1cat = jnp.concatenate(b1s).reshape(1, NPACK)
    b2cat = jnp.concatenate(b2s).reshape(1, NPACK)
    l3i = jnp.repeat(jnp.array(L3S, jnp.int32), CNN_SIZE).reshape(1, NPACK)
    il3 = jnp.repeat(1.0 / jnp.array(L3S, jnp.float32), CNN_SIZE).reshape(1, NPACK)
    return (w1cat.astype(jnp.bfloat16), b1cat,
            w2cat.astype(jnp.bfloat16), b2cat, l3i, il3)


# ----------------------------------------------------------------------------
# Full forward pass
# ----------------------------------------------------------------------------
@jax.jit
def byte_rcnn_forward(params, x_ids):
    emb = params["emb"][x_ids]                              # (B, L, E) embedding gather
    # TODO(synk): F.dropout(emb, 0.1) treated as identity (inference mode)

    gru_args = pack_gru(params["gru1"], params["gru2"])
    conv_args = pack_convs(params)
    head_args = (
        params["fc1_w"].astype(jnp.bfloat16), params["fc1_b"].reshape(1, -1),
        params["fc2_w"].astype(jnp.bfloat16), params["fc2_b"].reshape(1, -1),
        params["out_w"].astype(jnp.bfloat16), params["out_b"].reshape(1, -1),
    )
    return byte_rcnn_pallas(emb, *gru_args, *conv_args, *head_args)


# ----------------------------------------------------------------------------
# Deterministic parameter init (shapes from the module's __init__)
# ----------------------------------------------------------------------------
def xavier(key, shape, fan_in, fan_out):
    lim = (6.0 / (fan_in + fan_out)) ** 0.5
    return jax.random.uniform(key, shape, jnp.float32, -lim, lim)


def init_params(key):
    ks = iter(jax.random.split(key, 64))
    p = {}
    p["emb"] = jax.random.uniform(next(ks), (MAXLEN, EMBED_DIM), jnp.float32, -0.05, 0.05)

    def gru_params(in_dim):
        return {
            "wih_f": xavier(next(ks), (3 * H, in_dim), in_dim, 3 * H),
            "whh_f": xavier(next(ks), (3 * H, H), H, 3 * H),
            "bih_f": jnp.zeros((3 * H,), jnp.float32),
            "bhh_f": jnp.zeros((3 * H,), jnp.float32),
            "wih_b": xavier(next(ks), (3 * H, in_dim), in_dim, 3 * H),
            "whh_b": xavier(next(ks), (3 * H, H), H, 3 * H),
            "bih_b": jnp.zeros((3 * H,), jnp.float32),
            "bhh_b": jnp.zeros((3 * H,), jnp.float32),
        }

    p["gru1"] = gru_params(EMBED_DIM)
    p["gru2"] = gru_params(2 * RNN_SIZE)

    for K in KERNELS:
        p[f"conv{K}"] = {
            "w1": xavier(next(ks), (CNN_SIZE, C_IN, K), C_IN * K, CNN_SIZE * K),
            "b1": jnp.zeros((CNN_SIZE,), jnp.float32),
            "w2": xavier(next(ks), (CNN_SIZE, CNN_SIZE, K), CNN_SIZE * K, CNN_SIZE * K),
            "b2": jnp.zeros((CNN_SIZE,), jnp.float32),
        }

    p["fc1_w"] = xavier(next(ks), (FEAT, 1024), FEAT, 1024)
    p["fc1_b"] = jnp.zeros((1024,), jnp.float32)
    p["fc2_w"] = xavier(next(ks), (1024, 512), 1024, 512)
    p["fc2_b"] = jnp.zeros((512,), jnp.float32)
    p["out_w"] = xavier(next(ks), (512, OUTPUT_CNT), 512, OUTPUT_CNT)
    p["out_b"] = jnp.zeros((OUTPUT_CNT,), jnp.float32)
    return p


if __name__ == "__main__":
    key = jax.random.PRNGKey(0)
    k_param, k_data = jax.random.split(key)
    params = init_params(k_param)
    x = jax.random.randint(k_data, (BATCH, MAXLEN), 0, MAXLEN, dtype=jnp.int32)

    out = byte_rcnn_forward(params, x)
    out = jax.block_until_ready(out)

    assert out.shape == (BATCH, OUTPUT_CNT), out.shape
    assert bool(jnp.all(jnp.isfinite(out)))
    print("KERNEL_OK")
</pallas_src>

<mosaic_0001>
module attributes {stable_mosaic.version = 11 : i64} {
  func.func @_byte_rcnn_kernel(%arg0: i32, %arg1: memref<2x340x16xf32, #tpu.memory_space<vmem>>, %arg2: memref<16x96xf32, #tpu.memory_space<vmem>>, %arg3: memref<1x96xf32, #tpu.memory_space<vmem>>, %arg4: memref<32x96xf32, #tpu.memory_space<vmem>>, %arg5: memref<1x96xf32, #tpu.memory_space<vmem>>, %arg6: memref<2x32x96xf32, #tpu.memory_space<vmem>>, %arg7: memref<2x1x96xf32, #tpu.memory_space<vmem>>, %arg8: memref<65x48x64xbf16, #tpu.memory_space<vmem>>, %arg9: memref<1x64xf32, #tpu.memory_space<vmem>>, %arg10: memref<65x64x64xbf16, #tpu.memory_space<vmem>>, %arg11: memref<1x64xf32, #tpu.memory_space<vmem>>, %arg12: memref<1x64xi32, #tpu.memory_space<vmem>>, %arg13: memref<1x64xf32, #tpu.memory_space<vmem>>, %arg14: memref<128x1024xbf16, #tpu.memory_space<vmem>>, %arg15: memref<1x1024xf32, #tpu.memory_space<vmem>>, %arg16: memref<1024x512xbf16, #tpu.memory_space<vmem>>, %arg17: memref<1x512xf32, #tpu.memory_space<vmem>>, %arg18: memref<512x8xbf16, #tpu.memory_space<vmem>>, %arg19: memref<1x8xf32, #tpu.memory_space<vmem>>, %arg20: memref<2x8xf32, #tpu.memory_space<vmem>>, %arg21: memref<2x340x48xf32, #tpu.memory_space<vmem>>, %arg22: memref<2x340x48xf32, #tpu.memory_space<vmem>>, %arg23: memref<2x340x48xf32, #tpu.memory_space<vmem>>, %arg24: memref<2x340x48xf32, #tpu.memory_space<vmem>>, %arg25: memref<2x340x16xf32, #tpu.memory_space<vmem>>, %arg26: memref<2x340x16xf32, #tpu.memory_space<vmem>>, %arg27: memref<2x340x16xf32, #tpu.memory_space<vmem>>, %arg28: memref<2x340x16xf32, #tpu.memory_space<vmem>>, %arg29: memref<2x408x48xf32, #tpu.memory_space<vmem>>, %arg30: memref<340x64xf32, #tpu.memory_space<vmem>>, %arg31: memref<144x64xf32, #tpu.memory_space<vmem>>) attributes {dimension_semantics = [#tpu.dimension_semantics<arbitrary>], iteration_bounds = array<i64: 1>, scalar_prefetch = 0 : i64, scratch_operands = 11 : i64, tpu.core_type = #tpu.core_type<tc>, window_params = [{pipeline_mode = #tpu.pipeline_mode<synchronous>, transform_indices = @transform_0, window_bounds = array<i64: 2, 340, 16>}, {pipeline_mode = #tpu.pipeline_mode<synchronous>, transform_indices = @transform_1, window_bounds = array<i64: 16, 96>}, {pipeline_mode = #tpu.pipeline_mode<synchronous>, transform_indices = @transform_2, window_bounds = array<i64: 1, 96>}, {pipeline_mode = #tpu.pipeline_mode<synchronous>, transform_indices = @transform_3, window_bounds = array<i64: 32, 96>}, {pipeline_mode = #tpu.pipeline_mode<synchronous>, transform_indices = @transform_4, window_bounds = array<i64: 1, 96>}, {pipeline_mode = #tpu.pipeline_mode<synchronous>, transform_indices = @transform_5, window_bounds = array<i64: 2, 32, 96>}, {pipeline_mode = #tpu.pipeline_mode<synchronous>, transform_indices = @transform_6, window_bounds = array<i64: 2, 1, 96>}, {pipeline_mode = #tpu.pipeline_mode<synchronous>, transform_indices = @transform_7, window_bounds = array<i64: 65, 48, 64>}, {pipeline_mode = #tpu.pipeline_mode<synchronous>, transform_indices = @transform_8, window_bounds = array<i64: 1, 64>}, {pipeline_mode = #tpu.pipeline_mode<synchronous>, transform_indices = @transform_9, window_bounds = array<i64: 65, 64, 64>}, {pipeline_mode = #tpu.pipeline_mode<synchronous>, transform_indices = @transform_10, window_bounds = array<i64: 1, 64>}, {pipeline_mode = #tpu.pipeline_mode<synchronous>, transform_indices = @transform_11, window_bounds = array<i64: 1, 64>}, {pipeline_mode = #tpu.pipeline_mode<synchronous>, transform_indices = @transform_12, window_bounds = array<i64: 1, 64>}, {pipeline_mode = #tpu.pipeline_mode<synchronous>, transform_indices = @transform_13, window_bounds = array<i64: 128, 1024>}, {pipeline_mode = #tpu.pipeline_mode<synchronous>, transform_indices = @transform_14, window_bounds = array<i64: 1, 1024>}, {pipeline_mode = #tpu.pipeline_mode<synchronous>, transform_indices = @transform_15, window_bounds = array<i64: 1024, 512>}, {pipeline_mode = #tpu.pipeline_mode<synchronous>, transform_indices = @transform_16, window_bounds = array<i64: 1, 512>}, {pipeline_mode = #tpu.pipeline_mode<synchronous>, transform_indices = @transform_17, window_bounds = array<i64: 512, 8>}, {pipeline_mode = #tpu.pipeline_mode<synchronous>, transform_indices = @transform_18, window_bounds = array<i64: 1, 8>}, {pipeline_mode = #tpu.pipeline_mode<synchronous>, transform_indices = @transform_19, window_bounds = array<i64: 2, 8>}]} {
    %c0 = arith.constant 0 : index
    %c0_0 = arith.constant 0 : index
    %0 = vector.load %arg2[%c0, %c0_0] : memref<16x96xf32, #tpu.memory_space<vmem>>, vector<16x96xf32>
    %c0_1 = arith.constant 0 : index
    %c0_2 = arith.constant 0 : index
    %1 = vector.load %arg3[%c0_1, %c0_2] : memref<1x96xf32, #tpu.memory_space<vmem>>, vector<1x96xf32>
    %c0_3 = arith.constant 0 : index
    %c0_4 = arith.constant 0 : index
    %c0_5 = arith.constant 0 : index
    %2 = vector.load %arg1[%c0_3, %c0_4, %c0_5] : memref<2x340x16xf32, #tpu.memory_space<vmem>>, vector<1x340x16xf32>
    %3 = vector.shape_cast %2 : vector<1x340x16xf32> to vector<340x16xf32>
    %cst = arith.constant dense<0.000000e+00> : vector<340x96xf32>
    %4 = tpu.matmul %3, %0, %cst {dimension_numbers = #tpu.dot_dimension_numbers<[1], [0], [0], [1], [0, 0, 1, 1], [], []>} : vector<340x16xf32>, vector<16x96xf32>, vector<340x96xf32> -> vector<340x96xf32>
    %5 = vector.broadcast %1 : vector<1x96xf32> to vector<340x96xf32>
    %6 = arith.addf %4, %5 : vector<340x96xf32>
    %7 = vector.extract_strided_slice %6 {offsets = [0, 0], sizes = [340, 48], strides = [1, 1]} : vector<340x96xf32> to vector<340x48xf32>
    %c0_6 = arith.constant 0 : index
    %c0_7 = arith.constant 0 : index
    %c0_8 = arith.constant 0 : index
    %8 = vector.load %arg21[%c0_6, %c0_7, %c0_8] : memref<2x340x48xf32, #tpu.memory_space<vmem>>, vector<1x340x48xf32>
    %9 = vector.shape_cast %8 : vector<1x340x48xf32> to vector<340x48xf32>
    %10 = vector.shape_cast %7 : vector<340x48xf32> to vector<1x340x48xf32>
    tpu.vector_store %arg21[%c0_6, %c0_7, %c0_8], %10 {strides = array<i32>} : memref<2x340x48xf32, #tpu.memory_space<vmem>>, vector<1x340x48xf32>,
    %11 = vector.extract_strided_slice %6 {offsets = [0, 48], sizes = [340, 48], strides = [1, 1]} : vector<340x96xf32> to vector<340x48xf32>
    %c0_9 = arith.constant 0 : index
    %c0_10 = arith.constant 0 : index
    %c0_11 = arith.constant 0 : index
    %12 = vector.load %arg22[%c0_9, %c0_10, %c0_11] : memref<2x340x48xf32, #tpu.memory_space<vmem>>, vector<1x340x48xf32>
    %13 = vector.shape_cast %12 : vector<1x340x48xf32> to vector<340x48xf32>
    %14 = vector.shape_cast %11 : vector<340x48xf32> to vector<1x340x48xf32>
    tpu.vector_store %arg22[%c0_9, %c0_10, %c0_11], %14 {strides = array<i32>} : memref<2x340x48xf32, #tpu.memory_space<vmem>>, vector<1x340x48xf32>,
    %c1 = arith.constant 1 : index
    %c0_12 = arith.constant 0 : index
    %c0_13 = arith.constant 0 : index
    %15 = vector.load %arg1[%c1, %c0_12, %c0_13] : memref<2x340x16xf32, #tpu.memory_space<vmem>>, vector<1x340x16xf32>
    %16 = vector.shape_cast %15 : vector<1x340x16xf32> to vector<340x16xf32>
    %cst_14 = arith.constant dense<0.000000e+00> : vector<340x96xf32>
    %17 = tpu.matmul %16, %0, %cst_14 {dimension_numbers = #tpu.dot_dimension_numbers<[1], [0], [0], [1], [0, 0, 1, 1], [], []>} : vector<340x16xf32>, vector<16x96xf32>, vector<340x96xf32> -> vector<340x96xf32>
    %18 = vector.broadcast %1 : vector<1x96xf32> to vector<340x96xf32>
    %19 = arith.addf %17, %18 : vector<340x96xf32>
    %20 = vector.extract_strided_slice %19 {offsets = [0, 0], sizes = [340, 48], strides = [1, 1]} : vector<340x96xf32> to vector<340x48xf32>
    %c1_15 = arith.constant 1 : index
    %c0_16 = arith.constant 0 : index
    %c0_17 = arith.constant 0 : index
    %21 = vector.load %arg21[%c1_15, %c0_16, %c0_17] : memref<2x340x48xf32, #tpu.memory_space<vmem>>, vector<1x340x48xf32>
    %22 = vector.shape_cast %21 : vector<1x340x48xf32> to vector<340x48xf32>
    %23 = vector.shape_cast %20 : vector<340x48xf32> to vector<1x340x48xf32>
    tpu.vector_store %arg21[%c1_15, %c0_16, %c0_17], %23 {strides = array<i32>} : memref<2x340x48xf32, #tpu.memory_space<vmem>>, vector<1x340x48xf32>,
    %24 = vector.extract_strided_slice %19 {offsets = [0, 48], sizes = [340, 48], strides = [1, 1]} : vector<340x96xf32> to vector<340x48xf32>
    %c1_18 = arith.constant 1 : index
    %c0_19 = arith.constant 0 : index
    %c0_20 = arith.constant 0 : index
    %25 = vector.load %arg22[%c1_18, %c0_19, %c0_20] : memref<2x340x48xf32, #tpu.memory_space<vmem>>, vector<1x340x48xf32>
    %26 = vector.shape_cast %25 : vector<1x340x48xf32> to vector<340x48xf32>
    %27 = vector.shape_cast %24 : vector<340x48xf32> to vector<1x340x48xf32>
    tpu.vector_store %arg22[%c1_18, %c0_19, %c0_20], %27 {strides = array<i32>} : memref<2x340x48xf32, #tpu.memory_space<vmem>>, vector<1x340x48xf32>,
    %cst_21 = arith.constant 0.000000e+00 : f32
    %28 = vector.broadcast %cst_21 : f32 to vector<2x32xf32>
    %c0_22 = arith.constant 0 : index
    %c0_23 = arith.constant 0 : index
    %c0_24 = arith.constant 0 : index
    %29 = vector.load %arg6[%c0_22, %c0_23, %c0_24] : memref<2x32x96xf32, #tpu.memory_space<vmem>>, vector<1x32x96xf32>
    %30 = vector.shape_cast %29 : vector<1x32x96xf32> to vector<32x96xf32>
    %c0_25 = arith.constant 0 : index
    %c0_26 = arith.constant 0 : index
    %c0_27 = arith.constant 0 : index
    %31 = vector.load %arg7[%c0_25, %c0_26, %c0_27] : memref<2x1x96xf32, #tpu.memory_space<vmem>>, vector<1x1x96xf32>
    %32 = vector.shape_cast %31 : vector<1x1x96xf32> to vector<1x96xf32>
    %c0_i32 = arith.constant 0 : i32
    %c340_i32 = arith.constant 340 : i32
    %33 = arith.addi %c0_i32, %c340_i32 : i32
    %c1_i32 = arith.constant 1 : i32
    %34 = scf.for %arg32 = %c0_i32 to %33 step %c1_i32 iter_args(%arg33 = %28) -> (vector<2x32xf32>)  : i32 {
      %c0_177 = arith.constant 0 : index
      %200 = arith.index_cast %arg32 : i32 to index
      %c0_178 = arith.constant 0 : index
      %201 = vector.load %arg21[%c0_177, %200, %c0_178] : memref<2x340x48xf32, #tpu.memory_space<vmem>>, vector<2x1x48xf32>
      %202 = vector.shape_cast %201 : vector<2x1x48xf32> to vector<2x48xf32>
      %c339_i32 = arith.constant 339 : i32
      %203 = arith.subi %c339_i32, %arg32 : i32
      %c0_179 = arith.constant 0 : index
      %204 = arith.index_cast %203 : i32 to index
      %c0_180 = arith.constant 0 : index
      %205 = vector.load %arg22[%c0_179, %204, %c0_180] : memref<2x340x48xf32, #tpu.memory_space<vmem>>, vector<2x1x48xf32>
      %206 = vector.shape_cast %205 : vector<2x1x48xf32> to vector<2x48xf32>
      %cst_181 = arith.constant dense<0.000000e+00> : vector<2x96xf32>
      %207 = tpu.matmul %arg33, %30, %cst_181 {dimension_numbers = #tpu.dot_dimension_numbers<[1], [0], [0], [1], [0, 0, 1, 1], [], []>} : vector<2x32xf32>, vector<32x96xf32>, vector<2x96xf32> -> vector<2x96xf32>
      %208 = vector.broadcast %32 : vector<1x96xf32> to vector<2x96xf32>
      %209 = arith.addf %207, %208 : vector<2x96xf32>
      %210 = vector.extract_strided_slice %209 {offsets = [0, 0], sizes = [2, 48], strides = [1, 1]} : vector<2x96xf32> to vector<2x48xf32>
      %211 = vector.extract_strided_slice %arg33 {offsets = [0, 0], sizes = [2, 16], strides = [1, 1]} : vector<2x32xf32> to vector<2x16xf32>
      %212 = vector.extract_strided_slice %202 {offsets = [0, 0], sizes = [2, 16], strides = [1, 1]} : vector<2x48xf32> to vector<2x16xf32>
      %213 = vector.extract_strided_slice %210 {offsets = [0, 0], sizes = [2, 16], strides = [1, 1]} : vector<2x48xf32> to vector<2x16xf32>
      %214 = arith.addf %212, %213 : vector<2x16xf32>
      %215 = arith.negf %214 : vector<2x16xf32>
      %216 = math.exp %215 : vector<2x16xf32>
      %cst_182 = arith.constant 1.000000e+00 : f32
      %217 = vector.broadcast %cst_182 : f32 to vector<2x16xf32>
      %218 = arith.addf %217, %216 : vector<2x16xf32>
      %219 = arith.divf %217, %218 : vector<2x16xf32>
      %220 = vector.extract_strided_slice %202 {offsets = [0, 16], sizes = [2, 16], strides = [1, 1]} : vector<2x48xf32> to vector<2x16xf32>
      %221 = vector.extract_strided_slice %210 {offsets = [0, 16], sizes = [2, 16], strides = [1, 1]} : vector<2x48xf32> to vector<2x16xf32>
      %222 = arith.addf %220, %221 : vector<2x16xf32>
      %223 = arith.negf %222 : vector<2x16xf32>
      %224 = math.exp %223 : vector<2x16xf32>
      %cst_183 = arith.constant 1.000000e+00 : f32
      %225 = vector.broadcast %cst_183 : f32 to vector<2x16xf32>
      %226 = arith.addf %225, %224 : vector<2x16xf32>
      %227 = arith.divf %225, %226 : vector<2x16xf32>
      %228 = vector.extract_strided_slice %202 {offsets = [0, 32], sizes = [2, 16], strides = [1, 1]} : vector<2x48xf32> to vector<2x16xf32>
      %229 = vector.extract_strided_slice %210 {offsets = [0, 32], sizes = [2, 16], strides = [1, 1]} : vector<2x48xf32> to vector<2x16xf32>
      %230 = arith.mulf %219, %229 : vector<2x16xf32>
      %231 = arith.addf %228, %230 : vector<2x16xf32>
      %232 = math.tanh %231 : vector<2x16xf32>
      %cst_184 = arith.constant 1.000000e+00 : f32
      %233 = vector.broadcast %cst_184 : f32 to vector<2x16xf32>
      %234 = arith.subf %233, %227 : vector<2x16xf32>
      %235 = arith.mulf %234, %232 : vector<2x16xf32>
      %236 = arith.mulf %227, %211 : vector<2x16xf32>
      %237 = arith.addf %235, %236 : vector<2x16xf32>
      %238 = vector.extract_strided_slice %209 {offsets = [0, 48], sizes = [2, 48], strides = [1, 1]} : vector<2x96xf32> to vector<2x48xf32>
      %239 = vector.extract_strided_slice %arg33 {offsets = [0, 16], sizes = [2, 16], strides = [1, 1]} : vector<2x32xf32> to vector<2x16xf32>
      %240 = vector.extract_strided_slice %206 {offsets = [0, 0], sizes = [2, 16], strides = [1, 1]} : vector<2x48xf32> to vector<2x16xf32>
      %241 = vector.extract_strided_slice %238 {offsets = [0, 0], sizes = [2, 16], strides = [1, 1]} : vector<2x48xf32> to vector<2x16xf32>
      %242 = arith.addf %240, %241 : vector<2x16xf32>
      %243 = arith.negf %242 : vector<2x16xf32>
      %244 = math.exp %243 : vector<2x16xf32>
      %cst_185 = arith.constant 1.000000e+00 : f32
      %245 = vector.broadcast %cst_185 : f32 to vector<2x16xf32>
      %246 = arith.addf %245, %244 : vector<2x16xf32>
      %247 = arith.divf %245, %246 : vector<2x16xf32>
      %248 = vector.extract_strided_slice %206 {offsets = [0, 16], sizes = [2, 16], strides = [1, 1]} : vector<2x48xf32> to vector<2x16xf32>
      %249 = vector.extract_strided_slice %238 {offsets = [0, 16], sizes = [2, 16], strides = [1, 1]} : vector<2x48xf32> to vector<2x16xf32>
      %250 = arith.addf %248, %249 : vector<2x16xf32>
      %251 = arith.negf %250 : vector<2x16xf32>
      %252 = math.exp %251 : vector<2x16xf32>
      %cst_186 = arith.constant 1.000000e+00 : f32
      %253 = vector.broadcast %cst_186 : f32 to vector<2x16xf32>
      %254 = arith.addf %253, %252 : vector<2x16xf32>
      %255 = arith.divf %253, %254 : vector<2x16xf32>
      %256 = vector.extract_strided_slice %206 {offsets = [0, 32], sizes = [2, 16], strides = [1, 1]} : vector<2x48xf32> to vector<2x16xf32>
      %257 = vector.extract_strided_slice %238 {offsets = [0, 32], sizes = [2, 16], strides = [1, 1]} : vector<2x48xf32> to vector<2x16xf32>
      %258 = arith.mulf %247, %257 : vector<2x16xf32>
      %259 = arith.addf %256, %258 : vector<2x16xf32>
      %260 = math.tanh %259 : vector<2x16xf32>
      %cst_187 = arith.constant 1.000000e+00 : f32
      %261 = vector.broadcast %cst_187 : f32 to vector<2x16xf32>
      %262 = arith.subf %261, %255 : vector<2x16xf32>
      %263 = arith.mulf %262, %260 : vector<2x16xf32>
      %264 = arith.mulf %255, %239 : vector<2x16xf32>
      %265 = arith.addf %263, %264 : vector<2x16xf32>
      %266 = vector.shape_cast %237 : vector<2x16xf32> to vector<2x1x16xf32>
      %c0_188 = arith.constant 0 : index
      %267 = arith.index_cast %arg32 : i32 to index
      %c0_189 = arith.constant 0 : index
      %268 = vector.load %arg25[%c0_188, %267, %c0_189] : memref<2x340x16xf32, #tpu.memory_space<vmem>>, vector<2x1x16xf32>
      tpu.vector_store %arg25[%c0_188, %267, %c0_189], %266 {strides = array<i32>} : memref<2x340x16xf32, #tpu.memory_space<vmem>>, vector<2x1x16xf32>,
      %269 = vector.shape_cast %265 : vector<2x16xf32> to vector<2x1x16xf32>
      %c339_i32_190 = arith.constant 339 : i32
      %270 = arith.subi %c339_i32_190, %arg32 : i32
      %c0_191 = arith.constant 0 : index
      %271 = arith.index_cast %270 : i32 to index
      %c0_192 = arith.constant 0 : index
      %272 = vector.load %arg26[%c0_191, %271, %c0_192] : memref<2x340x16xf32, #tpu.memory_space<vmem>>, vector<2x1x16xf32>
      tpu.vector_store %arg26[%c0_191, %271, %c0_192], %269 {strides = array<i32>} : memref<2x340x16xf32, #tpu.memory_space<vmem>>, vector<2x1x16xf32>,
      %273 = tpu.concatenate %237, %265 in 1 : vector<2x16xf32>, vector<2x16xf32> -> vector<2x32xf32>
      scf.yield %273 : vector<2x32xf32>
    }
    %c340_i32_28 = arith.constant 340 : i32
    %c0_29 = arith.constant 0 : index
    %c0_30 = arith.constant 0 : index
    %35 = vector.load %arg4[%c0_29, %c0_30] : memref<32x96xf32, #tpu.memory_space<vmem>>, vector<32x96xf32>
    %c0_31 = arith.constant 0 : index
    %c0_32 = arith.constant 0 : index
    %36 = vector.load %arg5[%c0_31, %c0_32] : memref<1x96xf32, #tpu.memory_space<vmem>>, vector<1x96xf32>
    %c0_33 = arith.constant 0 : index
    %c0_34 = arith.constant 0 : index
    %c0_35 = arith.constant 0 : index
    %37 = vector.load %arg25[%c0_33, %c0_34, %c0_35] : memref<2x340x16xf32, #tpu.memory_space<vmem>>, vector<1x340x16xf32>
    %38 = vector.shape_cast %37 : vector<1x340x16xf32> to vector<340x16xf32>
    %c0_36 = arith.constant 0 : index
    %c0_37 = arith.constant 0 : index
    %c0_38 = arith.constant 0 : index
    %39 = vector.load %arg26[%c0_36, %c0_37, %c0_38] : memref<2x340x16xf32, #tpu.memory_space<vmem>>, vector<1x340x16xf32>
    %40 = vector.shape_cast %39 : vector<1x340x16xf32> to vector<340x16xf32>
    %41 = tpu.concatenate %38, %40 in 1 : vector<340x16xf32>, vector<340x16xf32> -> vector<340x32xf32>
    %cst_39 = arith.constant dense<0.000000e+00> : vector<340x96xf32>
    %42 = tpu.matmul %41, %35, %cst_39 {dimension_numbers = #tpu.dot_dimension_numbers<[1], [0], [0], [1], [0, 0, 1, 1], [], []>} : vector<340x32xf32>, vector<32x96xf32>, vector<340x96xf32> -> vector<340x96xf32>
    %43 = vector.broadcast %36 : vector<1x96xf32> to vector<340x96xf32>
    %44 = arith.addf %42, %43 : vector<340x96xf32>
    %45 = vector.extract_strided_slice %44 {offsets = [0, 0], sizes = [340, 48], strides = [1, 1]} : vector<340x96xf32> to vector<340x48xf32>
    %c0_40 = arith.constant 0 : index
    %c0_41 = arith.constant 0 : index
    %c0_42 = arith.constant 0 : index
    %46 = vector.load %arg23[%c0_40, %c0_41, %c0_42] : memref<2x340x48xf32, #tpu.memory_space<vmem>>, vector<1x340x48xf32>
    %47 = vector.shape_cast %46 : vector<1x340x48xf32> to vector<340x48xf32>
    %48 = vector.shape_cast %45 : vector<340x48xf32> to vector<1x340x48xf32>
    tpu.vector_store %arg23[%c0_40, %c0_41, %c0_42], %48 {strides = array<i32>} : memref<2x340x48xf32, #tpu.memory_space<vmem>>, vector<1x340x48xf32>,
    %49 = vector.extract_strided_slice %44 {offsets = [0, 48], sizes = [340, 48], strides = [1, 1]} : vector<340x96xf32> to vector<340x48xf32>
    %c0_43 = arith.constant 0 : index
    %c0_44 = arith.constant 0 : index
    %c0_45 = arith.constant 0 : index
    %50 = vector.load %arg24[%c0_43, %c0_44, %c0_45] : memref<2x340x48xf32, #tpu.memory_space<vmem>>, vector<1x340x48xf32>
    %51 = vector.shape_cast %50 : vector<1x340x48xf32> to vector<340x48xf32>
    %52 = vector.shape_cast %49 : vector<340x48xf32> to vector<1x340x48xf32>
    tpu.vector_store %arg24[%c0_43, %c0_44, %c0_45], %52 {strides = array<i32>} : memref<2x340x48xf32, #tpu.memory_space<vmem>>, vector<1x340x48xf32>,
    %c1_46 = arith.constant 1 : index
    %c0_47 = arith.constant 0 : index
    %c0_48 = arith.constant 0 : index
    %53 = vector.load %arg25[%c1_46, %c0_47, %c0_48] : memref<2x340x16xf32, #tpu.memory_space<vmem>>, vector<1x340x16xf32>
    %54 = vector.shape_cast %53 : vector<1x340x16xf32> to vector<340x16xf32>
    %c1_49 = arith.constant 1 : index
    %c0_50 = arith.constant 0 : index
    %c0_51 = arith.constant 0 : index
    %55 = vector.load %arg26[%c1_49, %c0_50, %c0_51] : memref<2x340x16xf32, #tpu.memory_space<vmem>>, vector<1x340x16xf32>
    %56 = vector.shape_cast %55 : vector<1x340x16xf32> to vector<340x16xf32>
    %57 = tpu.concatenate %54, %56 in 1 : vector<340x16xf32>, vector<340x16xf32> -> vector<340x32xf32>
    %cst_52 = arith.constant dense<0.000000e+00> : vector<340x96xf32>
    %58 = tpu.matmul %57, %35, %cst_52 {dimension_numbers = #tpu.dot_dimension_numbers<[1], [0], [0], [1], [0, 0, 1, 1], [], []>} : vector<340x32xf32>, vector<32x96xf32>, vector<340x96xf32> -> vector<340x96xf32>
    %59 = vector.broadcast %36 : vector<1x96xf32> to vector<340x96xf32>
    %60 = arith.addf %58, %59 : vector<340x96xf32>
    %61 = vector.extract_strided_slice %60 {offsets = [0, 0], sizes = [340, 48], strides = [1, 1]} : vector<340x96xf32> to vector<340x48xf32>
    %c1_53 = arith.constant 1 : index
    %c0_54 = arith.constant 0 : index
    %c0_55 = arith.constant 0 : index
    %62 = vector.load %arg23[%c1_53, %c0_54, %c0_55] : memref<2x340x48xf32, #tpu.memory_space<vmem>>, vector<1x340x48xf32>
    %63 = vector.shape_cast %62 : vector<1x340x48xf32> to vector<340x48xf32>
    %64 = vector.shape_cast %61 : vector<340x48xf32> to vector<1x340x48xf32>
    tpu.vector_store %arg23[%c1_53, %c0_54, %c0_55], %64 {strides = array<i32>} : memref<2x340x48xf32, #tpu.memory_space<vmem>>, vector<1x340x48xf32>,
    %65 = vector.extract_strided_slice %60 {offsets = [0, 48], sizes = [340, 48], strides = [1, 1]} : vector<340x96xf32> to vector<340x48xf32>
    %c1_56 = arith.constant 1 : index
    %c0_57 = arith.constant 0 : index
    %c0_58 = arith.constant 0 : index
    %66 = vector.load %arg24[%c1_56, %c0_57, %c0_58] : memref<2x340x48xf32, #tpu.memory_space<vmem>>, vector<1x340x48xf32>
    %67 = vector.shape_cast %66 : vector<1x340x48xf32> to vector<340x48xf32>
    %68 = vector.shape_cast %65 : vector<340x48xf32> to vector<1x340x48xf32>
    tpu.vector_store %arg24[%c1_56, %c0_57, %c0_58], %68 {strides = array<i32>} : memref<2x340x48xf32, #tpu.memory_space<vmem>>, vector<1x340x48xf32>,
    %c1_59 = arith.constant 1 : index
    %c0_60 = arith.constant 0 : index
    %c0_61 = arith.constant 0 : index
    %69 = vector.load %arg6[%c1_59, %c0_60, %c0_61] : memref<2x32x96xf32, #tpu.memory_space<vmem>>, vector<1x32x96xf32>
    %70 = vector.shape_cast %69 : vector<1x32x96xf32> to vector<32x96xf32>
    %c1_62 = arith.constant 1 : index
    %c0_63 = arith.constant 0 : index
    %c0_64 = arith.constant 0 : index
    %71 = vector.load %arg7[%c1_62, %c0_63, %c0_64] : memref<2x1x96xf32, #tpu.memory_space<vmem>>, vector<1x1x96xf32>
    %72 = vector.shape_cast %71 : vector<1x1x96xf32> to vector<1x96xf32>
    %c0_i32_65 = arith.constant 0 : i32
    %c340_i32_66 = arith.constant 340 : i32
    %73 = arith.addi %c0_i32_65, %c340_i32_66 : i32
    %c1_i32_67 = arith.constant 1 : i32
    %74 = scf.for %arg32 = %c0_i32_65 to %73 step %c1_i32_67 iter_args(%arg33 = %28) -> (vector<2x32xf32>)  : i32 {
      %c0_177 = arith.constant 0 : index
      %200 = arith.index_cast %arg32 : i32 to index
      %c0_178 = arith.constant 0 : index
      %201 = vector.load %arg23[%c0_177, %200, %c0_178] : memref<2x340x48xf32, #tpu.memory_space<vmem>>, vector<2x1x48xf32>
      %202 = vector.shape_cast %201 : vector<2x1x48xf32> to vector<2x48xf32>
      %c339_i32 = arith.constant 339 : i32
      %203 = arith.subi %c339_i32, %arg32 : i32
      %c0_179 = arith.constant 0 : index
      %204 = arith.index_cast %203 : i32 to index
      %c0_180 = arith.constant 0 : index
      %205 = vector.load %arg24[%c0_179, %204, %c0_180] : memref<2x340x48xf32, #tpu.memory_space<vmem>>, vector<2x1x48xf32>
      %206 = vector.shape_cast %205 : vector<2x1x48xf32> to vector<2x48xf32>
      %cst_181 = arith.constant dense<0.000000e+00> : vector<2x96xf32>
      %207 = tpu.matmul %arg33, %70, %cst_181 {dimension_numbers = #tpu.dot_dimension_numbers<[1], [0], [0], [1], [0, 0, 1, 1], [], []>} : vector<2x32xf32>, vector<32x96xf32>, vector<2x96xf32> -> vector<2x96xf32>
      %208 = vector.broadcast %72 : vector<1x96xf32> to vector<2x96xf32>
      %209 = arith.addf %207, %208 : vector<2x96xf32>
      %210 = vector.extract_strided_slice %209 {offsets = [0, 0], sizes = [2, 48], strides = [1, 1]} : vector<2x96xf32> to vector<2x48xf32>
      %211 = vector.extract_strided_slice %arg33 {offsets = [0, 0], sizes = [2, 16], strides = [1, 1]} : vector<2x32xf32> to vector<2x16xf32>
      %212 = vector.extract_strided_slice %202 {offsets = [0, 0], sizes = [2, 16], strides = [1, 1]} : vector<2x48xf32> to vector<2x16xf32>
      %213 = vector.extract_strided_slice %210 {offsets = [0, 0], sizes = [2, 16], strides = [1, 1]} : vector<2x48xf32> to vector<2x16xf32>
      %214 = arith.addf %212, %213 : vector<2x16xf32>
      %215 = arith.negf %214 : vector<2x16xf32>
      %216 = math.exp %215 : vector<2x16xf32>
      %cst_182 = arith.constant 1.000000e+00 : f32
      %217 = vector.broadcast %cst_182 : f32 to vector<2x16xf32>
      %218 = arith.addf %217, %216 : vector<2x16xf32>
      %219 = arith.divf %217, %218 : vector<2x16xf32>
      %220 = vector.extract_strided_slice %202 {offsets = [0, 16], sizes = [2, 16], strides = [1, 1]} : vector<2x48xf32> to vector<2x16xf32>
      %221 = vector.extract_strided_slice %210 {offsets = [0, 16], sizes = [2, 16], strides = [1, 1]} : vector<2x48xf32> to vector<2x16xf32>
      %222 = arith.addf %220, %221 : vector<2x16xf32>
      %223 = arith.negf %222 : vector<2x16xf32>
      %224 = math.exp %223 : vector<2x16xf32>
      %cst_183 = arith.constant 1.000000e+00 : f32
      %225 = vector.broadcast %cst_183 : f32 to vector<2x16xf32>
      %226 = arith.addf %225, %224 : vector<2x16xf32>
      %227 = arith.divf %225, %226 : vector<2x16xf32>
      %228 = vector.extract_strided_slice %202 {offsets = [0, 32], sizes = [2, 16], strides = [1, 1]} : vector<2x48xf32> to vector<2x16xf32>
      %229 = vector.extract_strided_slice %210 {offsets = [0, 32], sizes = [2, 16], strides = [1, 1]} : vector<2x48xf32> to vector<2x16xf32>
      %230 = arith.mulf %219, %229 : vector<2x16xf32>
      %231 = arith.addf %228, %230 : vector<2x16xf32>
      %232 = math.tanh %231 : vector<2x16xf32>
      %cst_184 = arith.constant 1.000000e+00 : f32
      %233 = vector.broadcast %cst_184 : f32 to vector<2x16xf32>
      %234 = arith.subf %233, %227 : vector<2x16xf32>
      %235 = arith.mulf %234, %232 : vector<2x16xf32>
      %236 = arith.mulf %227, %211 : vector<2x16xf32>
      %237 = arith.addf %235, %236 : vector<2x16xf32>
      %238 = vector.extract_strided_slice %209 {offsets = [0, 48], sizes = [2, 48], strides = [1, 1]} : vector<2x96xf32> to vector<2x48xf32>
      %239 = vector.extract_strided_slice %arg33 {offsets = [0, 16], sizes = [2, 16], strides = [1, 1]} : vector<2x32xf32> to vector<2x16xf32>
      %240 = vector.extract_strided_slice %206 {offsets = [0, 0], sizes = [2, 16], strides = [1, 1]} : vector<2x48xf32> to vector<2x16xf32>
      %241 = vector.extract_strided_slice %238 {offsets = [0, 0], sizes = [2, 16], strides = [1, 1]} : vector<2x48xf32> to vector<2x16xf32>
      %242 = arith.addf %240, %241 : vector<2x16xf32>
      %243 = arith.negf %242 : vector<2x16xf32>
      %244 = math.exp %243 : vector<2x16xf32>
      %cst_185 = arith.constant 1.000000e+00 : f32
      %245 = vector.broadcast %cst_185 : f32 to vector<2x16xf32>
      %246 = arith.addf %245, %244 : vector<2x16xf32>
      %247 = arith.divf %245, %246 : vector<2x16xf32>
      %248 = vector.extract_strided_slice %206 {offsets = [0, 16], sizes = [2, 16], strides = [1, 1]} : vector<2x48xf32> to vector<2x16xf32>
      %249 = vector.extract_strided_slice %238 {offsets = [0, 16], sizes = [2, 16], strides = [1, 1]} : vector<2x48xf32> to vector<2x16xf32>
      %250 = arith.addf %248, %249 : vector<2x16xf32>
      %251 = arith.negf %250 : vector<2x16xf32>
      %252 = math.exp %251 : vector<2x16xf32>
      %cst_186 = arith.constant 1.000000e+00 : f32
      %253 = vector.broadcast %cst_186 : f32 to vector<2x16xf32>
      %254 = arith.addf %253, %252 : vector<2x16xf32>
      %255 = arith.divf %253, %254 : vector<2x16xf32>
      %256 = vector.extract_strided_slice %206 {offsets = [0, 32], sizes = [2, 16], strides = [1, 1]} : vector<2x48xf32> to vector<2x16xf32>
      %257 = vector.extract_strided_slice %238 {offsets = [0, 32], sizes = [2, 16], strides = [1, 1]} : vector<2x48xf32> to vector<2x16xf32>
      %258 = arith.mulf %247, %257 : vector<2x16xf32>
      %259 = arith.addf %256, %258 : vector<2x16xf32>
      %260 = math.tanh %259 : vector<2x16xf32>
      %cst_187 = arith.constant 1.000000e+00 : f32
      %261 = vector.broadcast %cst_187 : f32 to vector<2x16xf32>
      %262 = arith.subf %261, %255 : vector<2x16xf32>
      %263 = arith.mulf %262, %260 : vector<2x16xf32>
      %264 = arith.mulf %255, %239 : vector<2x16xf32>
      %265 = arith.addf %263, %264 : vector<2x16xf32>
      %266 = vector.shape_cast %237 : vector<2x16xf32> to vector<2x1x16xf32>
      %c0_188 = arith.constant 0 : index
      %267 = arith.index_cast %arg32 : i32 to index
      %c0_189 = arith.constant 0 : index
      %268 = vector.load %arg27[%c0_188, %267, %c0_189] : memref<2x340x16xf32, #tpu.memory_space<vmem>>, vector<2x1x16xf32>
      tpu.vector_store %arg27[%c0_188, %267, %c0_189], %266 {strides = array<i32>} : memref<2x340x16xf32, #tpu.memory_space<vmem>>, vector<2x1x16xf32>,
      %269 = vector.shape_cast %265 : vector<2x16xf32> to vector<2x1x16xf32>
      %c339_i32_190 = arith.constant 339 : i32
      %270 = arith.subi %c339_i32_190, %arg32 : i32
      %c0_191 = arith.constant 0 : index
      %271 = arith.index_cast %270 : i32 to index
      %c0_192 = arith.constant 0 : index
      %272 = vector.load %arg28[%c0_191, %271, %c0_192] : memref<2x340x16xf32, #tpu.memory_space<vmem>>, vector<2x1x16xf32>
      tpu.vector_store %arg28[%c0_191, %271, %c0_192], %269 {strides = array<i32>} : memref<2x340x16xf32, #tpu.memory_space<vmem>>, vector<2x1x16xf32>,
      %273 = tpu.concatenate %237, %265 in 1 : vector<2x16xf32>, vector<2x16xf32> -> vector<2x32xf32>
      scf.yield %273 : vector<2x32xf32>
    }
    %c340_i32_68 = arith.constant 340 : i32
    %c0_69 = arith.constant 0 : index
    %c0_70 = arith.constant 0 : index
    %c0_71 = arith.constant 0 : index
    %75 = vector.load %arg1[%c0_69, %c0_70, %c0_71] : memref<2x340x16xf32, #tpu.memory_space<vmem>>, vector<1x340x16xf32>
    %76 = vector.shape_cast %75 : vector<1x340x16xf32> to vector<340x16xf32>
    %c0_72 = arith.constant 0 : index
    %c0_73 = arith.constant 0 : index
    %c0_74 = arith.constant 0 : index
    %77 = vector.load %arg27[%c0_72, %c0_73, %c0_74] : memref<2x340x16xf32, #tpu.memory_space<vmem>>, vector<1x340x16xf32>
    %78 = vector.shape_cast %77 : vector<1x340x16xf32> to vector<340x16xf32>
    %c0_75 = arith.constant 0 : index
    %c0_76 = arith.constant 0 : index
    %c0_77 = arith.constant 0 : index
    %79 = vector.load %arg28[%c0_75, %c0_76, %c0_77] : memref<2x340x16xf32, #tpu.memory_space<vmem>>, vector<1x340x16xf32>
    %80 = vector.shape_cast %79 : vector<1x340x16xf32> to vector<340x16xf32>
    %81 = tpu.concatenate %76, %78, %80 in 1 : vector<340x16xf32>, vector<340x16xf32>, vector<340x16xf32> -> vector<340x48xf32>
    %cst_78 = arith.constant 0.000000e+00 : f32
    %82 = vector.broadcast %cst_78 : f32 to vector<68x48xf32>
    %83 = tpu.concatenate %81, %82 in 0 : vector<340x48xf32>, vector<68x48xf32> -> vector<408x48xf32>
    %c0_79 = arith.constant 0 : index
    %c0_80 = arith.constant 0 : index
    %c0_81 = arith.constant 0 : index
    %84 = vector.load %arg29[%c0_79, %c0_80, %c0_81] : memref<2x408x48xf32, #tpu.memory_space<vmem>>, vector<1x408x48xf32>
    %85 = vector.shape_cast %84 : vector<1x408x48xf32> to vector<408x48xf32>
    %86 = vector.shape_cast %83 : vector<408x48xf32> to vector<1x408x48xf32>
    tpu.vector_store %arg29[%c0_79, %c0_80, %c0_81], %86 {strides = array<i32>} : memref<2x408x48xf32, #tpu.memory_space<vmem>>, vector<1x408x48xf32>,
    %c1_82 = arith.constant 1 : index
    %c0_83 = arith.constant 0 : index
    %c0_84 = arith.constant 0 : index
    %87 = vector.load %arg1[%c1_82, %c0_83, %c0_84] : memref<2x340x16xf32, #tpu.memory_space<vmem>>, vector<1x340x16xf32>
    %88 = vector.shape_cast %87 : vector<1x340x16xf32> to vector<340x16xf32>
    %c1_85 = arith.constant 1 : index
    %c0_86 = arith.constant 0 : index
    %c0_87 = arith.constant 0 : index
    %89 = vector.load %arg27[%c1_85, %c0_86, %c0_87] : memref<2x340x16xf32, #tpu.memory_space<vmem>>, vector<1x340x16xf32>
    %90 = vector.shape_cast %89 : vector<1x340x16xf32> to vector<340x16xf32>
    %c1_88 = arith.constant 1 : index
    %c0_89 = arith.constant 0 : index
    %c0_90 = arith.constant 0 : index
    %91 = vector.load %arg28[%c1_88, %c0_89, %c0_90] : memref<2x340x16xf32, #tpu.memory_space<vmem>>, vector<1x340x16xf32>
    %92 = vector.shape_cast %91 : vector<1x340x16xf32> to vector<340x16xf32>
    %93 = tpu.concatenate %88, %90, %92 in 1 : vector<340x16xf32>, vector<340x16xf32>, vector<340x16xf32> -> vector<340x48xf32>
    %cst_91 = arith.constant 0.000000e+00 : f32
    %94 = vector.broadcast %cst_91 : f32 to vector<68x48xf32>
    %95 = tpu.concatenate %93, %94 in 0 : vector<340x48xf32>, vector<68x48xf32> -> vector<408x48xf32>
    %c1_92 = arith.constant 1 : index
    %c0_93 = arith.constant 0 : index
    %c0_94 = arith.constant 0 : index
    %96 = vector.load %arg29[%c1_92, %c0_93, %c0_94] : memref<2x408x48xf32, #tpu.memory_space<vmem>>, vector<1x408x48xf32>
    %97 = vector.shape_cast %96 : vector<1x408x48xf32> to vector<408x48xf32>
    %98 = vector.shape_cast %95 : vector<408x48xf32> to vector<1x408x48xf32>
    tpu.vector_store %arg29[%c1_92, %c0_93, %c0_94], %98 {strides = array<i32>} : memref<2x408x48xf32, #tpu.memory_space<vmem>>, vector<1x408x48xf32>,
    %c0_95 = arith.constant 0 : index
    %c0_96 = arith.constant 0 : index
    %99 = vector.load %arg9[%c0_95, %c0_96] : memref<1x64xf32, #tpu.memory_space<vmem>>, vector<1x64xf32>
    %c0_97 = arith.constant 0 : index
    %c0_98 = arith.constant 0 : index
    %100 = vector.load %arg11[%c0_97, %c0_98] : memref<1x64xf32, #tpu.memory_space<vmem>>, vector<1x64xf32>
    %c0_99 = arith.constant 0 : index
    %c0_100 = arith.constant 0 : index
    %101 = vector.load %arg12[%c0_99, %c0_100] : memref<1x64xi32, #tpu.memory_space<vmem>>, vector<1x64xi32>
    %c0_101 = arith.constant 0 : index
    %c0_102 = arith.constant 0 : index
    %102 = vector.load %arg13[%c0_101, %c0_102] : memref<1x64xf32, #tpu.memory_space<vmem>>, vector<1x64xf32>
    %103 = tpu.iota {dimensions = array<i32: 0>} : vector<75x64xi32>
    %104 = vector.broadcast %101 : vector<1x64xi32> to vector<75x64xi32>
    %105 = arith.cmpi slt, %103, %104 : vector<75x64xi32>
    %cst_103 = arith.constant 0.000000e+00 : f32
    %106 = vector.broadcast %cst_103 : f32 to vector<340x64xf32>
    %c0_104 = arith.constant 0 : index
    %c0_105 = arith.constant 0 : index
    %107 = vector.load %arg30[%c0_104, %c0_105] : memref<340x64xf32, #tpu.memory_space<vmem>>, vector<340x64xf32>
    tpu.vector_store %arg30[%c0_104, %c0_105], %106 {strides = array<i32>} : memref<340x64xf32, #tpu.memory_space<vmem>>, vector<340x64xf32>,
    %c0_i32_106 = arith.constant 0 : i32
    %c65_i32 = arith.constant 65 : i32
    %108 = arith.addi %c0_i32_106, %c65_i32 : i32
    %c1_i32_107 = arith.constant 1 : i32
    scf.for %arg32 = %c0_i32_106 to %108 step %c1_i32_107  : i32 {
      %c1_i32_177 = arith.constant 1 : i32
      %200 = arith.muli %arg32, %c1_i32_177 : i32
      %c0_i32_178 = arith.constant 0 : i32
      %201 = arith.addi %c0_i32_178, %200 : i32
      %c0_179 = arith.constant 0 : index
      %202 = arith.index_cast %201 : i32 to index
      %c0_180 = arith.constant 0 : index
      %203 = vector.load %arg29[%c0_179, %202, %c0_180] : memref<2x408x48xf32, #tpu.memory_space<vmem>>, vector<1x340x48xf32>
      %204 = vector.shape_cast %203 : vector<1x340x48xf32> to vector<340x48xf32>
      %205 = arith.truncf %204 : vector<340x48xf32> to vector<340x48xbf16>
      %c0_181 = arith.constant 0 : index
      %c0_182 = arith.constant 0 : index
      %206 = vector.load %arg30[%c0_181, %c0_182] : memref<340x64xf32, #tpu.memory_space<vmem>>, vector<340x64xf32>
      %207 = arith.index_cast %201 : i32 to index
      %c0_183 = arith.constant 0 : index
      %c0_184 = arith.constant 0 : index
      %208 = vector.load %arg8[%207, %c0_183, %c0_184] : memref<65x48x64xbf16, #tpu.memory_space<vmem>>, vector<1x48x64xbf16>
      %209 = vector.shape_cast %208 : vector<1x48x64xbf16> to vector<48x64xbf16>
      %cst_185 = arith.constant dense<0.000000e+00> : vector<340x64xf32>
      %210 = tpu.matmul %205, %209, %cst_185 {dimension_numbers = #tpu.dot_dimension_numbers<[1], [0], [0], [1], [0, 0, 1, 1], [], []>} : vector<340x48xbf16>, vector<48x64xbf16>, vector<340x64xf32> -> vector<340x64xf32>
      %211 = arith.addf %206, %210 : vector<340x64xf32>
      %c0_186 = arith.constant 0 : index
      %c0_187 = arith.constant 0 : index
      %212 = vector.load %arg30[%c0_186, %c0_187] : memref<340x64xf32, #tpu.memory_space<vmem>>, vector<340x64xf32>
      tpu.vector_store %arg30[%c0_186, %c0_187], %211 {strides = array<i32>} : memref<340x64xf32, #tpu.memory_space<vmem>>, vector<340x64xf32>,
    }
    %c65_i32_108 = arith.constant 65 : i32
    %c0_109 = arith.constant 0 : index
    %c0_110 = arith.constant 0 : index
    %109 = tpu.strided_load %arg30[%c0_109, %c0_110] {strides = array<i32: 4, 1>} : memref<340x64xf32, #tpu.memory_space<vmem>>, vector<85x64xf32>
    %c1_111 = arith.constant 1 : index
    %c0_112 = arith.constant 0 : index
    %110 = tpu.strided_load %arg30[%c1_111, %c0_112] {strides = array<i32: 4, 1>} : memref<340x64xf32, #tpu.memory_space<vmem>>, vector<85x64xf32>
    %111 = arith.maximumf %109, %110 : vector<85x64xf32>
    %c2 = arith.constant 2 : index
    %c0_113 = arith.constant 0 : index
    %112 = tpu.strided_load %arg30[%c2, %c0_113] {strides = array<i32: 4, 1>} : memref<340x64xf32, #tpu.memory_space<vmem>>, vector<85x64xf32>
    %c3 = arith.constant 3 : index
    %c0_114 = arith.constant 0 : index
    %113 = tpu.strided_load %arg30[%c3, %c0_114] {strides = array<i32: 4, 1>} : memref<340x64xf32, #tpu.memory_space<vmem>>, vector<85x64xf32>
    %114 = arith.maximumf %112, %113 : vector<85x64xf32>
    %115 = arith.maximumf %111, %114 : vector<85x64xf32>
    %116 = vector.broadcast %99 : vector<1x64xf32> to vector<85x64xf32>
    %117 = arith.addf %115, %116 : vector<85x64xf32>
    %cst_115 = arith.constant 0.000000e+00 : f32
    %118 = vector.broadcast %cst_115 : f32 to vector<85x64xf32>
    %119 = arith.cmpf ogt, %117, %118 : vector<85x64xf32>
    %cst_116 = arith.constant 3.000000e-01 : f32
    %120 = vector.broadcast %cst_116 : f32 to vector<85x64xf32>
    %121 = arith.mulf %120, %117 : vector<85x64xf32>
    %122 = arith.select %119, %117, %121 : vector<85x64xi1>, vector<85x64xf32>
    %cst_117 = arith.constant 0.000000e+00 : f32
    %123 = vector.broadcast %cst_117 : f32 to vector<59x64xf32>
    %124 = tpu.concatenate %122, %123 in 0 : vector<85x64xf32>, vector<59x64xf32> -> vector<144x64xf32>
    %c0_118 = arith.constant 0 : index
    %c0_119 = arith.constant 0 : index
    %125 = vector.load %arg31[%c0_118, %c0_119] : memref<144x64xf32, #tpu.memory_space<vmem>>, vector<144x64xf32>
    tpu.vector_store %arg31[%c0_118, %c0_119], %124 {strides = array<i32>} : memref<144x64xf32, #tpu.memory_space<vmem>>, vector<144x64xf32>,
    %cst_120 = arith.constant 0.000000e+00 : f32
    %126 = vector.broadcast %cst_120 : f32 to vector<75x64xf32>
    %c0_i32_121 = arith.constant 0 : i32
    %c65_i32_122 = arith.constant 65 : i32
    %127 = arith.addi %c0_i32_121, %c65_i32_122 : i32
    %c1_i32_123 = arith.constant 1 : i32
    %128 = scf.for %arg32 = %c0_i32_121 to %127 step %c1_i32_123 iter_args(%arg33 = %126) -> (vector<75x64xf32>)  : i32 {
      %200 = arith.index_cast %arg32 : i32 to index
      %c0_177 = arith.constant 0 : index
      %201 = vector.load %arg31[%200, %c0_177] : memref<144x64xf32, #tpu.memory_space<vmem>>, vector<75x64xf32>
      %202 = arith.truncf %201 : vector<75x64xf32> to vector<75x64xbf16>
      %203 = arith.index_cast %arg32 : i32 to index
      %c0_178 = arith.constant 0 : index
      %c0_179 = arith.constant 0 : index
      %204 = vector.load %arg10[%203, %c0_178, %c0_179] : memref<65x64x64xbf16, #tpu.memory_space<vmem>>, vector<1x64x64xbf16>
      %205 = vector.shape_cast %204 : vector<1x64x64xbf16> to vector<64x64xbf16>
      %cst_180 = arith.constant dense<0.000000e+00> : vector<75x64xf32>
      %206 = tpu.matmul %202, %205, %cst_180 {dimension_numbers = #tpu.dot_dimension_numbers<[1], [0], [0], [1], [0, 0, 1, 1], [], []>} : vector<75x64xbf16>, vector<64x64xbf16>, vector<75x64xf32> -> vector<75x64xf32>
      %207 = arith.addf %arg33, %206 : vector<75x64xf32>
      scf.yield %207 : vector<75x64xf32>
    }
    %c65_i32_124 = arith.constant 65 : i32
    %129 = vector.broadcast %100 : vector<1x64xf32> to vector<75x64xf32>
    %130 = arith.addf %128, %129 : vector<75x64xf32>
    %cst_125 = arith.constant 0xFF800000 : f32
    %131 = vector.broadcast %cst_125 : f32 to vector<75x64xf32>
    %132 = arith.select %105, %130, %131 : vector<75x64xi1>, vector<75x64xf32>
    %cst_126 = arith.constant dense<0xFF800000> : vector<64xf32>
    %133 = vector.multi_reduction <maximumf>, %132, %cst_126 [0] : vector<75x64xf32> to vector<64xf32>
    %134 = vector.shape_cast %133 : vector<64xf32> to vector<1x64xf32>
    %cst_127 = arith.constant 0.000000e+00 : f32
    %135 = vector.broadcast %cst_127 : f32 to vector<75x64xf32>
    %136 = arith.select %105, %130, %135 : vector<75x64xi1>, vector<75x64xf32>
    %cst_128 = arith.constant dense<0.000000e+00> : vector<64xf32>
    %137 = vector.multi_reduction <add>, %136, %cst_128 [0] : vector<75x64xf32> to vector<64xf32>
    %138 = vector.shape_cast %137 : vector<64xf32> to vector<1x64xf32>
    %139 = arith.mulf %138, %102 : vector<1x64xf32>
    %140 = tpu.concatenate %134, %139 in 1 : vector<1x64xf32>, vector<1x64xf32> -> vector<1x128xf32>
    %cst_129 = arith.constant 0.000000e+00 : f32
    %141 = vector.broadcast %cst_129 : f32 to vector<340x64xf32>
    %c0_130 = arith.constant 0 : index
    %c0_131 = arith.constant 0 : index
    %142 = vector.load %arg30[%c0_130, %c0_131] : memref<340x64xf32, #tpu.memory_space<vmem>>, vector<340x64xf32>
    tpu.vector_store %arg30[%c0_130, %c0_131], %141 {strides = array<i32>} : memref<340x64xf32, #tpu.memory_space<vmem>>, vector<340x64xf32>,
    %c0_i32_132 = arith.constant 0 : i32
    %c65_i32_133 = arith.constant 65 : i32
    %143 = arith.addi %c0_i32_132, %c65_i32_133 : i32
    %c1_i32_134 = arith.constant 1 : i32
    scf.for %arg32 = %c0_i32_132 to %143 step %c1_i32_134  : i32 {
      %c1_i32_177 = arith.constant 1 : i32
      %200 = arith.muli %arg32, %c1_i32_177 : i32
      %c0_i32_178 = arith.constant 0 : i32
      %201 = arith.addi %c0_i32_178, %200 : i32
      %c1_179 = arith.constant 1 : index
      %202 = arith.index_cast %201 : i32 to index
      %c0_180 = arith.constant 0 : index
      %203 = vector.load %arg29[%c1_179, %202, %c0_180] : memref<2x408x48xf32, #tpu.memory_space<vmem>>, vector<1x340x48xf32>
      %204 = vector.shape_cast %203 : vector<1x340x48xf32> to vector<340x48xf32>
      %205 = arith.truncf %204 : vector<340x48xf32> to vector<340x48xbf16>
      %c0_181 = arith.constant 0 : index
      %c0_182 = arith.constant 0 : index
      %206 = vector.load %arg30[%c0_181, %c0_182] : memref<340x64xf32, #tpu.memory_space<vmem>>, vector<340x64xf32>
      %207 = arith.index_cast %201 : i32 to index
      %c0_183 = arith.constant 0 : index
      %c0_184 = arith.constant 0 : index
      %208 = vector.load %arg8[%207, %c0_183, %c0_184] : memref<65x48x64xbf16, #tpu.memory_space<vmem>>, vector<1x48x64xbf16>
      %209 = vector.shape_cast %208 : vector<1x48x64xbf16> to vector<48x64xbf16>
      %cst_185 = arith.constant dense<0.000000e+00> : vector<340x64xf32>
      %210 = tpu.matmul %205, %209, %cst_185 {dimension_numbers = #tpu.dot_dimension_numbers<[1], [0], [0], [1], [0, 0, 1, 1], [], []>} : vector<340x48xbf16>, vector<48x64xbf16>, vector<340x64xf32> -> vector<340x64xf32>
      %211 = arith.addf %206, %210 : vector<340x64xf32>
      %c0_186 = arith.constant 0 : index
      %c0_187 = arith.constant 0 : index
      %212 = vector.load %arg30[%c0_186, %c0_187] : memref<340x64xf32, #tpu.memory_space<vmem>>, vector<340x64xf32>
      tpu.vector_store %arg30[%c0_186, %c0_187], %211 {strides = array<i32>} : memref<340x64xf32, #tpu.memory_space<vmem>>, vector<340x64xf32>,
    }
    %c65_i32_135 = arith.constant 65 : i32
    %c0_136 = arith.constant 0 : index
    %c0_137 = arith.constant 0 : index
    %144 = tpu.strided_load %arg30[%c0_136, %c0_137] {strides = array<i32: 4, 1>} : memref<340x64xf32, #tpu.memory_space<vmem>>, vector<85x64xf32>
    %c1_138 = arith.constant 1 : index
    %c0_139 = arith.constant 0 : index
    %145 = tpu.strided_load %arg30[%c1_138, %c0_139] {strides = array<i32: 4, 1>} : memref<340x64xf32, #tpu.memory_space<vmem>>, vector<85x64xf32>
    %146 = arith.maximumf %144, %145 : vector<85x64xf32>
    %c2_140 = arith.constant 2 : index
    %c0_141 = arith.constant 0 : index
    %147 = tpu.strided_load %arg30[%c2_140, %c0_141] {strides = array<i32: 4, 1>} : memref<340x64xf32, #tpu.memory_space<vmem>>, vector<85x64xf32>
    %c3_142 = arith.constant 3 : index
    %c0_143 = arith.constant 0 : index
    %148 = tpu.strided_load %arg30[%c3_142, %c0_143] {strides = array<i32: 4, 1>} : memref<340x64xf32, #tpu.memory_space<vmem>>, vector<85x64xf32>
    %149 = arith.maximumf %147, %148 : vector<85x64xf32>
    %150 = arith.maximumf %146, %149 : vector<85x64xf32>
    %151 = vector.broadcast %99 : vector<1x64xf32> to vector<85x64xf32>
    %152 = arith.addf %150, %151 : vector<85x64xf32>
    %cst_144 = arith.constant 0.000000e+00 : f32
    %153 = vector.broadcast %cst_144 : f32 to vector<85x64xf32>
    %154 = arith.cmpf ogt, %152, %153 : vector<85x64xf32>
    %cst_145 = arith.constant 3.000000e-01 : f32
    %155 = vector.broadcast %cst_145 : f32 to vector<85x64xf32>
    %156 = arith.mulf %155, %152 : vector<85x64xf32>
    %157 = arith.select %154, %152, %156 : vector<85x64xi1>, vector<85x64xf32>
    %cst_146 = arith.constant 0.000000e+00 : f32
    %158 = vector.broadcast %cst_146 : f32 to vector<59x64xf32>
    %159 = tpu.concatenate %157, %158 in 0 : vector<85x64xf32>, vector<59x64xf32> -> vector<144x64xf32>
    %c0_147 = arith.constant 0 : index
    %c0_148 = arith.constant 0 : index
    %160 = vector.load %arg31[%c0_147, %c0_148] : memref<144x64xf32, #tpu.memory_space<vmem>>, vector<144x64xf32>
    tpu.vector_store %arg31[%c0_147, %c0_148], %159 {strides = array<i32>} : memref<144x64xf32, #tpu.memory_space<vmem>>, vector<144x64xf32>,
    %cst_149 = arith.constant 0.000000e+00 : f32
    %161 = vector.broadcast %cst_149 : f32 to vector<75x64xf32>
    %c0_i32_150 = arith.constant 0 : i32
    %c65_i32_151 = arith.constant 65 : i32
    %162 = arith.addi %c0_i32_150, %c65_i32_151 : i32
    %c1_i32_152 = arith.constant 1 : i32
    %163 = scf.for %arg32 = %c0_i32_150 to %162 step %c1_i32_152 iter_args(%arg33 = %161) -> (vector<75x64xf32>)  : i32 {
      %200 = arith.index_cast %arg32 : i32 to index
      %c0_177 = arith.constant 0 : index
      %201 = vector.load %arg31[%200, %c0_177] : memref<144x64xf32, #tpu.memory_space<vmem>>, vector<75x64xf32>
      %202 = arith.truncf %201 : vector<75x64xf32> to vector<75x64xbf16>
      %203 = arith.index_cast %arg32 : i32 to index
      %c0_178 = arith.constant 0 : index
      %c0_179 = arith.constant 0 : index
      %204 = vector.load %arg10[%203, %c0_178, %c0_179] : memref<65x64x64xbf16, #tpu.memory_space<vmem>>, vector<1x64x64xbf16>
      %205 = vector.shape_cast %204 : vector<1x64x64xbf16> to vector<64x64xbf16>
      %cst_180 = arith.constant dense<0.000000e+00> : vector<75x64xf32>
      %206 = tpu.matmul %202, %205, %cst_180 {dimension_numbers = #tpu.dot_dimension_numbers<[1], [0], [0], [1], [0, 0, 1, 1], [], []>} : vector<75x64xbf16>, vector<64x64xbf16>, vector<75x64xf32> -> vector<75x64xf32>
      %207 = arith.addf %arg33, %206 : vector<75x64xf32>
      scf.yield %207 : vector<75x64xf32>
    }
    %c65_i32_153 = arith.constant 65 : i32
    %164 = vector.broadcast %100 : vector<1x64xf32> to vector<75x64xf32>
    %165 = arith.addf %163, %164 : vector<75x64xf32>
    %cst_154 = arith.constant 0xFF800000 : f32
    %166 = vector.broadcast %cst_154 : f32 to vector<75x64xf32>
    %167 = arith.select %105, %165, %166 : vector<75x64xi1>, vector<75x64xf32>
    %cst_155 = arith.constant dense<0xFF800000> : vector<64xf32>
    %168 = vector.multi_reduction <maximumf>, %167, %cst_155 [0] : vector<75x64xf32> to vector<64xf32>
    %169 = vector.shape_cast %168 : vector<64xf32> to vector<1x64xf32>
    %cst_156 = arith.constant 0.000000e+00 : f32
    %170 = vector.broadcast %cst_156 : f32 to vector<75x64xf32>
    %171 = arith.select %105, %165, %170 : vector<75x64xi1>, vector<75x64xf32>
    %cst_157 = arith.constant dense<0.000000e+00> : vector<64xf32>
    %172 = vector.multi_reduction <add>, %171, %cst_157 [0] : vector<75x64xf32> to vector<64xf32>
    %173 = vector.shape_cast %172 : vector<64xf32> to vector<1x64xf32>
    %174 = arith.mulf %173, %102 : vector<1x64xf32>
    %175 = tpu.concatenate %169, %174 in 1 : vector<1x64xf32>, vector<1x64xf32> -> vector<1x128xf32>
    %176 = tpu.concatenate %140, %175 in 0 : vector<1x128xf32>, vector<1x128xf32> -> vector<2x128xf32>
    %177 = arith.truncf %176 : vector<2x128xf32> to vector<2x128xbf16>
    %c0_158 = arith.constant 0 : index
    %c0_159 = arith.constant 0 : index
    %178 = vector.load %arg14[%c0_158, %c0_159] : memref<128x1024xbf16, #tpu.memory_space<vmem>>, vector<128x1024xbf16>
    %cst_160 = arith.constant dense<0.000000e+00> : vector<2x1024xf32>
    %179 = tpu.matmul %177, %178, %cst_160 {dimension_numbers = #tpu.dot_dimension_numbers<[1], [0], [0], [1], [0, 0, 1, 1], [], []>} : vector<2x128xbf16>, vector<128x1024xbf16>, vector<2x1024xf32> -> vector<2x1024xf32>
    %c0_161 = arith.constant 0 : index
    %c0_162 = arith.constant 0 : index
    %180 = vector.load %arg15[%c0_161, %c0_162] : memref<1x1024xf32, #tpu.memory_space<vmem>>, vector<1x1024xf32>
    %181 = vector.broadcast %180 : vector<1x1024xf32> to vector<2x1024xf32>
    %182 = arith.addf %179, %181 : vector<2x1024xf32>
    %cst_163 = arith.constant 0.000000e+00 : f32
    %183 = vector.broadcast %cst_163 : f32 to vector<2x1024xf32>
    %184 = arith.maximumf %182, %183 : vector<2x1024xf32>
    %185 = arith.truncf %184 : vector<2x1024xf32> to vector<2x1024xbf16>
    %c0_164 = arith.constant 0 : index
    %c0_165 = arith.constant 0 : index
    %186 = vector.load %arg16[%c0_164, %c0_165] : memref<1024x512xbf16, #tpu.memory_space<vmem>>, vector<1024x512xbf16>
    %cst_166 = arith.constant dense<0.000000e+00> : vector<2x512xf32>
    %187 = tpu.matmul %185, %186, %cst_166 {dimension_numbers = #tpu.dot_dimension_numbers<[1], [0], [0], [1], [0, 0, 1, 1], [], []>} : vector<2x1024xbf16>, vector<1024x512xbf16>, vector<2x512xf32> -> vector<2x512xf32>
    %c0_167 = arith.constant 0 : index
    %c0_168 = arith.constant 0 : index
    %188 = vector.load %arg17[%c0_167, %c0_168] : memref<1x512xf32, #tpu.memory_space<vmem>>, vector<1x512xf32>
    %189 = vector.broadcast %188 : vector<1x512xf32> to vector<2x512xf32>
    %190 = arith.addf %187, %189 : vector<2x512xf32>
    %cst_169 = arith.constant 0.000000e+00 : f32
    %191 = vector.broadcast %cst_169 : f32 to vector<2x512xf32>
    %192 = arith.maximumf %190, %191 : vector<2x512xf32>
    %193 = arith.truncf %192 : vector<2x512xf32> to vector<2x512xbf16>
    %c0_170 = arith.constant 0 : index
    %c0_171 = arith.constant 0 : index
    %194 = vector.load %arg18[%c0_170, %c0_171] : memref<512x8xbf16, #tpu.memory_space<vmem>>, vector<512x8xbf16>
    %cst_172 = arith.constant dense<0.000000e+00> : vector<2x8xf32>
    %195 = tpu.matmul %193, %194, %cst_172 {dimension_numbers = #tpu.dot_dimension_numbers<[1], [0], [0], [1], [0, 0, 1, 1], [], []>} : vector<2x512xbf16>, vector<512x8xbf16>, vector<2x8xf32> -> vector<2x8xf32>
    %c0_173 = arith.constant 0 : index
    %c0_174 = arith.constant 0 : index
    %196 = vector.load %arg19[%c0_173, %c0_174] : memref<1x8xf32, #tpu.memory_space<vmem>>, vector<1x8xf32>
    %197 = vector.broadcast %196 : vector<1x8xf32> to vector<2x8xf32>
    %198 = arith.addf %195, %197 : vector<2x8xf32>
    %c0_175 = arith.constant 0 : index
    %c0_176 = arith.constant 0 : index
    %199 = vector.load %arg20[%c0_175, %c0_176] : memref<2x8xf32, #tpu.memory_space<vmem>>, vector<2x8xf32>
    tpu.vector_store %arg20[%c0_175, %c0_176], %198 {strides = array<i32>} : memref<2x8xf32, #tpu.memory_space<vmem>>, vector<2x8xf32>,
    return
  }
  func.func @transform_0(%arg0: i32) -> (i32, i32, i32) {
    %c0_i32 = arith.constant 0 : i32
    %c0_i32_0 = arith.constant 0 : i32
    %c0_i32_1 = arith.constant 0 : i32
    %c0_i32_2 = arith.constant 0 : i32
    return %c0_i32, %c0_i32_0, %c0_i32_1 : i32, i32, i32
  }
  func.func @transform_1(%arg0: i32) -> (i32, i32) {
    %c0_i32 = arith.constant 0 : i32
    %c0_i32_0 = arith.constant 0 : i32
    %c0_i32_1 = arith.constant 0 : i32
    return %c0_i32, %c0_i32_0 : i32, i32
  }
  func.func @transform_2(%arg0: i32) -> (i32, i32) {
    %c0_i32 = arith.constant 0 : i32
    %c0_i32_0 = arith.constant 0 : i32
    %c0_i32_1 = arith.constant 0 : i32
    return %c0_i32, %c0_i32_0 : i32, i32
  }
  func.func @transform_3(%arg0: i32) -> (i32, i32) {
    %c0_i32 = arith.constant 0 : i32
    %c0_i32_0 = arith.constant 0 : i32
    %c0_i32_1 = arith.constant 0 : i32
    return %c0_i32, %c0_i32_0 : i32, i32
  }
  func.func @transform_4(%arg0: i32) -> (i32, i32) {
    %c0_i32 = arith.constant 0 : i32
    %c0_i32_0 = arith.constant 0 : i32
    %c0_i32_1 = arith.constant 0 : i32
    return %c0_i32, %c0_i32_0 : i32, i32
  }
  func.func @transform_5(%arg0: i32) -> (i32, i32, i32) {
    %c0_i32 = arith.constant 0 : i32
    %c0_i32_0 = arith.constant 0 : i32
    %c0_i32_1 = arith.constant 0 : i32
    %c0_i32_2 = arith.constant 0 : i32
    return %c0_i32, %c0_i32_0, %c0_i32_1 : i32, i32, i32
  }
  func.func @transform_6(%arg0: i32) -> (i32, i32, i32) {
    %c0_i32 = arith.constant 0 : i32
    %c0_i32_0 = arith.constant 0 : i32
    %c0_i32_1 = arith.constant 0 : i32
    %c0_i32_2 = arith.constant 0 : i32
    return %c0_i32, %c0_i32_0, %c0_i32_1 : i32, i32, i32
  }
  func.func @transform_7(%arg0: i32) -> (i32, i32, i32) {
    %c0_i32 = arith.constant 0 : i32
    %c0_i32_0 = arith.constant 0 : i32
    %c0_i32_1 = arith.constant 0 : i32
    %c0_i32_2 = arith.constant 0 : i32
    return %c0_i32, %c0_i32_0, %c0_i32_1 : i32, i32, i32
  }
  func.func @transform_8(%arg0: i32) -> (i32, i32) {
    %c0_i32 = arith.constant 0 : i32
    %c0_i32_0 = arith.constant 0 : i32
    %c0_i32_1 = arith.constant 0 : i32
    return %c0_i32, %c0_i32_0 : i32, i32
  }
  func.func @transform_9(%arg0: i32) -> (i32, i32, i32) {
    %c0_i32 = arith.constant 0 : i32
    %c0_i32_0 = arith.constant 0 : i32
    %c0_i32_1 = arith.constant 0 : i32
    %c0_i32_2 = arith.constant 0 : i32
    return %c0_i32, %c0_i32_0, %c0_i32_1 : i32, i32, i32
  }
  func.func @transform_10(%arg0: i32) -> (i32, i32) {
    %c0_i32 = arith.constant 0 : i32
    %c0_i32_0 = arith.constant 0 : i32
    %c0_i32_1 = arith.constant 0 : i32
    return %c0_i32, %c0_i32_0 : i32, i32
  }
  func.func @transform_11(%arg0: i32) -> (i32, i32) {
    %c0_i32 = arith.constant 0 : i32
    %c0_i32_0 = arith.constant 0 : i32
    %c0_i32_1 = arith.constant 0 : i32
    return %c0_i32, %c0_i32_0 : i32, i32
  }
  func.func @transform_12(%arg0: i32) -> (i32, i32) {
    %c0_i32 = arith.constant 0 : i32
    %c0_i32_0 = arith.constant 0 : i32
    %c0_i32_1 = arith.constant 0 : i32
    return %c0_i32, %c0_i32_0 : i32, i32
  }
  func.func @transform_13(%arg0: i32) -> (i32, i32) {
    %c0_i32 = arith.constant 0 : i32
    %c0_i32_0 = arith.constant 0 : i32
    %c0_i32_1 = arith.constant 0 : i32
    return %c0_i32, %c0_i32_0 : i32, i32
  }
  func.func @transform_14(%arg0: i32) -> (i32, i32) {
    %c0_i32 = arith.constant 0 : i32
    %c0_i32_0 = arith.constant 0 : i32
    %c0_i32_1 = arith.constant 0 : i32
    return %c0_i32, %c0_i32_0 : i32, i32
  }
  func.func @transform_15(%arg0: i32) -> (i32, i32) {
    %c0_i32 = arith.constant 0 : i32
    %c0_i32_0 = arith.constant 0 : i32
    %c0_i32_1 = arith.constant 0 : i32
    return %c0_i32, %c0_i32_0 : i32, i32
  }
  func.func @transform_16(%arg0: i32) -> (i32, i32) {
    %c0_i32 = arith.constant 0 : i32
    %c0_i32_0 = arith.constant 0 : i32
    %c0_i32_1 = arith.constant 0 : i32
    return %c0_i32, %c0_i32_0 : i32, i32
  }
  func.func @transform_17(%arg0: i32) -> (i32, i32) {
    %c0_i32 = arith.constant 0 : i32
    %c0_i32_0 = arith.constant 0 : i32
    %c0_i32_1 = arith.constant 0 : i32
    return %c0_i32, %c0_i32_0 : i32, i32
  }
  func.func @transform_18(%arg0: i32) -> (i32, i32) {
    %c0_i32 = arith.constant 0 : i32
    %c0_i32_0 = arith.constant 0 : i32
    %c0_i32_1 = arith.constant 0 : i32
    return %c0_i32, %c0_i32_0 : i32, i32
  }
  func.func @transform_19(%arg0: i32) -> (i32, i32) {
    %c0_i32 = arith.constant 0 : i32
    %c0_i32_0 = arith.constant 0 : i32
    %c0_i32_1 = arith.constant 0 : i32
    return %c0_i32, %c0_i32_0 : i32, i32
  }
}

</mosaic_0001>

<bundles_post_ra>
// kernel: byte_rcnn_forward.1
= control target key start
LH: loop header
LB: loop body
LE: loop exit
PB: predicated region body
PF: predicated region fallthrough
CT: control target
= control target key end

     0   :  { %s18358_s0 = inlined_call_operand.vmem [shape: f32[2,340,16], index: 0, kind: input, shape index: {}]   ;;  %s18359_s1 = inlined_call_operand.vmem [shape: f32[16,96], index: 1, kind: input, shape index: {}]   ;;  %s18360_s2 = inlined_call_operand.vmem [shape: f32[1,96], index: 2, kind: input, shape index: {}]   ;;  %s18361_s3 = inlined_call_operand.vmem [shape: f32[32,96], index: 3, kind: input, shape index: {}]   ;;  %s18362_s4 = inlined_call_operand.vmem [shape: f32[1,96], index: 4, kind: input, shape index: {}]   ;;  %s18363_s5 = inlined_call_operand.vmem [shape: f32[2,32,96], index: 5, kind: input, shape index: {}]   ;;  %s18364_s6 = inlined_call_operand.vmem [shape: f32[2,1,96], index: 6, kind: input, shape index: {}]   ;;  %s18365_s7 = inlined_call_operand.vmem [shape: bf16[65,48,64], index: 7, kind: input, shape index: {}]   ;;  %s18366_s8 = inlined_call_operand.vmem [shape: f32[1,64], index: 8, kind: input, shape index: {}]   ;;  %s18367_s9 = inlined_call_operand.vmem [shape: bf16[65,64,64], index: 9, kind: input, shape index: {}]   ;;  %s18368_s10 = inlined_call_operand.vmem [shape: f32[1,64], index: 10, kind: input, shape index: {}]   ;;  %s18369_s11 = inlined_call_operand.vmem [shape: s32[1,64], index: 11, kind: input, shape index: {}]   ;;  %s18370_s12 = inlined_call_operand.vmem [shape: f32[1,64], index: 12, kind: input, shape index: {}]   ;;  %s18371_s13 = inlined_call_operand.vmem [shape: bf16[128,1024], index: 13, kind: input, shape index: {}]   ;;  %s18372_s14 = inlined_call_operand.vmem [shape: f32[1,1024], index: 14, kind: input, shape index: {}]   ;;  %s18373_s15 = inlined_call_operand.vmem [shape: bf16[1024,512], index: 15, kind: input, shape index: {}]   ;;  %s18374_s16 = inlined_call_operand.vmem [shape: f32[1,512], index: 16, kind: input, shape index: {}]   ;;  %s18375_s17 = inlined_call_operand.vmem [shape: bf16[512,8], index: 17, kind: input, shape index: {}]   ;;  %s18376_s18 = inlined_call_operand.vmem [shape: f32[1,8], index: 18, kind: input, shape index: {}]   ;;  %s18377_s19 = inlined_call_operand.hbm [shape: f32[2,8], index: 19, kind: output, shape index: {}]  }
   0x1   :  { %18387 = sst [smem:[#allocation16_spill]] %s18358_s0 }
   0x2   :  { %18388 = sst [smem:[#allocation17_spill]] %s18359_s1 }
   0x3   :  { %18389 = sst [smem:[#allocation18_spill]] %s18360_s2 }
   0x4   :  { %18390 = sst [smem:[#allocation19_spill]] %s18361_s3 }
   0x5   :  { %24 = vsyncpa [#allocation14], 0  ;;  %s18391_s20 = sld [smem:[#allocation17_spill]]  ;;  %vm113_vm0 = vcmask 130048   ;;  %vm18382_vm1 = vcmask 392192   ;;  %s12084_s25 = smov 80  }
   0x6   :  { %s18392_s23 = sld [smem:[#allocation16_spill]]  ;;  %vm432_vm2 = vcmask 388096   ;;  %s13068_s28 = smov 0  }
   0x7   :  { %s18393_s21 = sld [smem:[#allocation18_spill]] }
   0xb   :  { %v65_v0 = vld [vmem:[%s18391_s20 + $0x8] sm:$0xff]  ;;  %v64_v1 = vld [vmem:[%s18391_s20] sm:$0xff] }
   0xc   :  { %257 = vmatpush.msra.mxu0 %v65_v0  ;;  %836 = vmatpush.msra.mxu1 %v65_v0  ;;  %v67_v2 = vld [vmem:[%s18392_s23] sm:$0xff]  ;;  %v9318_v3 = vld [vmem:[%s18392_s23 + $0x158] sm:$0xff]  ;;  %v9340_v4 = vld [vmem:[%s18392_s23 + $0x208] sm:$0xff] }
   0xd   :  { %11487 = vmatpush.msra.mxu3 %v65_v0  ;;  %11485 = vmatpush.msra.mxu2 %v65_v0  ;;  %v89_v5 = vld [vmem:[%s18392_s23 + $0xb0] sm:$0xff]  ;;  %v68_v6 = vld [vmem:[%s18392_s23 + $0x8] sm:$0xff]  ;;  %v9319_v8 = vld [vmem:[%s18392_s23 + $0x160] sm:$0xff] }
   0xe   :  { %258 = vmatpush.msra.mxu0 %v64_v1  ;;  %837 = vmatpush.msra.mxu1 %v64_v1  ;;  %v9341_v7 = vld [vmem:[%s18392_s23 + $0x210] sm:$0xff]  ;;  %v90_v9 = vld [vmem:[%s18392_s23 + $0xb8] sm:$0xff]  ;;  %v9320_v12 = vld [vmem:[%s18392_s23 + $0x168] sm:$0xff] }
   0xf   :  { %11488 = vmatpush.msra.mxu3 %v64_v1  ;;  %9275 = vmatmul.msk.f32.vlgmr.msra.gmra.mxu0 %vm113_vm0, %v67_v2  ;;  %v69_v10 = vld [vmem:[%s18392_s23 + $0x10] sm:$0xff]  ;;  %v9342_v11 = vld [vmem:[%s18392_s23 + $0x218] sm:$0xff]  ;;  %v91_v13 = vld [vmem:[%s18392_s23 + $0xc0] sm:$0xff] }
  0x10   :  { %9361 = vmatmul.msk.f32.vlgmr.msra.gmra.mxu1 %vm113_vm0, %v9318_v3  ;;  %9383 = vmatmul.msk.f32.vlgmr.msra.gmra.mxu3 %vm113_vm0, %v9340_v4  ;;  %v70_v14 = vld [vmem:[%s18392_s23 + $0x18] sm:$0xff]  ;;  %v9343_v15 = vld [vmem:[%s18392_s23 + $0x220] sm:$0xff]  ;;  %v9321_v16 = vld [vmem:[%s18392_s23 + $0x170] sm:$0xff] }
  0x11   :  { %11486 = vmatpush.msra.mxu2 %v64_v1  ;;  %v92_v17 = vld [vmem:[%s18392_s23 + $0xc8] sm:$0xff]  ;;  %v71_v18 = vld [vmem:[%s18392_s23 + $0x20] sm:$0xff]  ;;  %v9322_v20 = vld [vmem:[%s18392_s23 + $0x178] sm:$0xff] }
  0x12   :  { %9297 = vmatmul.msk.f32.vlgmr.msra.gmra.mxu2 %vm113_vm0, %v89_v5  ;;  %v9344_v19 = vld [vmem:[%s18392_s23 + $0x228] sm:$0xff]  ;;  %v93_v21 = vld [vmem:[%s18392_s23 + $0xd0] sm:$0xff]  ;;  %v9323_v23 = vld [vmem:[%s18392_s23 + $0x180] sm:$0xff] }
  0x13   :  { %v72_v22 = vld [vmem:[%s18392_s23 + $0x28] sm:$0xff]  ;;  %v9345_v24 = vld [vmem:[%s18392_s23 + $0x230] sm:$0xff]  ;;  %v94_v25 = vld [vmem:[%s18392_s23 + $0xd8] sm:$0xff] }
  0x14   :  { %v73_v26 = vld [vmem:[%s18392_s23 + $0x30] sm:$0xff]  ;;  %v9346_v27 = vld [vmem:[%s18392_s23 + $0x238] sm:$0xff]  ;;  %v9324_v28 = vld [vmem:[%s18392_s23 + $0x188] sm:$0xff] }
  0x15   :  { %v95_v29 = vld [vmem:[%s18392_s23 + $0xe0] sm:$0xff]  ;;  %v74_v30 = vld [vmem:[%s18392_s23 + $0x38] sm:$0xff]  ;;  %v9325_v32 = vld [vmem:[%s18392_s23 + $0x190] sm:$0xff] }
  0x16   :  { %v9347_v31 = vld [vmem:[%s18392_s23 + $0x240] sm:$0xff]  ;;  %v96_v33 = vld [vmem:[%s18392_s23 + $0xe8] sm:$0xff]  ;;  %v9326_v35 = vld [vmem:[%s18392_s23 + $0x198] sm:$0xff] }
  0x17   :  { %9276 = vmatmul.msk.f32.gmra.mxu0 %vm113_vm0, %v68_v6  ;;  %v75_v34 = vld [vmem:[%s18392_s23 + $0x40] sm:$0xff]  ;;  %v9348_v36 = vld [vmem:[%s18392_s23 + $0x248] sm:$0xff]  ;;  %v97_v37 = vld [vmem:[%s18392_s23 + $0xf0] sm:$0xff] }
  0x18   :  { %9384 = vmatmul.msk.f32.gmra.mxu3 %vm113_vm0, %v9341_v7  ;;  %9362 = vmatmul.msk.f32.gmra.mxu1 %vm113_vm0, %v9319_v8  ;;  %v76_v38 = vld [vmem:[%s18392_s23 + $0x48] sm:$0xff]  ;;  %v9349_v39 = vld [vmem:[%s18392_s23 + $0x250] sm:$0xff]  ;;  %v9327_v40 = vld [vmem:[%s18392_s23 + $0x1a0] sm:$0xff] }
  0x19   :  { %v98_v41 = vld [vmem:[%s18392_s23 + $0xf8] sm:$0xff]  ;;  %v77_v42 = vld [vmem:[%s18392_s23 + $0x50] sm:$0xff]  ;;  %v9328_v44 = vld [vmem:[%s18392_s23 + $0x1a8] sm:$0xff] }
  0x1a   :  { %9298 = vmatmul.msk.f32.gmra.mxu2 %vm113_vm0, %v90_v9  ;;  %v9350_v43 = vld [vmem:[%s18392_s23 + $0x258] sm:$0xff]  ;;  %v99_v45 = vld [vmem:[%s18392_s23 + $0x100] sm:$0xff]  ;;  %v9329_v47 = vld [vmem:[%s18392_s23 + $0x1b0] sm:$0xff] }
  0x1b   :  { %v78_v46 = vld [vmem:[%s18392_s23 + $0x58] sm:$0xff]  ;;  %v9351_v48 = vld [vmem:[%s18392_s23 + $0x260] sm:$0xff]  ;;  %v100_v49 = vld [vmem:[%s18392_s23 + $0x108] sm:$0xff] }
  0x1c   :  { %v9352_v50 = vld [vmem:[%s18392_s23 + $0x268] sm:$0xff]  ;;  %v9330_v51 = vld [vmem:[%s18392_s23 + $0x1b8] sm:$0xff]  ;;  %v79_v52 = vld [vmem:[%s18392_s23 + $0x60] sm:$0xff] }
  0x1d   :  { %v101_v53 = vld [vmem:[%s18392_s23 + $0x110] sm:$0xff]  ;;  %v9331_v55 = vld [vmem:[%s18392_s23 + $0x1c0] sm:$0xff]  ;;  %v102_v56 = vld [vmem:[%s18392_s23 + $0x118] sm:$0xff] }
  0x1e   :  { %v9353_v54 = vld [vmem:[%s18392_s23 + $0x270] sm:$0xff]  ;;  %v80_v57 = vld [vmem:[%s18392_s23 + $0x68] sm:$0xff]  ;;  %v103_v59 = vld [vmem:[%s18392_s23 + $0x120] sm:$0xff] }
  0x1f   :  { %9277 = vmatmul.msk.f32.gmra.mxu0 %vm113_vm0, %v69_v10  ;;  %v9332_v58 = vld [vmem:[%s18392_s23 + $0x1c8] sm:$0xff]  ;;  %v9354_v60 = vld [vmem:[%s18392_s23 + $0x278] sm:$0xff]  ;;  %v81_v61 = vld [vmem:[%s18392_s23 + $0x70] sm:$0xff] }
  0x20   :  { %9385 = vmatmul.msk.f32.gmra.mxu3 %vm113_vm0, %v9342_v11  ;;  %9363 = vmatmul.msk.f32.gmra.mxu1 %vm113_vm0, %v9320_v12  ;;  %v9355_v62 = vld [vmem:[%s18392_s23 + $0x280] sm:$0xff]  ;;  %v82_v4 = vld [vmem:[%s18392_s23 + $0x78] sm:$0xff]  ;;  %v9333_v5 = vld [vmem:[%s18392_s23 + $0x1d0] sm:$0xff] }
  0x21   :  { %v12454_v63 = vld [vmem:[%s18393_s21] ss:$0 sm:$0xff]  ;;  %v104_v6 = vld [vmem:[%s18392_s23 + $0x128] sm:$0xff] }
  0x22   :  { %9299 = vmatmul.msk.f32.gmra.mxu2 %vm113_vm0, %v91_v13  ;;  %v9356_v7 = vld [vmem:[%s18392_s23 + $0x288] sm:$0xff] }
  0x27   :  { %9278 = vmatmul.msk.f32.gmra.mxu0 %vm113_vm0, %v70_v14 }
  0x28   :  { %9386 = vmatmul.msk.f32.gmra.mxu3 %vm113_vm0, %v9343_v15  ;;  %9364 = vmatmul.msk.f32.gmra.mxu1 %vm113_vm0, %v9321_v16  ;;  %v9334_v15 = vld [vmem:[%s18392_s23 + $0x1d8] sm:$0xff] }
  0x2a   :  { %9300 = vmatmul.msk.f32.gmra.mxu2 %vm113_vm0, %v92_v17  ;;  %v105_v17 = vld [vmem:[%s18392_s23 + $0x130] sm:$0xff] }
  0x2f   :  { %9279 = vmatmul.msk.f32.gmra.mxu0 %vm113_vm0, %v71_v18 }
  0x30   :  { %9387 = vmatmul.msk.f32.gmra.mxu3 %vm113_vm0, %v9344_v19  ;;  %9365 = vmatmul.msk.f32.gmra.mxu1 %vm113_vm0, %v9322_v20 }
  0x32   :  { %9301 = vmatmul.msk.f32.gmra.mxu2 %vm113_vm0, %v93_v21 }
  0x37   :  { %9280 = vmatmul.msk.f32.gmra.mxu0 %vm113_vm0, %v72_v22 }
  0x38   :  { %9366 = vmatmul.msk.f32.gmra.mxu1 %vm113_vm0, %v9323_v23  ;;  %9388 = vmatmul.msk.f32.gmra.mxu3 %vm113_vm0, %v9345_v24 }
  0x3a   :  { %9302 = vmatmul.msk.f32.gmra.mxu2 %vm113_vm0, %v94_v25 }
  0x3f   :  { %9281 = vmatmul.msk.f32.gmra.mxu0 %vm113_vm0, %v73_v26  ;;  %v83_v26 = vld [vmem:[%s18392_s23 + $0x80] sm:$0xff] }
  0x40   :  { %9389 = vmatmul.msk.f32.gmra.mxu3 %vm113_vm0, %v9346_v27  ;;  %9367 = vmatmul.msk.f32.gmra.mxu1 %vm113_vm0, %v9324_v28  ;;  %v9335_v27 = vld [vmem:[%s18392_s23 + $0x1e0] sm:$0xff]  ;;  %v106_v28 = vld [vmem:[%s18392_s23 + $0x138] sm:$0xff] }
  0x42   :  { %9303 = vmatmul.msk.f32.gmra.mxu2 %vm113_vm0, %v95_v29  ;;  %v9357_v29 = vld [vmem:[%s18392_s23 + $0x290] sm:$0xff] }
  0x47   :  { %9282 = vmatmul.msk.f32.gmra.mxu0 %vm113_vm0, %v74_v30 }
  0x48   :  { %9390 = vmatmul.msk.f32.gmra.mxu3 %vm113_vm0, %v9347_v31  ;;  %9368 = vmatmul.msk.f32.gmra.mxu1 %vm113_vm0, %v9325_v32 }
  0x4a   :  { %9304 = vmatmul.msk.f32.gmra.mxu2 %vm113_vm0, %v96_v33 }
  0x4f   :  { %9283 = vmatmul.msk.f32.gmra.mxu0 %vm113_vm0, %v75_v34 }
  0x50   :  { %9369 = vmatmul.msk.f32.gmra.mxu1 %vm113_vm0, %v9326_v35  ;;  %9391 = vmatmul.msk.f32.gmra.mxu3 %vm113_vm0, %v9348_v36 }
  0x52   :  { %9305 = vmatmul.msk.f32.gmra.mxu2 %vm113_vm0, %v97_v37 }
  0x57   :  { %9284 = vmatmul.msk.f32.gmra.mxu0 %vm113_vm0, %v76_v38  ;;  %v84_v38 = vld [vmem:[%s18392_s23 + $0x88] sm:$0xff] }
  0x58   :  { %9392 = vmatmul.msk.f32.gmra.mxu3 %vm113_vm0, %v9349_v39  ;;  %9370 = vmatmul.msk.f32.gmra.mxu1 %vm113_vm0, %v9327_v40  ;;  %v9336_v39 = vld [vmem:[%s18392_s23 + $0x1e8] sm:$0xff]  ;;  %v107_v40 = vld [vmem:[%s18392_s23 + $0x140] sm:$0xff] }
  0x5a   :  { %9306 = vmatmul.msk.f32.gmra.mxu2 %vm113_vm0, %v98_v41 }
  0x5f   :  { %9285 = vmatmul.msk.f32.gmra.mxu0 %vm113_vm0, %v77_v42 }
  0x60   :  { %9393 = vmatmul.msk.f32.gmra.mxu3 %vm113_vm0, %v9350_v43  ;;  %9371 = vmatmul.msk.f32.gmra.mxu1 %vm113_vm0, %v9328_v44 }
  0x62   :  { %9307 = vmatmul.msk.f32.gmra.mxu2 %vm113_vm0, %v99_v45 }
  0x67   :  { %9286 = vmatmul.msk.f32.gmra.mxu0 %vm113_vm0, %v78_v46 }
  0x68   :  { %9372 = vmatmul.msk.f32.gmra.mxu1 %vm113_vm0, %v9329_v47  ;;  %9394 = vmatmul.msk.f32.gmra.mxu3 %vm113_vm0, %v9351_v48 }
  0x6a   :  { %9308 = vmatmul.msk.f32.gmra.mxu2 %vm113_vm0, %v100_v49  ;;  %v85_v49 = vld [vmem:[%s18392_s23 + $0x90] sm:$0xff] }
  0x6f   :  { %9287 = vmatmul.msk.f32.gmra.mxu0 %vm113_vm0, %v79_v52 }
  0x70   :  { %9395 = vmatmul.msk.f32.gmra.mxu3 %vm113_vm0, %v9352_v50  ;;  %9373 = vmatmul.msk.f32.gmra.mxu1 %vm113_vm0, %v9330_v51  ;;  %v9337_v50 = vld [vmem:[%s18392_s23 + $0x1f0] sm:$0xff]  ;;  %v108_v51 = vld [vmem:[%s18392_s23 + $0x148] sm:$0xff] }
  0x72   :  { %9309 = vmatmul.msk.f32.gmra.mxu2 %vm113_vm0, %v101_v53 }
  0x77   :  { %9288 = vmatmul.msk.f32.gmra.mxu0 %vm113_vm0, %v80_v57 }
  0x78   :  { %9396 = vmatmul.msk.f32.gmra.mxu3 %vm113_vm0, %v9353_v54  ;;  %9374 = vmatmul.msk.f32.gmra.mxu1 %vm113_vm0, %v9331_v55 }
  0x7a   :  { %9310 = vmatmul.msk.f32.gmra.mxu2 %vm113_vm0, %v102_v56 }
  0x7f   :  { %9289 = vmatmul.msk.f32.gmra.mxu0 %vm113_vm0, %v81_v61  ;;  %v9338_v61 = vld [vmem:[%s18392_s23 + $0x1f8] sm:$0xff] }
  0x80   :  { %9375 = vmatmul.msk.f32.gmra.mxu1 %vm113_vm0, %v9332_v58  ;;  %9397 = vmatmul.msk.f32.gmra.mxu3 %vm113_vm0, %v9354_v60  ;;  %v86_v60 = vld [vmem:[%s18392_s23 + $0x98] sm:$0xff] }
  0x82   :  { %9311 = vmatmul.msk.f32.gmra.mxu2 %vm113_vm0, %v103_v59 }
  0x87   :  { %9290 = vmatmul.msk.f32.gmra.mxu0 %vm113_vm0, %v82_v4 }
  0x88   :  { %9398 = vmatmul.msk.f32.gmra.mxu3 %vm113_vm0, %v9355_v62  ;;  %9376 = vmatmul.msk.f32.gmra.mxu1 %vm113_vm0, %v9333_v5  ;;  %v109_v62 = vld [vmem:[%s18392_s23 + $0x150] sm:$0xf] }
  0x8a   :  { %9312 = vmatmul.msk.f32.gmra.mxu2 %vm113_vm0, %v104_v6 }
  0x8c   :  { %v260_v0 = vpop.f32.mrf.mxu0 }
  0x8d   :  { %v261_v1 = vadd.f32 %v12454_v63, %v260_v0  ;;  %v839_v2 = vpop.f32.mrf.mxu1  ;;  %v9358_v0 = vld [vmem:[%s18392_s23 + $0x298] sm:$0xff] }
  0x8e   :  { %v840_v3 = vadd.f32 %v12454_v63, %v839_v2 }
  0x8f   :  { %390 = vst.msk [vmem:[#allocation2] sm:$0xff] %vm18382_vm1, %v261_v1  ;;  %477 = vrot.lane.b32.xlu0 %v261_v1, %s12084_s25  ;;  %9291 = vmatmul.msk.f32.gmra.mxu0 %vm113_vm0, %v83_v26 }
  0x90   :  { %969 = vst.msk [vmem:[#allocation2 + $0x158] sm:$0xff] %vm18382_vm1, %v840_v3  ;;  %1055 = vrot.lane.b32.xlu1 %v840_v3, %s12084_s25  ;;  %9399 = vmatmul.msk.f32.gmra.mxu3 %vm113_vm0, %v9356_v7 }
  0x91   :  { %9377 = vmatmul.msk.f32.gmra.mxu1 %vm113_vm0, %v9334_v15 }
  0x92   :  { %9313 = vmatmul.msk.f32.gmra.mxu2 %vm113_vm0, %v105_v17 }
  0x93   :  { %v905_v8 = vpop.f32.mrf.mxu3 }
  0x94   :  { %v906_v9 = vadd.f32 %v12454_v63, %v905_v8  ;;  %v263_v10 = vpop.f32.mrf.mxu0 }
  0x95   :  { %v264_v11 = vadd.f32 %v12454_v63, %v263_v10  ;;  %v326_v12 = vpop.f32.mrf.mxu2  ;;  %v842_v13 = vpop.f32.mrf.mxu1  ;;  %v9359_v10 = vld [vmem:[%s18392_s23 + $0x2a0] sm:$0xff] }
  0x96   :  { %991 = vst.msk [vmem:[#allocation2 + $0x208] sm:$0xff] %vm18382_vm1, %v906_v9  ;;  %v327_v14 = vadd.f32 %v12454_v63, %v326_v12  ;;  %1099 = vrot.lane.b32.xlu2 %v906_v9, %s12084_s25  ;;  %v843_v16 = vadd.f32 %v12454_v63, %v842_v13  ;;  %v87_v9 = vld [vmem:[%s18392_s23 + $0xa0] sm:$0xff] }
  0x97   :  { %391 = vst.msk [vmem:[#allocation2 + $0x8] sm:$0xff] %vm18382_vm1, %v264_v11  ;;  %479 = vrot.lane.b32.xlu0 %v264_v11, %s12084_s25  ;;  %9292 = vmatmul.msk.f32.gmra.mxu0 %vm113_vm0, %v84_v38 }
  0x98   :  { %412 = vst.msk [vmem:[#allocation2 + $0xb0] sm:$0xff] %vm18382_vm1, %v327_v14  ;;  %521 = vrot.lane.b32.xlu1 %v327_v14, %s12084_s25  ;;  %9400 = vmatmul.msk.f32.gmra.mxu3 %vm113_vm0, %v9357_v29 }
  0x99   :  { %970 = vst.msk [vmem:[#allocation2 + $0x160] sm:$0xff] %vm18382_vm1, %v843_v16  ;;  %9378 = vmatmul.msk.f32.gmra.mxu1 %vm113_vm0, %v9335_v27 }
  0x9a   :  { %9314 = vmatmul.msk.f32.gmra.mxu2 %vm113_vm0, %v106_v28 }
  0x9b   :  { %v908_v18 = vpop.f32.mrf.mxu3 }
  0x9c   :  { %v909_v19 = vadd.f32 %v12454_v63, %v908_v18  ;;  %v266_v20 = vpop.f32.mrf.mxu0 }
  0x9d   :  { %v267_v21 = vadd.f32 %v12454_v63, %v266_v20  ;;  %v329_v22 = vpop.f32.mrf.mxu2  ;;  %v845_v23 = vpop.f32.mrf.mxu1  ;;  %v9339_v20 = vld [vmem:[%s18392_s23 + $0x200] sm:$0xff] }
  0x9e   :  { %992 = vst.msk [vmem:[#allocation2 + $0x210] sm:$0xff] %vm18382_vm1, %v909_v19  ;;  %1057 = vrot.lane.b32.xlu2 %v843_v16, %s12084_s25  ;;  %v330_v24 = vadd.f32 %v12454_v63, %v329_v22  ;;  %v846_v25 = vadd.f32 %v12454_v63, %v845_v23 }
  0x9f   :  { %392 = vst.msk [vmem:[#allocation2 + $0x10] sm:$0xff] %vm18382_vm1, %v267_v21  ;;  %1101 = vrot.lane.b32.xlu0 %v909_v19, %s12084_s25  ;;  %9293 = vmatmul.msk.f32.gmra.mxu0 %vm113_vm0, %v85_v49  ;;  %v88_v19 = vld [vmem:[%s18392_s23 + $0xa8] sm:$0xff] }
  0xa0   :  { %481 = vrot.lane.b32.xlu1 %v267_v21, %s12084_s25  ;;  %413 = vst.msk [vmem:[#allocation2 + $0xb8] sm:$0xff] %vm18382_vm1, %v330_v24  ;;  %9401 = vmatmul.msk.f32.gmra.mxu3 %vm113_vm0, %v9358_v0  ;;  %v9360_v21 = vld [vmem:[%s18392_s23 + $0x2a8] sm:$0xf] }
  0xa1   :  { %971 = vst.msk [vmem:[#allocation2 + $0x168] sm:$0xff] %vm18382_vm1, %v846_v25  ;;  %9379 = vmatmul.msk.f32.gmra.mxu1 %vm113_vm0, %v9336_v39 }
  0xa2   :  { %9315 = vmatmul.msk.f32.gmra.mxu2 %vm113_vm0, %v107_v40 }
  0xa3   :  { %v911_v30 = vpop.f32.mrf.mxu3 }
  0xa4   :  { %v912_v31 = vadd.f32 %v12454_v63, %v911_v30  ;;  %v269_v32 = vpop.f32.mrf.mxu0 }
  0xa5   :  { %v270_v33 = vadd.f32 %v12454_v63, %v269_v32  ;;  %v332_v34 = vpop.f32.mrf.mxu2  ;;  %v848_v35 = vpop.f32.mrf.mxu1 }
  0xa6   :  { %993 = vst.msk [vmem:[#allocation2 + $0x218] sm:$0xff] %vm18382_vm1, %v912_v31  ;;  %523 = vrot.lane.b32.xlu2 %v330_v24, %s12084_s25  ;;  %v333_v36 = vadd.f32 %v12454_v63, %v332_v34  ;;  %v849_v37 = vadd.f32 %v12454_v63, %v848_v35 }
  0xa7   :  { %1059 = vrot.lane.b32.xlu0 %v846_v25, %s12084_s25  ;;  %393 = vst.msk [vmem:[#allocation2 + $0x18] sm:$0xff] %vm18382_vm1, %v270_v33  ;;  %9294 = vmatmul.msk.f32.gmra.mxu0 %vm113_vm0, %v86_v60 }
  0xa8   :  { %1103 = vrot.lane.b32.xlu1 %v912_v31, %s12084_s25  ;;  %414 = vst.msk [vmem:[#allocation2 + $0xc0] sm:$0xff] %vm18382_vm1, %v333_v36  ;;  %9402 = vmatmul.msk.f32.gmra.mxu3 %vm113_vm0, %v9359_v10 }
  0xa9   :  { %972 = vst.msk [vmem:[#allocation2 + $0x170] sm:$0xff] %vm18382_vm1, %v849_v37  ;;  %9380 = vmatmul.msk.f32.gmra.mxu1 %vm113_vm0, %v9337_v50 }
  0xaa   :  { %9316 = vmatmul.msk.f32.gmra.mxu2 %vm113_vm0, %v108_v51 }
  0xab   :  { %v914_v41 = vpop.f32.mrf.mxu3 }
  0xac   :  { %v915_v42 = vadd.f32 %v12454_v63, %v914_v41  ;;  %v272_v43 = vpop.f32.mrf.mxu0 }
  0xad   :  { %v273_v44 = vadd.f32 %v12454_v63, %v272_v43  ;;  %v335_v45 = vpop.f32.mrf.mxu2  ;;  %v851_v46 = vpop.f32.mrf.mxu1 }
  0xae   :  { %994 = vst.msk [vmem:[#allocation2 + $0x220] sm:$0xff] %vm18382_vm1, %v915_v42  ;;  %1105 = vrot.lane.b32.xlu2 %v915_v42, %s12084_s25  ;;  %v336_v47 = vadd.f32 %v12454_v63, %v335_v45  ;;  %v852_v48 = vadd.f32 %v12454_v63, %v851_v46 }
  0xaf   :  { %525 = vrot.lane.b32.xlu0 %v333_v36, %s12084_s25  ;;  %394 = vst.msk [vmem:[#allocation2 + $0x20] sm:$0xff] %vm18382_vm1, %v273_v44  ;;  %9295 = vmatmul.msk.f32.gmra.mxu0 %vm113_vm0, %v87_v9 }
  0xb0   :  { %483 = vrot.lane.b32.xlu1 %v270_v33, %s12084_s25  ;;  %415 = vst.msk [vmem:[#allocation2 + $0xc8] sm:$0xff] %vm18382_vm1, %v336_v47  ;;  %9403 = vmatmul.msk.f32.gmra.mxu3 %vm113_vm0, %v9360_v21 }
  0xb1   :  { %973 = vst.msk [vmem:[#allocation2 + $0x178] sm:$0xff] %vm18382_vm1, %v852_v48  ;;  %9381 = vmatmul.msk.f32.gmra.mxu1 %vm113_vm0, %v9338_v61 }
  0xb2   :  { %9317 = vmatmul.msk.f32.gmra.mxu2 %vm113_vm0, %v109_v62 }
  0xb3   :  { %v917_v52 = vpop.f32.mrf.mxu3 }
  0xb4   :  { %v918_v53 = vadd.f32 %v12454_v63, %v917_v52  ;;  %v275_v54 = vpop.f32.mrf.mxu0 }
  0xb5   :  { %v338_v55 = vpop.f32.mrf.mxu2  ;;  %v854_v56 = vpop.f32.mrf.mxu1  ;;  %v12573_v57 = vadd.f32 %v12454_v63, %v275_v54 }
  0xb6   :  { %995 = vst.msk [vmem:[#allocation2 + $0x228] sm:$0xff] %vm18382_vm1, %v918_v53  ;;  %485 = vrot.lane.b32.xlu2 %v273_v44, %s12084_s25  ;;  %v339_v58 = vadd.f32 %v12454_v63, %v338_v55  ;;  %v855_v59 = vadd.f32 %v12454_v63, %v854_v56 }
  0xb7   :  { %1107 = vrot.lane.b32.xlu0 %v918_v53, %s12084_s25  ;;  %395 = vst.msk [vmem:[#allocation2 + $0x28] sm:$0xff] %vm18382_vm1, %v12573_v57  ;;  %9296 = vmatmul.msk.f32.gmra.mxu0 %vm113_vm0, %v88_v19 }
  0xb8   :  { %1061 = vrot.lane.b32.xlu1 %v849_v37, %s12084_s25  ;;  %416 = vst.msk [vmem:[#allocation2 + $0xd0] sm:$0xff] %vm18382_vm1, %v339_v58 }
  0xb9   :  { %974 = vst.msk [vmem:[#allocation2 + $0x180] sm:$0xff] %vm18382_vm1, %v855_v59  ;;  %9382 = vmatmul.msk.f32.gmra.mxu1 %vm113_vm0, %v9339_v20 }
  0xbb   :  { %v920_v1 = vpop.f32.mrf.mxu3 }
  0xbc   :  { %v921_v2 = vadd.f32 %v12454_v63, %v920_v1  ;;  %v278_v3 = vpop.f32.mrf.mxu0 }
  0xbd   :  { %v341_v4 = vpop.f32.mrf.mxu2  ;;  %v279_v5 = vadd.f32 %v12454_v63, %v278_v3  ;;  %v857_v6 = vpop.f32.mrf.mxu1 }
  0xbe   :  { %1063 = vrot.lane.b32.xlu2 %v852_v48, %s12084_s25  ;;  %v342_v7 = vadd.f32 %v12454_v63, %v341_v4  ;;  %996 = vst.msk [vmem:[#allocation2 + $0x230] sm:$0xff] %vm18382_vm1, %v921_v2  ;;  %v858_v8 = vadd.f32 %v12454_v63, %v857_v6 }
  0xbf   :  { %1065 = vrot.lane.b32.xlu0 %v855_v59, %s12084_s25  ;;  %396 = vst.msk [vmem:[#allocation2 + $0x30] sm:$0xff] %vm18382_vm1, %v279_v5 }
  0xc0   :  { %527 = vrot.lane.b32.xlu1 %v336_v47, %s12084_s25  ;;  %417 = vst.msk [vmem:[#allocation2 + $0xd8] sm:$0xff] %vm18382_vm1, %v342_v7 }
  0xc1   :  { %975 = vst.msk [vmem:[#allocation2 + $0x188] sm:$0xff] %vm18382_vm1, %v858_v8 }
  0xc3   :  { %v923_v11 = vpop.f32.mrf.mxu3 }
  0xc4   :  { %v924_v12 = vadd.f32 %v12454_v63, %v923_v11  ;;  %v281_v13 = vpop.f32.mrf.mxu0 }
  0xc5   :  { %v344_v14 = vpop.f32.mrf.mxu2  ;;  %v860_v15 = vpop.f32.mrf.mxu1  ;;  %v282_v16 = vadd.f32 %v12454_v63, %v281_v13 }
  0xc6   :  { %529 = vrot.lane.b32.xlu2 %v339_v58, %s12084_s25  ;;  %997 = vst.msk [vmem:[#allocation2 + $0x238] sm:$0xff] %vm18382_vm1, %v924_v12  ;;  %v345_v17 = vadd.f32 %v12454_v63, %v344_v14  ;;  %v861_v18 = vadd.f32 %v12454_v63, %v860_v15 }
  0xc7   :  { %531 = vrot.lane.b32.xlu0 %v342_v7, %s12084_s25  ;;  %397 = vst.msk [vmem:[#allocation2 + $0x38] sm:$0xff] %vm18382_vm1, %v282_v16 }
  0xc8   :  { %1109 = vrot.lane.b32.xlu1 %v921_v2, %s12084_s25  ;;  %418 = vst.msk [vmem:[#allocation2 + $0xe0] sm:$0xff] %vm18382_vm1, %v345_v17 }
  0xc9   :  { %976 = vst.msk [vmem:[#allocation2 + $0x190] sm:$0xff] %vm18382_vm1, %v861_v18 }
  0xcb   :  { %v926_v22 = vpop.f32.mrf.mxu3 }
  0xcc   :  { %v927_v23 = vadd.f32 %v12454_v63, %v926_v22  ;;  %v284_v24 = vpop.f32.mrf.mxu0 }
  0xcd   :  { %v347_v25 = vpop.f32.mrf.mxu2  ;;  %v863_v26 = vpop.f32.mrf.mxu1  ;;  %v285_v27 = vadd.f32 %v12454_v63, %v284_v24 }
  0xce   :  { %487 = vrot.lane.b32.xlu2 %v12573_v57, %s12084_s25  ;;  %998 = vst.msk [vmem:[#allocation2 + $0x240] sm:$0xff] %vm18382_vm1, %v927_v23  ;;  %v348_v28 = vadd.f32 %v12454_v63, %v347_v25  ;;  %v864_v29 = vadd.f32 %v12454_v63, %v863_v26 }
  0xcf   :  { %489 = vrot.lane.b32.xlu0 %v279_v5, %s12084_s25  ;;  %398 = vst.msk [vmem:[#allocation2 + $0x40] sm:$0xff] %vm18382_vm1, %v285_v27 }
  0xd0   :  { %1067 = vrot.lane.b32.xlu1 %v858_v8, %s12084_s25  ;;  %419 = vst.msk [vmem:[#allocation2 + $0xe8] sm:$0xff] %vm18382_vm1, %v348_v28 }
  0xd1   :  { %977 = vst.msk [vmem:[#allocation2 + $0x198] sm:$0xff] %vm18382_vm1, %v864_v29 }
  0xd3   :  { %v929_v30 = vpop.f32.mrf.mxu3 }
  0xd4   :  { %v930_v31 = vadd.f32 %v12454_v63, %v929_v30  ;;  %v287_v32 = vpop.f32.mrf.mxu0 }
  0xd5   :  { %v350_v33 = vpop.f32.mrf.mxu2  ;;  %v288_v34 = vadd.f32 %v12454_v63, %v287_v32  ;;  %v866_v35 = vpop.f32.mrf.mxu1 }
  0xd6   :  { %1111 = vrot.lane.b32.xlu2 %v924_v12, %s12084_s25  ;;  %v351_v36 = vadd.f32 %v12454_v63, %v350_v33  ;;  %999 = vst.msk [vmem:[#allocation2 + $0x248] sm:$0xff] %vm18382_vm1, %v930_v31  ;;  %v867_v37 = vadd.f32 %v12454_v63, %v866_v35 }
  0xd7   :  { %1113 = vrot.lane.b32.xlu0 %v927_v23, %s12084_s25  ;;  %399 = vst.msk [vmem:[#allocation2 + $0x48] sm:$0xff] %vm18382_vm1, %v288_v34 }
  0xd8   :  { %533 = vrot.lane.b32.xlu1 %v345_v17, %s12084_s25  ;;  %420 = vst.msk [vmem:[#allocation2 + $0xf0] sm:$0xff] %vm18382_vm1, %v351_v36 }
  0xd9   :  { %978 = vst.msk [vmem:[#allocation2 + $0x1a0] sm:$0xff] %vm18382_vm1, %v867_v37 }
  0xdb   :  { %v932_v38 = vpop.f32.mrf.mxu3 }
  0xdc   :  { %v933_v39 = vadd.f32 %v12454_v63, %v932_v38  ;;  %v290_v40 = vpop.f32.mrf.mxu0 }
  0xdd   :  { %v353_v41 = vpop.f32.mrf.mxu2  ;;  %v869_v42 = vpop.f32.mrf.mxu1  ;;  %v12668_v43 = vadd.f32 %v12454_v63, %v290_v40 }
  0xde   :  { %1069 = vrot.lane.b32.xlu2 %v861_v18, %s12084_s25  ;;  %1000 = vst.msk [vmem:[#allocation2 + $0x250] sm:$0xff] %vm18382_vm1, %v933_v39  ;;  %v354_v44 = vadd.f32 %v12454_v63, %v353_v41  ;;  %v870_v45 = vadd.f32 %v12454_v63, %v869_v42 }
  0xdf   :  { %1071 = vrot.lane.b32.xlu0 %v864_v29, %s12084_s25  ;;  %400 = vst.msk [vmem:[#allocation2 + $0x50] sm:$0xff] %vm18382_vm1, %v12668_v43 }
  0xe0   :  { %491 = vrot.lane.b32.xlu1 %v282_v16, %s12084_s25  ;;  %421 = vst.msk [vmem:[#allocation2 + $0xf8] sm:$0xff] %vm18382_vm1, %v354_v44 }
  0xe1   :  { %979 = vst.msk [vmem:[#allocation2 + $0x1a8] sm:$0xff] %vm18382_vm1, %v870_v45 }
  0xe3   :  { %v935_v46 = vpop.f32.mrf.mxu3 }
  0xe4   :  { %v936_v47 = vadd.f32 %v12454_v63, %v935_v46  ;;  %v293_v48 = vpop.f32.mrf.mxu0 }
  0xe5   :  { %v356_v49 = vpop.f32.mrf.mxu2  ;;  %v872_v50 = vpop.f32.mrf.mxu1  ;;  %v12682_v51 = vadd.f32 %v12454_v63, %v293_v48 }
  0xe6   :  { %535 = vrot.lane.b32.xlu2 %v348_v28, %s12084_s25  ;;  %1001 = vst.msk [vmem:[#allocation2 + $0x258] sm:$0xff] %vm18382_vm1, %v936_v47  ;;  %v12687_v52 = vadd.f32 %v12454_v63, %v356_v49  ;;  %v873_v53 = vadd.f32 %v12454_v63, %v872_v50 }
  0xe7   :  { %537 = vrot.lane.b32.xlu0 %v351_v36, %s12084_s25  ;;  %401 = vst.msk [vmem:[#allocation2 + $0x58] sm:$0xff] %vm18382_vm1, %v12682_v51 }
  0xe8   :  { %1115 = vrot.lane.b32.xlu1 %v930_v31, %s12084_s25  ;;  %422 = vst.msk [vmem:[#allocation2 + $0x100] sm:$0xff] %vm18382_vm1, %v12687_v52 }
  0xe9   :  { %980 = vst.msk [vmem:[#allocation2 + $0x1b0] sm:$0xff] %vm18382_vm1, %v873_v53 }
  0xeb   :  { %v938_v54 = vpop.f32.mrf.mxu3 }
  0xec   :  { %v939_v55 = vadd.f32 %v12454_v63, %v938_v54  ;;  %v296_v59 = vpop.f32.mrf.mxu0 }
  0xed   :  { %v359_v56 = vpop.f32.mrf.mxu2  ;;  %v875_v57 = vpop.f32.mrf.mxu1  ;;  %v12703_v60 = vadd.f32 %v12454_v63, %v296_v59 }
  0xee   :  { %493 = vrot.lane.b32.xlu2 %v285_v27, %s12084_s25  ;;  %v360_v58 = vadd.f32 %v12454_v63, %v359_v56  ;;  %1002 = vst.msk [vmem:[#allocation2 + $0x260] sm:$0xff] %vm18382_vm1, %v939_v55  ;;  %v12706_v61 = vadd.f32 %v12454_v63, %v875_v57 }
  0xef   :  { %495 = vrot.lane.b32.xlu0 %v288_v34, %s12084_s25  ;;  %402 = vst.msk [vmem:[#allocation2 + $0x60] sm:$0xff] %vm18382_vm1, %v12703_v60 }
  0xf0   :  { %v1100_v62 = vpop.permute.xlu2 %1099  ;;  %1073 = vrot.lane.b32.xlu1 %v867_v37, %s12084_s25  ;;  %423 = vst.msk [vmem:[#allocation2 + $0x108] sm:$0xff] %vm18382_vm1, %v360_v58 }
  0xf1   :  { %1207 = vst.msk [vmem:[#allocation3 + $0x208] sm:$0xff] %vm18382_vm1, %v1100_v62 }
  0xf2   :  { %981 = vst.msk [vmem:[#allocation2 + $0x1b8] sm:$0xff] %vm18382_vm1, %v12706_v61 }
  0xf3   :  { %v941_v0 = vpop.f32.mrf.mxu3 }
  0xf4   :  { %v12716_v1 = vadd.f32 %v12454_v63, %v941_v0  ;;  %v299_v9 = vpop.f32.mrf.mxu0 }
  0xf5   :  { %v362_v2 = vpop.f32.mrf.mxu2  ;;  %v878_v3 = vpop.f32.mrf.mxu1  ;;  %v12738_v11 = vadd.f32 %v12454_v63, %v299_v9 }
  0xf6   :  { %1117 = vrot.lane.b32.xlu2 %v933_v39, %s12084_s25  ;;  %1003 = vst.msk [vmem:[#allocation2 + $0x268] sm:$0xff] %vm18382_vm1, %v12716_v1  ;;  %v12722_v4 = vadd.f32 %v12454_v63, %v362_v2  ;;  %v12725_v5 = vadd.f32 %v12454_v63, %v878_v3 }
  0xf7   :  { %1119 = vrot.lane.b32.xlu0 %v936_v47, %s12084_s25  ;;  %403 = vst.msk [vmem:[#allocation2 + $0x68] sm:$0xff] %vm18382_vm1, %v12738_v11 }
  0xf8   :  { %v1058_v6 = vpop.permute.xlu2 %1057  ;;  %539 = vrot.lane.b32.xlu1 %v354_v44, %s12084_s25  ;;  %424 = vst.msk [vmem:[#allocation2 + $0x110] sm:$0xff] %vm18382_vm1, %v12722_v4 }
  0xf9   :  { %1186 = vst.msk [vmem:[#allocation3 + $0x160] sm:$0xff] %vm18382_vm1, %v1058_v6 }
  0xfa   :  { %982 = vst.msk [vmem:[#allocation2 + $0x1c0] sm:$0xff] %vm18382_vm1, %v12725_v5 }
  0xfb   :  { %v944_v7 = vpop.f32.mrf.mxu3 }
  0xfc   :  { %v945_v8 = vadd.f32 %v12454_v63, %v944_v7  ;;  %v302_v19 = vpop.f32.mrf.mxu0 }
  0xfd   :  { %v365_v10 = vpop.f32.mrf.mxu2  ;;  %v881_v12 = vpop.f32.mrf.mxu1  ;;  %v12764_v22 = vadd.f32 %v12454_v63, %v302_v19 }
  0xfe   :  { %1075 = vrot.lane.b32.xlu2 %v870_v45, %s12084_s25  ;;  %1004 = vst.msk [vmem:[#allocation2 + $0x270] sm:$0xff] %vm18382_vm1, %v945_v8  ;;  %v12746_v14 = vadd.f32 %v12454_v63, %v365_v10  ;;  %v12750_v16 = vadd.f32 %v12454_v63, %v881_v12 }
  0xff   :  { %1077 = vrot.lane.b32.xlu0 %v873_v53, %s12084_s25  ;;  %404 = vst.msk [vmem:[#allocation2 + $0x70] sm:$0xff] %vm18382_vm1, %v12764_v22 }
 0x100   :  { %v524_v13 = vpop.permute.xlu2 %523  ;;  %497 = vrot.lane.b32.xlu1 %v12668_v43, %s12084_s25  ;;  %425 = vst.msk [vmem:[#allocation2 + $0x118] sm:$0xff] %vm18382_vm1, %v12746_v14 }
 0x101   :  { %629 = vst.msk [vmem:[#allocation3 + $0xb8] sm:$0xff] %vm18382_vm1, %v524_v13  ;;  %v478_v15 = vpop.permute.xlu0 %477 }
 0x102   :  { %v1056_v17 = vpop.permute.xlu1 %1055  ;;  %606 = vst.msk [vmem:[#allocation3] sm:$0xff] %vm18382_vm1, %v478_v15 }
 0x103   :  { %1185 = vst.msk [vmem:[#allocation3 + $0x158] sm:$0xff] %vm18382_vm1, %v1056_v17  ;;  %v947_v18 = vpop.f32.mrf.mxu3 }
 0x104   :  { %983 = vst.msk [vmem:[#allocation2 + $0x1c8] sm:$0xff] %vm18382_vm1, %v12750_v16  ;;  %v12759_v21 = vadd.f32 %v12454_v63, %v947_v18  ;;  %v305_v29 = vpop.f32.mrf.mxu0 }
 0x105   :  { %v368_v20 = vpop.f32.mrf.mxu2  ;;  %v884_v27 = vpop.f32.mrf.mxu1  ;;  %v12786_v31 = vadd.f32 %v12454_v63, %v305_v29 }
 0x106   :  { %541 = vrot.lane.b32.xlu2 %v12687_v52, %s12084_s25  ;;  %1005 = vst.msk [vmem:[#allocation2 + $0x278] sm:$0xff] %vm18382_vm1, %v12759_v21  ;;  %v12773_v24 = vadd.f32 %v12454_v63, %v368_v20  ;;  %v12781_v30 = vadd.f32 %v12454_v63, %v884_v27 }
 0x107   :  { %543 = vrot.lane.b32.xlu0 %v360_v58, %s12084_s25  ;;  %405 = vst.msk [vmem:[#allocation2 + $0x78] sm:$0xff] %vm18382_vm1, %v12786_v31 }
 0x108   :  { %v1106_v23 = vpop.permute.xlu2 %1105  ;;  %1121 = vrot.lane.b32.xlu1 %v939_v55, %s12084_s25  ;;  %426 = vst.msk [vmem:[#allocation2 + $0x120] sm:$0xff] %vm18382_vm1, %v12773_v24 }
 0x109   :  { %1210 = vst.msk [vmem:[#allocation3 + $0x220] sm:$0xff] %vm18382_vm1, %v1106_v23  ;;  %v480_v25 = vpop.permute.xlu0 %479 }
 0x10a   :  { %v522_v26 = vpop.permute.xlu1 %521  ;;  %607 = vst.msk [vmem:[#allocation3 + $0x8] sm:$0xff] %vm18382_vm1, %v480_v25 }
 0x10b   :  { %628 = vst.msk [vmem:[#allocation3 + $0xb0] sm:$0xff] %vm18382_vm1, %v522_v26  ;;  %v950_v28 = vpop.f32.mrf.mxu3 }
 0x10c   :  { %984 = vst.msk [vmem:[#allocation2 + $0x1d0] sm:$0xff] %vm18382_vm1, %v12781_v30  ;;  %v12797_v33 = vadd.f32 %v12454_v63, %v950_v28  ;;  %v308_v45 = vpop.f32.mrf.mxu0 }
 0x10d   :  { %v371_v36 = vpop.f32.mrf.mxu2  ;;  %v12828_v47 = vadd.f32 %v12454_v63, %v308_v45 }
 0x10e   :  { %499 = vrot.lane.b32.xlu2 %v12682_v51, %s12084_s25  ;;  %1006 = vst.msk [vmem:[#allocation2 + $0x280] sm:$0xff] %vm18382_vm1, %v12797_v33  ;;  %v887_v37 = vpop.f32.mrf.mxu1  ;;  %v12805_v38 = vadd.f32 %v12454_v63, %v371_v36 }
 0x10f   :  { %501 = vrot.lane.b32.xlu0 %v12703_v60, %s12084_s25  ;;  %v12808_v39 = vadd.f32 %v12454_v63, %v887_v37  ;;  %406 = vst.msk [vmem:[#allocation2 + $0x80] sm:$0xff] %vm18382_vm1, %v12828_v47 }
 0x110   :  { %v486_v32 = vpop.permute.xlu2 %485  ;;  %1079 = vrot.lane.b32.xlu1 %v12706_v61, %s12084_s25  ;;  %427 = vst.msk [vmem:[#allocation2 + $0x128] sm:$0xff] %vm18382_vm1, %v12805_v38 }
 0x111   :  { %610 = vst.msk [vmem:[#allocation3 + $0x20] sm:$0xff] %vm18382_vm1, %v486_v32  ;;  %v1102_v34 = vpop.permute.xlu0 %1101 }
 0x112   :  { %v482_v35 = vpop.permute.xlu1 %481  ;;  %1208 = vst.msk [vmem:[#allocation3 + $0x210] sm:$0xff] %vm18382_vm1, %v1102_v34 }
 0x113   :  { %608 = vst.msk [vmem:[#allocation3 + $0x10] sm:$0xff] %vm18382_vm1, %v482_v35  ;;  %v953_v40 = vpop.f32.mrf.mxu3 }
 0x114   :  { %985 = vst.msk [vmem:[#allocation2 + $0x1d8] sm:$0xff] %vm18382_vm1, %v12808_v39  ;;  %v12820_v42 = vadd.f32 %v12454_v63, %v953_v40  ;;  %v311_v54 = vpop.f32.mrf.mxu0 }
 0x115   :  { %v374_v46 = vpop.f32.mrf.mxu2  ;;  %v12852_v56 = vadd.f32 %v12454_v63, %v311_v54 }
 0x116   :  { %1123 = vrot.lane.b32.xlu2 %v12716_v1, %s12084_s25  ;;  %1007 = vst.msk [vmem:[#allocation2 + $0x288] sm:$0xff] %vm18382_vm1, %v12820_v42  ;;  %v12831_v48 = vadd.f32 %v12454_v63, %v374_v46  ;;  %v890_v49 = vpop.f32.mrf.mxu1 }
 0x117   :  { %1125 = vrot.lane.b32.xlu0 %v945_v8, %s12084_s25  ;;  %v12844_v51 = vadd.f32 %v12454_v63, %v890_v49  ;;  %407 = vst.msk [vmem:[#allocation2 + $0x88] sm:$0xff] %vm18382_vm1, %v12852_v56 }
 0x118   :  { %v1064_v41 = vpop.permute.xlu2 %1063  ;;  %545 = vrot.lane.b32.xlu1 %v12722_v4, %s12084_s25  ;;  %428 = vst.msk [vmem:[#allocation2 + $0x130] sm:$0xff] %vm18382_vm1, %v12831_v48 }
 0x119   :  { %1189 = vst.msk [vmem:[#allocation3 + $0x178] sm:$0xff] %vm18382_vm1, %v1064_v41  ;;  %v1060_v43 = vpop.permute.xlu0 %1059 }
 0x11a   :  { %v1104_v44 = vpop.permute.xlu1 %1103  ;;  %1187 = vst.msk [vmem:[#allocation3 + $0x168] sm:$0xff] %vm18382_vm1, %v1060_v43 }
 0x11b   :  { %1209 = vst.msk [vmem:[#allocation3 + $0x218] sm:$0xff] %vm18382_vm1, %v1104_v44  ;;  %v956_v59 = vpop.f32.mrf.mxu3 }
 0x11c   :  { %986 = vst.msk [vmem:[#allocation2 + $0x1e0] sm:$0xff] %vm18382_vm1, %v12844_v51  ;;  %v12872_v0 = vadd.f32 %v12454_v63, %v956_v59  ;;  %v314_v2 = vpop.f32.mrf.mxu0 }
 0x11d   :  { %v377_v55 = vpop.f32.mrf.mxu2  ;;  %v12881_v4 = vadd.f32 %v12454_v63, %v314_v2 }
 0x11e   :  { %1081 = vrot.lane.b32.xlu2 %v12725_v5, %s12084_s25  ;;  %v12855_v57 = vadd.f32 %v12454_v63, %v377_v55  ;;  %v893_v58 = vpop.f32.mrf.mxu1  ;;  %1008 = vst.msk [vmem:[#allocation2 + $0x290] sm:$0xff] %vm18382_vm1, %v12872_v0 }
 0x11f   :  { %1083 = vrot.lane.b32.xlu0 %v12750_v16, %s12084_s25  ;;  %v12868_v61 = vadd.f32 %v12454_v63, %v893_v58  ;;  %408 = vst.msk [vmem:[#allocation2 + $0x90] sm:$0xff] %vm18382_vm1, %v12881_v4 }
 0x120   :  { %v530_v50 = vpop.permute.xlu2 %529  ;;  %503 = vrot.lane.b32.xlu1 %v12738_v11, %s12084_s25  ;;  %429 = vst.msk [vmem:[#allocation2 + $0x138] sm:$0xff] %vm18382_vm1, %v12855_v57 }
 0x121   :  { %632 = vst.msk [vmem:[#allocation3 + $0xd0] sm:$0xff] %vm18382_vm1, %v530_v50  ;;  %v526_v52 = vpop.permute.xlu0 %525 }
 0x122   :  { %v484_v53 = vpop.permute.xlu1 %483  ;;  %630 = vst.msk [vmem:[#allocation3 + $0xc0] sm:$0xff] %vm18382_vm1, %v526_v52 }
 0x123   :  { %609 = vst.msk [vmem:[#allocation3 + $0x18] sm:$0xff] %vm18382_vm1, %v484_v53 }
 0x124   :  { %987 = vst.msk [vmem:[#allocation2 + $0x1e8] sm:$0xff] %vm18382_vm1, %v12868_v61  ;;  %v317_v11 = vpop.f32.mrf.mxu0 }
 0x125   :  { %v380_v3 = vpop.f32.mrf.mxu2  ;;  %v12905_v13 = vadd.f32 %v12454_v63, %v317_v11 }
 0x126   :  { %547 = vrot.lane.b32.xlu2 %v12746_v14, %s12084_s25  ;;  %v12884_v5 = vadd.f32 %v12454_v63, %v380_v3  ;;  %v896_v6 = vpop.f32.mrf.mxu1 }
 0x127   :  { %549 = vrot.lane.b32.xlu0 %v12773_v24, %s12084_s25  ;;  %v12897_v8 = vadd.f32 %v12454_v63, %v896_v6  ;;  %409 = vst.msk [vmem:[#allocation2 + $0x98] sm:$0xff] %vm18382_vm1, %v12905_v13  ;;  %v959_v24 = vpop.f32.mrf.mxu3 }
 0x128   :  { %v488_v60 = vpop.permute.xlu2 %487  ;;  %1127 = vrot.lane.b32.xlu1 %v12759_v21, %s12084_s25  ;;  %430 = vst.msk [vmem:[#allocation2 + $0x140] sm:$0xff] %vm18382_vm1, %v12884_v5  ;;  %v12939_v26 = vadd.f32 %v12454_v63, %v959_v24  ;;  %v13050_v24 = vld [vmem:[%s18363_s5 + $0x18] sm:$0xff] }
 0x129   :  { %611 = vst.msk [vmem:[#allocation3 + $0x28] sm:$0xff] %vm18382_vm1, %v488_v60  ;;  %v1108_v62 = vpop.permute.xlu0 %1107 }
 0x12a   :  { %v1062_v1 = vpop.permute.xlu1 %1061  ;;  %1211 = vst.msk [vmem:[#allocation3 + $0x228] sm:$0xff] %vm18382_vm1, %v1108_v62 }
 0x12b   :  { %1188 = vst.msk [vmem:[#allocation3 + $0x170] sm:$0xff] %vm18382_vm1, %v1062_v1 }
 0x12c   :  { %988 = vst.msk [vmem:[#allocation2 + $0x1f0] sm:$0xff] %vm18382_vm1, %v12897_v8  ;;  %v320_v20 = vpop.f32.mrf.mxu0 }
 0x12d   :  { %v383_v12 = vpop.f32.mrf.mxu2  ;;  %1009 = vst.msk [vmem:[#allocation2 + $0x298] sm:$0xff] %vm18382_vm1, %v12939_v26 }
 0x12e   :  { %505 = vrot.lane.b32.xlu2 %v12764_v22, %s12084_s25  ;;  %v12908_v14 = vadd.f32 %v12454_v63, %v383_v12  ;;  %v899_v15 = vpop.f32.mrf.mxu1  ;;  %v12926_v22 = vadd.f32 %v12454_v63, %v320_v20 }
 0x12f   :  { %507 = vrot.lane.b32.xlu0 %v12786_v31, %s12084_s25  ;;  %v900_v17 = vadd.f32 %v12454_v63, %v899_v15  ;;  %v962_v32 = vpop.f32.mrf.mxu3 }
 0x130   :  { %v1112_v7 = vpop.permute.xlu2 %1111  ;;  %1085 = vrot.lane.b32.xlu1 %v12781_v30, %s12084_s25  ;;  %431 = vst.msk [vmem:[#allocation2 + $0x148] sm:$0xff] %vm18382_vm1, %v12908_v14  ;;  %v963_v35 = vadd.f32 %v12454_v63, %v962_v32 }
 0x131   :  { %1213 = vst.msk [vmem:[#allocation3 + $0x238] sm:$0xff] %vm18382_vm1, %v1112_v7  ;;  %v1066_v9 = vpop.permute.xlu0 %1065 }
 0x132   :  { %v528_v10 = vpop.permute.xlu1 %527  ;;  %1190 = vst.msk [vmem:[#allocation3 + $0x180] sm:$0xff] %vm18382_vm1, %v1066_v9 }
 0x133   :  { %631 = vst.msk [vmem:[#allocation3 + $0xc8] sm:$0xff] %vm18382_vm1, %v528_v10 }
 0x134   :  { %989 = vst.msk [vmem:[#allocation2 + $0x1f8] sm:$0xff] %vm18382_vm1, %v900_v17  ;;  %v323_v29 = vpop.f32.mrf.mxu0 }
 0x135   :  { %v386_v21 = vpop.f32.mrf.mxu2  ;;  %410 = vst.msk [vmem:[#allocation2 + $0xa0] sm:$0xff] %vm18382_vm1, %v12926_v22  ;;  %v324_v30 = vadd.f32 %v12454_v63, %v323_v29 }
 0x136   :  { %1129 = vrot.lane.b32.xlu2 %v12797_v33, %s12084_s25  ;;  %v387_v23 = vadd.f32 %v12454_v63, %v386_v21  ;;  %v902_v31 = vpop.f32.mrf.mxu1  ;;  %1010 = vst.msk [vmem:[#allocation2 + $0x2a0] sm:$0xff] %vm18382_vm1, %v963_v35  ;;  %v13035_v21 = vld [vmem:[%s18363_s5] sm:$0xff] }
 0x137   :  { %1131 = vrot.lane.b32.xlu0 %v12820_v42, %s12084_s25  ;;  %v903_v33 = vadd.f32 %v12454_v63, %v902_v31  ;;  %411 = vst.msk [vmem:[#allocation2 + $0xa8] sm:$0xff] %vm18382_vm1, %v324_v30 }
 0x138   :  { %v1070_v16 = vpop.permute.xlu2 %1069  ;;  %551 = vrot.lane.b32.xlu1 %v12805_v38, %s12084_s25  ;;  %433 = vst.msk [vmem:[#allocation2 + $0x150] sm:$0xf] %vm432_vm2, %v387_v23  ;;  %v965_v38 = vpop.f32.mrf.mxu3 }
 0x139   :  { %1192 = vst.msk [vmem:[#allocation3 + $0x190] sm:$0xff] %vm18382_vm1, %v1070_v16  ;;  %v532_v18 = vpop.permute.xlu0 %531 }
 0x13a   :  { %v1110_v19 = vpop.permute.xlu1 %1109  ;;  %633 = vst.msk [vmem:[#allocation3 + $0xd8] sm:$0xff] %vm18382_vm1, %v532_v18 }
 0x13b   :  { %1212 = vst.msk [vmem:[#allocation3 + $0x230] sm:$0xff] %vm18382_vm1, %v1110_v19 }
 0x13c   :  { %990 = vst.msk [vmem:[#allocation2 + $0x200] sm:$0xff] %vm18382_vm1, %v903_v33 }
 0x13e   :  { %1087 = vrot.lane.b32.xlu2 %v12808_v39, %s12084_s25  ;;  %v966_v39 = vadd.f32 %v12454_v63, %v965_v38 }
 0x13f   :  { %1089 = vrot.lane.b32.xlu0 %v12844_v51, %s12084_s25 }
 0x140   :  { %v536_v25 = vpop.permute.xlu2 %535  ;;  %509 = vrot.lane.b32.xlu1 %v12828_v47, %s12084_s25  ;;  %1011 = vst.msk [vmem:[#allocation2 + $0x2a8] sm:$0xf] %vm432_vm2, %v966_v39 }
 0x141   :  { %635 = vst.msk [vmem:[#allocation3 + $0xe8] sm:$0xff] %vm18382_vm1, %v536_v25  ;;  %v490_v27 = vpop.permute.xlu0 %489  ;;  %v13055_v25 = vld [vmem:[%s18364_s6] sm:$0x1] }
 0x142   :  { %v1068_v28 = vpop.permute.xlu1 %1067  ;;  %612 = vst.msk [vmem:[#allocation3 + $0x30] sm:$0xff] %vm18382_vm1, %v490_v27 }
 0x143   :  { %1191 = vst.msk [vmem:[#allocation3 + $0x188] sm:$0xff] %vm18382_vm1, %v1068_v28 }
 0x146   :  { %553 = vrot.lane.b32.xlu2 %v12831_v48, %s12084_s25 }
 0x147   :  { %555 = vrot.lane.b32.xlu0 %v12855_v57, %s12084_s25 }
 0x148   :  { %v494_v34 = vpop.permute.xlu2 %493  ;;  %1133 = vrot.lane.b32.xlu1 %v12872_v0, %s12084_s25 }
 0x149   :  { %614 = vst.msk [vmem:[#allocation3 + $0x40] sm:$0xff] %vm18382_vm1, %v494_v34  ;;  %v1114_v36 = vpop.permute.xlu0 %1113 }
 0x14a   :  { %v534_v37 = vpop.permute.xlu1 %533  ;;  %1214 = vst.msk [vmem:[#allocation3 + $0x240] sm:$0xff] %vm18382_vm1, %v1114_v36 }
 0x14b   :  { %634 = vst.msk [vmem:[#allocation3 + $0xe0] sm:$0xff] %vm18382_vm1, %v534_v37 }
 0x14e   :  { %511 = vrot.lane.b32.xlu2 %v12852_v56, %s12084_s25 }
 0x14f   :  { %513 = vrot.lane.b32.xlu0 %v12881_v4, %s12084_s25 }
 0x150   :  { %v1118_v40 = vpop.permute.xlu2 %1117  ;;  %1091 = vrot.lane.b32.xlu1 %v12868_v61, %s12084_s25 }
 0x151   :  { %1216 = vst.msk [vmem:[#allocation3 + $0x250] sm:$0xff] %vm18382_vm1, %v1118_v40  ;;  %v1072_v41 = vpop.permute.xlu0 %1071 }
 0x152   :  { %v492_v42 = vpop.permute.xlu1 %491  ;;  %1193 = vst.msk [vmem:[#allocation3 + $0x198] sm:$0xff] %vm18382_vm1, %v1072_v41 }
 0x153   :  { %613 = vst.msk [vmem:[#allocation3 + $0x38] sm:$0xff] %vm18382_vm1, %v492_v42 }
 0x156   :  { %1093 = vrot.lane.b32.xlu2 %v12897_v8, %s12084_s25 }
 0x157   :  { %1095 = vrot.lane.b32.xlu0 %v900_v17, %s12084_s25 }
 0x158   :  { %v1076_v63 = vpop.permute.xlu2 %1075  ;;  %557 = vrot.lane.b32.xlu1 %v12884_v5, %s12084_s25 }
 0x159   :  { %1195 = vst.msk [vmem:[#allocation3 + $0x1a8] sm:$0xff] %vm18382_vm1, %v1076_v63  ;;  %v538_v43 = vpop.permute.xlu0 %537 }
 0x15a   :  { %v1116_v44 = vpop.permute.xlu1 %1115  ;;  %636 = vst.msk [vmem:[#allocation3 + $0xf0] sm:$0xff] %vm18382_vm1, %v538_v43 }
 0x15b   :  { %1215 = vst.msk [vmem:[#allocation3 + $0x248] sm:$0xff] %vm18382_vm1, %v1116_v44 }
 0x15e   :  { %559 = vrot.lane.b32.xlu2 %v12908_v14, %s12084_s25 }
 0x15f   :  { %561 = vrot.lane.b32.xlu0 %v387_v23, %s12084_s25  ;;  %v13045_v23 = vld [vmem:[%s18363_s5 + $0x10] sm:$0xff] }
 0x160   :  { %v542_v45 = vpop.permute.xlu2 %541  ;;  %515 = vrot.lane.b32.xlu1 %v12905_v13, %s12084_s25 }
 0x161   :  { %638 = vst.msk [vmem:[#allocation3 + $0x100] sm:$0xff] %vm18382_vm1, %v542_v45  ;;  %v496_v46 = vpop.permute.xlu0 %495 }
 0x162   :  { %v1074_v47 = vpop.permute.xlu1 %1073  ;;  %615 = vst.msk [vmem:[#allocation3 + $0x48] sm:$0xff] %vm18382_vm1, %v496_v46 }
 0x163   :  { %1194 = vst.msk [vmem:[#allocation3 + $0x1a0] sm:$0xff] %vm18382_vm1, %v1074_v47 }
 0x166   :  { %517 = vrot.lane.b32.xlu2 %v12926_v22, %s12084_s25  ;;  %v13040_v22 = vld [vmem:[%s18363_s5 + $0x8] sm:$0xff] }
 0x167   :  { %519 = vrot.lane.b32.xlu0 %v324_v30, %s12084_s25 }
 0x168   :  { %v500_v48 = vpop.permute.xlu2 %499  ;;  %1097 = vrot.lane.b32.xlu1 %v903_v33, %s12084_s25 }
 0x169   :  { %617 = vst.msk [vmem:[#allocation3 + $0x58] sm:$0xff] %vm18382_vm1, %v500_v48  ;;  %v1120_v49 = vpop.permute.xlu0 %1119 }
 0x16a   :  { %v540_v50 = vpop.permute.xlu1 %539  ;;  %1217 = vst.msk [vmem:[#allocation3 + $0x258] sm:$0xff] %vm18382_vm1, %v1120_v49 }
 0x16b   :  { %637 = vst.msk [vmem:[#allocation3 + $0xf8] sm:$0xff] %vm18382_vm1, %v540_v50 }
 0x16e   :  { %1135 = vrot.lane.b32.xlu2 %v12939_v26, %s12084_s25 }
 0x16f   :  { %1137 = vrot.lane.b32.xlu0 %v963_v35, %s12084_s25  ;;  %v13066_v35 = vmov 0.0  }
 0x170   :  { %v1124_v51 = vpop.permute.xlu2 %1123  ;;  %1139 = vrot.lane.b32.xlu1 %v966_v39, %s12084_s25 }
 0x171   :  { %1219 = vst.msk [vmem:[#allocation3 + $0x268] sm:$0xff] %vm18382_vm1, %v1124_v51  ;;  %v1078_v52 = vpop.permute.xlu0 %1077 }
 0x172   :  { %v498_v53 = vpop.permute.xlu1 %497  ;;  %1196 = vst.msk [vmem:[#allocation3 + $0x1b0] sm:$0xff] %vm18382_vm1, %v1078_v52 }
 0x173   :  { %616 = vst.msk [vmem:[#allocation3 + $0x50] sm:$0xff] %vm18382_vm1, %v498_v53 }
 0x178   :  { %v1082_v54 = vpop.permute.xlu2 %1081 }
 0x179   :  { %1198 = vst.msk [vmem:[#allocation3 + $0x1c0] sm:$0xff] %vm18382_vm1, %v1082_v54  ;;  %v544_v55 = vpop.permute.xlu0 %543 }
 0x17a   :  { %v1122_v56 = vpop.permute.xlu1 %1121  ;;  %639 = vst.msk [vmem:[#allocation3 + $0x108] sm:$0xff] %vm18382_vm1, %v544_v55 }
 0x17b   :  { %1218 = vst.msk [vmem:[#allocation3 + $0x260] sm:$0xff] %vm18382_vm1, %v1122_v56 }
 0x180   :  { %v548_v57 = vpop.permute.xlu2 %547 }
 0x181   :  { %641 = vst.msk [vmem:[#allocation3 + $0x118] sm:$0xff] %vm18382_vm1, %v548_v57  ;;  %v502_v58 = vpop.permute.xlu0 %501 }
 0x182   :  { %v1080_v59 = vpop.permute.xlu1 %1079  ;;  %618 = vst.msk [vmem:[#allocation3 + $0x60] sm:$0xff] %vm18382_vm1, %v502_v58 }
 0x183   :  { %1197 = vst.msk [vmem:[#allocation3 + $0x1b8] sm:$0xff] %vm18382_vm1, %v1080_v59 }
 0x188   :  { %v506_v60 = vpop.permute.xlu2 %505 }
 0x189   :  { %620 = vst.msk [vmem:[#allocation3 + $0x70] sm:$0xff] %vm18382_vm1, %v506_v60  ;;  %v1126_v61 = vpop.permute.xlu0 %1125 }
 0x18a   :  { %v546_v62 = vpop.permute.xlu1 %545  ;;  %1220 = vst.msk [vmem:[#allocation3 + $0x270] sm:$0xff] %vm18382_vm1, %v1126_v61 }
 0x18b   :  { %640 = vst.msk [vmem:[#allocation3 + $0x110] sm:$0xff] %vm18382_vm1, %v546_v62 }
 0x190   :  { %v1130_v0 = vpop.permute.xlu2 %1129 }
 0x191   :  { %1222 = vst.msk [vmem:[#allocation3 + $0x280] sm:$0xff] %vm18382_vm1, %v1130_v0  ;;  %v1084_v1 = vpop.permute.xlu0 %1083 }
 0x192   :  { %v504_v2 = vpop.permute.xlu1 %503  ;;  %1199 = vst.msk [vmem:[#allocation3 + $0x1c8] sm:$0xff] %vm18382_vm1, %v1084_v1 }
 0x193   :  { %619 = vst.msk [vmem:[#allocation3 + $0x68] sm:$0xff] %vm18382_vm1, %v504_v2 }
 0x198   :  { %v1088_v3 = vpop.permute.xlu2 %1087 }
 0x199   :  { %1201 = vst.msk [vmem:[#allocation3 + $0x1d8] sm:$0xff] %vm18382_vm1, %v1088_v3  ;;  %v550_v4 = vpop.permute.xlu0 %549 }
 0x19a   :  { %v1128_v5 = vpop.permute.xlu1 %1127  ;;  %642 = vst.msk [vmem:[#allocation3 + $0x120] sm:$0xff] %vm18382_vm1, %v550_v4 }
 0x19b   :  { %1221 = vst.msk [vmem:[#allocation3 + $0x278] sm:$0xff] %vm18382_vm1, %v1128_v5 }
 0x1a0   :  { %v554_v6 = vpop.permute.xlu2 %553 }
 0x1a1   :  { %644 = vst.msk [vmem:[#allocation3 + $0x130] sm:$0xff] %vm18382_vm1, %v554_v6  ;;  %v508_v7 = vpop.permute.xlu0 %507 }
 0x1a2   :  { %v1086_v8 = vpop.permute.xlu1 %1085  ;;  %621 = vst.msk [vmem:[#allocation3 + $0x78] sm:$0xff] %vm18382_vm1, %v508_v7 }
 0x1a3   :  { %1200 = vst.msk [vmem:[#allocation3 + $0x1d0] sm:$0xff] %vm18382_vm1, %v1086_v8 }
 0x1a8   :  { %v512_v9 = vpop.permute.xlu2 %511 }
 0x1a9   :  { %623 = vst.msk [vmem:[#allocation3 + $0x88] sm:$0xff] %vm18382_vm1, %v512_v9  ;;  %v1132_v10 = vpop.permute.xlu0 %1131 }
 0x1aa   :  { %v552_v11 = vpop.permute.xlu1 %551  ;;  %1223 = vst.msk [vmem:[#allocation3 + $0x288] sm:$0xff] %vm18382_vm1, %v1132_v10 }
 0x1ab   :  { %643 = vst.msk [vmem:[#allocation3 + $0x128] sm:$0xff] %vm18382_vm1, %v552_v11 }
 0x1b0   :  { %v1094_v12 = vpop.permute.xlu2 %1093 }
 0x1b1   :  { %1204 = vst.msk [vmem:[#allocation3 + $0x1f0] sm:$0xff] %vm18382_vm1, %v1094_v12  ;;  %v1090_v13 = vpop.permute.xlu0 %1089 }
 0x1b2   :  { %v510_v14 = vpop.permute.xlu1 %509  ;;  %1202 = vst.msk [vmem:[#allocation3 + $0x1e0] sm:$0xff] %vm18382_vm1, %v1090_v13 }
 0x1b3   :  { %622 = vst.msk [vmem:[#allocation3 + $0x80] sm:$0xff] %vm18382_vm1, %v510_v14 }
 0x1b8   :  { %v560_v15 = vpop.permute.xlu2 %559 }
 0x1b9   :  { %647 = vst.msk [vmem:[#allocation3 + $0x148] sm:$0xff] %vm18382_vm1, %v560_v15  ;;  %v556_v16 = vpop.permute.xlu0 %555 }
 0x1ba   :  { %v1134_v17 = vpop.permute.xlu1 %1133  ;;  %645 = vst.msk [vmem:[#allocation3 + $0x138] sm:$0xff] %vm18382_vm1, %v556_v16 }
 0x1bb   :  { %1224 = vst.msk [vmem:[#allocation3 + $0x290] sm:$0xff] %vm18382_vm1, %v1134_v17 }
 0x1c0   :  { %v518_v18 = vpop.permute.xlu2 %517 }
 0x1c1   :  { %626 = vst.msk [vmem:[#allocation3 + $0xa0] sm:$0xff] %vm18382_vm1, %v518_v18  ;;  %v514_v19 = vpop.permute.xlu0 %513 }
 0x1c2   :  { %v1092_v20 = vpop.permute.xlu1 %1091  ;;  %624 = vst.msk [vmem:[#allocation3 + $0x90] sm:$0xff] %vm18382_vm1, %v514_v19 }
 0x1c3   :  { %1203 = vst.msk [vmem:[#allocation3 + $0x1e8] sm:$0xff] %vm18382_vm1, %v1092_v20 }
 0x1c8   :  { %v1136_v26 = vpop.permute.xlu2 %1135 }
 0x1c9   :  { %1225 = vst.msk [vmem:[#allocation3 + $0x298] sm:$0xff] %vm18382_vm1, %v1136_v26  ;;  %v1096_v27 = vpop.permute.xlu0 %1095 }
 0x1ca   :  { %v558_v28 = vpop.permute.xlu1 %557  ;;  %1205 = vst.msk [vmem:[#allocation3 + $0x1f8] sm:$0xff] %vm18382_vm1, %v1096_v27 }
 0x1cb   :  { %646 = vst.msk [vmem:[#allocation3 + $0x140] sm:$0xff] %vm18382_vm1, %v558_v28 }
 0x1d1   :  { %v562_v29 = vpop.permute.xlu0 %561 }
 0x1d2   :  { %v516_v30 = vpop.permute.xlu1 %515  ;;  %648 = vst.msk [vmem:[#allocation3 + $0x150] sm:$0xf] %vm432_vm2, %v562_v29 }
 0x1d3   :  { %625 = vst.msk [vmem:[#allocation3 + $0x98] sm:$0xff] %vm18382_vm1, %v516_v30 }
 0x1d9   :  { %v520_v31 = vpop.permute.xlu0 %519 }
 0x1da   :  { %v1098_v32 = vpop.permute.xlu1 %1097  ;;  %627 = vst.msk [vmem:[#allocation3 + $0xa8] sm:$0xff] %vm18382_vm1, %v520_v31 }
 0x1db   :  { %1206 = vst.msk [vmem:[#allocation3 + $0x200] sm:$0xff] %vm18382_vm1, %v1098_v32 }
 0x1e1   :  { %v1138_v33 = vpop.permute.xlu0 %1137 }
 0x1e2   :  { %v1140_v34 = vpop.permute.xlu1 %1139  ;;  %1226 = vst.msk [vmem:[#allocation3 + $0x2a0] sm:$0xff] %vm18382_vm1, %v1138_v33 }
 0x1e3   :  { %1227 = vst.msk [vmem:[#allocation3 + $0x2a8] sm:$0xf] %vm432_vm2, %v1140_v34 }
 0x1e4 LB: > { %1266 = vmatpush.msra.mxu0 %v13050_v24  ;;  %vm1250_vm3 = vcmask 261120   ;;  %v1248_v36 = vperm.slane %v13055_v25, 0  ;;  %s12085_s29 = smov 48   ;;  %s12086_s0 = smov 80   ;;  %s11978_s28 = sphi %s13068_s28, %s1238_s28   ;;  %v11974_v35 = vphi %v13066_v35, %v1477_v35  }
 0x1e5   : > { %s12087_s30 = smov 96   ;;  %s1240_s23 = scalar_lea.vmem [#allocation2], %s11978_s28 }
 0x1e6   : > { %1267 = vmatpush.msra.mxu0 %v13045_v23  ;;  %v13084_v40 = vld [vmem:[%s1240_s23 + $0x158] sm:$0x1]  ;;  %v13087_v63 = vld [vmem:[%s1240_s23] sm:$0x1]  ;;  %s1243_s20 = ssub.s32 339, %s11978_s28  ;;  %s12088_s1 = smov 32  }
 0x1e7   : > { %s1244_s21 = scalar_lea.vmem [#allocation3], %s1243_s20  ;;  %s12089_s22 = smov 16  }
 0x1e8   : > { %1268 = vmatpush.msra.mxu0 %v13040_v22  ;;  %s12090_s2 = smov 112   ;;  %s1453_s24 = scalar_lea.vmem [#allocation6], %s11978_s28 }
 0x1e9   : > { %s1465_s3 = scalar_lea.vmem [#allocation7], %s1243_s20  ;;  %s1238_s28 = sadd.s32 1, %s11978_s28  }
 0x1ea   : > { %1269 = vmatpush.msra.mxu0 %v13035_v21  ;;  %v13093_v59 = vld [vmem:[%s1244_s21] sm:$0x1]  ;;  %v13100_v9 = vld [vmem:[%s1244_s21 + $0x158] sm:$0x1]  ;;  %p1235_p0 = scmp.ge.s32.totalorder %s1238_s28, 340  }
 0x1eb   : > { %9404 = vmatmul.msk.f32.vlgmr.msra.gmra.mxu0 %vm1250_vm3, %v11974_v35  ;;  %s12091_s26 = smov (%p1235_p0), 16  }
 0x268   : > { %v1271_v37 = vpop.f32.mrf.mxu0 }
 0x269   : > { %v1272_v38 = vadd.f32 %v1271_v37, %v1248_v36 }
 0x26b   : > { %1407 = vrot.lane.b32.xlu2 %v1272_v38, %s12085_s29  ;;  %1361 = vrot.lane.b32.xlu0 %v1272_v38, %s12086_s0  ;;  %v1275_v39 = vrot.slane %v1272_v38, 1  ;;  %v1278_v43 = vadd.f32 %v1272_v38, %v13087_v63 }
 0x26d   : > { %1320 = vrot.lane.b32.xlu1 %v1275_v39, %s12087_s30  ;;  %v1279_v41 = vadd.f32 %v1275_v39, %v13084_v40  ;;  %v9405_v44 = vmul.f32 -1.442695, %v1278_v43 }
 0x26f   : > { %v9406_v42 = vmul.f32 -1.442695, %v1279_v41 }
 0x271   : > { %11782 = vpow2.f32 %v9406_v42 }
 0x272   : > { %11784 = vpow2.f32 %v9405_v44 }
 0x273   : > { %1409 = vrot.lane.b32.xlu2 %v1275_v39, %s12085_s29  ;;  %1363 = vrot.lane.b32.xlu0 %v1275_v39, %s12086_s0  ;;  %s18394_s29 = sld [smem:[#allocation19_spill]] (%p1235_p0) }
 0x275   : > { %1318 = vrot.lane.b32.xlu1 %v1272_v38, %s12087_s30 }
 0x277   : > { %v11783_v45 = vpop.eup %11782 }
 0x278   : > { %v1287_v46 = vadd.f32 1.0, %v11783_v45  ;;  %v11785_v47 = vpop.eup %11784 }
 0x279   : > { %v1286_v48 = vadd.f32 1.0, %v11785_v47  ;;  %v1350_v47 = vrot.slane %v11974_v35, 1 }
 0x27a   : > { %11786 = vrcp.f32 %v1287_v46  ;;  %v1314_v57 = vand.u32 2147483648, %v1287_v46  ;;  %vm1308_vm5 = vweird.f32 %v1287_v46  ;;  %v1312_v58 = vand.u32 2147483647, %v1287_v46 }
 0x27b   : > { %11788 = vrcp.f32 %v1286_v48  ;;  %v1299_v7 = vand.u32 2147483648, %v1286_v48  ;;  %vm1293_vm9 = vweird.f32 %v1286_v48  ;;  %v1297_v8 = vand.u32 2147483647, %v1286_v48 }
 0x27c   : > { %v1315_v0 = vor.u32 1.1754944e-38, %v1314_v57  ;;  %vm1313_vm7 = vcmp.eq.f32.partialorder %v1312_v58, 8.507059e+37 }
 0x27d   : > { %v1300_v12 = vor.u32 1.1754944e-38, %v1299_v7  ;;  %vm1298_vm11 = vcmp.eq.f32.partialorder %v1297_v8, 8.507059e+37 }
 0x280   : > { %v11787_v49 = vpop.eup %11786 }
 0x281   : > { %v1304_v50 = vmul.f32 %v11787_v49, %v1287_v46  ;;  %v11789_v52 = vpop.eup %11788  ;;  %vm1309_vm4 = vweird.f32 %v11787_v49 }
 0x282   : > { %v1289_v54 = vmul.f32 %v11789_v52, %v1286_v48  ;;  %vm1310_vm6 = vmor %vm1308_vm5, %vm1309_vm4  ;;  %vm1294_vm8 = vweird.f32 %v11789_v52 }
 0x283   : > { %v1305_v51 = vsub.f32 1.0, %v1304_v50  ;;  %vm1295_vm10 = vmor %vm1293_vm9, %vm1294_vm8  ;;  %vm1469_vm8 = vcmask 1041409   ;;  %vm1454_vm9 = vcmask 122880  }
 0x284   : > { %v1290_v56 = vsub.f32 1.0, %v1289_v54 }
 0x285   : > { %v1306_v53 = vmul.f32 %v11787_v49, %v1305_v51 }
 0x286   : > { %v1291_v61 = vmul.f32 %v11789_v52, %v1290_v56 }
 0x287   : > { %v1307_v55 = vadd.f32 %v11787_v49, %v1306_v53 }
 0x288   : > { %v1292_v6 = vadd.f32 %v11789_v52, %v1291_v61 }
 0x289   : > { %v1311_v60 = vsel %vm1310_vm6, %v11787_v49, %v1307_v55 }
 0x28a   : > { %v13096_v3 = vsel %vm1313_vm7, %v1315_v0, %v1311_v60  ;;  %v1296_v10 = vsel %vm1295_vm10, %v11789_v52, %v1292_v6 }
 0x28b   : > { %v13103_v14 = vsel %vm1298_vm11, %v1300_v12, %v1296_v10  ;;  %v1339_v10 = vsub.f32 1.0, %v13096_v3 }
 0x2c5   : > { %v1408_v36 = vpop.permute.xlu2 %1407 }
 0x2cd   : > { %v1410_v51 = vpop.permute.xlu2 %1409 }
 0x2dd   : > { %v1362_v62 = vpop.permute.xlu0 %1361 }
 0x2de   : > { %v1367_v1 = vadd.f32 %v1362_v62, %v13093_v59 }
 0x2df   : > { %v1321_v2 = vpop.permute.xlu1 %1320 }
 0x2e0   : > { %v9407_v4 = vmul.f32 -1.442695, %v1367_v1  ;;  %v1325_v5 = vmul.f32 %v1321_v2, %v13096_v3 }
 0x2e2   : > { %11790 = vpow2.f32 %v9407_v4  ;;  %1330 = vrot.lane.b32.xlu0 %v1325_v5, %s12088_s1 }
 0x2e5   : > { %v1364_v11 = vpop.permute.xlu0 %1363 }
 0x2e6   : > { %v1368_v13 = vadd.f32 %v1364_v11, %v13100_v9 }
 0x2e7   : > { %v1319_v15 = vpop.permute.xlu1 %1318 }
 0x2e8   : > { %v11791_v16 = vpop.eup %11790  ;;  %v9408_v17 = vmul.f32 -1.442695, %v1368_v13  ;;  %v1324_v18 = vmul.f32 %v1319_v15, %v13103_v14  ;;  %v1338_v15 = vsub.f32 1.0, %v13103_v14 }
 0x2e9   : > { %v1375_v19 = vadd.f32 1.0, %v11791_v16 }
 0x2ea   : > { %11792 = vpow2.f32 %v9408_v17  ;;  %1328 = vrot.lane.b32.xlu1 %v1324_v18, %s12088_s1 }
 0x2eb   : > { %11794 = vrcp.f32 %v1375_v19  ;;  %v1388_v30 = vand.u32 2147483648, %v1375_v19  ;;  %v1386_v32 = vand.u32 2147483647, %v1375_v19  ;;  %vm1382_vm13 = vweird.f32 %v1375_v19 }
 0x2ed   : > { %v1389_v37 = vor.u32 1.1754944e-38, %v1388_v30  ;;  %vm1387_vm15 = vcmp.eq.f32.partialorder %v1386_v32, 8.507059e+37 }
 0x2f0   : > { %v11793_v20 = vpop.eup %11792 }
 0x2f1   : > { %v11795_v26 = vpop.eup %11794  ;;  %v1376_v27 = vadd.f32 1.0, %v11793_v20 }
 0x2f2   : > { %v1378_v28 = vmul.f32 %v11795_v26, %v1375_v19  ;;  %vm1383_vm12 = vweird.f32 %v11795_v26 }
 0x2f3   : > { %11796 = vrcp.f32 %v1376_v27  ;;  %vm1384_vm14 = vmor %vm1382_vm13, %vm1383_vm12  ;;  %v1403_v44 = vand.u32 2147483648, %v1376_v27  ;;  %v1401_v46 = vand.u32 2147483647, %v1376_v27  ;;  %vm1397_vm5 = vweird.f32 %v1376_v27 }
 0x2f4   : > { %v1379_v29 = vsub.f32 1.0, %v1378_v28 }
 0x2f5   : > { %v1404_v49 = vor.u32 1.1754944e-38, %v1403_v44  ;;  %vm1402_vm7 = vcmp.eq.f32.partialorder %v1401_v46, 8.507059e+37 }
 0x2f6   : > { %v1380_v31 = vmul.f32 %v11795_v26, %v1379_v29 }
 0x2f8   : > { %v1381_v33 = vadd.f32 %v11795_v26, %v1380_v31 }
 0x2f9   : > { %v11797_v34 = vpop.eup %11796 }
 0x2fa   : > { %v1393_v38 = vmul.f32 %v11797_v34, %v1376_v27  ;;  %v1385_v39 = vsel %vm1384_vm14, %v11795_v26, %v1381_v33  ;;  %vm1398_vm4 = vweird.f32 %v11797_v34 }
 0x2fb   : > { %v1390_v41 = vsel %vm1387_vm15, %v1389_v37, %v1385_v39  ;;  %vm1399_vm6 = vmor %vm1397_vm5, %vm1398_vm4 }
 0x2fc   : > { %v1394_v42 = vsub.f32 1.0, %v1393_v38  ;;  %v1413_v43 = vmul.f32 %v1408_v36, %v1390_v41  ;;  %v1427_v4 = vsub.f32 1.0, %v1390_v41  ;;  %v1441_v6 = vmul.f32 %v11974_v35, %v1390_v41 }
 0x2fe   : > { %1417 = vrot.lane.b32.xlu2 %v1413_v43, %s12088_s1  ;;  %v1395_v45 = vmul.f32 %v11797_v34, %v1394_v42 }
 0x300   : > { %v1396_v48 = vadd.f32 %v11797_v34, %v1395_v45 }
 0x302   : > { %v1400_v50 = vsel %vm1399_vm6, %v11797_v34, %v1396_v48 }
 0x303   : > { %v1405_v52 = vsel %vm1402_vm7, %v1404_v49, %v1400_v50 }
 0x304   : > { %v1414_v53 = vmul.f32 %v1410_v51, %v1405_v52  ;;  %v1442_v54 = vmul.f32 %v1405_v52, %v1350_v47  ;;  %v1428_v26 = vsub.f32 1.0, %v1405_v52 }
 0x306   : > { %1353 = vrot.lane.b32.xlu2 %v1350_v47, %s12089_s22  ;;  %1419 = vrot.lane.b32.xlu0 %v1414_v53, %s12088_s1 }
 0x354   : > { %v1331_v55 = vpop.permute.xlu0 %1330 }
 0x355   : > { %v1335_v56 = vadd.f32 %v1331_v55, %v13084_v40 }
 0x357   : > { %11798 = vtanh.f32 %v1335_v56 }
 0x358   : > { %v1418_v57 = vpop.permute.xlu2 %1417 }
 0x359   : > { %v1423_v58 = vadd.f32 %v1418_v57, %v13093_v59 }
 0x35b   : > { %11800 = vtanh.f32 %v1423_v58 }
 0x35c   : > { %v1329_v60 = vpop.permute.xlu1 %1328 }
 0x35d   : > { %v11799_v61 = vpop.eup %11798  ;;  %v1334_v62 = vadd.f32 %v1329_v60, %v13087_v63 }
 0x35e   : > { %1344 = vrot.lane.b32.xlu1 %v11799_v61, %s12090_s2 }
 0x35f   : > { %11802 = vtanh.f32 %v1334_v62 }
 0x360   : > { %v1354_v63 = vpop.permute.xlu2 %1353 }
 0x361   : > { %v11801_v0 = vpop.eup %11800  ;;  %v1358_v12 = vmul.f32 %v1354_v63, %v13096_v3 }
 0x362   : > { %1431 = vrot.lane.b32.xlu2 %v11801_v0, %s12090_s2 }
 0x365   : > { %v11803_v1 = vpop.eup %11802 }
 0x366   : > { %1342 = vrot.lane.b32.xlu0 %v11803_v1, %s12090_s2  ;;  %1351 = vrot.lane.b32.xlu1 %v11974_v35, %s12089_s22  ;;  %v1481_v1 = vld [vmem:[%s18394_s29 + $0x18] sm:$0xff] (%p1235_p0) }
 0x367   :  { %1929 = vmatpush.msra.mxu0 (%p1235_p0), %v1481_v1  ;;  %11489 = vmatpush.msra.mxu2 (%p1235_p0), %v1481_v1 }
 0x368   :  { %2765 = vmatpush.msra.mxu1 (%p1235_p0), %v1481_v1  ;;  %11493 = vmatpush.msra.mxu3 (%p1235_p0), %v1481_v1 }
 0x378   : > { %v1420_v40 = vpop.permute.xlu0 %1419 }
 0x379   : > { %v1424_v59 = vadd.f32 %v1420_v40, %v13100_v9  ;;  %v1480_v40 = vld [vmem:[%s18394_s29 + $0x10] sm:$0xff] (%p1235_p0) }
 0x37a   :  { %1930 = vmatpush.msra.mxu0 (%p1235_p0), %v1480_v40  ;;  %11490 = vmatpush.msra.mxu2 (%p1235_p0), %v1480_v40 }
 0x37b   : > { %11804 = vtanh.f32 %v1424_v59  ;;  %2766 = vmatpush.msra.mxu1 (%p1235_p0), %v1480_v40  ;;  %11494 = vmatpush.msra.mxu3 (%p1235_p0), %v1480_v40 }
 0x381   : > { %v11805_v2 = vpop.eup %11804 }
 0x382   : > { %1433 = vrot.lane.b32.xlu0 %v11805_v2, %s12090_s2 }
 0x3bc   : > { %v1432_v5 = vpop.permute.xlu2 %1431 }
 0x3bd   : > { %v1437_v7 = vmul.f32 %v1432_v5, %v1427_v4  ;;  %v1479_v4 = vld [vmem:[%s18394_s29 + $0x8] sm:$0xff] (%p1235_p0)  ;;  %v1478_v5 = vld [vmem:[%s18394_s29] sm:$0xff] (%p1235_p0) }
 0x3be   :  { %1931 = vmatpush.msra.mxu0 (%p1235_p0), %v1479_v4  ;;  %11491 = vmatpush.msra.mxu2 (%p1235_p0), %v1479_v4 }
 0x3bf   : > { %v1443_v8 = vadd.f32 %v1441_v6, %v1437_v7  ;;  %2767 = vmatpush.msra.mxu1 (%p1235_p0), %v1479_v4  ;;  %11495 = vmatpush.msra.mxu3 (%p1235_p0), %v1479_v4 }
 0x3c0   :  { %1932 = vmatpush.msra.mxu0 (%p1235_p0), %v1478_v5  ;;  %11492 = vmatpush.msra.mxu2 (%p1235_p0), %v1478_v5 }
 0x3c1   : > { %1459 = vrot.lane.b32.xlu0 %v1443_v8, %s12090_s2  ;;  %2768 = vmatpush.msra.mxu1 (%p1235_p0), %v1478_v5 }
 0x3c2   :  { %11496 = vmatpush.msra.mxu3 (%p1235_p0), %v1478_v5 }
 0x3d0   : > { %v1345_v11 = vpop.permute.xlu1 %1344 }
 0x3d1   : > { %v1349_v13 = vmul.f32 %v1345_v11, %v1339_v10 }
 0x3d3   : > { %v1360_v9 = vadd.f32 %v1358_v12, %v1349_v13 }
 0x3d5   : > { %1449 = vrot.lane.b32.xlu2 %v1360_v9, %s12090_s2  ;;  %v1468_v19 = vrot.slane %v1360_v9, 7 }
 0x3d8   : > { %v1352_v16 = vpop.permute.xlu1 %1351  ;;  %v1343_v17 = vpop.permute.xlu0 %1342 }
 0x3d9   : > { %v1357_v18 = vmul.f32 %v1352_v16, %v13103_v14  ;;  %v1348_v35 = vmul.f32 %v1343_v17, %v1338_v15 }
 0x3db   : > { %v1359_v20 = vadd.f32 %v1357_v18, %v1348_v35 }
 0x3dd   : > { %1447 = vrot.lane.b32.xlu1 %v1359_v20, %s12090_s2  ;;  %v1470_v3 = vsel %vm1469_vm8, %v1468_v19, %v1359_v20 }
 0x3de   : > { %1471 = vrot.lane.b32.xlu2 %v1470_v3, %s12090_s2 }
 0x3f4   : > { %v1434_v27 = vpop.permute.xlu0 %1433 }
 0x3f5   : > { %v1438_v28 = vmul.f32 %v1434_v27, %v1428_v26 }
 0x3f7   : > { %v1444_v29 = vadd.f32 %v1442_v54, %v1438_v28 }
 0x3f9   : > { %v1474_v30 = vrot.slane %v1444_v29, 7  ;;  %1461 = vrot.lane.b32.xlu1 %v1444_v29, %s12090_s2 }
 0x3fb   : > { %v1475_v14 = vsel %vm1469_vm8, %v1474_v30, %v1443_v8 }
 0x42f   : > { %v1450_v31 = vpop.permute.xlu2 %1449 }
 0x430   : > { %1456 = vst.msk [vmem:[%s1453_s24 + $0x158] sm:$0x1] %vm1454_vm9, %v1450_v31 }
 0x433   : > { %v1460_v32 = vpop.permute.xlu0 %1459 }
 0x434   : > { %1466 = vst.msk [vmem:[%s1465_s3] sm:$0x1] %vm1454_vm9, %v1460_v32 }
 0x438   : > { %v1472_v33 = vpop.permute.xlu2 %1471 }
 0x439   : > { %v1477_v35 = vsel %vm113_vm0, %v1472_v33, %v1475_v14  }
 0x44f   : > { %v1448_v34 = vpop.permute.xlu1 %1447 }
 0x450   : > { %1455 = vst.msk [vmem:[%s1453_s24] sm:$0x1] %vm1454_vm9, %v1448_v34 }
 0x457   :  { %v1483_v3 = vld [vmem:[#allocation6] sm:$0xff] (%p1235_p0)  ;;  %v1484_v32 = vld [vmem:[#allocation6 + $0x8] sm:$0xff] (%p1235_p0)  ;;  %v1489_v5 = vld [vmem:[#allocation6 + $0x30] sm:$0xff] (%p1235_p0) }
 0x468   :  { %1237 = sbr.rel (!%p1235_p0) target bundleno = 484 (0x1e4), region = 209 }
 0x46b   : > { %v1462_v36 = vpop.permute.xlu1 %1461 }
 0x46c   : > { %1467 = vst.msk [vmem:[%s1465_s3 + $0x158] sm:$0x1] %vm1454_vm9, %v1462_v36 }
 0x473   :  { %v1530_v37 = vld [vmem:[#allocation7 + $0x20] sm:$0xff]  ;;  %v1528_v38 = vld [vmem:[#allocation7 + $0x10] sm:$0xff]  ;;  %v1531_v41 = vld [vmem:[#allocation7 + $0x28] sm:$0xff] }
 0x474   :  { %v1526_v39 = vld [vmem:[#allocation7] sm:$0xff]  ;;  %1620 = vrot.lane.b32.xlu2 %v1530_v37, %s12091_s26  ;;  %1616 = vrot.lane.b32.xlu1 %v1528_v38, %s12091_s26  ;;  %v1529_v42 = vld [vmem:[#allocation7 + $0x18] sm:$0xff]  ;;  %v1527_v43 = vld [vmem:[#allocation7 + $0x8] sm:$0xff] }
 0x475   :  { %1612 = vrot.lane.b32.xlu0 %v1526_v39, %s12091_s26  ;;  %v1534_v44 = vld [vmem:[#allocation7 + $0x40] sm:$0xff]  ;;  %v1533_v21 = vld [vmem:[#allocation7 + $0x38] sm:$0xff]  ;;  %v1532_v22 = vld [vmem:[#allocation7 + $0x30] sm:$0xff] }
 0x476   :  { %v1537_v23 = vld [vmem:[#allocation7 + $0x58] sm:$0xff]  ;;  %v1536_v24 = vld [vmem:[#allocation7 + $0x50] sm:$0xff]  ;;  %v1535_v25 = vld [vmem:[#allocation7 + $0x48] sm:$0xff] }
 0x477   :  { %v1540_v45 = vld [vmem:[#allocation7 + $0x70] sm:$0xff]  ;;  %v1539_v46 = vld [vmem:[#allocation7 + $0x68] sm:$0xff]  ;;  %v1538_v47 = vld [vmem:[#allocation7 + $0x60] sm:$0xff] }
 0x478   :  { %v1543_v48 = vld [vmem:[#allocation7 + $0x88] sm:$0xff]  ;;  %v1542_v49 = vld [vmem:[#allocation7 + $0x80] sm:$0xff]  ;;  %v1541_v50 = vld [vmem:[#allocation7 + $0x78] sm:$0xff] }
 0x479   :  { %v1546_v51 = vld [vmem:[#allocation7 + $0xa0] sm:$0xff]  ;;  %v1545_v52 = vld [vmem:[#allocation7 + $0x98] sm:$0xff]  ;;  %v1544_v53 = vld [vmem:[#allocation7 + $0x90] sm:$0xff] }
 0x47a   :  { %v1549_v54 = vld [vmem:[#allocation7 + $0xb8] sm:$0xff]  ;;  %v1548_v55 = vld [vmem:[#allocation7 + $0xb0] sm:$0xff]  ;;  %v1547_v56 = vld [vmem:[#allocation7 + $0xa8] sm:$0xff] }
 0x47b   :  { %v1552_v57 = vld [vmem:[#allocation7 + $0xd0] sm:$0xff]  ;;  %v1551_v58 = vld [vmem:[#allocation7 + $0xc8] sm:$0xff]  ;;  %v1550_v60 = vld [vmem:[#allocation7 + $0xc0] sm:$0xff] }
 0x47c   :  { %1622 = vrot.lane.b32.xlu2 %v1531_v41, %s12091_s26  ;;  %1618 = vrot.lane.b32.xlu1 %v1529_v42, %s12091_s26  ;;  %v1555_v61 = vld [vmem:[#allocation7 + $0xe8] sm:$0xff]  ;;  %v1554_v62 = vld [vmem:[#allocation7 + $0xe0] sm:$0xff]  ;;  %v1553_v0 = vld [vmem:[#allocation7 + $0xd8] sm:$0xff] }
 0x47d   :  { %1614 = vrot.lane.b32.xlu0 %v1527_v43, %s12091_s26  ;;  %v1558_v59 = vld [vmem:[#allocation7 + $0x100] sm:$0xff]  ;;  %v1557_v2 = vld [vmem:[#allocation7 + $0xf8] sm:$0xff]  ;;  %v1556_v63 = vld [vmem:[#allocation7 + $0xf0] sm:$0xff] }
 0x47e   :  { %v1561_v6 = vld [vmem:[#allocation7 + $0x118] sm:$0xff]  ;;  %v1560_v7 = vld [vmem:[#allocation7 + $0x110] sm:$0xff]  ;;  %v1559_v8 = vld [vmem:[#allocation7 + $0x108] sm:$0xff] }
 0x47f   :  { %v1564_v11 = vld [vmem:[#allocation7 + $0x130] sm:$0xff]  ;;  %v1563_v12 = vld [vmem:[#allocation7 + $0x128] sm:$0xff]  ;;  %v1562_v13 = vld [vmem:[#allocation7 + $0x120] sm:$0xff] }
 0x480   :  { %v1567_v15 = vld [vmem:[#allocation7 + $0x148] sm:$0xff]  ;;  %v1566_v16 = vld [vmem:[#allocation7 + $0x140] sm:$0xff]  ;;  %v1565_v17 = vld [vmem:[#allocation7 + $0x138] sm:$0xff] }
 0x481   :  { %v2366_v35 = vld [vmem:[#allocation7 + $0x158] sm:$0xff]  ;;  %v2369_v19 = vld [vmem:[#allocation7 + $0x170] sm:$0xff]  ;;  %v2367_v30 = vld [vmem:[#allocation7 + $0x160] sm:$0xff] }
 0x482   :  { %v1568_v20 = vld [vmem:[#allocation7 + $0x150] sm:$0xf]  ;;  %v2370_v14 = vld [vmem:[#allocation7 + $0x178] sm:$0xff]  ;;  %v2388_v31 = vld [vmem:[#allocation7 + $0x208] sm:$0xff] }
 0x483   :  { %v2368_v38 = vld [vmem:[#allocation7 + $0x168] sm:$0xff]  ;;  %v2371_v39 = vld [vmem:[#allocation7 + $0x180] sm:$0xff]  ;;  %v2389_v41 = vld [vmem:[#allocation7 + $0x210] sm:$0xff] }
 0x484   :  { %1628 = vrot.lane.b32.xlu2 %v1534_v44, %s12091_s26  ;;  %1626 = vrot.lane.b32.xlu1 %v1533_v21, %s12091_s26  ;;  %v1485_v42 = vld [vmem:[#allocation6 + $0x10] sm:$0xff]  ;;  %v2374_v4 = vld [vmem:[#allocation7 + $0x198] sm:$0xff] }
 0x485   :  { %1624 = vrot.lane.b32.xlu0 %v1532_v22, %s12091_s26 }
 0x48c   :  { %1634 = vrot.lane.b32.xlu2 %v1537_v23, %s12091_s26  ;;  %1632 = vrot.lane.b32.xlu1 %v1536_v24, %s12091_s26  ;;  %v2391_v23 = vld [vmem:[#allocation7 + $0x220] sm:$0xff]  ;;  %v2394_v24 = vld [vmem:[#allocation7 + $0x238] sm:$0xff] }
 0x48d   :  { %1630 = vrot.lane.b32.xlu0 %v1535_v25, %s12091_s26  ;;  %v2390_v25 = vld [vmem:[#allocation7 + $0x218] sm:$0xff] }
 0x494   :  { %1640 = vrot.lane.b32.xlu2 %v1540_v45, %s12091_s26  ;;  %1638 = vrot.lane.b32.xlu1 %v1539_v46, %s12091_s26  ;;  %v1486_v45 = vld [vmem:[#allocation6 + $0x18] sm:$0xff] }
 0x495   :  { %1636 = vrot.lane.b32.xlu0 %v1538_v47, %s12091_s26 }
 0x49c   :  { %1646 = vrot.lane.b32.xlu2 %v1543_v48, %s12091_s26  ;;  %1644 = vrot.lane.b32.xlu1 %v1542_v49, %s12091_s26 }
 0x49d   :  { %1642 = vrot.lane.b32.xlu0 %v1541_v50, %s12091_s26  ;;  %v2392_v50 = vld [vmem:[#allocation7 + $0x228] sm:$0xff] }
 0x4a4   :  { %1652 = vrot.lane.b32.xlu2 %v1546_v51, %s12091_s26  ;;  %1650 = vrot.lane.b32.xlu1 %v1545_v52, %s12091_s26  ;;  %v2395_v51 = vld [vmem:[#allocation7 + $0x240] sm:$0xff]  ;;  %v2372_v52 = vld [vmem:[#allocation7 + $0x188] sm:$0xff] }
 0x4a5   :  { %1648 = vrot.lane.b32.xlu0 %v1544_v53, %s12091_s26  ;;  %v1487_v53 = vld [vmem:[#allocation6 + $0x20] sm:$0xff] }
 0x4ac   :  { %1658 = vrot.lane.b32.xlu2 %v1549_v54, %s12091_s26  ;;  %1656 = vrot.lane.b32.xlu1 %v1548_v55, %s12091_s26 }
 0x4ad   :  { %1654 = vrot.lane.b32.xlu0 %v1547_v56, %s12091_s26 }
 0x4b4   :  { %1664 = vrot.lane.b32.xlu2 %v1552_v57, %s12091_s26  ;;  %1662 = vrot.lane.b32.xlu1 %v1551_v58, %s12091_s26  ;;  %v2393_v58 = vld [vmem:[#allocation7 + $0x230] sm:$0xff] }
 0x4b5   :  { %1660 = vrot.lane.b32.xlu0 %v1550_v60, %s12091_s26  ;;  %v2396_v60 = vld [vmem:[#allocation7 + $0x248] sm:$0xff] }
 0x4bc   :  { %1670 = vrot.lane.b32.xlu2 %v1555_v61, %s12091_s26  ;;  %1668 = vrot.lane.b32.xlu1 %v1554_v62, %s12091_s26  ;;  %v2373_v61 = vld [vmem:[#allocation7 + $0x190] sm:$0xff]  ;;  %v1488_v62 = vld [vmem:[#allocation6 + $0x28] sm:$0xff] }
 0x4bd   :  { %1666 = vrot.lane.b32.xlu0 %v1553_v0, %s12091_s26 }
 0x4c4   :  { %1676 = vrot.lane.b32.xlu2 %v1558_v59, %s12091_s26  ;;  %1674 = vrot.lane.b32.xlu1 %v1557_v2, %s12091_s26  ;;  %v2375_v2 = vld [vmem:[#allocation7 + $0x1a0] sm:$0xff] }
 0x4c5   :  { %1672 = vrot.lane.b32.xlu0 %v1556_v63, %s12091_s26  ;;  %v2378_v63 = vld [vmem:[#allocation7 + $0x1b8] sm:$0xff] }
 0x4cc   :  { %1682 = vrot.lane.b32.xlu2 %v1561_v6, %s12091_s26  ;;  %1680 = vrot.lane.b32.xlu1 %v1560_v7, %s12091_s26 }
 0x4cd   :  { %1678 = vrot.lane.b32.xlu0 %v1559_v8, %s12091_s26 }
 0x4ce   :  { %v13192_v10 = vpop.permute.xlu2 %1620 }
 0x4cf   :  { %v1745_v57 = vsel %vm113_vm0, %v1487_v53, %v13192_v10 }
 0x4d4   :  { %1688 = vrot.lane.b32.xlu2 %v1564_v11, %s12091_s26  ;;  %1686 = vrot.lane.b32.xlu1 %v1563_v12, %s12091_s26  ;;  %v2376_v11 = vld [vmem:[#allocation7 + $0x1a8] sm:$0xff]  ;;  %v2379_v12 = vld [vmem:[#allocation7 + $0x1c0] sm:$0xff] }
 0x4d5   :  { %1684 = vrot.lane.b32.xlu0 %v1562_v13, %s12091_s26  ;;  %v2397_v13 = vld [vmem:[#allocation7 + $0x250] sm:$0xff] }
 0x4d6   :  { %v13197_v9 = vpop.permute.xlu2 %1622 }
 0x4d7   :  { %v1746_v59 = vsel %vm113_vm0, %v1488_v62, %v13197_v9  ;;  %v1505_v9 = vld [vmem:[#allocation6 + $0xb0] sm:$0xff]  ;;  %v2322_v62 = vld [vmem:[#allocation6 + $0x158] sm:$0xff] }
 0x4dc   :  { %1694 = vrot.lane.b32.xlu2 %v1567_v15, %s12091_s26  ;;  %1692 = vrot.lane.b32.xlu1 %v1566_v16, %s12091_s26  ;;  %v1490_v15 = vld [vmem:[#allocation6 + $0x38] sm:$0xff] }
 0x4dd   :  { %1690 = vrot.lane.b32.xlu0 %v1565_v17, %s12091_s26 }
 0x4de   :  { %v13202_v18 = vpop.permute.xlu2 %1628 }
 0x4e4   :  { %2452 = vrot.lane.b32.xlu2 %v2366_v35, %s12091_s26  ;;  %2458 = vrot.lane.b32.xlu1 %v2369_v19, %s12091_s26 }
 0x4e5   :  { %1696 = vrot.lane.b32.xlu0 %v1568_v20, %s12091_s26 }
 0x4e6   :  { %v13207_v26 = vpop.permute.xlu2 %1634  ;;  %v1617_v27 = vpop.permute.xlu1 %1616 }
 0x4e7   :  { %v1613_v28 = vpop.permute.xlu0 %1612  ;;  %v1743_v22 = vsel %vm113_vm0, %v1485_v42, %v1617_v27  ;;  %v2380_v27 = vld [vmem:[#allocation7 + $0x1c8] sm:$0xff]  ;;  %v1492_v42 = vld [vmem:[#allocation6 + $0x48] sm:$0xff] }
 0x4e8   :  { %v1741_v29 = vsel %vm113_vm0, %v1483_v3, %v1613_v28  ;;  %v2377_v3 = vld [vmem:[#allocation7 + $0x1b0] sm:$0xff]  ;;  %v2398_v28 = vld [vmem:[#allocation7 + $0x258] sm:$0xff] }
 0x4e9   :  { %9409 = vmatmul.msk.f32.vlgmr.msra.gmra.mxu0 %vm1250_vm3, %v1741_v29  ;;  %v1506_v29 = vld [vmem:[#allocation6 + $0xb8] sm:$0xff] }
 0x4ec   :  { %2454 = vrot.lane.b32.xlu2 %v2367_v30, %s12091_s26  ;;  %2460 = vrot.lane.b32.xlu1 %v2370_v14, %s12091_s26  ;;  %v1491_v30 = vld [vmem:[#allocation6 + $0x40] sm:$0xff] }
 0x4ed   :  { %2496 = vrot.lane.b32.xlu0 %v2388_v31, %s12091_s26 }
 0x4ee   :  { %v13214_v33 = vpop.permute.xlu2 %1640  ;;  %v1619_v34 = vpop.permute.xlu1 %1618 }
 0x4ef   :  { %v1615_v36 = vpop.permute.xlu0 %1614  ;;  %v1744_v49 = vsel %vm113_vm0, %v1486_v45, %v1619_v34  ;;  %v2381_v45 = vld [vmem:[#allocation7 + $0x1d0] sm:$0xff] }
 0x4f0   :  { %v1742_v37 = vsel %vm113_vm0, %v1484_v32, %v1615_v36  ;;  %v1749_v36 = vsel %vm113_vm0, %v1491_v30, %v13202_v18  ;;  %v2324_v30 = vld [vmem:[#allocation6 + $0x168] sm:$0xff] }
 0x4f1   :  { %9410 = vmatmul.msk.f32.gmra.mxu0 %vm1250_vm3, %v1742_v37  ;;  %v2400_v37 = vld [vmem:[#allocation7 + $0x268] sm:$0xff] }
 0x4f4   :  { %2456 = vrot.lane.b32.xlu2 %v2368_v38, %s12091_s26  ;;  %2462 = vrot.lane.b32.xlu1 %v2371_v39, %s12091_s26  ;;  %v2403_v38 = vld [vmem:[#allocation7 + $0x280] sm:$0xff] }
 0x4f5   :  { %2498 = vrot.lane.b32.xlu0 %v2389_v41, %s12091_s26  ;;  %v2399_v39 = vld [vmem:[#allocation7 + $0x260] sm:$0xff]  ;;  %v1507_v41 = vld [vmem:[#allocation6 + $0xc0] sm:$0xff] }
 0x4f6   :  { %v13221_v43 = vpop.permute.xlu2 %1646  ;;  %v13223_v44 = vpop.permute.xlu1 %1626 }
 0x4f7   :  { %v1625_v21 = vpop.permute.xlu0 %1624  ;;  %v1748_v20 = vsel %vm113_vm0, %v1490_v15, %v13223_v44  ;;  %v2323_v15 = vld [vmem:[#allocation6 + $0x160] sm:$0xff] }
 0x4f8   :  { %v1747_v10 = vsel %vm113_vm0, %v1489_v5, %v1625_v21 }
 0x4f9   :  { %9411 = vmatmul.msk.f32.gmra.mxu0 %vm1250_vm3, %v1743_v22 }
 0x4fc   :  { %2502 = vrot.lane.b32.xlu2 %v2391_v23, %s12091_s26  ;;  %2508 = vrot.lane.b32.xlu1 %v2394_v24, %s12091_s26  ;;  %v2401_v24 = vld [vmem:[#allocation7 + $0x270] sm:$0xff] }
 0x4fd   :  { %2500 = vrot.lane.b32.xlu0 %v2390_v25, %s12091_s26  ;;  %v2404_v25 = vld [vmem:[#allocation7 + $0x288] sm:$0xff] }
 0x4fe   :  { %v13230_v46 = vpop.permute.xlu2 %1652  ;;  %v13232_v47 = vpop.permute.xlu1 %1632 }
 0x4ff   :  { %v13234_v48 = vpop.permute.xlu0 %1630 }
 0x500   :  { %v1750_v23 = vsel %vm113_vm0, %v1492_v42, %v13234_v48  ;;  %v2325_v42 = vld [vmem:[#allocation6 + $0x170] sm:$0xff] }
 0x501   :  { %9412 = vmatmul.msk.f32.gmra.mxu0 %vm1250_vm3, %v1744_v49  ;;  %v1508_v49 = vld [vmem:[#allocation6 + $0xc8] sm:$0xff] }
 0x504   :  { %2504 = vrot.lane.b32.xlu2 %v2392_v50, %s12091_s26  ;;  %2510 = vrot.lane.b32.xlu1 %v2395_v51, %s12091_s26  ;;  %v1493_v50 = vld [vmem:[#allocation6 + $0x50] sm:$0xff] }
 0x505   :  { %2464 = vrot.lane.b32.xlu0 %v2372_v52, %s12091_s26 }
 0x506   :  { %v1659_v54 = vpop.permute.xlu2 %1658  ;;  %v13241_v55 = vpop.permute.xlu1 %1638 }
 0x507   :  { %v13243_v56 = vpop.permute.xlu0 %1636  ;;  %v1764_v34 = vsel %vm113_vm0, %v1506_v29, %v1659_v54  ;;  %v1751_v54 = vsel %vm113_vm0, %v1493_v50, %v13232_v47  ;;  %v1511_v29 = vld [vmem:[#allocation6 + $0xe0] sm:$0xff]  ;;  %v1498_v50 = vld [vmem:[#allocation6 + $0x78] sm:$0xff] }
 0x509   :  { %9413 = vmatmul.msk.f32.gmra.mxu0 %vm1250_vm3, %v1745_v57  ;;  %v2402_v57 = vld [vmem:[#allocation7 + $0x278] sm:$0xff] }
 0x50c   :  { %2506 = vrot.lane.b32.xlu2 %v2393_v58, %s12091_s26  ;;  %2512 = vrot.lane.b32.xlu1 %v2396_v60, %s12091_s26  ;;  %v2405_v58 = vld [vmem:[#allocation7 + $0x290] sm:$0xff]  ;;  %v2382_v60 = vld [vmem:[#allocation7 + $0x1d8] sm:$0xff] }
 0x50d   :  { %2466 = vrot.lane.b32.xlu0 %v2373_v61, %s12091_s26  ;;  %v1509_v61 = vld [vmem:[#allocation6 + $0xd0] sm:$0xff] }
 0x50e   :  { %v13251_v0 = vpop.permute.xlu2 %1664  ;;  %v13253_v1 = vpop.permute.xlu1 %1644 }
 0x50f   :  { %v13255_v40 = vpop.permute.xlu0 %1642 }
 0x511   :  { %9414 = vmatmul.msk.f32.gmra.mxu0 %vm1250_vm3, %v1746_v59  ;;  %v1494_v59 = vld [vmem:[#allocation6 + $0x58] sm:$0xff] }
 0x514   :  { %2470 = vrot.lane.b32.xlu2 %v2375_v2, %s12091_s26  ;;  %2476 = vrot.lane.b32.xlu1 %v2378_v63, %s12091_s26 }
 0x515   :  { %2468 = vrot.lane.b32.xlu0 %v2374_v4, %s12091_s26  ;;  %v1767_v4 = vsel %vm113_vm0, %v1509_v61, %v13251_v0  ;;  %v1495_v0 = vld [vmem:[#allocation6 + $0x60] sm:$0xff] }
 0x516   :  { %v13263_v6 = vpop.permute.xlu2 %1670  ;;  %v13265_v7 = vpop.permute.xlu1 %1650 }
 0x517   :  { %v13267_v8 = vpop.permute.xlu0 %1648 }
 0x519   :  { %9415 = vmatmul.msk.f32.gmra.mxu0 %vm1250_vm3, %v1747_v10  ;;  %v1752_v10 = vsel %vm113_vm0, %v1494_v59, %v13207_v26  ;;  %v2327_v59 = vld [vmem:[#allocation6 + $0x180] sm:$0xff] }
 0x51c   :  { %2472 = vrot.lane.b32.xlu2 %v2376_v11, %s12091_s26  ;;  %2478 = vrot.lane.b32.xlu1 %v2379_v12, %s12091_s26  ;;  %v2384_v11 = vld [vmem:[#allocation7 + $0x1e8] sm:$0xff]  ;;  %v2387_v12 = vld [vmem:[#allocation7 + $0x200] sm:$0xff] }
 0x51d   :  { %2514 = vrot.lane.b32.xlu0 %v2397_v13, %s12091_s26  ;;  %v2383_v13 = vld [vmem:[#allocation7 + $0x1e0] sm:$0xff] }
 0x51e   :  { %v13274_v16 = vpop.permute.xlu2 %1676  ;;  %v1657_v17 = vpop.permute.xlu1 %1656 }
 0x51f   :  { %v13276_v35 = vpop.permute.xlu0 %1654  ;;  %v1763_v19 = vsel %vm113_vm0, %v1505_v9, %v1657_v17  ;;  %v1510_v9 = vld [vmem:[#allocation6 + $0xd8] sm:$0xff] }
 0x520   :  { %9431 = vmatmul.msk.f32.vlgmr.msra.gmra.mxu2 %vm1250_vm3, %v1763_v19 }
 0x521   :  { %9416 = vmatmul.msk.f32.gmra.mxu0 %vm1250_vm3, %v1748_v20 }
 0x524   :  { %2474 = vrot.lane.b32.xlu2 %v2377_v3, %s12091_s26  ;;  %2480 = vrot.lane.b32.xlu1 %v2380_v27, %s12091_s26  ;;  %v1753_v27 = vsel %vm113_vm0, %v1495_v0, %v13243_v56 }
 0x525   :  { %2516 = vrot.lane.b32.xlu0 %v2398_v28, %s12091_s26  ;;  %v2385_v28 = vld [vmem:[#allocation7 + $0x1f0] sm:$0xff] }
 0x526   :  { %v13286_v14 = vpop.permute.xlu2 %1682  ;;  %v1663_v31 = vpop.permute.xlu1 %1662 }
 0x527   :  { %v1661_v32 = vpop.permute.xlu0 %1660  ;;  %v1766_v53 = vsel %vm113_vm0, %v1508_v49, %v1663_v31  ;;  %v1496_v31 = vld [vmem:[#allocation6 + $0x68] sm:$0xff]  ;;  %v2326_v49 = vld [vmem:[#allocation6 + $0x178] sm:$0xff] }
 0x528   :  { %9432 = vmatmul.msk.f32.gmra.mxu2 %vm1250_vm3, %v1764_v34  ;;  %v1765_v22 = vsel %vm113_vm0, %v1507_v41, %v1661_v32  ;;  %v1512_v41 = vld [vmem:[#allocation6 + $0xe8] sm:$0xff] }
 0x529   :  { %9417 = vmatmul.msk.f32.gmra.mxu0 %vm1250_vm3, %v1749_v36 }
 0x52c   :  { %2520 = vrot.lane.b32.xlu2 %v2400_v37, %s12091_s26  ;;  %2526 = vrot.lane.b32.xlu1 %v2403_v38, %s12091_s26  ;;  %v1754_v38 = vsel %vm113_vm0, %v1496_v31, %v13241_v55  ;;  %v1770_v55 = vsel %vm113_vm0, %v1512_v41, %v13263_v6 }
 0x52d   :  { %2518 = vrot.lane.b32.xlu0 %v2399_v39, %s12091_s26  ;;  %v2386_v39 = vld [vmem:[#allocation7 + $0x1f8] sm:$0xff] }
 0x52e   :  { %v13296_v44 = vpop.permute.xlu2 %1688  ;;  %v13298_v21 = vpop.permute.xlu1 %1668 }
 0x52f   :  { %v1667_v18 = vpop.permute.xlu0 %1666  ;;  %v1769_v56 = vsel %vm113_vm0, %v1511_v29, %v13298_v21 }
 0x530   :  { %9433 = vmatmul.msk.f32.gmra.mxu2 %vm1250_vm3, %v1765_v22  ;;  %v1768_v20 = vsel %vm113_vm0, %v1510_v9, %v1667_v18  ;;  %v1497_v18 = vld [vmem:[#allocation6 + $0x70] sm:$0xff] }
 0x531   :  { %9418 = vmatmul.msk.f32.gmra.mxu0 %vm1250_vm3, %v1750_v23 }
 0x534   :  { %2522 = vrot.lane.b32.xlu2 %v2401_v24, %s12091_s26  ;;  %2528 = vrot.lane.b32.xlu1 %v2404_v25, %s12091_s26  ;;  %v1755_v25 = vsel %vm113_vm0, %v1497_v18, %v13214_v33  ;;  %v1756_v33 = vsel %vm113_vm0, %v1498_v50, %v13255_v40 }
 0x535   :  { %2482 = vrot.lane.b32.xlu0 %v2381_v45, %s12091_s26  ;;  %v1513_v45 = vld [vmem:[#allocation6 + $0xf0] sm:$0xff] }
 0x536   :  { %v13308_v51 = vpop.permute.xlu2 %1694  ;;  %v13310_v52 = vpop.permute.xlu1 %1674 }
 0x537   :  { %v13312_v48 = vpop.permute.xlu0 %1672 }
 0x538   :  { %9434 = vmatmul.msk.f32.gmra.mxu2 %vm1250_vm3, %v1766_v53  ;;  %v2344_v53 = vld [vmem:[#allocation6 + $0x208] sm:$0xff]  ;;  %v1771_v6 = vsel %vm113_vm0, %v1513_v45, %v13312_v48  ;;  %v1514_v48 = vld [vmem:[#allocation6 + $0xf8] sm:$0xff]  ;;  %v2329_v45 = vld [vmem:[#allocation6 + $0x190] sm:$0xff] }
 0x539   :  { %9419 = vmatmul.msk.f32.gmra.mxu0 %vm1250_vm3, %v1751_v54 }
 0x53c   :  { %2524 = vrot.lane.b32.xlu2 %v2402_v57, %s12091_s26  ;;  %2530 = vrot.lane.b32.xlu1 %v2405_v58, %s12091_s26 }
 0x53d   :  { %2484 = vrot.lane.b32.xlu0 %v2382_v60, %s12091_s26 }
 0x53e   :  { %v2453_v2 = vpop.permute.xlu2 %2452  ;;  %v13322_v63 = vpop.permute.xlu1 %1680 }
 0x53f   :  { %v13324_v47 = vpop.permute.xlu0 %1678  ;;  %v2581_v5 = vsel %vm113_vm0, %v2322_v62, %v2453_v2  ;;  %v13389_v62 = vld [vmem:[%s18362_s4] ss:$0 sm:$0xff] }
 0x540   :  { %9435 = vmatmul.msk.f32.gmra.mxu2 %vm1250_vm3, %v1767_v4  ;;  %9452 = vmatmul.msk.f32.vlgmr.msra.gmra.mxu1 %vm1250_vm3, %v2581_v5  ;;  %v1499_v2 = vld [vmem:[#allocation6 + $0x80] sm:$0xff]  ;;  %v2345_v4 = vld [vmem:[#allocation6 + $0x210] sm:$0xff] }
 0x541   :  { %9420 = vmatmul.msk.f32.gmra.mxu0 %vm1250_vm3, %v1752_v10  ;;  %v1757_v9 = vsel %vm113_vm0, %v1499_v2, %v13253_v1 }
 0x544   :  { %2488 = vrot.lane.b32.xlu2 %v2384_v11, %s12091_s26  ;;  %2494 = vrot.lane.b32.xlu1 %v2387_v12, %s12091_s26  ;;  %v1772_v12 = vsel %vm113_vm0, %v1514_v48, %v13310_v52  ;;  %v1515_v52 = vld [vmem:[#allocation6 + $0x100] sm:$0xff] }
 0x545   :  { %2486 = vrot.lane.b32.xlu0 %v2383_v13, %s12091_s26 }
 0x546   :  { %v2455_v17 = vpop.permute.xlu2 %2454  ;;  %v13337_v26 = vpop.permute.xlu1 %1686 }
 0x547   :  { %v13339_v19 = vpop.permute.xlu0 %1684  ;;  %v2582_v3 = vsel %vm113_vm0, %v2323_v15, %v2455_v17  ;;  %v1500_v17 = vld [vmem:[#allocation6 + $0x88] sm:$0xff] }
 0x548   :  { %9436 = vmatmul.msk.f32.gmra.mxu2 %vm1250_vm3, %v1768_v20  ;;  %9453 = vmatmul.msk.f32.gmra.mxu1 %vm1250_vm3, %v2582_v3  ;;  %v2346_v20 = vld [vmem:[#allocation6 + $0x218] sm:$0xff]  ;;  %v1758_v29 = vsel %vm113_vm0, %v1500_v17, %v13221_v43 }
 0x549   :  { %9421 = vmatmul.msk.f32.gmra.mxu0 %vm1250_vm3, %v1753_v27 }
 0x54c   :  { %2490 = vrot.lane.b32.xlu2 %v2385_v28, %s12091_s26  ;;  %v1773_v28 = vsel %vm113_vm0, %v1515_v52, %v13274_v16  ;;  %v1501_v16 = vld [vmem:[#allocation6 + $0x90] sm:$0xff] }
 0x54d   :  { %v1759_v18 = vsel %vm113_vm0, %v1501_v16, %v13267_v8 }
 0x54e   :  { %v2457_v32 = vpop.permute.xlu2 %2456  ;;  %v13349_v34 = vpop.permute.xlu1 %1692 }
 0x54f   :  { %v13351_v36 = vpop.permute.xlu0 %1690  ;;  %v2583_v37 = vsel %vm113_vm0, %v2324_v30, %v2457_v32  ;;  %v1516_v32 = vld [vmem:[#allocation6 + $0x108] sm:$0xff] }
 0x550   :  { %9437 = vmatmul.msk.f32.gmra.mxu2 %vm1250_vm3, %v1769_v56  ;;  %9454 = vmatmul.msk.f32.gmra.mxu1 %vm1250_vm3, %v2583_v37  ;;  %v2347_v56 = vld [vmem:[#allocation6 + $0x220] sm:$0xff]  ;;  %v2328_v37 = vld [vmem:[#allocation6 + $0x188] sm:$0xff]  ;;  %v1774_v41 = vsel %vm113_vm0, %v1516_v32, %v13324_v47  ;;  %v1517_v47 = vld [vmem:[#allocation6 + $0x110] sm:$0xff] }
 0x551   :  { %9422 = vmatmul.msk.f32.gmra.mxu0 %vm1250_vm3, %v1754_v38 }
 0x554   :  { %2492 = vrot.lane.b32.xlu2 %v2386_v39, %s12091_s26 }
 0x556   :  { %v2459_v22 = vpop.permute.xlu1 %2458  ;;  %v13362_v23 = vpop.permute.xlu2 %2502 }
 0x557   :  { %v13364_v21 = vpop.permute.xlu0 %1696  ;;  %v2584_v24 = vsel %vm113_vm0, %v2325_v42, %v2459_v22  ;;  %v2606_v42 = vsel %vm113_vm0, %v2347_v56, %v13362_v23 }
 0x558   :  { %9438 = vmatmul.msk.f32.gmra.mxu2 %vm1250_vm3, %v1770_v55  ;;  %9455 = vmatmul.msk.f32.gmra.mxu1 %vm1250_vm3, %v2584_v24  ;;  %v2348_v24 = vld [vmem:[#allocation6 + $0x228] sm:$0xff] }
 0x559   :  { %9423 = vmatmul.msk.f32.gmra.mxu0 %vm1250_vm3, %v1755_v25  ;;  %v1502_v25 = vld [vmem:[#allocation6 + $0x98] sm:$0xff] }
 0x55e   :  { %v2461_v54 = vpop.permute.xlu1 %2460  ;;  %v13374_v57 = vpop.permute.xlu2 %2504 }
 0x55f   :  { %v2497_v58 = vpop.permute.xlu0 %2496  ;;  %v2585_v60 = vsel %vm113_vm0, %v2326_v49, %v2461_v54  ;;  %v2607_v54 = vsel %vm113_vm0, %v2348_v24, %v13374_v57  ;;  %v1518_v57 = vld [vmem:[#allocation6 + $0x118] sm:$0xff] }
 0x560   :  { %9439 = vmatmul.msk.f32.gmra.mxu2 %vm1250_vm3, %v1771_v6  ;;  %9456 = vmatmul.msk.f32.gmra.mxu1 %vm1250_vm3, %v2585_v60  ;;  %v2603_v61 = vsel %vm113_vm0, %v2344_v53, %v2497_v58  ;;  %v1775_v53 = vsel %vm113_vm0, %v1517_v47, %v13322_v63  ;;  %v2406_v58 = vld [vmem:[#allocation7 + $0x298] sm:$0xff]  ;;  %v1760_v6 = vsel %vm113_vm0, %v1502_v25, %v13265_v7  ;;  %v2330_v7 = vld [vmem:[#allocation6 + $0x198] sm:$0xff] }
 0x561   :  { %9424 = vmatmul.msk.f32.gmra.mxu0 %vm1250_vm3, %v1756_v33  ;;  %9474 = vmatmul.msk.f32.vlgmr.msra.gmra.mxu3 %vm1250_vm3, %v2603_v61  ;;  %v2349_v33 = vld [vmem:[#allocation6 + $0x230] sm:$0xff]  ;;  %v1503_v61 = vld [vmem:[#allocation6 + $0xa0] sm:$0xff] }
 0x562   :  { %2532 = vrot.lane.b32.xlu0 %v2406_v58, %s12091_s26 }
 0x566   :  { %v1934_v40 = vpop.f32.mrf.mxu0  ;;  %v2463_v5 = vpop.permute.xlu1 %2462 }
 0x567   :  { %v1935_v10 = vadd.f32 %v13389_v62, %v1934_v40  ;;  %v2499_v11 = vpop.permute.xlu0 %2498  ;;  %v2586_v13 = vsel %vm113_vm0, %v2327_v59, %v2463_v5  ;;  %v13400_v0 = vpop.permute.xlu2 %2506  ;;  %v1776_v40 = vsel %vm113_vm0, %v1518_v57, %v13286_v14  ;;  %v2331_v14 = vld [vmem:[#allocation6 + $0x1a0] sm:$0xff] }
 0x568   :  { %9440 = vmatmul.msk.f32.gmra.mxu2 %vm1250_vm3, %v1772_v12  ;;  %9457 = vmatmul.msk.f32.gmra.mxu1 %vm1250_vm3, %v2586_v13  ;;  %v2604_v15 = vsel %vm113_vm0, %v2345_v4, %v2499_v11  ;;  %v2608_v5 = vsel %vm113_vm0, %v2349_v33, %v13400_v0  ;;  %v1761_v11 = vsel %vm113_vm0, %v1503_v61, %v13230_v46  ;;  %v1519_v13 = vld [vmem:[#allocation6 + $0x120] sm:$0xff]  ;;  %v1504_v46 = vld [vmem:[#allocation6 + $0xa8] sm:$0xff] }
 0x569   :  { %2063 = vst.msk [vmem:[#allocation4] sm:$0xff] %vm18382_vm1, %v1935_v10  ;;  %9425 = vmatmul.msk.f32.gmra.mxu0 %vm1250_vm3, %v1757_v9  ;;  %9475 = vmatmul.msk.f32.gmra.mxu3 %vm1250_vm3, %v2604_v15  ;;  %v2350_v9 = vld [vmem:[#allocation6 + $0x238] sm:$0xff] }
 0x56a   :  { %2149 = vrot.lane.b32.xlu1 %v1935_v10, %s12084_s25  ;;  %v2407_v10 = vld [vmem:[#allocation7 + $0x2a0] sm:$0xff] }
 0x56b   :  { %2534 = vrot.lane.b32.xlu0 %v2407_v10, %s12091_s26 }
 0x56e   :  { %v1937_v1 = vpop.f32.mrf.mxu0  ;;  %v2509_v55 = vpop.permute.xlu1 %2508 }
 0x56f   :  { %v1938_v3 = vadd.f32 %v13389_v62, %v1937_v1  ;;  %v2501_v27 = vpop.permute.xlu0 %2500  ;;  %v13417_v31 = vpop.permute.xlu2 %2470  ;;  %v2609_v1 = vsel %vm113_vm0, %v2350_v9, %v2509_v55  ;;  %v2336_v9 = vld [vmem:[#allocation6 + $0x1c8] sm:$0xff] }
 0x570   :  { %9441 = vmatmul.msk.f32.gmra.mxu2 %vm1250_vm3, %v1773_v28  ;;  %v2605_v30 = vsel %vm113_vm0, %v2346_v20, %v2501_v27  ;;  %v2590_v52 = vsel %vm113_vm0, %v2331_v14, %v13417_v31  ;;  %v1777_v20 = vsel %vm113_vm0, %v1519_v13, %v13339_v19  ;;  %v1762_v27 = vsel %vm113_vm0, %v1504_v46, %v13276_v35  ;;  %v2332_v19 = vld [vmem:[#allocation6 + $0x1a8] sm:$0xff] }
 0x571   :  { %2064 = vst.msk [vmem:[#allocation4 + $0x8] sm:$0xff] %vm18382_vm1, %v1938_v3  ;;  %9426 = vmatmul.msk.f32.gmra.mxu0 %vm1250_vm3, %v1758_v29  ;;  %9476 = vmatmul.msk.f32.gmra.mxu3 %vm1250_vm3, %v2605_v30  ;;  %v1520_v29 = vld [vmem:[#allocation6 + $0x128] sm:$0xff]  ;;  %v2351_v30 = vld [vmem:[#allocation6 + $0x240] sm:$0xff] }
 0x572   :  { %2151 = vrot.lane.b32.xlu2 %v1938_v3, %s12084_s25  ;;  %v2408_v3 = vld [vmem:[#allocation7 + $0x2a8] sm:$0xf]  ;;  %v1778_v16 = vsel %vm113_vm0, %v1520_v29, %v13337_v26  ;;  %v1524_v46 = vld [vmem:[#allocation6 + $0x148] sm:$0xff] }
 0x573   :  { %2536 = vrot.lane.b32.xlu0 %v2408_v3, %s12091_s26  ;;  %v1782_v3 = vsel %vm113_vm0, %v1524_v46, %v13308_v51  ;;  %v2356_v51 = vld [vmem:[#allocation6 + $0x268] sm:$0xff] }
 0x576   :  { %v1940_v38 = vpop.f32.mrf.mxu0  ;;  %v2511_v63 = vpop.permute.xlu1 %2510 }
 0x577   :  { %v13420_v43 = vadd.f32 %v13389_v62, %v1940_v38  ;;  %v2465_v39 = vpop.permute.xlu0 %2464  ;;  %v2473_v23 = vpop.permute.xlu2 %2472 }
 0x578   :  { %9442 = vmatmul.msk.f32.gmra.mxu2 %vm1250_vm3, %v1774_v41  ;;  %v2587_v22 = vsel %vm113_vm0, %v2328_v37, %v2465_v39  ;;  %v2591_v35 = vsel %vm113_vm0, %v2332_v19, %v2473_v23  ;;  %v2610_v37 = vsel %vm113_vm0, %v2351_v30, %v2511_v63  ;;  %v2333_v41 = vld [vmem:[#allocation6 + $0x1b0] sm:$0xff] }
 0x579   :  { %2065 = vst.msk [vmem:[#allocation4 + $0x10] sm:$0xff] %vm18382_vm1, %v13420_v43  ;;  %9427 = vmatmul.msk.f32.gmra.mxu0 %vm1250_vm3, %v1759_v18  ;;  %9458 = vmatmul.msk.f32.gmra.mxu1 %vm1250_vm3, %v2587_v22  ;;  %v2352_v18 = vld [vmem:[#allocation6 + $0x248] sm:$0xff] }
 0x57a   :  { %9477 = vmatmul.msk.f32.gmra.mxu3 %vm1250_vm3, %v2606_v42  ;;  %v1521_v42 = vld [vmem:[#allocation6 + $0x130] sm:$0xff] }
 0x57b   :  { %v1779_v47 = vsel %vm113_vm0, %v1521_v42, %v13296_v44  ;;  %v2353_v44 = vld [vmem:[#allocation6 + $0x250] sm:$0xff] }
 0x57e   :  { %v1943_v8 = vpop.f32.mrf.mxu0  ;;  %v2513_v15 = vpop.permute.xlu1 %2512 }
 0x57f   :  { %v13436_v49 = vadd.f32 %v13389_v62, %v1943_v8  ;;  %v2467_v50 = vpop.permute.xlu0 %2466  ;;  %v2475_v59 = vpop.permute.xlu2 %2474  ;;  %v2611_v24 = vsel %vm113_vm0, %v2352_v18, %v2513_v15 }
 0x580   :  { %9443 = vmatmul.msk.f32.gmra.mxu2 %vm1250_vm3, %v1775_v53  ;;  %v2588_v60 = vsel %vm113_vm0, %v2329_v45, %v2467_v50  ;;  %v2592_v26 = vsel %vm113_vm0, %v2333_v41, %v2475_v59  ;;  %v2334_v45 = vld [vmem:[#allocation6 + $0x1b8] sm:$0xff]  ;;  %v1523_v59 = vld [vmem:[#allocation6 + $0x140] sm:$0xff] }
 0x581   :  { %2066 = vst.msk [vmem:[#allocation4 + $0x18] sm:$0xff] %vm18382_vm1, %v13436_v49  ;;  %9428 = vmatmul.msk.f32.gmra.mxu0 %vm1250_vm3, %v1760_v6  ;;  %9459 = vmatmul.msk.f32.gmra.mxu1 %vm1250_vm3, %v2588_v60  ;;  %v1522_v53 = vld [vmem:[#allocation6 + $0x138] sm:$0xff] }
 0x582   :  { %9478 = vmatmul.msk.f32.gmra.mxu3 %vm1250_vm3, %v2607_v54  ;;  %v1780_v63 = vsel %vm113_vm0, %v1522_v53, %v13351_v36 }
 0x586   :  { %v1946_v48 = vpop.f32.mrf.mxu0  ;;  %v2477_v32 = vpop.permute.xlu1 %2476 }
 0x587   :  { %v13453_v2 = vadd.f32 %v13389_v62, %v1946_v48  ;;  %v2469_v4 = vpop.permute.xlu0 %2468  ;;  %v13480_v28 = vpop.permute.xlu2 %2520  ;;  %v2593_v6 = vsel %vm113_vm0, %v2334_v45, %v2477_v32  ;;  %v1525_v32 = vld [vmem:[#allocation6 + $0x150] sm:$0xf] }
 0x588   :  { %9444 = vmatmul.msk.f32.gmra.mxu2 %vm1250_vm3, %v1776_v40  ;;  %v2589_v12 = vsel %vm113_vm0, %v2330_v7, %v2469_v4  ;;  %v2335_v7 = vld [vmem:[#allocation6 + $0x1c0] sm:$0xff]  ;;  %v2354_v4 = vld [vmem:[#allocation6 + $0x258] sm:$0xff] }
 0x589   :  { %2067 = vst.msk [vmem:[#allocation4 + $0x20] sm:$0xff] %vm18382_vm1, %v13453_v2  ;;  %9429 = vmatmul.msk.f32.gmra.mxu0 %vm1250_vm3, %v1761_v11  ;;  %9460 = vmatmul.msk.f32.gmra.mxu1 %vm1250_vm3, %v2589_v12  ;;  %v1781_v12 = vsel %vm113_vm0, %v1523_v59, %v13349_v34  ;;  %v2358_v59 = vld [vmem:[#allocation6 + $0x278] sm:$0xff] }
 0x58a   :  { %9479 = vmatmul.msk.f32.gmra.mxu3 %vm1250_vm3, %v2608_v5 }
 0x58e   :  { %v1949_v0 = vpop.f32.mrf.mxu0  ;;  %v2479_v23 = vpop.permute.xlu1 %2478 }
 0x58f   :  { %v13472_v17 = vadd.f32 %v13389_v62, %v1949_v0  ;;  %v2515_v38 = vpop.permute.xlu0 %2514  ;;  %v13500_v39 = vpop.permute.xlu2 %2522  ;;  %v2594_v5 = vsel %vm113_vm0, %v2335_v7, %v2479_v23  ;;  %v2355_v0 = vld [vmem:[#allocation6 + $0x260] sm:$0xff]  ;;  %v2338_v23 = vld [vmem:[#allocation6 + $0x1d8] sm:$0xff] }
 0x590   :  { %9445 = vmatmul.msk.f32.gmra.mxu2 %vm1250_vm3, %v1777_v20  ;;  %v2612_v57 = vsel %vm113_vm0, %v2353_v44, %v2515_v38 }
 0x591   :  { %2068 = vst.msk [vmem:[#allocation4 + $0x28] sm:$0xff] %vm18382_vm1, %v13472_v17  ;;  %9430 = vmatmul.msk.f32.gmra.mxu0 %vm1250_vm3, %v1762_v27  ;;  %9461 = vmatmul.msk.f32.gmra.mxu1 %vm1250_vm3, %v2590_v52 }
 0x592   :  { %9480 = vmatmul.msk.f32.gmra.mxu3 %vm1250_vm3, %v2609_v1 }
 0x596   :  { %v1952_v31 = vpop.f32.mrf.mxu0  ;;  %v2481_v33 = vpop.permute.xlu1 %2480 }
 0x597   :  { %v13490_v56 = vadd.f32 %v13389_v62, %v1952_v31  ;;  %v2517_v8 = vpop.permute.xlu0 %2516  ;;  %v13517_v54 = vpop.permute.xlu2 %2524  ;;  %v2595_v20 = vsel %vm113_vm0, %v2336_v9, %v2481_v33  ;;  %v2337_v31 = vld [vmem:[#allocation6 + $0x1d0] sm:$0xff] }
 0x598   :  { %9446 = vmatmul.msk.f32.gmra.mxu2 %vm1250_vm3, %v1778_v16  ;;  %v2613_v14 = vsel %vm113_vm0, %v2354_v4, %v2517_v8 }
 0x599   :  { %2069 = vst.msk [vmem:[#allocation4 + $0x30] sm:$0xff] %vm18382_vm1, %v13490_v56  ;;  %9462 = vmatmul.msk.f32.gmra.mxu1 %vm1250_vm3, %v2591_v35 }
 0x59a   :  { %9481 = vmatmul.msk.f32.gmra.mxu3 %vm1250_vm3, %v2610_v37 }
 0x59e   :  { %v1955_v22 = vpop.f32.mrf.mxu0  ;;  %v13555_v52 = vpop.permute.xlu1 %2526 }
 0x59f   :  { %v13504_v55 = vadd.f32 %v13389_v62, %v1955_v22  ;;  %v2519_v36 = vpop.permute.xlu0 %2518  ;;  %v13539_v10 = vpop.permute.xlu2 %2488  ;;  %v2615_v22 = vsel %vm113_vm0, %v2356_v51, %v13480_v28 }
 0x5a0   :  { %9447 = vmatmul.msk.f32.gmra.mxu2 %vm1250_vm3, %v1779_v47  ;;  %v2614_v27 = vsel %vm113_vm0, %v2355_v0, %v2519_v36 }
 0x5a1   :  { %2070 = vst.msk [vmem:[#allocation4 + $0x38] sm:$0xff] %vm18382_vm1, %v13504_v55  ;;  %9463 = vmatmul.msk.f32.gmra.mxu1 %vm1250_vm3, %v2592_v26  ;;  %v1783_v26 = vsel %vm113_vm0, %v1525_v32, %v13364_v21 }
 0x5a2   :  { %9482 = vmatmul.msk.f32.gmra.mxu3 %vm1250_vm3, %v2611_v24 }
 0x5a3   :  { %v2000_v25 = vpop.f32.mrf.mxu2 }
 0x5a4   :  { %v13515_v50 = vadd.f32 %v13389_v62, %v2000_v25  ;;  %v2357_v25 = vld [vmem:[#allocation6 + $0x270] sm:$0xff] }
 0x5a6   :  { %2085 = vst.msk [vmem:[#allocation4 + $0xb0] sm:$0xff] %vm18382_vm1, %v13515_v50  ;;  %v1958_v58 = vpop.f32.mrf.mxu0  ;;  %v13580_v42 = vpop.permute.xlu1 %2528 }
 0x5a7   :  { %v13523_v60 = vadd.f32 %v13389_v62, %v1958_v58  ;;  %v2483_v19 = vpop.permute.xlu0 %2482  ;;  %v13567_v29 = vpop.permute.xlu2 %2490 }
 0x5a8   :  { %9448 = vmatmul.msk.f32.gmra.mxu2 %vm1250_vm3, %v1780_v63  ;;  %v2596_v41 = vsel %vm113_vm0, %v2337_v31, %v2483_v19 }
 0x5a9   :  { %2071 = vst.msk [vmem:[#allocation4 + $0x40] sm:$0xff] %vm18382_vm1, %v13523_v60  ;;  %9464 = vmatmul.msk.f32.gmra.mxu1 %vm1250_vm3, %v2593_v6  ;;  %v2616_v6 = vsel %vm113_vm0, %v2357_v25, %v13500_v39  ;;  %v2343_v25 = vld [vmem:[#allocation6 + $0x200] sm:$0xff] }
 0x5aa   :  { %9483 = vmatmul.msk.f32.gmra.mxu3 %vm1250_vm3, %v2612_v57 }
 0x5ab   :  { %v2003_v61 = vpop.f32.mrf.mxu2 }
 0x5ac   :  { %v13534_v48 = vadd.f32 %v13389_v62, %v2003_v61  ;;  %v2339_v61 = vld [vmem:[#allocation6 + $0x1e0] sm:$0xff] }
 0x5ae   :  { %2086 = vst.msk [vmem:[#allocation4 + $0xb8] sm:$0xff] %vm18382_vm1, %v13534_v48  ;;  %v1961_v40 = vpop.f32.mrf.mxu0  ;;  %v13614_v63 = vpop.permute.xlu1 %2530 }
 0x5af   :  { %v13542_v11 = vadd.f32 %v13389_v62, %v1961_v40  ;;  %v2485_v47 = vpop.permute.xlu0 %2484  ;;  %v13596_v24 = vpop.permute.xlu2 %2492 }
 0x5b0   :  { %9449 = vmatmul.msk.f32.gmra.mxu2 %vm1250_vm3, %v1781_v12  ;;  %v2597_v44 = vsel %vm113_vm0, %v2338_v23, %v2485_v47  ;;  %v2617_v12 = vsel %vm113_vm0, %v2358_v59, %v13517_v54 }
 0x5b1   :  { %2072 = vst.msk [vmem:[#allocation4 + $0x48] sm:$0xff] %vm18382_vm1, %v13542_v11  ;;  %9465 = vmatmul.msk.f32.gmra.mxu1 %vm1250_vm3, %v2594_v5 }
 0x5b2   :  { %9484 = vmatmul.msk.f32.gmra.mxu3 %vm1250_vm3, %v2613_v14 }
 0x5b3   :  { %v2006_v13 = vpop.f32.mrf.mxu2 }
 0x5b4   :  { %v13553_v15 = vadd.f32 %v13389_v62, %v2006_v13  ;;  %v2340_v13 = vld [vmem:[#allocation6 + $0x1e8] sm:$0xff] }
 0x5b6   :  { %2087 = vst.msk [vmem:[#allocation4 + $0xc0] sm:$0xff] %vm18382_vm1, %v13553_v15  ;;  %v1964_v34 = vpop.f32.mrf.mxu0  ;;  %v13643_v14 = vpop.permute.xlu1 %2494 }
 0x5b7   :  { %v13561_v1 = vadd.f32 %v13389_v62, %v1964_v34  ;;  %v2487_v33 = vpop.permute.xlu0 %2486 }
 0x5b8   :  { %9450 = vmatmul.msk.f32.gmra.mxu2 %vm1250_vm3, %v1782_v3  ;;  %v2598_v40 = vsel %vm113_vm0, %v2339_v61, %v2487_v33 }
 0x5b9   :  { %2073 = vst.msk [vmem:[#allocation4 + $0x50] sm:$0xff] %vm18382_vm1, %v13561_v1  ;;  %9466 = vmatmul.msk.f32.gmra.mxu1 %vm1250_vm3, %v2595_v20 }
 0x5ba   :  { %9485 = vmatmul.msk.f32.gmra.mxu3 %vm1250_vm3, %v2614_v27  ;;  %v2341_v27 = vld [vmem:[#allocation6 + $0x1f0] sm:$0xff] }
 0x5bb   :  { %v2009_v30 = vpop.f32.mrf.mxu2 }
 0x5bc   :  { %v13574_v35 = vadd.f32 %v13389_v62, %v2009_v30  ;;  %v2360_v30 = vld [vmem:[#allocation6 + $0x288] sm:$0xff] }
 0x5bd   :  { %v2770_v16 = vpop.f32.mrf.mxu1 }
 0x5be   :  { %2088 = vst.msk [vmem:[#allocation4 + $0xc8] sm:$0xff] %vm18382_vm1, %v13574_v35  ;;  %v1967_v37 = vpop.f32.mrf.mxu0  ;;  %v2771_v38 = vadd.f32 %v13389_v62, %v2770_v16  ;;  %v2619_v16 = vsel %vm113_vm0, %v2360_v30, %v13580_v42  ;;  %v2361_v42 = vld [vmem:[#allocation6 + $0x290] sm:$0xff] }
 0x5bf   :  { %v13583_v18 = vadd.f32 %v13389_v62, %v1967_v37  ;;  %v2342_v37 = vld [vmem:[#allocation6 + $0x1f8] sm:$0xff]  ;;  %v2620_v23 = vsel %vm113_vm0, %v2361_v42, %v13614_v63 }
 0x5c0   :  { %2900 = vst.msk [vmem:[#allocation4 + $0x158] sm:$0xff] %vm18382_vm1, %v2771_v38  ;;  %2986 = vrot.lane.b32.xlu0 %v2771_v38, %s12084_s25  ;;  %9451 = vmatmul.msk.f32.gmra.mxu2 %vm1250_vm3, %v1783_v26  ;;  %v2601_v47 = vsel %vm113_vm0, %v2342_v37, %v13596_v24 }
 0x5c1   :  { %2074 = vst.msk [vmem:[#allocation4 + $0x58] sm:$0xff] %vm18382_vm1, %v13583_v18  ;;  %9467 = vmatmul.msk.f32.gmra.mxu1 %vm1250_vm3, %v2596_v41 }
 0x5c2   :  { %9486 = vmatmul.msk.f32.gmra.mxu3 %vm1250_vm3, %v2615_v22 }
 0x5c3   :  { %v2012_v28 = vpop.f32.mrf.mxu2 }
 0x5c4   :  { %v13599_v21 = vadd.f32 %v13389_v62, %v2012_v28 }
 0x5c5   :  { %v2773_v45 = vpop.f32.mrf.mxu1 }
 0x5c6   :  { %2089 = vst.msk [vmem:[#allocation4 + $0xd0] sm:$0xff] %vm18382_vm1, %v13599_v21  ;;  %v1970_v8 = vpop.f32.mrf.mxu0  ;;  %v2774_v53 = vadd.f32 %v13389_v62, %v2773_v45 }
 0x5c7   :  { %v13606_v58 = vadd.f32 %v13389_v62, %v1970_v8 }
 0x5c8   :  { %2901 = vst.msk [vmem:[#allocation4 + $0x160] sm:$0xff] %vm18382_vm1, %v2774_v53  ;;  %2193 = vrot.lane.b32.xlu0 %v13515_v50, %s12084_s25  ;;  %2988 = vrot.lane.b32.xlu1 %v2774_v53, %s12084_s25 }
 0x5c9   :  { %2075 = vst.msk [vmem:[#allocation4 + $0x60] sm:$0xff] %vm18382_vm1, %v13606_v58  ;;  %9468 = vmatmul.msk.f32.gmra.mxu1 %vm1250_vm3, %v2597_v44  ;;  %v2602_v44 = vsel %vm113_vm0, %v2343_v25, %v13643_v14 }
 0x5ca   :  { %9487 = vmatmul.msk.f32.gmra.mxu3 %vm1250_vm3, %v2616_v6 }
 0x5cb   :  { %v2015_v57 = vpop.f32.mrf.mxu2 }
 0x5cc   :  { %v2152_v39 = vpop.permute.xlu2 %2151  ;;  %v13621_v7 = vadd.f32 %v13389_v62, %v2015_v57  ;;  %v2362_v57 = vld [vmem:[#allocation6 + $0x298] sm:$0xff] }
 0x5cd   :  { %2279 = vst.msk [vmem:[#allocation5 + $0x8] sm:$0xff] %vm18382_vm1, %v2152_v39  ;;  %v2776_v50 = vpop.f32.mrf.mxu1 }
 0x5ce   :  { %2090 = vst.msk [vmem:[#allocation4 + $0xd8] sm:$0xff] %vm18382_vm1, %v13621_v7  ;;  %v1973_v4 = vpop.f32.mrf.mxu0  ;;  %v2777_v36 = vadd.f32 %v13389_v62, %v2776_v50 }
 0x5cf   :  { %v13629_v5 = vadd.f32 %v13389_v62, %v1973_v4 }
 0x5d0   :  { %2902 = vst.msk [vmem:[#allocation4 + $0x168] sm:$0xff] %vm18382_vm1, %v2777_v36  ;;  %2153 = vrot.lane.b32.xlu0 %v13420_v43, %s12084_s25  ;;  %2990 = vrot.lane.b32.xlu2 %v2777_v36, %s12084_s25  ;;  %v2359_v43 = vld [vmem:[#allocation6 + $0x280] sm:$0xff] }
 0x5d1   :  { %2076 = vst.msk [vmem:[#allocation4 + $0x68] sm:$0xff] %vm18382_vm1, %v13629_v5  ;;  %9469 = vmatmul.msk.f32.gmra.mxu1 %vm1250_vm3, %v2598_v40  ;;  %2195 = vrot.lane.b32.xlu1 %v13534_v48, %s12084_s25  ;;  %v2599_v48 = vsel %vm113_vm0, %v2340_v13, %v13539_v10  ;;  %v2618_v3 = vsel %vm113_vm0, %v2359_v43, %v13555_v52 }
 0x5d2   :  { %9488 = vmatmul.msk.f32.gmra.mxu3 %vm1250_vm3, %v2617_v12  ;;  %v2363_v12 = vld [vmem:[#allocation6 + $0x2a0] sm:$0xff] }
 0x5d3   :  { %v2018_v54 = vpop.f32.mrf.mxu2 }
 0x5d4   :  { %v13646_v9 = vadd.f32 %v13389_v62, %v2018_v54  ;;  %v2533_v63 = vpop.permute.xlu0 %2532 }
 0x5d5   :  { %v2779_v46 = vpop.f32.mrf.mxu1  ;;  %v2621_v61 = vsel %vm113_vm0, %v2362_v57, %v2533_v63 }
 0x5d6   :  { %2091 = vst.msk [vmem:[#allocation4 + $0xe0] sm:$0xff] %vm18382_vm1, %v13646_v9  ;;  %v1976_v0 = vpop.f32.mrf.mxu0  ;;  %v2780_v34 = vadd.f32 %v13389_v62, %v2779_v46 }
 0x5d7   :  { %v13654_v20 = vadd.f32 %v13389_v62, %v1976_v0 }
 0x5d8   :  { %2903 = vst.msk [vmem:[#allocation4 + $0x170] sm:$0xff] %vm18382_vm1, %v2780_v34  ;;  %2992 = vrot.lane.b32.xlu0 %v2780_v34, %s12084_s25  ;;  %2197 = vrot.lane.b32.xlu2 %v13553_v15, %s12084_s25  ;;  %v2364_v34 = vld [vmem:[#allocation6 + $0x2a8] sm:$0xf] }
 0x5d9   :  { %2077 = vst.msk [vmem:[#allocation4 + $0x70] sm:$0xff] %vm18382_vm1, %v13654_v20  ;;  %9470 = vmatmul.msk.f32.gmra.mxu1 %vm1250_vm3, %v2599_v48  ;;  %2155 = vrot.lane.b32.xlu1 %v13436_v49, %s12084_s25  ;;  %v2600_v49 = vsel %vm113_vm0, %v2341_v27, %v13567_v29 }
 0x5da   :  { %9489 = vmatmul.msk.f32.gmra.mxu3 %vm1250_vm3, %v2618_v3 }
 0x5db   :  { %v2021_v10 = vpop.f32.mrf.mxu2 }
 0x5dc   :  { %v2150_v52 = vpop.permute.xlu1 %2149  ;;  %v13669_v19 = vadd.f32 %v13389_v62, %v2021_v10 }
 0x5dd   :  { %2278 = vst.msk [vmem:[#allocation5] sm:$0xff] %vm18382_vm1, %v2150_v52  ;;  %v2782_v15 = vpop.f32.mrf.mxu1  ;;  %v2535_v40 = vpop.permute.xlu0 %2534 }
 0x5de   :  { %2092 = vst.msk [vmem:[#allocation4 + $0xe8] sm:$0xff] %vm18382_vm1, %v13669_v19  ;;  %v1979_v31 = vpop.f32.mrf.mxu0  ;;  %v2783_v51 = vadd.f32 %v13389_v62, %v2782_v15  ;;  %v2622_v54 = vsel %vm113_vm0, %v2363_v12, %v2535_v40 }
 0x5df   :  { %v13678_v32 = vadd.f32 %v13389_v62, %v1979_v31 }
 0x5e0   :  { %2904 = vst.msk [vmem:[#allocation4 + $0x178] sm:$0xff] %vm18382_vm1, %v2783_v51  ;;  %2199 = vrot.lane.b32.xlu0 %v13574_v35, %s12084_s25 }
 0x5e1   :  { %2078 = vst.msk [vmem:[#allocation4 + $0x78] sm:$0xff] %vm18382_vm1, %v13678_v32  ;;  %2157 = vrot.lane.b32.xlu1 %v13453_v2, %s12084_s25  ;;  %9471 = vmatmul.msk.f32.gmra.mxu1 %vm1250_vm3, %v2600_v49 }
 0x5e2   :  { %9490 = vmatmul.msk.f32.gmra.mxu3 %vm1250_vm3, %v2619_v16 }
 0x5e3   :  { %v2024_v29 = vpop.f32.mrf.mxu2 }
 0x5e4   :  { %v13692_v38 = vadd.f32 %v13389_v62, %v2024_v29  ;;  %v2836_v41 = vpop.f32.mrf.mxu3 }
 0x5e5   :  { %v13695_v22 = vadd.f32 %v13389_v62, %v2836_v41  ;;  %v2785_v35 = vpop.f32.mrf.mxu1  ;;  %v2537_v0 = vpop.permute.xlu0 %2536 }
 0x5e6   :  { %2093 = vst.msk [vmem:[#allocation4 + $0xf0] sm:$0xff] %vm18382_vm1, %v13692_v38  ;;  %v1982_v26 = vpop.f32.mrf.mxu0  ;;  %v2786_v2 = vadd.f32 %v13389_v62, %v2785_v35  ;;  %v2623_v3 = vsel %vm113_vm0, %v2364_v34, %v2537_v0 }
 0x5e7   :  { %2922 = vst.msk [vmem:[#allocation4 + $0x208] sm:$0xff] %vm18382_vm1, %v13695_v22  ;;  %v13705_v28 = vadd.f32 %v13389_v62, %v1982_v26 }
 0x5e8   :  { %2905 = vst.msk [vmem:[#allocation4 + $0x180] sm:$0xff] %vm18382_vm1, %v2786_v2  ;;  %2161 = vrot.lane.b32.xlu0 %v13490_v56, %s12084_s25  ;;  %2996 = vrot.lane.b32.xlu2 %v2786_v2, %s12084_s25 }
 0x5e9   :  { %2079 = vst.msk [vmem:[#allocation4 + $0x80] sm:$0xff] %vm18382_vm1, %v13705_v28  ;;  %2994 = vrot.lane.b32.xlu1 %v2783_v51, %s12084_s25  ;;  %9472 = vmatmul.msk.f32.gmra.mxu1 %vm1250_vm3, %v2601_v47 }
 0x5ea   :  { %9491 = vmatmul.msk.f32.gmra.mxu3 %vm1250_vm3, %v2620_v23 }
 0x5eb   :  { %v2027_v24 = vpop.f32.mrf.mxu2 }
 0x5ec   :  { %v13719_v45 = vadd.f32 %v13389_v62, %v2027_v24  ;;  %v2839_v8 = vpop.f32.mrf.mxu3 }
 0x5ed   :  { %v13722_v53 = vadd.f32 %v13389_v62, %v2839_v8 }
 0x5ee   :  { %2094 = vst.msk [vmem:[#allocation4 + $0xf8] sm:$0xff] %vm18382_vm1, %v13719_v45  ;;  %v1985_v56 = vpop.f32.mrf.mxu0 }
 0x5ef   :  { %2923 = vst.msk [vmem:[#allocation4 + $0x210] sm:$0xff] %vm18382_vm1, %v13722_v53  ;;  %v13731_v6 = vadd.f32 %v13389_v62, %v1985_v56 }
 0x5f0   :  { %2205 = vrot.lane.b32.xlu0 %v13646_v9, %s12084_s25  ;;  %2203 = vrot.lane.b32.xlu2 %v13621_v7, %s12084_s25 }
 0x5f1   :  { %2080 = vst.msk [vmem:[#allocation4 + $0x88] sm:$0xff] %vm18382_vm1, %v13731_v6  ;;  %2201 = vrot.lane.b32.xlu1 %v13599_v21, %s12084_s25  ;;  %9473 = vmatmul.msk.f32.gmra.mxu1 %vm1250_vm3, %v2602_v44 }
 0x5f2   :  { %9492 = vmatmul.msk.f32.gmra.mxu3 %vm1250_vm3, %v2621_v61 }
 0x5f3   :  { %v2030_v33 = vpop.f32.mrf.mxu2 }
 0x5f4   :  { %v13744_v39 = vadd.f32 %v13389_v62, %v2030_v33  ;;  %v2842_v59 = vpop.f32.mrf.mxu3 }
 0x5f5   :  { %v13748_v7 = vadd.f32 %v13389_v62, %v2842_v59 }
 0x5f6   :  { %2095 = vst.msk [vmem:[#allocation4 + $0x100] sm:$0xff] %vm18382_vm1, %v13744_v39  ;;  %v1988_v21 = vpop.f32.mrf.mxu0  ;;  %v2788_v50 = vpop.f32.mrf.mxu1 }
 0x5f7   :  { %2924 = vst.msk [vmem:[#allocation4 + $0x218] sm:$0xff] %vm18382_vm1, %v13748_v7  ;;  %v13755_v4 = vadd.f32 %v13389_v62, %v1988_v21  ;;  %v2789_v36 = vadd.f32 %v13389_v62, %v2788_v50 }
 0x5f8   :  { %2163 = vrot.lane.b32.xlu0 %v13504_v55, %s12084_s25  ;;  %2165 = vrot.lane.b32.xlu2 %v13523_v60, %s12084_s25 }
 0x5f9   :  { %2081 = vst.msk [vmem:[#allocation4 + $0x90] sm:$0xff] %vm18382_vm1, %v13755_v4  ;;  %2159 = vrot.lane.b32.xlu1 %v13472_v17, %s12084_s25 }
 0x5fa   :  { %2906 = vst.msk [vmem:[#allocation4 + $0x188] sm:$0xff] %vm18382_vm1, %v2789_v36  ;;  %9493 = vmatmul.msk.f32.gmra.mxu3 %vm1250_vm3, %v2622_v54 }
 0x5fb   :  { %v2033_v14 = vpop.f32.mrf.mxu2 }
 0x5fc   :  { %v13769_v13 = vadd.f32 %v13389_v62, %v2033_v14 }
 0x5fd   :  { %v2845_v55 = vpop.f32.mrf.mxu3 }
 0x5fe   :  { %2096 = vst.msk [vmem:[#allocation4 + $0x108] sm:$0xff] %vm18382_vm1, %v13769_v13  ;;  %v13775_v60 = vadd.f32 %v13389_v62, %v2845_v55  ;;  %v1991_v17 = vpop.f32.mrf.mxu0  ;;  %v2791_v9 = vpop.f32.mrf.mxu1 }
 0x5ff   :  { %v13778_v43 = vadd.f32 %v13389_v62, %v1991_v17  ;;  %v2792_v46 = vadd.f32 %v13389_v62, %v2791_v9 }
 0x600   :  { %2925 = vst.msk [vmem:[#allocation4 + $0x220] sm:$0xff] %vm18382_vm1, %v13775_v60  ;;  %2998 = vrot.lane.b32.xlu0 %v2789_v36, %s12084_s25 }
 0x601   :  { %2082 = vst.msk [vmem:[#allocation4 + $0x98] sm:$0xff] %vm18382_vm1, %v13778_v43  ;;  %3000 = vrot.lane.b32.xlu1 %v2792_v46, %s12084_s25 }
 0x602   :  { %2907 = vst.msk [vmem:[#allocation4 + $0x190] sm:$0xff] %vm18382_vm1, %v2792_v46  ;;  %9494 = vmatmul.msk.f32.gmra.mxu3 %vm1250_vm3, %v2623_v3 }
 0x603   :  { %v2036_v48 = vpop.f32.mrf.mxu2 }
 0x604   :  { %v2037_v10 = vadd.f32 %v13389_v62, %v2036_v48 }
 0x605   :  { %v2848_v27 = vpop.f32.mrf.mxu3 }
 0x606   :  { %2097 = vst.msk [vmem:[#allocation4 + $0x110] sm:$0xff] %vm18382_vm1, %v2037_v10  ;;  %v13793_v52 = vadd.f32 %v13389_v62, %v2848_v27  ;;  %v1994_v30 = vpop.f32.mrf.mxu0  ;;  %v2794_v15 = vpop.f32.mrf.mxu1 }
 0x607   :  { %v13796_v31 = vadd.f32 %v13389_v62, %v1994_v30  ;;  %v2795_v51 = vadd.f32 %v13389_v62, %v2794_v15 }
 0x608   :  { %2926 = vst.msk [vmem:[#allocation4 + $0x228] sm:$0xff] %vm18382_vm1, %v13793_v52 }
 0x609   :  { %2083 = vst.msk [vmem:[#allocation4 + $0xa0] sm:$0xff] %vm18382_vm1, %v13796_v31  ;;  %3002 = vrot.lane.b32.xlu2 %v2795_v51, %s12084_s25  ;;  %2207 = vrot.lane.b32.xlu1 %v13669_v19, %s12084_s25 }
 0x60a   :  { %2908 = vst.msk [vmem:[#allocation4 + $0x198] sm:$0xff] %vm18382_vm1, %v2795_v51 }
 0x60b   :  { %v2039_v49 = vpop.f32.mrf.mxu2 }
 0x60c   :  { %v13808_v16 = vadd.f32 %v13389_v62, %v2039_v49 }
 0x60d   :  { %v2851_v29 = vpop.f32.mrf.mxu3 }
 0x60e   :  { %2098 = vst.msk [vmem:[#allocation4 + $0x118] sm:$0xff] %vm18382_vm1, %v13808_v16  ;;  %v13813_v37 = vadd.f32 %v13389_v62, %v2851_v29  ;;  %v1997_v41 = vpop.f32.mrf.mxu0  ;;  %v2797_v42 = vpop.f32.mrf.mxu1 }
 0x60f   :  { %v13816_v35 = vadd.f32 %v13389_v62, %v1997_v41  ;;  %v2798_v19 = vadd.f32 %v13389_v62, %v2797_v42 }
 0x610   :  { %2927 = vst.msk [vmem:[#allocation4 + $0x230] sm:$0xff] %vm18382_vm1, %v13813_v37 }
 0x611   :  { %2084 = vst.msk [vmem:[#allocation4 + $0xa8] sm:$0xff] %vm18382_vm1, %v13816_v35  ;;  %3004 = vrot.lane.b32.xlu0 %v2798_v19, %s12084_s25  ;;  %2209 = vrot.lane.b32.xlu2 %v13692_v38, %s12084_s25 }
 0x612   :  { %2909 = vst.msk [vmem:[#allocation4 + $0x1a0] sm:$0xff] %vm18382_vm1, %v2798_v19  ;;  %2169 = vrot.lane.b32.xlu1 %v13561_v1, %s12084_s25 }
 0x613   :  { %v2042_v26 = vpop.f32.mrf.mxu2 }
 0x614   :  { %v13830_v2 = vadd.f32 %v13389_v62, %v2042_v26 }
 0x615   :  { %v2854_v47 = vpop.f32.mrf.mxu3 }
 0x616   :  { %2099 = vst.msk [vmem:[#allocation4 + $0x120] sm:$0xff] %vm18382_vm1, %v13830_v2  ;;  %v13835_v23 = vadd.f32 %v13389_v62, %v2854_v47  ;;  %v2800_v24 = vpop.f32.mrf.mxu1 }
 0x617   :  { %v2801_v25 = vadd.f32 %v13389_v62, %v2800_v24 }
 0x618   :  { %2928 = vst.msk [vmem:[#allocation4 + $0x238] sm:$0xff] %vm18382_vm1, %v13835_v23 }
 0x619   :  { %2910 = vst.msk [vmem:[#allocation4 + $0x1a8] sm:$0xff] %vm18382_vm1, %v2801_v25  ;;  %2211 = vrot.lane.b32.xlu0 %v13719_v45, %s12084_s25  ;;  %2167 = vrot.lane.b32.xlu2 %v13542_v11, %s12084_s25 }
 0x61a   :  { %3006 = vrot.lane.b32.xlu1 %v2801_v25, %s12084_s25 }
 0x61b   :  { %v2045_v1 = vpop.f32.mrf.mxu2 }
 0x61c   :  { %v13847_v38 = vadd.f32 %v13389_v62, %v2045_v1 }
 0x61d   :  { %v2857_v8 = vpop.f32.mrf.mxu3 }
 0x61e   :  { %2100 = vst.msk [vmem:[#allocation4 + $0x128] sm:$0xff] %vm18382_vm1, %v13847_v38  ;;  %v13852_v56 = vadd.f32 %v13389_v62, %v2857_v8  ;;  %v2803_v44 = vpop.f32.mrf.mxu1  ;;  %v13975_v8 = vld [vmem:[%s18362_s4] ss:$0 sm:$0xff] }
 0x61f   :  { %v2804_v63 = vadd.f32 %v13389_v62, %v2803_v44 }
 0x620   :  { %2929 = vst.msk [vmem:[#allocation4 + $0x240] sm:$0xff] %vm18382_vm1, %v13852_v56 }
 0x621   :  { %2911 = vst.msk [vmem:[#allocation4 + $0x1b0] sm:$0xff] %vm18382_vm1, %v2804_v63  ;;  %2173 = vrot.lane.b32.xlu0 %v13606_v58, %s12084_s25  ;;  %3008 = vrot.lane.b32.xlu2 %v2804_v63, %s12084_s25 }
 0x622   :  { %2213 = vrot.lane.b32.xlu1 %v13744_v39, %s12084_s25 }
 0x623   :  { %v2048_v11 = vpop.f32.mrf.mxu2 }
 0x624   :  { %v13864_v45 = vadd.f32 %v13389_v62, %v2048_v11 }
 0x625   :  { %v2860_v57 = vpop.f32.mrf.mxu3 }
 0x626   :  { %2101 = vst.msk [vmem:[#allocation4 + $0x130] sm:$0xff] %vm18382_vm1, %v13864_v45  ;;  %v13869_v33 = vadd.f32 %v13389_v62, %v2860_v57  ;;  %v2806_v61 = vpop.f32.mrf.mxu1 }
 0x627   :  { %v2807_v59 = vadd.f32 %v13389_v62, %v2806_v61 }
 0x628   :  { %2930 = vst.msk [vmem:[#allocation4 + $0x248] sm:$0xff] %vm18382_vm1, %v13869_v33 }
 0x629   :  { %2912 = vst.msk [vmem:[#allocation4 + $0x1b8] sm:$0xff] %vm18382_vm1, %v2807_v59  ;;  %2217 = vrot.lane.b32.xlu0 %v2037_v10, %s12084_s25  ;;  %2215 = vrot.lane.b32.xlu2 %v13769_v13, %s12084_s25 }
 0x62a   :  { %2171 = vrot.lane.b32.xlu1 %v13583_v18, %s12084_s25  ;;  %v2991_v58 = vpop.permute.xlu2 %2990 }
 0x62b   :  { %3118 = vst.msk [vmem:[#allocation5 + $0x168] sm:$0xff] %vm18382_vm1, %v2991_v58  ;;  %v2051_v39 = vpop.f32.mrf.mxu2 }
 0x62c   :  { %v13882_v21 = vadd.f32 %v13389_v62, %v2051_v39 }
 0x62d   :  { %v2863_v50 = vpop.f32.mrf.mxu3 }
 0x62e   :  { %2102 = vst.msk [vmem:[#allocation4 + $0x138] sm:$0xff] %vm18382_vm1, %v13882_v21  ;;  %v13887_v36 = vadd.f32 %v13389_v62, %v2863_v50  ;;  %v2809_v40 = vpop.f32.mrf.mxu1 }
 0x62f   :  { %v2810_v12 = vadd.f32 %v13389_v62, %v2809_v40 }
 0x630   :  { %2931 = vst.msk [vmem:[#allocation4 + $0x250] sm:$0xff] %vm18382_vm1, %v13887_v36 }
 0x631   :  { %2913 = vst.msk [vmem:[#allocation4 + $0x1c0] sm:$0xff] %vm18382_vm1, %v2810_v12  ;;  %2175 = vrot.lane.b32.xlu0 %v13629_v5, %s12084_s25  ;;  %3032 = vrot.lane.b32.xlu2 %v13722_v53, %s12084_s25 }
 0x632   :  { %3030 = vrot.lane.b32.xlu1 %v13695_v22, %s12084_s25  ;;  %v2987_v18 = vpop.permute.xlu0 %2986  ;;  %v2198_v14 = vpop.permute.xlu2 %2197 }
 0x633   :  { %3116 = vst.msk [vmem:[#allocation5 + $0x158] sm:$0xff] %vm18382_vm1, %v2987_v18  ;;  %v2054_v54 = vpop.f32.mrf.mxu2 }
 0x634   :  { %2302 = vst.msk [vmem:[#allocation5 + $0xc0] sm:$0xff] %vm18382_vm1, %v2198_v14  ;;  %v13902_v13 = vadd.f32 %v13389_v62, %v2054_v54 }
 0x635   :  { %v2866_v55 = vpop.f32.mrf.mxu3 }
 0x636   :  { %2103 = vst.msk [vmem:[#allocation4 + $0x140] sm:$0xff] %vm18382_vm1, %v13902_v13  ;;  %v13907_v5 = vadd.f32 %v13389_v62, %v2866_v55  ;;  %v2812_v53 = vpop.f32.mrf.mxu1 }
 0x637   :  { %v2813_v22 = vadd.f32 %v13389_v62, %v2812_v53 }
 0x638   :  { %2932 = vst.msk [vmem:[#allocation4 + $0x258] sm:$0xff] %vm18382_vm1, %v13907_v5 }
 0x639   :  { %2914 = vst.msk [vmem:[#allocation4 + $0x1c8] sm:$0xff] %vm18382_vm1, %v2813_v22  ;;  %3010 = vrot.lane.b32.xlu0 %v2807_v59, %s12084_s25  ;;  %2177 = vrot.lane.b32.xlu2 %v13654_v20, %s12084_s25 }
 0x63a   :  { %3012 = vrot.lane.b32.xlu1 %v2810_v12, %s12084_s25  ;;  %v2194_v17 = vpop.permute.xlu0 %2193  ;;  %v2989_v9 = vpop.permute.xlu1 %2988 }
 0x63b   :  { %2300 = vst.msk [vmem:[#allocation5 + $0xb0] sm:$0xff] %vm18382_vm1, %v2194_v17  ;;  %v2057_v46 = vpop.f32.mrf.mxu2 }
 0x63c   :  { %3117 = vst.msk [vmem:[#allocation5 + $0x160] sm:$0xff] %vm18382_vm1, %v2989_v9  ;;  %v13920_v0 = vadd.f32 %v13389_v62, %v2057_v46 }
 0x63d   :  { %v2869_v34 = vpop.f32.mrf.mxu3 }
 0x63e   :  { %2104 = vst.msk [vmem:[#allocation4 + $0x148] sm:$0xff] %vm18382_vm1, %v13920_v0  ;;  %v13925_v48 = vadd.f32 %v13389_v62, %v2869_v34  ;;  %v2815_v20 = vpop.f32.mrf.mxu1 }
 0x63f   :  { %v2816_v3 = vadd.f32 %v13389_v62, %v2815_v20 }
 0x640   :  { %2933 = vst.msk [vmem:[#allocation4 + $0x260] sm:$0xff] %vm18382_vm1, %v13925_v48 }
 0x641   :  { %2915 = vst.msk [vmem:[#allocation4 + $0x1d0] sm:$0xff] %vm18382_vm1, %v2816_v3  ;;  %3016 = vrot.lane.b32.xlu0 %v2816_v3, %s12084_s25  ;;  %3014 = vrot.lane.b32.xlu2 %v2813_v22, %s12084_s25 }
 0x642   :  { %2219 = vrot.lane.b32.xlu1 %v13808_v16, %s12084_s25  ;;  %v2154_v10 = vpop.permute.xlu0 %2153  ;;  %v2997_v27 = vpop.permute.xlu2 %2996 }
 0x643   :  { %2280 = vst.msk [vmem:[#allocation5 + $0x10] sm:$0xff] %vm18382_vm1, %v2154_v10  ;;  %v2196_v30 = vpop.permute.xlu1 %2195  ;;  %v2060_v15 = vpop.f32.mrf.mxu2 }
 0x644   :  { %3121 = vst.msk [vmem:[#allocation5 + $0x180] sm:$0xff] %vm18382_vm1, %v2997_v27  ;;  %v13938_v51 = vadd.f32 %v13389_v62, %v2060_v15 }
 0x645   :  { %2301 = vst.msk [vmem:[#allocation5 + $0xb8] sm:$0xff] %vm18382_vm1, %v2196_v30  ;;  %v2872_v49 = vpop.f32.mrf.mxu3 }
 0x646   :  { %2105 = vst.msk [vmem:[#allocation4 + $0x150] sm:$0xf] %vm432_vm2, %v13938_v51  ;;  %v13944_v29 = vadd.f32 %v13389_v62, %v2872_v49  ;;  %v2818_v16 = vpop.f32.mrf.mxu1 }
 0x647   :  { %v2819_v41 = vadd.f32 %v13389_v62, %v2818_v16 }
 0x648   :  { %2934 = vst.msk [vmem:[#allocation4 + $0x268] sm:$0xff] %vm18382_vm1, %v13944_v29 }
 0x649   :  { %2916 = vst.msk [vmem:[#allocation4 + $0x1d8] sm:$0xff] %vm18382_vm1, %v2819_v41  ;;  %2223 = vrot.lane.b32.xlu0 %v13847_v38, %s12084_s25  ;;  %2221 = vrot.lane.b32.xlu2 %v13830_v2, %s12084_s25 }
 0x64a   :  { %2181 = vrot.lane.b32.xlu1 %v13705_v28, %s12084_s25  ;;  %v2993_v42 = vpop.permute.xlu0 %2992  ;;  %v2204_v19 = vpop.permute.xlu2 %2203 }
 0x64b   :  { %3119 = vst.msk [vmem:[#allocation5 + $0x170] sm:$0xff] %vm18382_vm1, %v2993_v42  ;;  %v2156_v26 = vpop.permute.xlu1 %2155 }
 0x64c   :  { %2305 = vst.msk [vmem:[#allocation5 + $0xd8] sm:$0xff] %vm18382_vm1, %v2204_v19 }
 0x64d   :  { %2281 = vst.msk [vmem:[#allocation5 + $0x18] sm:$0xff] %vm18382_vm1, %v2156_v26  ;;  %v2875_v47 = vpop.f32.mrf.mxu3 }
 0x64e   :  { %v13960_v24 = vadd.f32 %v13389_v62, %v2875_v47  ;;  %v2821_v25 = vpop.f32.mrf.mxu1 }
 0x64f   :  { %v2822_v1 = vadd.f32 %v13389_v62, %v2821_v25 }
 0x650   :  { %2935 = vst.msk [vmem:[#allocation4 + $0x270] sm:$0xff] %vm18382_vm1, %v13960_v24 }
 0x651   :  { %2917 = vst.msk [vmem:[#allocation4 + $0x1e0] sm:$0xff] %vm18382_vm1, %v2822_v1  ;;  %2179 = vrot.lane.b32.xlu2 %v13678_v32, %s12084_s25 }
 0x652   :  { %3018 = vrot.lane.b32.xlu1 %v2819_v41, %s12084_s25  ;;  %v2200_v28 = vpop.permute.xlu0 %2199  ;;  %v2166_v2 = vpop.permute.xlu2 %2165 }
 0x653   :  { %2303 = vst.msk [vmem:[#allocation5 + $0xc8] sm:$0xff] %vm18382_vm1, %v2200_v28  ;;  %v2158_v38 = vpop.permute.xlu1 %2157 }
 0x654   :  { %2286 = vst.msk [vmem:[#allocation5 + $0x40] sm:$0xff] %vm18382_vm1, %v2166_v2 }
 0x655   :  { %2282 = vst.msk [vmem:[#allocation5 + $0x20] sm:$0xff] %vm18382_vm1, %v2158_v38  ;;  %v2878_v62 = vpop.f32.mrf.mxu3 }
 0x656   :  { %v13978_v44 = vadd.f32 %v13975_v8, %v2878_v62  ;;  %v2824_v32 = vpop.f32.mrf.mxu1 }
 0x657   :  { %v2825_v63 = vadd.f32 %v13975_v8, %v2824_v32 }
 0x658   :  { %2936 = vst.msk [vmem:[#allocation4 + $0x278] sm:$0xff] %vm18382_vm1, %v13978_v44 }
 0x659   :  { %2918 = vst.msk [vmem:[#allocation4 + $0x1e8] sm:$0xff] %vm18382_vm1, %v2825_v63  ;;  %3022 = vrot.lane.b32.xlu0 %v2825_v63, %s12084_s25  ;;  %3020 = vrot.lane.b32.xlu2 %v2822_v1, %s12084_s25 }
 0x65a   :  { %2225 = vrot.lane.b32.xlu1 %v13864_v45, %s12084_s25  ;;  %v2162_v11 = vpop.permute.xlu0 %2161 }
 0x65b   :  { %2284 = vst.msk [vmem:[#allocation5 + $0x30] sm:$0xff] %vm18382_vm1, %v2162_v11  ;;  %v2995_v57 = vpop.permute.xlu1 %2994 }
 0x65c   :  { %3120 = vst.msk [vmem:[#allocation5 + $0x178] sm:$0xff] %vm18382_vm1, %v2995_v57 }
 0x65d   :  { %v2881_v61 = vpop.f32.mrf.mxu3 }
 0x65e   :  { %v13991_v59 = vadd.f32 %v13975_v8, %v2881_v61  ;;  %v2827_v58 = vpop.f32.mrf.mxu1 }
 0x65f   :  { %v2828_v39 = vadd.f32 %v13975_v8, %v2827_v58 }
 0x660   :  { %2937 = vst.msk [vmem:[#allocation4 + $0x280] sm:$0xff] %vm18382_vm1, %v13991_v59 }
 0x661   :  { %2229 = vrot.lane.b32.xlu0 %v13902_v13, %s12084_s25  ;;  %2227 = vrot.lane.b32.xlu2 %v13882_v21, %s12084_s25  ;;  %2919 = vst.msk [vmem:[#allocation4 + $0x1f0] sm:$0xff] %vm18382_vm1, %v2828_v39 }
 0x662   :  { %2183 = vrot.lane.b32.xlu1 %v13731_v6, %s12084_s25  ;;  %v2206_v45 = vpop.permute.xlu0 %2205 }
 0x663   :  { %2306 = vst.msk [vmem:[#allocation5 + $0xe0] sm:$0xff] %vm18382_vm1, %v2206_v45  ;;  %v3003_v50 = vpop.permute.xlu2 %3002  ;;  %v2202_v40 = vpop.permute.xlu1 %2201 }
 0x664   :  { %3124 = vst.msk [vmem:[#allocation5 + $0x198] sm:$0xff] %vm18382_vm1, %v3003_v50 }
 0x665   :  { %2304 = vst.msk [vmem:[#allocation5 + $0xd0] sm:$0xff] %vm18382_vm1, %v2202_v40  ;;  %v2884_v12 = vpop.f32.mrf.mxu3 }
 0x666   :  { %v14007_v18 = vadd.f32 %v13975_v8, %v2884_v12  ;;  %v2830_v14 = vpop.f32.mrf.mxu1 }
 0x667   :  { %v2831_v21 = vadd.f32 %v13975_v8, %v2830_v14 }
 0x668   :  { %2938 = vst.msk [vmem:[#allocation4 + $0x288] sm:$0xff] %vm18382_vm1, %v14007_v18 }
 0x669   :  { %2187 = vrot.lane.b32.xlu0 %v13778_v43, %s12084_s25  ;;  %2185 = vrot.lane.b32.xlu2 %v13755_v4, %s12084_s25  ;;  %2920 = vst.msk [vmem:[#allocation4 + $0x1f8] sm:$0xff] %vm18382_vm1, %v2831_v21 }
 0x66a   :  { %3024 = vrot.lane.b32.xlu1 %v2828_v39, %s12084_s25  ;;  %v2164_v6 = vpop.permute.xlu0 %2163 }
 0x66b   :  { %2285 = vst.msk [vmem:[#allocation5 + $0x38] sm:$0xff] %vm18382_vm1, %v2164_v6  ;;  %v2210_v54 = vpop.permute.xlu2 %2209  ;;  %v2160_v13 = vpop.permute.xlu1 %2159 }
 0x66c   :  { %2308 = vst.msk [vmem:[#allocation5 + $0xf0] sm:$0xff] %vm18382_vm1, %v2210_v54  ;;  %v14133_v54 = vld [vmem:[%s18363_s5 + $0x20] sm:$0xff] }
 0x66d   :  { %2283 = vst.msk [vmem:[#allocation5 + $0x28] sm:$0xff] %vm18382_vm1, %v2160_v13  ;;  %v2887_v55 = vpop.f32.mrf.mxu3  ;;  %v14138_v13 = vld [vmem:[%s18363_s5 + $0x28] sm:$0xff] }
 0x66e   :  { %v14022_v53 = vadd.f32 %v13975_v8, %v2887_v55  ;;  %v2833_v43 = vpop.f32.mrf.mxu1  ;;  %v14143_v55 = vld [vmem:[%s18363_s5 + $0x30] sm:$0xff] }
 0x66f   :  { %v2834_v4 = vadd.f32 %v13975_v8, %v2833_v43  ;;  %v14154_v43 = vld [vmem:[%s18364_s6 + $0x1] sm:$0x1] }
 0x670   :  { %2939 = vst.msk [vmem:[#allocation4 + $0x290] sm:$0xff] %vm18382_vm1, %v14022_v53 }
 0x671   :  { %3034 = vrot.lane.b32.xlu0 %v13748_v7, %s12084_s25  ;;  %3038 = vrot.lane.b32.xlu2 %v13793_v52, %s12084_s25  ;;  %2921 = vst.msk [vmem:[#allocation4 + $0x200] sm:$0xff] %vm18382_vm1, %v2834_v4 }
 0x672   :  { %2231 = vrot.lane.b32.xlu1 %v13920_v0, %s12084_s25  ;;  %v2999_v22 = vpop.permute.xlu0 %2998 }
 0x673   :  { %3122 = vst.msk [vmem:[#allocation5 + $0x188] sm:$0xff] %vm18382_vm1, %v2999_v22  ;;  %v2168_v17 = vpop.permute.xlu2 %2167  ;;  %v3001_v9 = vpop.permute.xlu1 %3000 }
 0x674   :  { %2287 = vst.msk [vmem:[#allocation5 + $0x48] sm:$0xff] %vm18382_vm1, %v2168_v17 }
 0x675   :  { %3123 = vst.msk [vmem:[#allocation5 + $0x190] sm:$0xff] %vm18382_vm1, %v3001_v9  ;;  %v2890_v46 = vpop.f32.mrf.mxu3 }
 0x676   :  { %v2891_v7 = vadd.f32 %v13975_v8, %v2890_v46 }
 0x678   :  { %2940 = vst.msk [vmem:[#allocation4 + $0x298] sm:$0xff] %vm18382_vm1, %v2891_v7 }
 0x679   :  { %3028 = vrot.lane.b32.xlu0 %v2834_v4, %s12084_s25  ;;  %3026 = vrot.lane.b32.xlu2 %v2831_v21, %s12084_s25 }
 0x67a   :  { %2189 = vrot.lane.b32.xlu1 %v13796_v31, %s12084_s25 }
 0x67b   :  { %v3009_v52 = vpop.permute.xlu2 %3008  ;;  %v2208_v0 = vpop.permute.xlu1 %2207 }
 0x67c   :  { %3127 = vst.msk [vmem:[#allocation5 + $0x1b0] sm:$0xff] %vm18382_vm1, %v3009_v52 }
 0x67d   :  { %2307 = vst.msk [vmem:[#allocation5 + $0xe8] sm:$0xff] %vm18382_vm1, %v2208_v0  ;;  %v2893_v34 = vpop.f32.mrf.mxu3 }
 0x67e   :  { %v2894_v20 = vadd.f32 %v13975_v8, %v2893_v34 }
 0x680   :  { %2941 = vst.msk [vmem:[#allocation4 + $0x2a0] sm:$0xff] %vm18382_vm1, %v2894_v20 }
 0x681   :  { %3040 = vrot.lane.b32.xlu0 %v13813_v37, %s12084_s25  ;;  %2233 = vrot.lane.b32.xlu2 %v13938_v51, %s12084_s25 }
 0x682   :  { %3036 = vrot.lane.b32.xlu1 %v13775_v60, %s12084_s25 }
 0x683   :  { %v3005_v31 = vpop.permute.xlu0 %3004  ;;  %v2216_v3 = vpop.permute.xlu2 %2215 }
 0x684   :  { %3125 = vst.msk [vmem:[#allocation5 + $0x1a0] sm:$0xff] %vm18382_vm1, %v3005_v31  ;;  %v2170_v10 = vpop.permute.xlu1 %2169  ;;  %v14166_v31 = vmov 0.0  }
 0x685   :  { %2311 = vst.msk [vmem:[#allocation5 + $0x108] sm:$0xff] %vm18382_vm1, %v2216_v3  ;;  %v2896_v27 = vpop.f32.mrf.mxu3 }
 0x686   :  { %2288 = vst.msk [vmem:[#allocation5 + $0x50] sm:$0xff] %vm18382_vm1, %v2170_v10  ;;  %v2897_v37 = vadd.f32 %v13975_v8, %v2896_v27 }
 0x688   :  { %2942 = vst.msk [vmem:[#allocation4 + $0x2a8] sm:$0xf] %vm432_vm2, %v2897_v37 }
 0x689   :  { %3046 = vrot.lane.b32.xlu0 %v13869_v33, %s12084_s25  ;;  %2191 = vrot.lane.b32.xlu2 %v13816_v35, %s12084_s25 }
 0x68a   :  { %3042 = vrot.lane.b32.xlu1 %v13835_v23, %s12084_s25 }
 0x68b   :  { %v2212_v60 = vpop.permute.xlu0 %2211  ;;  %v3033_v30 = vpop.permute.xlu2 %3032 }
 0x68c   :  { %2309 = vst.msk [vmem:[#allocation5 + $0xf8] sm:$0xff] %vm18382_vm1, %v2212_v60  ;;  %v3007_v15 = vpop.permute.xlu1 %3006 }
 0x68d   :  { %3139 = vst.msk [vmem:[#allocation5 + $0x210] sm:$0xff] %vm18382_vm1, %v3033_v30 }
 0x68e   :  { %3126 = vst.msk [vmem:[#allocation5 + $0x1a8] sm:$0xff] %vm18382_vm1, %v3007_v15 }
 0x691   :  { %3052 = vrot.lane.b32.xlu0 %v13925_v48, %s12084_s25  ;;  %3044 = vrot.lane.b32.xlu2 %v13852_v56, %s12084_s25 }
 0x692   :  { %3048 = vrot.lane.b32.xlu1 %v13887_v36, %s12084_s25 }
 0x693   :  { %v2174_v35 = vpop.permute.xlu0 %2173  ;;  %v2178_v23 = vpop.permute.xlu2 %2177 }
 0x694   :  { %2290 = vst.msk [vmem:[#allocation5 + $0x60] sm:$0xff] %vm18382_vm1, %v2174_v35  ;;  %v2214_v33 = vpop.permute.xlu1 %2213 }
 0x695   :  { %2292 = vst.msk [vmem:[#allocation5 + $0x70] sm:$0xff] %vm18382_vm1, %v2178_v23 }
 0x696   :  { %2310 = vst.msk [vmem:[#allocation5 + $0x100] sm:$0xff] %vm18382_vm1, %v2214_v33 }
 0x699   :  { %3058 = vrot.lane.b32.xlu0 %v13978_v44, %s12084_s25  ;;  %3050 = vrot.lane.b32.xlu2 %v13907_v5, %s12084_s25 }
 0x69a   :  { %3054 = vrot.lane.b32.xlu1 %v13944_v29, %s12084_s25 }
 0x69b   :  { %v2218_v56 = vpop.permute.xlu0 %2217  ;;  %v3015_v36 = vpop.permute.xlu2 %3014 }
 0x69c   :  { %2312 = vst.msk [vmem:[#allocation5 + $0x110] sm:$0xff] %vm18382_vm1, %v2218_v56  ;;  %v2172_v48 = vpop.permute.xlu1 %2171 }
 0x69d   :  { %3130 = vst.msk [vmem:[#allocation5 + $0x1c8] sm:$0xff] %vm18382_vm1, %v3015_v36 }
 0x69e   :  { %2289 = vst.msk [vmem:[#allocation5 + $0x58] sm:$0xff] %vm18382_vm1, %v2172_v48 }
 0x6a1   :  { %3064 = vrot.lane.b32.xlu0 %v14022_v53, %s12084_s25  ;;  %3056 = vrot.lane.b32.xlu2 %v13960_v24, %s12084_s25  ;;  %v14149_v53 = vld [vmem:[%s18363_s5 + $0x38] sm:$0xff]  ;;  %s14168_s5 = smov 0  }
 0x6a2   :  { %3060 = vrot.lane.b32.xlu1 %v13991_v59, %s12084_s25 }
 0x6a3   :  { %v2176_v5 = vpop.permute.xlu0 %2175  ;;  %v2222_v51 = vpop.permute.xlu2 %2221 }
 0x6a4   :  { %2291 = vst.msk [vmem:[#allocation5 + $0x68] sm:$0xff] %vm18382_vm1, %v2176_v5  ;;  %v3031_v49 = vpop.permute.xlu1 %3030 }
 0x6a5   :  { %2314 = vst.msk [vmem:[#allocation5 + $0x120] sm:$0xff] %vm18382_vm1, %v2222_v51 }
 0x6a6   :  { %3138 = vst.msk [vmem:[#allocation5 + $0x208] sm:$0xff] %vm18382_vm1, %v3031_v49 }
 0x6a9   :  { %3070 = vrot.lane.b32.xlu0 %v2897_v37, %s12084_s25  ;;  %3062 = vrot.lane.b32.xlu2 %v14007_v18, %s12084_s25 }
 0x6aa   :  { %3066 = vrot.lane.b32.xlu1 %v2891_v7, %s12084_s25 }
 0x6ab   :  { %v3011_v29 = vpop.permute.xlu0 %3010  ;;  %v2180_v16 = vpop.permute.xlu2 %2179 }
 0x6ac   :  { %3128 = vst.msk [vmem:[#allocation5 + $0x1b8] sm:$0xff] %vm18382_vm1, %v3011_v29  ;;  %v3013_v41 = vpop.permute.xlu1 %3012 }
 0x6ad   :  { %2293 = vst.msk [vmem:[#allocation5 + $0x78] sm:$0xff] %vm18382_vm1, %v2180_v16 }
 0x6ae   :  { %3129 = vst.msk [vmem:[#allocation5 + $0x1c0] sm:$0xff] %vm18382_vm1, %v3013_v41 }
 0x6b1   :  { %3068 = vrot.lane.b32.xlu2 %v2894_v20, %s12084_s25 }
 0x6b3   :  { %v3017_v42 = vpop.permute.xlu0 %3016  ;;  %v3021_v19 = vpop.permute.xlu2 %3020 }
 0x6b4   :  { %3131 = vst.msk [vmem:[#allocation5 + $0x1d0] sm:$0xff] %vm18382_vm1, %v3017_v42  ;;  %v2220_v26 = vpop.permute.xlu1 %2219 }
 0x6b5   :  { %3133 = vst.msk [vmem:[#allocation5 + $0x1e0] sm:$0xff] %vm18382_vm1, %v3021_v19 }
 0x6b6   :  { %2313 = vst.msk [vmem:[#allocation5 + $0x118] sm:$0xff] %vm18382_vm1, %v2220_v26 }
 0x6bb   :  { %v2224_v47 = vpop.permute.xlu0 %2223  ;;  %v2228_v24 = vpop.permute.xlu2 %2227 }
 0x6bc   :  { %2315 = vst.msk [vmem:[#allocation5 + $0x128] sm:$0xff] %vm18382_vm1, %v2224_v47  ;;  %v2182_v25 = vpop.permute.xlu1 %2181 }
 0x6bd   :  { %2317 = vst.msk [vmem:[#allocation5 + $0x138] sm:$0xff] %vm18382_vm1, %v2228_v24 }
 0x6be   :  { %2294 = vst.msk [vmem:[#allocation5 + $0x80] sm:$0xff] %vm18382_vm1, %v2182_v25 }
 0x6c3   :  { %v2186_v1 = vpop.permute.xlu2 %2185 }
 0x6c4   :  { %2296 = vst.msk [vmem:[#allocation5 + $0x90] sm:$0xff] %vm18382_vm1, %v2186_v1  ;;  %v3019_v28 = vpop.permute.xlu1 %3018 }
 0x6c5   :  { %3132 = vst.msk [vmem:[#allocation5 + $0x1d8] sm:$0xff] %vm18382_vm1, %v3019_v28 }
 0x6cb   :  { %v3023_v2 = vpop.permute.xlu0 %3022  ;;  %v3039_v38 = vpop.permute.xlu2 %3038 }
 0x6cc   :  { %3134 = vst.msk [vmem:[#allocation5 + $0x1e8] sm:$0xff] %vm18382_vm1, %v3023_v2  ;;  %v2226_v62 = vpop.permute.xlu1 %2225 }
 0x6cd   :  { %3142 = vst.msk [vmem:[#allocation5 + $0x228] sm:$0xff] %vm18382_vm1, %v3039_v38 }
 0x6ce   :  { %2316 = vst.msk [vmem:[#allocation5 + $0x130] sm:$0xff] %vm18382_vm1, %v2226_v62 }
 0x6d3   :  { %v2230_v8 = vpop.permute.xlu0 %2229  ;;  %v3027_v44 = vpop.permute.xlu2 %3026 }
 0x6d4   :  { %2318 = vst.msk [vmem:[#allocation5 + $0x140] sm:$0xff] %vm18382_vm1, %v2230_v8  ;;  %v2184_v32 = vpop.permute.xlu1 %2183 }
 0x6d5   :  { %3136 = vst.msk [vmem:[#allocation5 + $0x1f8] sm:$0xff] %vm18382_vm1, %v3027_v44 }
 0x6d6   :  { %2295 = vst.msk [vmem:[#allocation5 + $0x88] sm:$0xff] %vm18382_vm1, %v2184_v32 }
 0x6db   :  { %v2188_v63 = vpop.permute.xlu0 %2187  ;;  %v2234_v11 = vpop.permute.xlu2 %2233 }
 0x6dc   :  { %2297 = vst.msk [vmem:[#allocation5 + $0x98] sm:$0xff] %vm18382_vm1, %v2188_v63  ;;  %v3025_v57 = vpop.permute.xlu1 %3024 }
 0x6dd   :  { %2320 = vst.msk [vmem:[#allocation5 + $0x150] sm:$0xf] %vm432_vm2, %v2234_v11 }
 0x6de   :  { %3135 = vst.msk [vmem:[#allocation5 + $0x1f0] sm:$0xff] %vm18382_vm1, %v3025_v57 }
 0x6e3   :  { %v3035_v61 = vpop.permute.xlu0 %3034  ;;  %v2192_v59 = vpop.permute.xlu2 %2191 }
 0x6e4   :  { %3140 = vst.msk [vmem:[#allocation5 + $0x218] sm:$0xff] %vm18382_vm1, %v3035_v61  ;;  %v2232_v58 = vpop.permute.xlu1 %2231 }
 0x6e5   :  { %2299 = vst.msk [vmem:[#allocation5 + $0xa8] sm:$0xff] %vm18382_vm1, %v2192_v59 }
 0x6e6   :  { %2319 = vst.msk [vmem:[#allocation5 + $0x148] sm:$0xff] %vm18382_vm1, %v2232_v58 }
 0x6eb   :  { %v3029_v39 = vpop.permute.xlu0 %3028  ;;  %v3045_v45 = vpop.permute.xlu2 %3044 }
 0x6ec   :  { %3137 = vst.msk [vmem:[#allocation5 + $0x200] sm:$0xff] %vm18382_vm1, %v3029_v39  ;;  %v2190_v50 = vpop.permute.xlu1 %2189 }
 0x6ed   :  { %3145 = vst.msk [vmem:[#allocation5 + $0x240] sm:$0xff] %vm18382_vm1, %v3045_v45 }
 0x6ee   :  { %2298 = vst.msk [vmem:[#allocation5 + $0xa0] sm:$0xff] %vm18382_vm1, %v2190_v50 }
 0x6f3   :  { %v3041_v40 = vpop.permute.xlu0 %3040  ;;  %v3051_v12 = vpop.permute.xlu2 %3050 }
 0x6f4   :  { %3143 = vst.msk [vmem:[#allocation5 + $0x230] sm:$0xff] %vm18382_vm1, %v3041_v40  ;;  %v3037_v18 = vpop.permute.xlu1 %3036 }
 0x6f5   :  { %3148 = vst.msk [vmem:[#allocation5 + $0x258] sm:$0xff] %vm18382_vm1, %v3051_v12 }
 0x6f6   :  { %3141 = vst.msk [vmem:[#allocation5 + $0x220] sm:$0xff] %vm18382_vm1, %v3037_v18 }
 0x6fb   :  { %v3047_v14 = vpop.permute.xlu0 %3046  ;;  %v3057_v21 = vpop.permute.xlu2 %3056 }
 0x6fc   :  { %3146 = vst.msk [vmem:[#allocation5 + $0x248] sm:$0xff] %vm18382_vm1, %v3047_v14  ;;  %v3043_v6 = vpop.permute.xlu1 %3042 }
 0x6fd   :  { %3151 = vst.msk [vmem:[#allocation5 + $0x270] sm:$0xff] %vm18382_vm1, %v3057_v21 }
 0x6fe   :  { %3144 = vst.msk [vmem:[#allocation5 + $0x238] sm:$0xff] %vm18382_vm1, %v3043_v6 }
 0x703   :  { %v3053_v4 = vpop.permute.xlu0 %3052  ;;  %v3063_v22 = vpop.permute.xlu2 %3062 }
 0x704   :  { %3149 = vst.msk [vmem:[#allocation5 + $0x260] sm:$0xff] %vm18382_vm1, %v3053_v4  ;;  %v3049_v17 = vpop.permute.xlu1 %3048 }
 0x705   :  { %3154 = vst.msk [vmem:[#allocation5 + $0x288] sm:$0xff] %vm18382_vm1, %v3063_v22 }
 0x706   :  { %3147 = vst.msk [vmem:[#allocation5 + $0x250] sm:$0xff] %vm18382_vm1, %v3049_v17 }
 0x70b   :  { %v3059_v9 = vpop.permute.xlu0 %3058  ;;  %v3069_v46 = vpop.permute.xlu2 %3068 }
 0x70c   :  { %3152 = vst.msk [vmem:[#allocation5 + $0x278] sm:$0xff] %vm18382_vm1, %v3059_v9  ;;  %v3055_v7 = vpop.permute.xlu1 %3054 }
 0x70d   :  { %3157 = vst.msk [vmem:[#allocation5 + $0x2a0] sm:$0xff] %vm18382_vm1, %v3069_v46 }
 0x70e   :  { %3150 = vst.msk [vmem:[#allocation5 + $0x268] sm:$0xff] %vm18382_vm1, %v3055_v7 }
 0x713   :  { %v3065_v52 = vpop.permute.xlu0 %3064 }
 0x714   :  { %3155 = vst.msk [vmem:[#allocation5 + $0x290] sm:$0xff] %vm18382_vm1, %v3065_v52  ;;  %v3061_v0 = vpop.permute.xlu1 %3060 }
 0x715   :  { %3153 = vst.msk [vmem:[#allocation5 + $0x280] sm:$0xff] %vm18382_vm1, %v3061_v0 }
 0x71b   :  { %v3071_v34 = vpop.permute.xlu0 %3070 }
 0x71c   :  { %3158 = vst.msk [vmem:[#allocation5 + $0x2a8] sm:$0xf] %vm432_vm2, %v3071_v34  ;;  %v3067_v20 = vpop.permute.xlu1 %3066 }
 0x71d   :  { %3156 = vst.msk [vmem:[#allocation5 + $0x298] sm:$0xff] %vm18382_vm1, %v3067_v20 }
 0x71e LB: > { %3198 = vmatpush.msra.mxu0 %v14149_v53  ;;  %v3181_v3 = vperm.slane %v14154_v43, 0  ;;  %s12092_s6 = smov 48   ;;  %s12093_s1 = smov 80   ;;  %s11986_s5 = sphi %s14168_s5, %s3171_s5   ;;  %v11982_v31 = vphi %v14166_v31, %v3409_v31  }
 0x71f   : > { %s12094_s22 = smov 96   ;;  %s3173_s2 = scalar_lea.vmem [#allocation4], %s11986_s5 }
 0x720   : > { %3199 = vmatpush.msra.mxu0 %v14143_v55  ;;  %v14184_v60 = vld [vmem:[%s3173_s2 + $0x158] sm:$0x1]  ;;  %v14187_v35 = vld [vmem:[%s3173_s2] sm:$0x1]  ;;  %s3176_s24 = ssub.s32 339, %s11986_s5  ;;  %s12095_s4 = smov 32  }
 0x721   : > { %s3177_s3 = scalar_lea.vmem [#allocation5], %s3176_s24  ;;  %s12096_s25 = smov 16  }
 0x722   : > { %3200 = vmatpush.msra.mxu0 %v14138_v13  ;;  %s12097_s27 = smov 112   ;;  %s3385_s28 = scalar_lea.vmem [#allocation8], %s11986_s5 }
 0x723   : > { %s3397_s29 = scalar_lea.vmem [#allocation9], %s3176_s24  ;;  %s3171_s5 = sadd.s32 1, %s11986_s5  }
 0x724   : > { %3201 = vmatpush.msra.mxu0 %v14133_v54  ;;  %v14193_v25 = vld [vmem:[%s3177_s3] sm:$0x1]  ;;  %v14200_v59 = vld [vmem:[%s3177_s3 + $0x158] sm:$0x1]  ;;  %p3168_p1 = scmp.ge.s32.totalorder %s3171_s5, 340  }
 0x725   : > { %9500 = vmatmul.msk.f32.vlgmr.msra.gmra.mxu0 %vm1250_vm3, %v11982_v31  ;;  %s12098_s0 = smov (%p3168_p1), 32   ;;  %s18395_s20 = sld [smem:[#allocation16_spill]] (%p3168_p1) }
 0x7a2   : > { %v3203_v10 = vpop.f32.mrf.mxu0 }
 0x7a3   : > { %v3204_v27 = vadd.f32 %v3203_v10, %v3181_v3 }
 0x7a5   : > { %3339 = vrot.lane.b32.xlu2 %v3204_v27, %s12092_s6  ;;  %3293 = vrot.lane.b32.xlu0 %v3204_v27, %s12093_s1  ;;  %v3207_v37 = vrot.slane %v3204_v27, 1  ;;  %v3210_v23 = vadd.f32 %v3204_v27, %v14187_v35 }
 0x7a7   : > { %3252 = vrot.lane.b32.xlu1 %v3207_v37, %s12094_s22  ;;  %v3211_v30 = vadd.f32 %v3207_v37, %v14184_v60  ;;  %v9501_v33 = vmul.f32 -1.442695, %v3210_v23 }
 0x7a9   : > { %v9502_v15 = vmul.f32 -1.442695, %v3211_v30 }
 0x7ab   : > { %11808 = vpow2.f32 %v9502_v15 }
 0x7ac   : > { %11810 = vpow2.f32 %v9501_v33 }
 0x7ad   : > { %3341 = vrot.lane.b32.xlu2 %v3207_v37, %s12092_s6  ;;  %3295 = vrot.lane.b32.xlu0 %v3207_v37, %s12093_s1 }
 0x7af   : > { %3250 = vrot.lane.b32.xlu1 %v3204_v27, %s12094_s22 }
 0x7b1   : > { %v11809_v56 = vpop.eup %11808 }
 0x7b2   : > { %v3219_v36 = vadd.f32 1.0, %v11809_v56  ;;  %v11811_v48 = vpop.eup %11810 }
 0x7b3   : > { %v3218_v5 = vadd.f32 1.0, %v11811_v48  ;;  %v3282_v48 = vrot.slane %v11982_v31, 1 }
 0x7b4   : > { %11812 = vrcp.f32 %v3219_v36  ;;  %v3246_v47 = vand.u32 2147483648, %v3219_v36  ;;  %vm3240_vm10 = vweird.f32 %v3219_v36  ;;  %v3244_v24 = vand.u32 2147483647, %v3219_v36 }
 0x7b5   : > { %11814 = vrcp.f32 %v3218_v5  ;;  %v3231_v57 = vand.u32 2147483648, %v3218_v5  ;;  %vm3225_vm14 = vweird.f32 %v3218_v5  ;;  %v3229_v61 = vand.u32 2147483647, %v3218_v5 }
 0x7b6   : > { %v3247_v38 = vor.u32 1.1754944e-38, %v3246_v47  ;;  %vm3245_vm12 = vcmp.eq.f32.partialorder %v3244_v24, 8.507059e+37 }
 0x7b7   : > { %v3232_v45 = vor.u32 1.1754944e-38, %v3231_v57  ;;  %vm3230_vm4 = vcmp.eq.f32.partialorder %v3229_v61, 8.507059e+37 }
 0x7ba   : > { %v11813_v51 = vpop.eup %11812 }
 0x7bb   : > { %v3236_v49 = vmul.f32 %v11813_v51, %v3219_v36  ;;  %v11815_v16 = vpop.eup %11814  ;;  %vm3241_vm2 = vweird.f32 %v11813_v51 }
 0x7bc   : > { %v3221_v42 = vmul.f32 %v11815_v16, %v3218_v5  ;;  %vm3242_vm11 = vmor %vm3240_vm10, %vm3241_vm2  ;;  %vm3226_vm13 = vweird.f32 %v11815_v16 }
 0x7bd   : > { %v3237_v29 = vsub.f32 1.0, %v3236_v49  ;;  %vm3227_vm15 = vmor %vm3225_vm14, %vm3226_vm13 }
 0x7be   : > { %v3222_v26 = vsub.f32 1.0, %v3221_v42 }
 0x7bf   : > { %v3238_v41 = vmul.f32 %v11813_v51, %v3237_v29 }
 0x7c0   : > { %v3223_v28 = vmul.f32 %v11815_v16, %v3222_v26 }
 0x7c1   : > { %v3239_v19 = vadd.f32 %v11813_v51, %v3238_v41 }
 0x7c2   : > { %v3224_v11 = vadd.f32 %v11815_v16, %v3223_v28 }
 0x7c3   : > { %v3243_v1 = vsel %vm3242_vm11, %v11813_v51, %v3239_v19 }
 0x7c4   : > { %v14196_v44 = vsel %vm3245_vm12, %v3247_v38, %v3243_v1  ;;  %v3228_v58 = vsel %vm3227_vm15, %v11815_v16, %v3224_v11 }
 0x7c5   : > { %v14203_v40 = vsel %vm3230_vm4, %v3232_v45, %v3228_v58  ;;  %v3271_v58 = vsub.f32 1.0, %v14196_v44 }
 0x7ff   : > { %v3340_v3 = vpop.permute.xlu2 %3339 }
 0x807   : > { %v3342_v29 = vpop.permute.xlu2 %3341 }
 0x817   : > { %v3294_v2 = vpop.permute.xlu0 %3293 }
 0x818   : > { %v3299_v62 = vadd.f32 %v3294_v2, %v14193_v25 }
 0x819   : > { %v3253_v8 = vpop.permute.xlu1 %3252 }
 0x81a   : > { %v9503_v32 = vmul.f32 -1.442695, %v3299_v62  ;;  %v3257_v63 = vmul.f32 %v3253_v8, %v14196_v44 }
 0x81c   : > { %11816 = vpow2.f32 %v9503_v32  ;;  %3262 = vrot.lane.b32.xlu0 %v3257_v63, %s12095_s4 }
 0x81f   : > { %v3296_v39 = vpop.permute.xlu0 %3295 }
 0x820   : > { %v3300_v50 = vadd.f32 %v3296_v39, %v14200_v59 }
 0x821   : > { %v3251_v12 = vpop.permute.xlu1 %3250 }
 0x822   : > { %v11817_v18 = vpop.eup %11816  ;;  %v9504_v14 = vmul.f32 -1.442695, %v3300_v50  ;;  %v3256_v21 = vmul.f32 %v3251_v12, %v14203_v40  ;;  %v3270_v12 = vsub.f32 1.0, %v14203_v40 }
 0x823   : > { %v3307_v6 = vadd.f32 1.0, %v11817_v18 }
 0x824   : > { %11818 = vpow2.f32 %v9504_v14  ;;  %3260 = vrot.lane.b32.xlu1 %v3256_v21, %s12095_s4 }
 0x825   : > { %11820 = vrcp.f32 %v3307_v6  ;;  %v3320_v7 = vand.u32 2147483648, %v3307_v6  ;;  %v3318_v0 = vand.u32 2147483647, %v3307_v6  ;;  %vm3314_vm6 = vweird.f32 %v3307_v6 }
 0x827   : > { %v3321_v10 = vor.u32 1.1754944e-38, %v3320_v7  ;;  %vm3319_vm2 = vcmp.eq.f32.partialorder %v3318_v0, 8.507059e+37 }
 0x82a   : > { %v11819_v4 = vpop.eup %11818 }
 0x82b   : > { %v11821_v22 = vpop.eup %11820  ;;  %v3308_v17 = vadd.f32 1.0, %v11819_v4 }
 0x82c   : > { %v3310_v9 = vmul.f32 %v11821_v22, %v3307_v6  ;;  %vm3315_vm5 = vweird.f32 %v11821_v22 }
 0x82d   : > { %11822 = vrcp.f32 %v3308_v17  ;;  %vm3316_vm7 = vmor %vm3314_vm6, %vm3315_vm5  ;;  %v3335_v33 = vand.u32 2147483648, %v3308_v17  ;;  %v3333_v36 = vand.u32 2147483647, %v3308_v17  ;;  %vm3329_vm11 = vweird.f32 %v3308_v17 }
 0x82e   : > { %v3311_v46 = vsub.f32 1.0, %v3310_v9 }
 0x82f   : > { %v3336_v51 = vor.u32 1.1754944e-38, %v3335_v33  ;;  %vm3334_vm13 = vcmp.eq.f32.partialorder %v3333_v36, 8.507059e+37 }
 0x830   : > { %v3312_v52 = vmul.f32 %v11821_v22, %v3311_v46 }
 0x832   : > { %v3313_v34 = vadd.f32 %v11821_v22, %v3312_v52 }
 0x833   : > { %v11823_v20 = vpop.eup %11822 }
 0x834   : > { %v3325_v27 = vmul.f32 %v11823_v20, %v3308_v17  ;;  %v3317_v37 = vsel %vm3316_vm7, %v11821_v22, %v3313_v34  ;;  %vm3330_vm10 = vweird.f32 %v11823_v20 }
 0x835   : > { %v3322_v30 = vsel %vm3319_vm2, %v3321_v10, %v3317_v37  ;;  %vm3331_vm12 = vmor %vm3329_vm11, %vm3330_vm10 }
 0x836   : > { %v3326_v15 = vsub.f32 1.0, %v3325_v27  ;;  %v3345_v23 = vmul.f32 %v3340_v3, %v3322_v30  ;;  %v3359_v32 = vsub.f32 1.0, %v3322_v30  ;;  %v3373_v11 = vmul.f32 %v11982_v31, %v3322_v30 }
 0x838   : > { %3349 = vrot.lane.b32.xlu2 %v3345_v23, %s12095_s4  ;;  %v3327_v56 = vmul.f32 %v11823_v20, %v3326_v15 }
 0x83a   : > { %v3328_v5 = vadd.f32 %v11823_v20, %v3327_v56 }
 0x83c   : > { %v3332_v49 = vsel %vm3331_vm12, %v11823_v20, %v3328_v5  ;;  %vm4662_vm12 = vcmask (%p3168_p1), 523264  }
 0x83d   : > { %v3337_v16 = vsel %vm3334_vm13, %v3336_v51, %v3332_v49 }
 0x83e   : > { %v3346_v41 = vmul.f32 %v3342_v29, %v3337_v16  ;;  %v3374_v42 = vmul.f32 %v3337_v16, %v3282_v48 }
 0x840   : > { %3285 = vrot.lane.b32.xlu2 %v3282_v48, %s12096_s25  ;;  %3351 = vrot.lane.b32.xlu0 %v3346_v41, %s12095_s4 }
 0x88e   : > { %v3263_v19 = vpop.permute.xlu0 %3262 }
 0x88f   : > { %v3267_v26 = vadd.f32 %v3263_v19, %v14184_v60 }
 0x891   : > { %11824 = vtanh.f32 %v3267_v26 }
 0x892   : > { %v3350_v47 = vpop.permute.xlu2 %3349 }
 0x893   : > { %v3355_v24 = vadd.f32 %v3350_v47, %v14193_v25 }
 0x895   : > { %11826 = vtanh.f32 %v3355_v24 }
 0x896   : > { %v3261_v1 = vpop.permute.xlu1 %3260 }
 0x897   : > { %v11825_v28 = vpop.eup %11824  ;;  %v3266_v2 = vadd.f32 %v3261_v1, %v14187_v35 }
 0x898   : > { %3276 = vrot.lane.b32.xlu1 %v11825_v28, %s12097_s27 }
 0x899   : > { %11828 = vtanh.f32 %v3266_v2 }
 0x89a   : > { %v3286_v35 = vpop.permute.xlu2 %3285 }
 0x89b   : > { %v11827_v38 = vpop.eup %11826  ;;  %v3290_v45 = vmul.f32 %v3286_v35, %v14196_v44  ;;  %v3360_v44 = vsub.f32 1.0, %v3337_v16 }
 0x89c   : > { %3363 = vrot.lane.b32.xlu2 %v11827_v38, %s12097_s27 }
 0x89f   : > { %v11829_v62 = vpop.eup %11828 }
 0x8a0   : > { %3274 = vrot.lane.b32.xlu0 %v11829_v62, %s12097_s27  ;;  %3283 = vrot.lane.b32.xlu1 %v11982_v31, %s12096_s25 }
 0x8b2   : > { %v3352_v60 = vpop.permute.xlu0 %3351 }
 0x8b3   : > { %v3356_v25 = vadd.f32 %v3352_v60, %v14200_v59 }
 0x8b5   : > { %11830 = vtanh.f32 %v3356_v25 }
 0x8bb   : > { %v11831_v8 = vpop.eup %11830 }
 0x8bc   : > { %3365 = vrot.lane.b32.xlu0 %v11831_v8, %s12097_s27 }
 0x8f6   : > { %v3364_v63 = vpop.permute.xlu2 %3363 }
 0x8f7   : > { %v3369_v57 = vmul.f32 %v3364_v63, %v3359_v32 }
 0x8f9   : > { %v3375_v61 = vadd.f32 %v3373_v11, %v3369_v57 }
 0x8fb   : > { %3391 = vrot.lane.b32.xlu0 %v3375_v61, %s12097_s27 }
 0x90a   : > { %v3277_v39 = vpop.permute.xlu1 %3276 }
 0x90b   : > { %v3281_v50 = vmul.f32 %v3277_v39, %v3271_v58 }
 0x90d   : > { %v3292_v59 = vadd.f32 %v3290_v45, %v3281_v50 }
 0x90f   : > { %3381 = vrot.lane.b32.xlu2 %v3292_v59, %s12097_s27  ;;  %v3400_v4 = vrot.slane %v3292_v59, 7 }
 0x912   : > { %v3284_v18 = vpop.permute.xlu1 %3283  ;;  %v3275_v14 = vpop.permute.xlu0 %3274 }
 0x913   : > { %v3289_v31 = vmul.f32 %v3284_v18, %v14203_v40  ;;  %v3280_v21 = vmul.f32 %v3275_v14, %v3270_v12 }
 0x915   : > { %v3291_v6 = vadd.f32 %v3289_v31, %v3280_v21 }
 0x917   : > { %3379 = vrot.lane.b32.xlu1 %v3291_v6, %s12097_s27  ;;  %v3402_v22 = vsel %vm1469_vm8, %v3400_v4, %v3291_v6 }
 0x918   : > { %3403 = vrot.lane.b32.xlu2 %v3402_v22, %s12097_s27 }
 0x92e   : > { %v3366_v17 = vpop.permute.xlu0 %3365 }
 0x92f   : > { %v3370_v9 = vmul.f32 %v3366_v17, %v3360_v44 }
 0x931   : > { %v3376_v46 = vadd.f32 %v3374_v42, %v3370_v9 }
 0x933   : > { %3393 = vrot.lane.b32.xlu1 %v3376_v46, %s12097_s27  ;;  %v3406_v7 = vrot.slane %v3376_v46, 7 }
 0x935   : > { %v3407_v52 = vsel %vm1469_vm8, %v3406_v7, %v3375_v61  ;;  %vm3969_vm8 = vcmask (%p3168_p1), 1043456  }
 0x969   : > { %v3382_v40 = vpop.permute.xlu2 %3381 }
 0x96a   : > { %3388 = vst.msk [vmem:[%s3385_s28 + $0x158] sm:$0x1] %vm1454_vm9, %v3382_v40 }
 0x96d   : > { %v3392_v0 = vpop.permute.xlu0 %3391 }
 0x96e   : > { %3398 = vst.msk [vmem:[%s3397_s29] sm:$0x1] %vm1454_vm9, %v3392_v0 }
 0x972   : > { %v3404_v34 = vpop.permute.xlu2 %3403 }
 0x973   : > { %v3409_v31 = vsel %vm113_vm0, %v3404_v34, %v3407_v52  }
 0x989   : > { %v3380_v20 = vpop.permute.xlu1 %3379 }
 0x98a   : > { %3387 = vst.msk [vmem:[%s3385_s28] sm:$0x1] %vm1454_vm9, %v3380_v20 }
 0x991   :  { %v3457_v10 = vld [vmem:[#allocation8 + $0x20] sm:$0xff] (%p3168_p1)  ;;  %v3455_v27 = vld [vmem:[#allocation8 + $0x10] sm:$0xff] (%p3168_p1)  ;;  %v3458_v30 = vld [vmem:[#allocation8 + $0x28] sm:$0xff] (%p3168_p1) }
 0x992   :  { %v3453_v37 = vld [vmem:[#allocation8] sm:$0xff] (%p3168_p1)  ;;  %3590 = vrot.lane.b32.xlu2 (%p3168_p1), %v3457_v10, %s12091_s26  ;;  %3586 = vrot.lane.b32.xlu1 (%p3168_p1), %v3455_v27, %s12091_s26  ;;  %v3456_v15 = vld [vmem:[#allocation8 + $0x18] sm:$0xff] (%p3168_p1)  ;;  %v3454_v23 = vld [vmem:[#allocation8 + $0x8] sm:$0xff] (%p3168_p1) }
 0x993   :  { %3582 = vrot.lane.b32.xlu0 (%p3168_p1), %v3453_v37, %s12091_s26  ;;  %v3461_v33 = vld [vmem:[#allocation8 + $0x40] sm:$0xff] (%p3168_p1)  ;;  %v3460_v56 = vld [vmem:[#allocation8 + $0x38] sm:$0xff] (%p3168_p1)  ;;  %v3459_v54 = vld [vmem:[#allocation8 + $0x30] sm:$0xff] (%p3168_p1) }
 0x994   :  { %v3464_v13 = vld [vmem:[#allocation8 + $0x58] sm:$0xff] (%p3168_p1)  ;;  %v3463_v55 = vld [vmem:[#allocation8 + $0x50] sm:$0xff] (%p3168_p1)  ;;  %v3462_v53 = vld [vmem:[#allocation8 + $0x48] sm:$0xff] (%p3168_p1) }
 0x995   :  { %v3467_v43 = vld [vmem:[#allocation8 + $0x70] sm:$0xff] (%p3168_p1)  ;;  %v3466_v36 = vld [vmem:[#allocation8 + $0x68] sm:$0xff] (%p3168_p1)  ;;  %v3465_v48 = vld [vmem:[#allocation8 + $0x60] sm:$0xff] (%p3168_p1) }
 0x996   :  { %v3470_v5 = vld [vmem:[#allocation8 + $0x88] sm:$0xff] (%p3168_p1)  ;;  %v3469_v51 = vld [vmem:[#allocation8 + $0x80] sm:$0xff] (%p3168_p1)  ;;  %v3468_v49 = vld [vmem:[#allocation8 + $0x78] sm:$0xff] (%p3168_p1) }
 0x997   :  { %v3473_v29 = vld [vmem:[#allocation8 + $0xa0] sm:$0xff] (%p3168_p1)  ;;  %v3472_v16 = vld [vmem:[#allocation8 + $0x98] sm:$0xff] (%p3168_p1)  ;;  %v3471_v41 = vld [vmem:[#allocation8 + $0x90] sm:$0xff] (%p3168_p1) }
 0x998   :  { %v3476_v42 = vld [vmem:[#allocation8 + $0xb8] sm:$0xff] (%p3168_p1)  ;;  %v3475_v19 = vld [vmem:[#allocation8 + $0xb0] sm:$0xff] (%p3168_p1)  ;;  %v3474_v26 = vld [vmem:[#allocation8 + $0xa8] sm:$0xff] (%p3168_p1) }
 0x999   :  { %v3479_v47 = vld [vmem:[#allocation8 + $0xd0] sm:$0xff] (%p3168_p1)  ;;  %v3478_v24 = vld [vmem:[#allocation8 + $0xc8] sm:$0xff] (%p3168_p1)  ;;  %v3477_v1 = vld [vmem:[#allocation8 + $0xc0] sm:$0xff] (%p3168_p1) }
 0x99a   :  { %3592 = vrot.lane.b32.xlu2 (%p3168_p1), %v3458_v30, %s12091_s26  ;;  %3588 = vrot.lane.b32.xlu1 (%p3168_p1), %v3456_v15, %s12091_s26  ;;  %v3482_v28 = vld [vmem:[#allocation8 + $0xe8] sm:$0xff] (%p3168_p1)  ;;  %v3481_v2 = vld [vmem:[#allocation8 + $0xe0] sm:$0xff] (%p3168_p1)  ;;  %v3480_v38 = vld [vmem:[#allocation8 + $0xd8] sm:$0xff] (%p3168_p1) }
 0x99b   :  { %3584 = vrot.lane.b32.xlu0 (%p3168_p1), %v3454_v23, %s12091_s26  ;;  %v3485_v62 = vld [vmem:[#allocation8 + $0x100] sm:$0xff] (%p3168_p1)  ;;  %v3484_v60 = vld [vmem:[#allocation8 + $0xf8] sm:$0xff] (%p3168_p1)  ;;  %v3483_v25 = vld [vmem:[#allocation8 + $0xf0] sm:$0xff] (%p3168_p1) }
 0x99c   :  { %v3488_v8 = vld [vmem:[#allocation8 + $0x118] sm:$0xff] (%p3168_p1)  ;;  %v3487_v35 = vld [vmem:[#allocation8 + $0x110] sm:$0xff] (%p3168_p1)  ;;  %v3486_v32 = vld [vmem:[#allocation8 + $0x108] sm:$0xff] (%p3168_p1) }
 0x99d   :  { %v3491_v11 = vld [vmem:[#allocation8 + $0x130] sm:$0xff] (%p3168_p1)  ;;  %v3490_v57 = vld [vmem:[#allocation8 + $0x128] sm:$0xff] (%p3168_p1)  ;;  %v3489_v61 = vld [vmem:[#allocation8 + $0x120] sm:$0xff] (%p3168_p1) }
 0x99e   :  { %v3494_v39 = vld [vmem:[#allocation8 + $0x148] sm:$0xff] (%p3168_p1)  ;;  %v3493_v45 = vld [vmem:[#allocation8 + $0x140] sm:$0xff] (%p3168_p1)  ;;  %v3492_v50 = vld [vmem:[#allocation8 + $0x138] sm:$0xff] (%p3168_p1) }
 0x99f   :  { %v3495_v14 = vld [vmem:[#allocation8 + $0x150] sm:$0xf] (%p3168_p1) }
 0x9a2   :  { %3170 = sbr.rel (!%p3168_p1) target bundleno = 1822 (0x71e), region = 220  ;;  %3598 = vrot.lane.b32.xlu2 (%p3168_p1), %v3461_v33, %s12091_s26  ;;  %3596 = vrot.lane.b32.xlu1 (%p3168_p1), %v3460_v56, %s12091_s26 }
 0x9a3   :  { %3594 = vrot.lane.b32.xlu0 (%p3168_p1), %v3459_v54, %s12091_s26 }
 0x9a5   : > { %v3394_v3 = vpop.permute.xlu1 %3393 }
 0x9a6   : > { %3399 = vst.msk [vmem:[%s3397_s29 + $0x158] sm:$0x1] %vm1454_vm9, %v3394_v3 }
 0x9aa   :  { %3604 = vrot.lane.b32.xlu2 %v3464_v13, %s12091_s26  ;;  %3602 = vrot.lane.b32.xlu1 %v3463_v55, %s12091_s26 }
 0x9ab   :  { %3600 = vrot.lane.b32.xlu0 %v3462_v53, %s12091_s26 }
 0x9ad   :  { %v3497_v12 = vld [vmem:[#allocation9 + $0x8] sm:$0xff]  ;;  %v3496_v18 = vld [vmem:[#allocation9] sm:$0xff]  ;;  %v3499_v22 = vld [vmem:[#allocation9 + $0x18] sm:$0xff] }
 0x9ae   :  { %v3500_v4 = vld [vmem:[#allocation9 + $0x20] sm:$0xff]  ;;  %v3498_v44 = vld [vmem:[#allocation9 + $0x10] sm:$0xff]  ;;  %v3503_v7 = vld [vmem:[#allocation9 + $0x38] sm:$0xff] }
 0x9af   :  { %v3502_v52 = vld [vmem:[#allocation9 + $0x30] sm:$0xff]  ;;  %v3501_v40 = vld [vmem:[#allocation9 + $0x28] sm:$0xff]  ;;  %v3504_v27 = vld [vmem:[#allocation9 + $0x40] sm:$0xff] }
 0x9b0   :  { %v3506_v3 = vld [vmem:[#allocation9 + $0x50] sm:$0xff]  ;;  %v3505_v10 = vld [vmem:[#allocation9 + $0x48] sm:$0xff]  ;;  %v3508_v33 = vld [vmem:[#allocation9 + $0x60] sm:$0xff] }
 0x9b1   :  { %v3509_v23 = vld [vmem:[#allocation9 + $0x68] sm:$0xff]  ;;  %v3507_v56 = vld [vmem:[#allocation9 + $0x58] sm:$0xff]  ;;  %v3512_v53 = vld [vmem:[#allocation9 + $0x80] sm:$0xff] }
 0x9b2   :  { %3610 = vrot.lane.b32.xlu2 %v3467_v43, %s12091_s26  ;;  %3608 = vrot.lane.b32.xlu1 %v3466_v36, %s12091_s26  ;;  %v3511_v43 = vld [vmem:[#allocation9 + $0x78] sm:$0xff]  ;;  %v3510_v36 = vld [vmem:[#allocation9 + $0x70] sm:$0xff] }
 0x9b3   :  { %3606 = vrot.lane.b32.xlu0 %v3465_v48, %s12091_s26 }
 0x9ba   :  { %3616 = vrot.lane.b32.xlu2 %v3470_v5, %s12091_s26  ;;  %3614 = vrot.lane.b32.xlu1 %v3469_v51, %s12091_s26 }
 0x9bb   :  { %3612 = vrot.lane.b32.xlu0 %v3468_v49, %s12091_s26  ;;  %v3515_v49 = vld [vmem:[#allocation9 + $0x98] sm:$0xff] }
 0x9c2   :  { %3622 = vrot.lane.b32.xlu2 %v3473_v29, %s12091_s26  ;;  %3620 = vrot.lane.b32.xlu1 %v3472_v16, %s12091_s26  ;;  %v3514_v29 = vld [vmem:[#allocation9 + $0x90] sm:$0xff]  ;;  %v3513_v16 = vld [vmem:[#allocation9 + $0x88] sm:$0xff] }
 0x9c3   :  { %3618 = vrot.lane.b32.xlu0 %v3471_v41, %s12091_s26 }
 0x9ca   :  { %3628 = vrot.lane.b32.xlu2 %v3476_v42, %s12091_s26  ;;  %3626 = vrot.lane.b32.xlu1 %v3475_v19, %s12091_s26 }
 0x9cb   :  { %3624 = vrot.lane.b32.xlu0 %v3474_v26, %s12091_s26  ;;  %v3518_v26 = vld [vmem:[#allocation9 + $0xb0] sm:$0xff] }
 0x9d2   :  { %3634 = vrot.lane.b32.xlu2 %v3479_v47, %s12091_s26  ;;  %3632 = vrot.lane.b32.xlu1 %v3478_v24, %s12091_s26  ;;  %v3517_v47 = vld [vmem:[#allocation9 + $0xa8] sm:$0xff]  ;;  %v3516_v24 = vld [vmem:[#allocation9 + $0xa0] sm:$0xff] }
 0x9d3   :  { %3630 = vrot.lane.b32.xlu0 %v3477_v1, %s12091_s26 }
 0x9da   :  { %3640 = vrot.lane.b32.xlu2 %v3482_v28, %s12091_s26  ;;  %3638 = vrot.lane.b32.xlu1 %v3481_v2, %s12091_s26 }
 0x9db   :  { %3636 = vrot.lane.b32.xlu0 %v3480_v38, %s12091_s26  ;;  %v3521_v38 = vld [vmem:[#allocation9 + $0xc8] sm:$0xff] }
 0x9e2   :  { %3646 = vrot.lane.b32.xlu2 %v3485_v62, %s12091_s26  ;;  %3644 = vrot.lane.b32.xlu1 %v3484_v60, %s12091_s26  ;;  %v3520_v62 = vld [vmem:[#allocation9 + $0xc0] sm:$0xff]  ;;  %v3519_v60 = vld [vmem:[#allocation9 + $0xb8] sm:$0xff] }
 0x9e3   :  { %3642 = vrot.lane.b32.xlu0 %v3483_v25, %s12091_s26 }
 0x9ea   :  { %3652 = vrot.lane.b32.xlu2 %v3488_v8, %s12091_s26  ;;  %3650 = vrot.lane.b32.xlu1 %v3487_v35, %s12091_s26 }
 0x9eb   :  { %3648 = vrot.lane.b32.xlu0 %v3486_v32, %s12091_s26  ;;  %v3524_v32 = vld [vmem:[#allocation9 + $0xe0] sm:$0xff] }
 0x9ec   :  { %v14280_v63 = vpop.permute.xlu2 %3590 }
 0x9f2   :  { %3658 = vrot.lane.b32.xlu2 %v3491_v11, %s12091_s26  ;;  %3656 = vrot.lane.b32.xlu1 %v3490_v57, %s12091_s26  ;;  %v3523_v11 = vld [vmem:[#allocation9 + $0xd8] sm:$0xff]  ;;  %v3522_v57 = vld [vmem:[#allocation9 + $0xd0] sm:$0xff] }
 0x9f3   :  { %3654 = vrot.lane.b32.xlu0 %v3489_v61, %s12091_s26 }
 0x9f4   :  { %v14285_v58 = vpop.permute.xlu2 %3592 }
 0x9fa   :  { %3664 = vrot.lane.b32.xlu2 %v3494_v39, %s12091_s26  ;;  %3662 = vrot.lane.b32.xlu1 %v3493_v45, %s12091_s26 }
 0x9fb   :  { %3660 = vrot.lane.b32.xlu0 %v3492_v50, %s12091_s26  ;;  %v3527_v50 = vld [vmem:[#allocation9 + $0xf8] sm:$0xff] }
 0x9fc   :  { %v14290_v59 = vpop.permute.xlu2 %3598 }
 0xa02   :  { %3756 = vrot.lane.b32.xlu2 %v3497_v12, %s12098_s0  ;;  %3754 = vrot.lane.b32.xlu1 %v3496_v18, %s12098_s0  ;;  %v3526_v12 = vld [vmem:[#allocation9 + $0xf0] sm:$0xff]  ;;  %v3525_v18 = vld [vmem:[#allocation9 + $0xe8] sm:$0xff] }
 0xa03   :  { %3666 = vrot.lane.b32.xlu0 %v3495_v14, %s12091_s26 }
 0xa04   :  { %v14295_v31 = vpop.permute.xlu2 %3604  ;;  %v14297_v21 = vpop.permute.xlu1 %3586 }
 0xa05   :  { %v14299_v6 = vpop.permute.xlu0 %3582 }
 0xa0a   :  { %3762 = vrot.lane.b32.xlu2 %v3500_v4, %s12098_s0  ;;  %3760 = vrot.lane.b32.xlu1 %v3499_v22, %s12098_s0 }
 0xa0b   :  { %3758 = vrot.lane.b32.xlu0 %v3498_v44, %s12098_s0  ;;  %v3530_v44 = vld [vmem:[#allocation9 + $0x110] sm:$0xff] }
 0xa0c   :  { %v14304_v17 = vpop.permute.xlu2 %3610  ;;  %v14306_v9 = vpop.permute.xlu1 %3588 }
 0xa0d   :  { %v14308_v46 = vpop.permute.xlu0 %3584 }
 0xa12   :  { %3768 = vrot.lane.b32.xlu2 %v3503_v7, %s12098_s0  ;;  %3766 = vrot.lane.b32.xlu1 %v3502_v52, %s12098_s0  ;;  %v3529_v7 = vld [vmem:[#allocation9 + $0x108] sm:$0xff]  ;;  %v3528_v52 = vld [vmem:[#allocation9 + $0x100] sm:$0xff] }
 0xa13   :  { %3764 = vrot.lane.b32.xlu0 %v3501_v40, %s12098_s0  ;;  %v3411_v40 = vld [vmem:[%s18395_s20 + $0x8] sm:$0xff] }
 0xa14   :  { %v14313_v0 = vpop.permute.xlu2 %3616  ;;  %v14315_v34 = vpop.permute.xlu1 %3596 }
 0xa15   :  { %v14317_v20 = vpop.permute.xlu0 %3594 }
 0xa1a   :  { %3774 = vrot.lane.b32.xlu2 %v3506_v3, %s12098_s0  ;;  %3772 = vrot.lane.b32.xlu1 %v3505_v10, %s12098_s0  ;;  %v3884_v10 = vsel %vm113_vm0, %v3411_v40, %v14308_v46 }
 0xa1b   :  { %3770 = vrot.lane.b32.xlu0 %v3504_v27, %s12098_s0 }
 0xa1c   :  { %v14322_v37 = vpop.permute.xlu2 %3622  ;;  %v14324_v30 = vpop.permute.xlu1 %3602 }
 0xa1d   :  { %v14326_v15 = vpop.permute.xlu0 %3600 }
 0xa22   :  { %3780 = vrot.lane.b32.xlu2 %v3509_v23, %s12098_s0  ;;  %3778 = vrot.lane.b32.xlu1 %v3508_v33, %s12098_s0 }
 0xa23   :  { %3776 = vrot.lane.b32.xlu0 %v3507_v56, %s12098_s0  ;;  %v3533_v56 = vld [vmem:[#allocation9 + $0x128] sm:$0xff] }
 0xa24   :  { %v14331_v54 = vpop.permute.xlu2 %3628  ;;  %v14333_v13 = vpop.permute.xlu1 %3608 }
 0xa25   :  { %v14335_v55 = vpop.permute.xlu0 %3606 }
 0xa2a   :  { %3786 = vrot.lane.b32.xlu2 %v3512_v53, %s12098_s0  ;;  %3784 = vrot.lane.b32.xlu1 %v3511_v43, %s12098_s0  ;;  %v3532_v53 = vld [vmem:[#allocation9 + $0x120] sm:$0xff]  ;;  %v3531_v43 = vld [vmem:[#allocation9 + $0x118] sm:$0xff] }
 0xa2b   :  { %3782 = vrot.lane.b32.xlu0 %v3510_v36, %s12098_s0  ;;  %v3414_v36 = vld [vmem:[%s18395_s20 + $0x20] sm:$0xff] }
 0xa2c   :  { %v14340_v48 = vpop.permute.xlu2 %3634  ;;  %v14342_v5 = vpop.permute.xlu1 %3614 }
 0xa2d   :  { %v14344_v51 = vpop.permute.xlu0 %3612 }
 0xa32   :  { %3792 = vrot.lane.b32.xlu2 %v3515_v49, %s12098_s0  ;;  %3790 = vrot.lane.b32.xlu1 %v3514_v29, %s12098_s0  ;;  %v3887_v49 = vsel %vm113_vm0, %v3414_v36, %v14280_v63  ;;  %v4067_v36 = vld [vmem:[#allocation8 + $0x160] sm:$0xff] }
 0xa33   :  { %3788 = vrot.lane.b32.xlu0 %v3513_v16, %s12098_s0 }
 0xa34   :  { %v14349_v41 = vpop.permute.xlu2 %3640  ;;  %v14351_v42 = vpop.permute.xlu1 %3620 }
 0xa35   :  { %v14353_v19 = vpop.permute.xlu0 %3618 }
 0xa3a   :  { %3798 = vrot.lane.b32.xlu2 %v3518_v26, %s12098_s0  ;;  %3796 = vrot.lane.b32.xlu1 %v3517_v47, %s12098_s0  ;;  %v3536_v47 = vld [vmem:[#allocation9 + $0x140] sm:$0xff] }
 0xa3b   :  { %3794 = vrot.lane.b32.xlu0 %v3516_v24, %s12098_s0  ;;  %v3535_v24 = vld [vmem:[#allocation9 + $0x138] sm:$0xff] }
 0xa3c   :  { %v14358_v1 = vpop.permute.xlu2 %3646  ;;  %v14360_v28 = vpop.permute.xlu1 %3626 }
 0xa3d   :  { %v14362_v2 = vpop.permute.xlu0 %3624 }
 0xa42   :  { %3804 = vrot.lane.b32.xlu2 %v3521_v38, %s12098_s0  ;;  %3802 = vrot.lane.b32.xlu1 %v3520_v62, %s12098_s0  ;;  %v3534_v38 = vld [vmem:[#allocation9 + $0x130] sm:$0xff]  ;;  %v3417_v62 = vld [vmem:[%s18395_s20 + $0x38] sm:$0xff] }
 0xa43   :  { %3800 = vrot.lane.b32.xlu0 %v3519_v60, %s12098_s0  ;;  %v3890_v60 = vsel %vm113_vm0, %v3417_v62, %v14315_v34 }
 0xa44   :  { %v14367_v25 = vpop.permute.xlu2 %3652  ;;  %v14369_v8 = vpop.permute.xlu1 %3632 }
 0xa45   :  { %v14371_v35 = vpop.permute.xlu0 %3630 }
 0xa4a   :  { %3810 = vrot.lane.b32.xlu2 %v3524_v32, %s12098_s0  ;;  %3808 = vrot.lane.b32.xlu1 %v3523_v11, %s12098_s0 }
 0xa4b   :  { %3806 = vrot.lane.b32.xlu0 %v3522_v57, %s12098_s0 }
 0xa4c   :  { %v14376_v61 = vpop.permute.xlu2 %3658  ;;  %v14378_v39 = vpop.permute.xlu1 %3638 }
 0xa4d   :  { %v14380_v45 = vpop.permute.xlu0 %3636 }
 0xa52   :  { %3816 = vrot.lane.b32.xlu2 %v3527_v50, %s12098_s0  ;;  %3814 = vrot.lane.b32.xlu1 %v3526_v12, %s12098_s0  ;;  %v4066_v50 = vld [vmem:[#allocation8 + $0x158] sm:$0xff]  ;;  %v3538_v12 = vld [vmem:[#allocation9 + $0x150] sm:$0xf] }
 0xa53   :  { %3812 = vrot.lane.b32.xlu0 %v3525_v18, %s12098_s0  ;;  %v3537_v18 = vld [vmem:[#allocation9 + $0x148] sm:$0xff] }
 0xa54   :  { %v14385_v14 = vpop.permute.xlu2 %3664  ;;  %v14387_v4 = vpop.permute.xlu1 %3644 }
 0xa55   :  { %v14389_v22 = vpop.permute.xlu0 %3642 }
 0xa5a   :  { %3822 = vrot.lane.b32.xlu2 %v3530_v44, %s12098_s0  ;;  %3820 = vrot.lane.b32.xlu1 %v3529_v7, %s12098_s0  ;;  %v3420_v44 = vld [vmem:[%s18395_s20 + $0x50] sm:$0xff]  ;;  %v3410_v7 = vld [vmem:[%s18395_s20] sm:$0xff] }
 0xa5b   :  { %3818 = vrot.lane.b32.xlu0 %v3528_v52, %s12098_s0  ;;  %v3893_v52 = vsel %vm113_vm0, %v3420_v44, %v14324_v30  ;;  %v3423_v30 = vld [vmem:[%s18395_s20 + $0x68] sm:$0xff] }
 0xa5c   :  { %v3757_v3 = vpop.permute.xlu2 %3756  ;;  %v14399_v27 = vpop.permute.xlu1 %3650 }
 0xa5d   :  { %v3927_v23 = vsel %vm1250_vm3, %v3884_v10, %v3757_v3  ;;  %v14402_v33 = vpop.permute.xlu0 %3648  ;;  %v3883_v3 = vsel %vm113_vm0, %v3410_v7, %v14299_v6  ;;  %v3413_v6 = vld [vmem:[%s18395_s20 + $0x18] sm:$0xff] }
 0xa5e   :  { %3972 = vst.msk [vmem:[#allocation10 + $0x8] sm:$0xff] %vm18382_vm1, %v3927_v23 }
 0xa62   :  { %3828 = vrot.lane.b32.xlu2 %v3533_v56, %s12098_s0  ;;  %3826 = vrot.lane.b32.xlu1 %v3532_v53, %s12098_s0  ;;  %v4069_v53 = vld [vmem:[#allocation8 + $0x170] sm:$0xff] }
 0xa63   :  { %3824 = vrot.lane.b32.xlu0 %v3531_v43, %s12098_s0  ;;  %v4068_v43 = vld [vmem:[#allocation8 + $0x168] sm:$0xff] }
 0xa64   :  { %v3763_v46 = vpop.permute.xlu2 %3762  ;;  %v14413_v29 = vpop.permute.xlu1 %3656 }
 0xa65   :  { %v3930_v16 = vsel %vm1250_vm3, %v3887_v49, %v3763_v46  ;;  %v14416_v26 = vpop.permute.xlu0 %3654  ;;  %v3412_v46 = vld [vmem:[%s18395_s20 + $0x10] sm:$0xff] }
 0xa66   :  { %3975 = vst.msk [vmem:[#allocation10 + $0x20] sm:$0xff] %vm18382_vm1, %v3930_v16  ;;  %v3896_v16 = vsel %vm113_vm0, %v3423_v30, %v14333_v13  ;;  %v4071_v13 = vld [vmem:[#allocation8 + $0x180] sm:$0xff]  ;;  %v3419_v30 = vld [vmem:[%s18395_s20 + $0x48] sm:$0xff] }
 0xa6a   :  { %3834 = vrot.lane.b32.xlu2 %v3536_v47, %s12098_s0  ;;  %3832 = vrot.lane.b32.xlu1 %v3535_v24, %s12098_s0  ;;  %v3886_v24 = vsel %vm113_vm0, %v3413_v6, %v14306_v9  ;;  %v3426_v9 = vld [vmem:[%s18395_s20 + $0x80] sm:$0xff] }
 0xa6b   :  { %3830 = vrot.lane.b32.xlu0 %v3534_v38, %s12098_s0  ;;  %v3899_v7 = vsel %vm113_vm0, %v3426_v9, %v14342_v5  ;;  %v4074_v5 = vld [vmem:[#allocation8 + $0x198] sm:$0xff] }
 0xa6c   :  { %v3769_v63 = vpop.permute.xlu2 %3768  ;;  %v14427_v32 = vpop.permute.xlu1 %3662 }
 0xa6d   :  { %v3933_v11 = vsel %vm1250_vm3, %v3890_v60, %v3769_v63  ;;  %v14430_v57 = vpop.permute.xlu0 %3660  ;;  %v3885_v60 = vsel %vm113_vm0, %v3412_v46, %v14297_v21  ;;  %v3415_v21 = vld [vmem:[%s18395_s20 + $0x28] sm:$0xff] }
 0xa6e   :  { %3978 = vst.msk [vmem:[#allocation10 + $0x38] sm:$0xff] %vm18382_vm1, %v3933_v11 }
 0xa72   :  { %4196 = vrot.lane.b32.xlu2 %v4066_v50, %s12091_s26  ;;  %3838 = vrot.lane.b32.xlu1 %v3538_v12, %s12098_s0  ;;  %v4072_v50 = vld [vmem:[#allocation8 + $0x188] sm:$0xff]  ;;  %v4070_v12 = vld [vmem:[#allocation8 + $0x178] sm:$0xff] }
 0xa73   :  { %3836 = vrot.lane.b32.xlu0 %v3537_v18, %s12098_s0  ;;  %v3416_v18 = vld [vmem:[%s18395_s20 + $0x30] sm:$0xff] }
 0xa74   :  { %v3775_v34 = vpop.permute.xlu2 %3774  ;;  %v3755_v40 = vpop.permute.xlu1 %3754 }
 0xa75   :  { %v3936_v10 = vsel %vm1250_vm3, %v3893_v52, %v3775_v34  ;;  %v3926_v23 = vsel %vm1250_vm3, %v3883_v3, %v3755_v40  ;;  %v14448_v56 = vpop.permute.xlu0 %3666  ;;  %v3889_v52 = vsel %vm113_vm0, %v3416_v18, %v14317_v20  ;;  %v3429_v20 = vld [vmem:[%s18395_s20 + $0x98] sm:$0xff] }
 0xa76   :  { %3981 = vst.msk [vmem:[#allocation10 + $0x50] sm:$0xff] %vm18382_vm1, %v3936_v10  ;;  %v3902_v46 = vsel %vm113_vm0, %v3429_v20, %v14351_v42  ;;  %v4077_v42 = vld [vmem:[#allocation8 + $0x1b0] sm:$0xff] }
 0xa77   :  { %3971 = vst.msk [vmem:[#allocation10] sm:$0xff] %vm18382_vm1, %v3926_v23  ;;  %v3888_v23 = vsel %vm113_vm0, %v3415_v21, %v14285_v58  ;;  %v3418_v58 = vld [vmem:[%s18395_s20 + $0x40] sm:$0xff] }
 0xa7a   :  { %4202 = vrot.lane.b32.xlu2 %v4069_v53, %s12091_s26  ;;  %4200 = vrot.lane.b32.xlu1 %v4068_v43, %s12091_s26  ;;  %v4075_v43 = vld [vmem:[#allocation8 + $0x1a0] sm:$0xff] }
 0xa7b   :  { %4198 = vrot.lane.b32.xlu0 %v4067_v36, %s12091_s26  ;;  %v4073_v36 = vld [vmem:[#allocation8 + $0x190] sm:$0xff] }
 0xa7c   :  { %v3781_v49 = vpop.permute.xlu2 %3780  ;;  %v3761_v47 = vpop.permute.xlu1 %3760 }
 0xa7d   :  { %v3939_v38 = vsel %vm1250_vm3, %v3896_v16, %v3781_v49  ;;  %v3929_v62 = vsel %vm1250_vm3, %v3886_v24, %v3761_v47  ;;  %v3759_v63 = vpop.permute.xlu0 %3758  ;;  %v3892_v16 = vsel %vm113_vm0, %v3419_v30, %v14326_v15  ;;  %v3432_v15 = vld [vmem:[%s18395_s20 + $0xb0] sm:$0xff] }
 0xa7e   :  { %3984 = vst.msk [vmem:[#allocation10 + $0x68] sm:$0xff] %vm18382_vm1, %v3939_v38  ;;  %v3928_v11 = vsel %vm1250_vm3, %v3885_v60, %v3759_v63  ;;  %v4078_v60 = vld [vmem:[#allocation8 + $0x1b8] sm:$0xff] }
 0xa7f   :  { %3974 = vst.msk [vmem:[#allocation10 + $0x18] sm:$0xff] %vm18382_vm1, %v3929_v62  ;;  %v3891_v62 = vsel %vm113_vm0, %v3418_v58, %v14290_v59  ;;  %v3421_v59 = vld [vmem:[%s18395_s20 + $0x58] sm:$0xff] }
 0xa80   :  { %3973 = vst.msk [vmem:[#allocation10 + $0x10] sm:$0xff] %vm18382_vm1, %v3928_v11  ;;  %v4076_v11 = vld [vmem:[#allocation8 + $0x1a8] sm:$0xff] }
 0xa82   :  { %4208 = vrot.lane.b32.xlu2 %v4072_v50, %s12091_s26  ;;  %4206 = vrot.lane.b32.xlu1 %v4071_v13, %s12091_s26  ;;  %v3422_v50 = vld [vmem:[%s18395_s20 + $0x60] sm:$0xff] }
 0xa83   :  { %4204 = vrot.lane.b32.xlu0 %v4070_v12, %s12091_s26  ;;  %v3905_v12 = vsel %vm113_vm0, %v3432_v15, %v14360_v28  ;;  %v3895_v18 = vsel %vm113_vm0, %v3422_v50, %v14335_v55  ;;  %v4080_v28 = vld [vmem:[#allocation8 + $0x1c8] sm:$0xff]  ;;  %v4086_v50 = vld [vmem:[#allocation8 + $0x1f8] sm:$0xff] }
 0xa84   :  { %v3787_v44 = vpop.permute.xlu2 %3786  ;;  %v3767_v34 = vpop.permute.xlu1 %3766  ;;  %v3435_v55 = vld [vmem:[%s18395_s20 + $0xc8] sm:$0xff] }
 0xa85   :  { %v3942_v40 = vsel %vm1250_vm3, %v3899_v7, %v3787_v44  ;;  %v3932_v3 = vsel %vm1250_vm3, %v3889_v52, %v3767_v34  ;;  %v3765_v10 = vpop.permute.xlu0 %3764  ;;  %v3894_v34 = vsel %vm113_vm0, %v3421_v59, %v14295_v31  ;;  %v3424_v31 = vld [vmem:[%s18395_s20 + $0x70] sm:$0xff] }
 0xa86   :  { %3987 = vst.msk [vmem:[#allocation10 + $0x80] sm:$0xff] %vm18382_vm1, %v3942_v40  ;;  %v3931_v53 = vsel %vm1250_vm3, %v3888_v23, %v3765_v10  ;;  %v4081_v40 = vld [vmem:[#allocation8 + $0x1d0] sm:$0xff]  ;;  %v3425_v10 = vld [vmem:[%s18395_s20 + $0x78] sm:$0xff]  ;;  %v3908_v23 = vsel %vm113_vm0, %v3435_v55, %v14369_v8  ;;  %v3897_v58 = vsel %vm113_vm0, %v3424_v31, %v14304_v17  ;;  %v4084_v8 = vld [vmem:[#allocation8 + $0x1e8] sm:$0xff] }
 0xa87   :  { %3977 = vst.msk [vmem:[#allocation10 + $0x30] sm:$0xff] %vm18382_vm1, %v3932_v3  ;;  %v4079_v3 = vld [vmem:[#allocation8 + $0x1c0] sm:$0xff]  ;;  %v3427_v17 = vld [vmem:[%s18395_s20 + $0x88] sm:$0xff]  ;;  %v4085_v59 = vld [vmem:[#allocation8 + $0x1f0] sm:$0xff] }
 0xa88   :  { %3976 = vst.msk [vmem:[#allocation10 + $0x28] sm:$0xff] %vm18382_vm1, %v3931_v53  ;;  %v3434_v55 = vld [vmem:[%s18395_s20 + $0xc0] sm:$0xff] }
 0xa8a   :  { %4214 = vrot.lane.b32.xlu2 %v4075_v43, %s12091_s26  ;;  %4212 = vrot.lane.b32.xlu1 %v4074_v5, %s12091_s26  ;;  %v3898_v5 = vsel %vm113_vm0, %v3425_v10, %v14344_v51  ;;  %v3438_v51 = vld [vmem:[%s18395_s20 + $0xe0] sm:$0xff] }
 0xa8b   :  { %4210 = vrot.lane.b32.xlu0 %v4073_v36, %s12091_s26 }
 0xa8c   :  { %v3793_v6 = vpop.permute.xlu2 %3792  ;;  %v3773_v49 = vpop.permute.xlu1 %3772 }
 0xa8d   :  { %v3945_v47 = vsel %vm1250_vm3, %v3902_v46, %v3793_v6  ;;  %v3935_v24 = vsel %vm1250_vm3, %v3892_v16, %v3773_v49  ;;  %v3771_v38 = vpop.permute.xlu0 %3770  ;;  %v4083_v46 = vld [vmem:[#allocation8 + $0x1e0] sm:$0xff]  ;;  %v4082_v49 = vld [vmem:[#allocation8 + $0x1d8] sm:$0xff]  ;;  %v3428_v16 = vld [vmem:[%s18395_s20 + $0x90] sm:$0xff] }
 0xa8e   :  { %3990 = vst.msk [vmem:[#allocation10 + $0x98] sm:$0xff] %vm18382_vm1, %v3945_v47  ;;  %v3934_v63 = vsel %vm1250_vm3, %v3891_v62, %v3771_v38  ;;  %v3911_v47 = vsel %vm113_vm0, %v3438_v51, %v14378_v39  ;;  %v3901_v62 = vsel %vm113_vm0, %v3428_v16, %v14353_v19  ;;  %v4087_v39 = vld [vmem:[#allocation8 + $0x200] sm:$0xff]  ;;  %v3441_v19 = vld [vmem:[%s18395_s20 + $0xf8] sm:$0xff] }
 0xa8f   :  { %3980 = vst.msk [vmem:[#allocation10 + $0x48] sm:$0xff] %vm18382_vm1, %v3935_v24 }
 0xa90   :  { %3979 = vst.msk [vmem:[#allocation10 + $0x40] sm:$0xff] %vm18382_vm1, %v3934_v63 }
 0xa92   :  { %4220 = vrot.lane.b32.xlu2 %v4078_v60, %s12091_s26  ;;  %4218 = vrot.lane.b32.xlu1 %v4077_v42, %s12091_s26 }
 0xa93   :  { %4216 = vrot.lane.b32.xlu0 %v4076_v11, %s12091_s26  ;;  %v3900_v11 = vsel %vm113_vm0, %v3427_v17, %v14313_v0  ;;  %v3430_v0 = vld [vmem:[%s18395_s20 + $0xa0] sm:$0xff] }
 0xa94   :  { %v3799_v13 = vpop.permute.xlu2 %3798  ;;  %v3779_v9 = vpop.permute.xlu1 %3778 }
 0xa95   :  { %v3948_v21 = vsel %vm1250_vm3, %v3905_v12, %v3799_v13  ;;  %v3938_v44 = vsel %vm1250_vm3, %v3895_v18, %v3779_v9  ;;  %v3777_v7 = vpop.permute.xlu0 %3776  ;;  %v3431_v13 = vld [vmem:[%s18395_s20 + $0xa8] sm:$0xff]  ;;  %v3914_v12 = vsel %vm113_vm0, %v3441_v19, %v14387_v4  ;;  %v4090_v4 = vld [vmem:[#allocation8 + $0x218] sm:$0xff] }
 0xa96   :  { %3993 = vst.msk [vmem:[#allocation10 + $0xb0] sm:$0xff] %vm18382_vm1, %v3948_v21  ;;  %v3937_v52 = vsel %vm1250_vm3, %v3894_v34, %v3777_v7  ;;  %v3904_v21 = vsel %vm113_vm0, %v3431_v13, %v14362_v2  ;;  %v3444_v2 = vld [vmem:[%s18395_s20 + $0x110] sm:$0xff] }
 0xa97   :  { %3983 = vst.msk [vmem:[#allocation10 + $0x60] sm:$0xff] %vm18382_vm1, %v3938_v44  ;;  %v3917_v10 = vsel %vm113_vm0, %v3444_v2, %v14399_v27  ;;  %v4093_v27 = vld [vmem:[#allocation8 + $0x230] sm:$0xff]  ;;  %v4100_v2 = vld [vmem:[#allocation8 + $0x268] sm:$0xff] }
 0xa98   :  { %3982 = vst.msk [vmem:[#allocation10 + $0x58] sm:$0xff] %vm18382_vm1, %v3937_v52  ;;  %v3903_v52 = vsel %vm113_vm0, %v3430_v0, %v14322_v37  ;;  %v3433_v37 = vld [vmem:[%s18395_s20 + $0xb8] sm:$0xff] }
 0xa9a   :  { %4226 = vrot.lane.b32.xlu2 %v4081_v40, %s12091_s26  ;;  %4224 = vrot.lane.b32.xlu1 %v4080_v28, %s12091_s26  ;;  %v4089_v28 = vld [vmem:[#allocation8 + $0x210] sm:$0xff] }
 0xa9b   :  { %4222 = vrot.lane.b32.xlu0 %v4079_v3, %s12091_s26  ;;  %v4088_v3 = vld [vmem:[#allocation8 + $0x208] sm:$0xff] }
 0xa9c   :  { %v3805_v53 = vpop.permute.xlu2 %3804  ;;  %v3785_v43 = vpop.permute.xlu1 %3784 }
 0xa9d   :  { %v3951_v36 = vsel %vm1250_vm3, %v3908_v23, %v3805_v53  ;;  %v3941_v20 = vsel %vm1250_vm3, %v3898_v5, %v3785_v43  ;;  %v3783_v30 = vpop.permute.xlu0 %3782  ;;  %v3907_v53 = vsel %vm113_vm0, %v3434_v55, %v14371_v35  ;;  %v3437_v35 = vld [vmem:[%s18395_s20 + $0xd8] sm:$0xff] }
 0xa9e   :  { %3996 = vst.msk [vmem:[#allocation10 + $0xc8] sm:$0xff] %vm18382_vm1, %v3951_v36  ;;  %v3940_v6 = vsel %vm1250_vm3, %v3897_v58, %v3783_v30  ;;  %v4092_v58 = vld [vmem:[#allocation8 + $0x228] sm:$0xff] }
 0xa9f   :  { %3986 = vst.msk [vmem:[#allocation10 + $0x78] sm:$0xff] %vm18382_vm1, %v3941_v20  ;;  %v3906_v20 = vsel %vm113_vm0, %v3433_v37, %v14331_v54  ;;  %v3436_v54 = vld [vmem:[%s18395_s20 + $0xd0] sm:$0xff] }
 0xaa0   :  { %3985 = vst.msk [vmem:[#allocation10 + $0x70] sm:$0xff] %vm18382_vm1, %v3940_v6  ;;  %v4091_v6 = vld [vmem:[#allocation8 + $0x220] sm:$0xff]  ;;  %v3909_v17 = vsel %vm113_vm0, %v3436_v54, %v14340_v48  ;;  %v3440_v48 = vld [vmem:[%s18395_s20 + $0xf0] sm:$0xff] }
 0xaa2   :  { %4232 = vrot.lane.b32.xlu2 %v4084_v8, %s12091_s26  ;;  %4230 = vrot.lane.b32.xlu1 %v4083_v46, %s12091_s26  ;;  %v3447_v8 = vld [vmem:[%s18395_s20 + $0x128] sm:$0xff]  ;;  %v3910_v46 = vsel %vm113_vm0, %v3437_v35, %v14380_v45 }
 0xaa3   :  { %4228 = vrot.lane.b32.xlu0 %v4082_v49, %s12091_s26  ;;  %v3920_v49 = vsel %vm113_vm0, %v3447_v8, %v14413_v29  ;;  %v4096_v45 = vld [vmem:[#allocation8 + $0x248] sm:$0xff]  ;;  %v4094_v29 = vld [vmem:[#allocation8 + $0x238] sm:$0xff] }
 0xaa4   :  { %v3811_v24 = vpop.permute.xlu2 %3810  ;;  %v3791_v38 = vpop.permute.xlu1 %3790 }
 0xaa5   :  { %v3954_v63 = vsel %vm1250_vm3, %v3911_v47, %v3811_v24  ;;  %v3944_v60 = vsel %vm1250_vm3, %v3901_v62, %v3791_v38  ;;  %v3789_v42 = vpop.permute.xlu0 %3788 }
 0xaa6   :  { %3999 = vst.msk [vmem:[#allocation10 + $0xe0] sm:$0xff] %vm18382_vm1, %v3954_v63  ;;  %v3943_v15 = vsel %vm1250_vm3, %v3900_v11, %v3789_v42  ;;  %v4095_v63 = vld [vmem:[#allocation8 + $0x240] sm:$0xff]  ;;  %v3439_v42 = vld [vmem:[%s18395_s20 + $0xe8] sm:$0xff]  ;;  %v3913_v11 = vsel %vm113_vm0, %v3440_v48, %v14389_v22  ;;  %v4111_v48 = vld [vmem:[#allocation9 + $0x160] sm:$0xff] }
 0xaa7   :  { %3989 = vst.msk [vmem:[#allocation10 + $0x90] sm:$0xff] %vm18382_vm1, %v3944_v60  ;;  %v3450_v60 = vld [vmem:[%s18395_s20 + $0x140] sm:$0xff] }
 0xaa8   :  { %3988 = vst.msk [vmem:[#allocation10 + $0x88] sm:$0xff] %vm18382_vm1, %v3943_v15  ;;  %v3923_v15 = vsel %vm113_vm0, %v3450_v60, %v14427_v32  ;;  %v4099_v22 = vld [vmem:[#allocation8 + $0x260] sm:$0xff]  ;;  %v4097_v32 = vld [vmem:[#allocation8 + $0x250] sm:$0xff] }
 0xaaa   :  { %4238 = vrot.lane.b32.xlu2 %v4087_v39, %s12091_s26  ;;  %4236 = vrot.lane.b32.xlu1 %v4086_v50, %s12091_s26 }
 0xaab   :  { %4234 = vrot.lane.b32.xlu0 %v4085_v59, %s12091_s26  ;;  %v3912_v59 = vsel %vm113_vm0, %v3439_v42, %v14349_v41  ;;  %v3443_v41 = vld [vmem:[%s18395_s20 + $0x108] sm:$0xff] }
 0xaac   :  { %v3817_v9 = vpop.permute.xlu2 %3816  ;;  %v3797_v18 = vpop.permute.xlu1 %3796 }
 0xaad   :  { %v3957_v44 = vsel %vm1250_vm3, %v3914_v12, %v3817_v9  ;;  %v3947_v7 = vsel %vm1250_vm3, %v3904_v21, %v3797_v18  ;;  %v3795_v34 = vpop.permute.xlu0 %3794  ;;  %v4098_v9 = vld [vmem:[#allocation8 + $0x258] sm:$0xff]  ;;  %v3442_v18 = vld [vmem:[%s18395_s20 + $0x100] sm:$0xff]  ;;  %v3916_v21 = vsel %vm113_vm0, %v3443_v41, %v14402_v33 }
 0xaae   :  { %4002 = vst.msk [vmem:[#allocation10 + $0xf8] sm:$0xff] %vm18382_vm1, %v3957_v44  ;;  %v3946_v40 = vsel %vm1250_vm3, %v3903_v52, %v3795_v34  ;;  %v3915_v34 = vsel %vm113_vm0, %v3442_v18, %v14358_v1  ;;  %v3446_v33 = vld [vmem:[%s18395_s20 + $0x120] sm:$0xff]  ;;  %v3445_v1 = vld [vmem:[%s18395_s20 + $0x118] sm:$0xff] }
 0xaaf   :  { %3992 = vst.msk [vmem:[#allocation10 + $0xa8] sm:$0xff] %vm18382_vm1, %v3947_v7  ;;  %v3919_v55 = vsel %vm113_vm0, %v3446_v33, %v14416_v26  ;;  %v3449_v26 = vld [vmem:[%s18395_s20 + $0x138] sm:$0xff]  ;;  %v4121_v41 = vld [vmem:[#allocation9 + $0x1b0] sm:$0xff] }
 0xab0   :  { %3991 = vst.msk [vmem:[#allocation10 + $0xa0] sm:$0xff] %vm18382_vm1, %v3946_v40  ;;  %v4120_v18 = vld [vmem:[#allocation9 + $0x1a8] sm:$0xff] }
 0xab2   :  { %4244 = vrot.lane.b32.xlu2 %v4090_v4, %s12091_s26  ;;  %4242 = vrot.lane.b32.xlu1 %v4089_v28, %s12091_s26  ;;  %v4102_v28 = vld [vmem:[#allocation8 + $0x278] sm:$0xff] }
 0xab3   :  { %4240 = vrot.lane.b32.xlu0 %v4088_v3, %s12091_s26  ;;  %v4101_v3 = vld [vmem:[#allocation8 + $0x270] sm:$0xff] }
 0xab4   :  { %v3823_v31 = vpop.permute.xlu2 %3822  ;;  %v3803_v23 = vpop.permute.xlu1 %3802 }
 0xab5   :  { %v3960_v43 = vsel %vm1250_vm3, %v3917_v10, %v3823_v31  ;;  %v3950_v5 = vsel %vm1250_vm3, %v3907_v53, %v3803_v23  ;;  %v3801_v36 = vpop.permute.xlu0 %3800  ;;  %v3918_v31 = vsel %vm113_vm0, %v3445_v1, %v14367_v25  ;;  %v3448_v25 = vld [vmem:[%s18395_s20 + $0x130] sm:$0xff] }
 0xab6   :  { %4005 = vst.msk [vmem:[#allocation10 + $0x110] sm:$0xff] %vm18382_vm1, %v3960_v43  ;;  %v3949_v30 = vsel %vm1250_vm3, %v3906_v20, %v3801_v36  ;;  %v4104_v36 = vld [vmem:[#allocation8 + $0x288] sm:$0xff]  ;;  %v4103_v20 = vld [vmem:[#allocation8 + $0x280] sm:$0xff]  ;;  %v4127_v1 = vld [vmem:[#allocation9 + $0x1e0] sm:$0xff] }
 0xab7   :  { %3995 = vst.msk [vmem:[#allocation10 + $0xc0] sm:$0xff] %vm18382_vm1, %v3950_v5  ;;  %v4105_v5 = vld [vmem:[#allocation8 + $0x290] sm:$0xff] }
 0xab8   :  { %3994 = vst.msk [vmem:[#allocation10 + $0xb8] sm:$0xff] %vm18382_vm1, %v3949_v30  ;;  %v3922_v30 = vsel %vm113_vm0, %v3449_v26, %v14430_v57  ;;  %v3452_v57 = vld [vmem:[%s18395_s20 + $0x150] sm:$0xf] }
 0xaba   :  { %4250 = vrot.lane.b32.xlu2 %v4093_v27, %s12091_s26  ;;  %4248 = vrot.lane.b32.xlu1 %v4092_v58, %s12091_s26 }
 0xabb   :  { %4246 = vrot.lane.b32.xlu0 %v4091_v6, %s12091_s26  ;;  %v3921_v6 = vsel %vm113_vm0, %v3448_v25, %v14376_v61  ;;  %v3451_v61 = vld [vmem:[%s18395_s20 + $0x148] sm:$0xff] }
 0xabc   :  { %v3829_v51 = vpop.permute.xlu2 %3828  ;;  %v3809_v16 = vpop.permute.xlu1 %3808 }
 0xabd   :  { %v3963_v47 = vsel %vm1250_vm3, %v3920_v49, %v3829_v51  ;;  %v3953_v24 = vsel %vm1250_vm3, %v3910_v46, %v3809_v16  ;;  %v3807_v38 = vpop.permute.xlu0 %3806  ;;  %v4108_v46 = vld [vmem:[#allocation8 + $0x2a8] sm:$0xf]  ;;  %v4107_v49 = vld [vmem:[#allocation8 + $0x2a0] sm:$0xff]  ;;  %v4106_v51 = vld [vmem:[#allocation8 + $0x298] sm:$0xff]  ;;  %v3925_v16 = vsel %vm113_vm0, %v3452_v57, %v14448_v56 }
 0xabe   :  { %4008 = vst.msk [vmem:[#allocation10 + $0x128] sm:$0xff] %vm18382_vm1, %v3963_v47  ;;  %v3952_v62 = vsel %vm1250_vm3, %v3909_v17, %v3807_v38  ;;  %v4110_v56 = vld [vmem:[#allocation9 + $0x158] sm:$0xff] }
 0xabf   :  { %3998 = vst.msk [vmem:[#allocation10 + $0xd8] sm:$0xff] %vm18382_vm1, %v3953_v24  ;;  %v3924_v24 = vsel %vm113_vm0, %v3451_v61, %v14385_v14 }
 0xac0   :  { %3997 = vst.msk [vmem:[#allocation10 + $0xd0] sm:$0xff] %vm18382_vm1, %v3952_v62 }
 0xac2   :  { %4256 = vrot.lane.b32.xlu2 %v4096_v45, %s12091_s26  ;;  %4254 = vrot.lane.b32.xlu1 %v4095_v63, %s12091_s26 }
 0xac3   :  { %4252 = vrot.lane.b32.xlu0 %v4094_v29, %s12091_s26  ;;  %v4112_v29 = vld [vmem:[#allocation9 + $0x168] sm:$0xff] }
 0xac4   :  { %v3835_v39 = vpop.permute.xlu2 %3834  ;;  %v3815_v50 = vpop.permute.xlu1 %3814 }
 0xac5   :  { %v3966_v19 = vsel %vm1250_vm3, %v3923_v15, %v3835_v39  ;;  %v3956_v13 = vsel %vm1250_vm3, %v3913_v11, %v3815_v50  ;;  %v3813_v0 = vpop.permute.xlu0 %3812  ;;  %v4115_v11 = vld [vmem:[#allocation9 + $0x180] sm:$0xff]  ;;  %v4114_v15 = vld [vmem:[#allocation9 + $0x178] sm:$0xff]  ;;  %v4113_v39 = vld [vmem:[#allocation9 + $0x170] sm:$0xff] }
 0xac6   :  { %4011 = vst.msk [vmem:[#allocation10 + $0x140] sm:$0xff] %vm18382_vm1, %v3966_v19  ;;  %v3955_v12 = vsel %vm1250_vm3, %v3912_v59, %v3813_v0  ;;  %v4117_v0 = vld [vmem:[#allocation9 + $0x190] sm:$0xff] }
 0xac7   :  { %4001 = vst.msk [vmem:[#allocation10 + $0xf0] sm:$0xff] %vm18382_vm1, %v3956_v13  ;;  %v4118_v13 = vld [vmem:[#allocation9 + $0x198] sm:$0xff] }
 0xac8   :  { %4000 = vst.msk [vmem:[#allocation10 + $0xe8] sm:$0xff] %vm18382_vm1, %v3955_v12  ;;  %v4116_v12 = vld [vmem:[#allocation9 + $0x188] sm:$0xff] }
 0xaca   :  { %4262 = vrot.lane.b32.xlu2 %v4099_v22, %s12091_s26  ;;  %4260 = vrot.lane.b32.xlu1 %v4098_v9, %s12091_s26 }
 0xacb   :  { %4258 = vrot.lane.b32.xlu0 %v4097_v32, %s12091_s26 }
 0xacc   :  { %v14703_v44 = vpop.permute.xlu2 %4196  ;;  %v3821_v7 = vpop.permute.xlu1 %3820 }
 0xacd   :  { %v3959_v52 = vsel %vm1250_vm3, %v3916_v21, %v3821_v7  ;;  %v3819_v40 = vpop.permute.xlu0 %3818  ;;  %v4119_v21 = vld [vmem:[#allocation9 + $0x1a0] sm:$0xff] }
 0xace   :  { %4004 = vst.msk [vmem:[#allocation10 + $0x108] sm:$0xff] %vm18382_vm1, %v3959_v52  ;;  %v3958_v4 = vsel %vm1250_vm3, %v3915_v34, %v3819_v40  ;;  %v4124_v40 = vld [vmem:[#allocation9 + $0x1c8] sm:$0xff] }
 0xacf   :  { %4003 = vst.msk [vmem:[#allocation10 + $0x100] sm:$0xff] %vm18382_vm1, %v3958_v4  ;;  %v4123_v4 = vld [vmem:[#allocation9 + $0x1c0] sm:$0xff] }
 0xad2   :  { %4268 = vrot.lane.b32.xlu2 %v4102_v28, %s12091_s26  ;;  %4266 = vrot.lane.b32.xlu1 %v4101_v3, %s12091_s26  ;;  %v4122_v28 = vld [vmem:[#allocation9 + $0x1b8] sm:$0xff] }
 0xad3   :  { %4264 = vrot.lane.b32.xlu0 %v4100_v2, %s12091_s26 }
 0xad4   :  { %v14722_v37 = vpop.permute.xlu2 %4202  ;;  %v3827_v10 = vpop.permute.xlu1 %3826 }
 0xad5   :  { %v3962_v23 = vsel %vm1250_vm3, %v3919_v55, %v3827_v10  ;;  %v3825_v53 = vpop.permute.xlu0 %3824  ;;  %v4126_v55 = vld [vmem:[#allocation9 + $0x1d8] sm:$0xff]  ;;  %v4125_v10 = vld [vmem:[#allocation9 + $0x1d0] sm:$0xff] }
 0xad6   :  { %4007 = vst.msk [vmem:[#allocation10 + $0x120] sm:$0xff] %vm18382_vm1, %v3962_v23  ;;  %v3961_v43 = vsel %vm1250_vm3, %v3918_v31, %v3825_v53 }
 0xad7   :  { %4006 = vst.msk [vmem:[#allocation10 + $0x118] sm:$0xff] %vm18382_vm1, %v3961_v43  ;;  %v4130_v43 = vld [vmem:[#allocation9 + $0x1f8] sm:$0xff] }
 0xada   :  { %4274 = vrot.lane.b32.xlu2 %v4105_v5, %s12091_s26  ;;  %4272 = vrot.lane.b32.xlu1 %v4104_v36, %s12091_s26  ;;  %v4129_v5 = vld [vmem:[#allocation9 + $0x1f0] sm:$0xff]  ;;  %v4128_v36 = vld [vmem:[#allocation9 + $0x1e8] sm:$0xff] }
 0xadb   :  { %4270 = vrot.lane.b32.xlu0 %v4103_v20, %s12091_s26 }
 0xadc   :  { %v14741_v27 = vpop.permute.xlu2 %4208  ;;  %v3833_v58 = vpop.permute.xlu1 %3832 }
 0xadd   :  { %v3965_v35 = vsel %vm1250_vm3, %v3922_v30, %v3833_v58  ;;  %v3831_v8 = vpop.permute.xlu0 %3830  ;;  %v4133_v30 = vld [vmem:[#allocation9 + $0x210] sm:$0xff]  ;;  %v4132_v58 = vld [vmem:[#allocation9 + $0x208] sm:$0xff] }
 0xade   :  { %4010 = vst.msk [vmem:[#allocation10 + $0x138] sm:$0xff] %vm18382_vm1, %v3965_v35  ;;  %v3964_v54 = vsel %vm1250_vm3, %v3921_v6, %v3831_v8  ;;  %v4131_v6 = vld [vmem:[#allocation9 + $0x200] sm:$0xff] }
 0xadf   :  { %4009 = vst.msk [vmem:[#allocation10 + $0x130] sm:$0xff] %vm18382_vm1, %v3964_v54 }
 0xae2   :  { %4280 = vrot.lane.b32.xlu2 %v4108_v46, %s12091_s26  ;;  %4278 = vrot.lane.b32.xlu1 %v4107_v49, %s12091_s26  ;;  %v4136_v46 = vld [vmem:[#allocation9 + $0x228] sm:$0xff]  ;;  %v4135_v49 = vld [vmem:[#allocation9 + $0x220] sm:$0xff] }
 0xae3   :  { %4276 = vrot.lane.b32.xlu0 %v4106_v51, %s12091_s26  ;;  %v4134_v51 = vld [vmem:[#allocation9 + $0x218] sm:$0xff] }
 0xae4   :  { %v14760_v17 = vpop.permute.xlu2 %4214  ;;  %v3839_v47 = vpop.permute.xlu1 %3838 }
 0xae5   :  { %v3968_v38 = vsel %vm1250_vm3, %v3925_v16, %v3839_v47  ;;  %v3837_v62 = vpop.permute.xlu0 %3836  ;;  %v4139_v47 = vld [vmem:[#allocation9 + $0x240] sm:$0xff] }
 0xae6   :  { %v3970_v45 = vsel %vm3969_vm8, %v3968_v38, 0.0  ;;  %v3967_v63 = vsel %vm1250_vm3, %v3924_v24, %v3837_v62  ;;  %v4138_v24 = vld [vmem:[#allocation9 + $0x238] sm:$0xff]  ;;  %v4137_v38 = vld [vmem:[#allocation9 + $0x230] sm:$0xff] }
 0xae7   :  { %4013 = vst.msk [vmem:[#allocation10 + $0x150] sm:$0xff] %vm18382_vm1, %v3970_v45 }
 0xae8   :  { %4012 = vst.msk [vmem:[#allocation10 + $0x148] sm:$0xff] %vm18382_vm1, %v3967_v63 }
 0xaea   :  { %4372 = vrot.lane.b32.xlu2 %v4112_v29, %s12098_s0  ;;  %4370 = vrot.lane.b32.xlu1 %v4111_v48, %s12098_s0  ;;  %v4141_v29 = vld [vmem:[#allocation9 + $0x250] sm:$0xff]  ;;  %v4140_v48 = vld [vmem:[#allocation9 + $0x248] sm:$0xff] }
 0xaeb   :  { %4368 = vrot.lane.b32.xlu0 %v4110_v56, %s12098_s0  ;;  %v4152_v56 = vld [vmem:[#allocation9 + $0x2a8] sm:$0xf] }
 0xaec   :  { %v14772_v14 = vpop.permute.xlu2 %4220  ;;  %v14774_v60 = vpop.permute.xlu1 %4200 }
 0xaed   :  { %v14776_v42 = vpop.permute.xlu0 %4198 }
 0xaf2   :  { %4378 = vrot.lane.b32.xlu2 %v4115_v11, %s12098_s0  ;;  %4376 = vrot.lane.b32.xlu1 %v4114_v15, %s12098_s0 }
 0xaf3   :  { %4374 = vrot.lane.b32.xlu0 %v4113_v39, %s12098_s0 }
 0xaf4   :  { %v14781_v50 = vpop.permute.xlu2 %4226  ;;  %v14783_v59 = vpop.permute.xlu1 %4206 }
 0xaf5   :  { %v14785_v19 = vpop.permute.xlu0 %4204 }
 0xafa   :  { %4384 = vrot.lane.b32.xlu2 %v4118_v13, %s12098_s0  ;;  %4382 = vrot.lane.b32.xlu1 %v4117_v0, %s12098_s0  ;;  %v4144_v13 = vld [vmem:[#allocation9 + $0x268] sm:$0xff]  ;;  %v4143_v0 = vld [vmem:[#allocation9 + $0x260] sm:$0xff] }
 0xafb   :  { %4380 = vrot.lane.b32.xlu0 %v4116_v12, %s12098_s0  ;;  %v4142_v12 = vld [vmem:[#allocation9 + $0x258] sm:$0xff] }
 0xafc   :  { %v14790_v22 = vpop.permute.xlu2 %4232  ;;  %v14792_v9 = vpop.permute.xlu1 %4212 }
 0xafd   :  { %v14794_v32 = vpop.permute.xlu0 %4210 }
 0xb02   :  { %4390 = vrot.lane.b32.xlu2 %v4121_v41, %s12098_s0  ;;  %4388 = vrot.lane.b32.xlu1 %v4120_v18, %s12098_s0  ;;  %v9507_v41 = vld [vmem:[%s18395_s20 + $0x168] sm:$0xff] }
 0xb03   :  { %4386 = vrot.lane.b32.xlu0 %v4119_v21, %s12098_s0  ;;  %v4499_v18 = vsel %vm113_vm0, %v9507_v41, %v14774_v60 }
 0xb04   :  { %v14799_v7 = vpop.permute.xlu2 %4238  ;;  %v14801_v34 = vpop.permute.xlu1 %4218 }
 0xb05   :  { %v14803_v52 = vpop.permute.xlu0 %4216 }
 0xb0a   :  { %4396 = vrot.lane.b32.xlu2 %v4124_v40, %s12098_s0  ;;  %4394 = vrot.lane.b32.xlu1 %v4123_v4, %s12098_s0 }
 0xb0b   :  { %4392 = vrot.lane.b32.xlu0 %v4122_v28, %s12098_s0 }
 0xb0c   :  { %v14808_v3 = vpop.permute.xlu2 %4244  ;;  %v14810_v2 = vpop.permute.xlu1 %4224 }
 0xb0d   :  { %v14812_v33 = vpop.permute.xlu0 %4222 }
 0xb12   :  { %4402 = vrot.lane.b32.xlu2 %v4127_v1, %s12098_s0  ;;  %4400 = vrot.lane.b32.xlu1 %v4126_v55, %s12098_s0  ;;  %v4147_v1 = vld [vmem:[#allocation9 + $0x280] sm:$0xff]  ;;  %v4146_v55 = vld [vmem:[#allocation9 + $0x278] sm:$0xff] }
 0xb13   :  { %4398 = vrot.lane.b32.xlu0 %v4125_v10, %s12098_s0  ;;  %v4145_v10 = vld [vmem:[#allocation9 + $0x270] sm:$0xff] }
 0xb14   :  { %v14817_v31 = vpop.permute.xlu2 %4250  ;;  %v14819_v23 = vpop.permute.xlu1 %4230 }
 0xb15   :  { %v14821_v53 = vpop.permute.xlu0 %4228 }
 0xb1a   :  { %4408 = vrot.lane.b32.xlu2 %v4130_v43, %s12098_s0  ;;  %4406 = vrot.lane.b32.xlu1 %v4129_v5, %s12098_s0  ;;  %v9510_v43 = vld [vmem:[%s18395_s20 + $0x180] sm:$0xff] }
 0xb1b   :  { %4404 = vrot.lane.b32.xlu0 %v4128_v36, %s12098_s0  ;;  %v4502_v60 = vsel %vm113_vm0, %v9510_v43, %v14783_v59 }
 0xb1c   :  { %v14826_v20 = vpop.permute.xlu2 %4256  ;;  %v14828_v26 = vpop.permute.xlu1 %4236 }
 0xb1d   :  { %v14830_v25 = vpop.permute.xlu0 %4234 }
 0xb22   :  { %4414 = vrot.lane.b32.xlu2 %v4133_v30, %s12098_s0  ;;  %4412 = vrot.lane.b32.xlu1 %v4132_v58, %s12098_s0 }
 0xb23   :  { %4410 = vrot.lane.b32.xlu0 %v4131_v6, %s12098_s0  ;;  %v4150_v6 = vld [vmem:[#allocation9 + $0x298] sm:$0xff] }
 0xb24   :  { %v14835_v35 = vpop.permute.xlu2 %4262  ;;  %v14837_v8 = vpop.permute.xlu1 %4242 }
 0xb25   :  { %v14839_v54 = vpop.permute.xlu0 %4240 }
 0xb2a   :  { %4420 = vrot.lane.b32.xlu2 %v4136_v46, %s12098_s0  ;;  %4418 = vrot.lane.b32.xlu1 %v4135_v49, %s12098_s0  ;;  %v4149_v46 = vld [vmem:[#allocation9 + $0x290] sm:$0xff]  ;;  %v4148_v49 = vld [vmem:[#allocation9 + $0x288] sm:$0xff] }
 0xb2b   :  { %4416 = vrot.lane.b32.xlu0 %v4134_v51, %s12098_s0  ;;  %v9513_v51 = vld [vmem:[%s18395_s20 + $0x198] sm:$0xff] }
 0xb2c   :  { %v14844_v57 = vpop.permute.xlu2 %4268  ;;  %v14846_v61 = vpop.permute.xlu1 %4248  ;;  %v4505_v59 = vsel %vm113_vm0, %v9513_v51, %v14792_v9  ;;  %v9505_v9 = vld [vmem:[%s18395_s20 + $0x158] sm:$0xff] }
 0xb2d   :  { %v14848_v16 = vpop.permute.xlu0 %4246 }
 0xb32   :  { %4426 = vrot.lane.b32.xlu2 %v4139_v47, %s12098_s0  ;;  %4424 = vrot.lane.b32.xlu1 %v4138_v24, %s12098_s0 }
 0xb33   :  { %4422 = vrot.lane.b32.xlu0 %v4137_v38, %s12098_s0 }
 0xb34   :  { %v14853_v62 = vpop.permute.xlu2 %4274  ;;  %v14855_v45 = vpop.permute.xlu1 %4254 }
 0xb35   :  { %v14857_v63 = vpop.permute.xlu0 %4252 }
 0xb3a   :  { %4430 = vrot.lane.b32.xlu2 %v4141_v29, %s12098_s0  ;;  %4428 = vrot.lane.b32.xlu1 %v4140_v48, %s12098_s0  ;;  %v4151_v48 = vld [vmem:[#allocation9 + $0x2a0] sm:$0xff] }
 0xb3b   :  { %4452 = vrot.lane.b32.xlu0 %v4152_v56, %s12098_s0  ;;  %v9506_v56 = vld [vmem:[%s18395_s20 + $0x160] sm:$0xff] }
 0xb3c   :  { %v14862_v11 = vpop.permute.xlu2 %4280  ;;  %v14864_v15 = vpop.permute.xlu1 %4260 }
 0xb3d   :  { %v14866_v39 = vpop.permute.xlu0 %4258 }
 0xb42   :  { %4436 = vrot.lane.b32.xlu2 %v4144_v13, %s12098_s0  ;;  %4434 = vrot.lane.b32.xlu1 %v4143_v0, %s12098_s0  ;;  %v9516_v13 = vld [vmem:[%s18395_s20 + $0x1b0] sm:$0xff]  ;;  %v4498_v0 = vsel %vm113_vm0, %v9506_v56, %v14776_v42  ;;  %v9509_v42 = vld [vmem:[%s18395_s20 + $0x178] sm:$0xff] }
 0xb43   :  { %4432 = vrot.lane.b32.xlu0 %v4142_v12, %s12098_s0  ;;  %v4508_v12 = vsel %vm113_vm0, %v9516_v13, %v14801_v34  ;;  %v9508_v34 = vld [vmem:[%s18395_s20 + $0x170] sm:$0xff]  ;;  %v4501_v43 = vsel %vm113_vm0, %v9509_v42, %v14785_v19 }
 0xb44   :  { %v4373_v21 = vpop.permute.xlu2 %4372  ;;  %v14876_v40 = vpop.permute.xlu1 %4266  ;;  %v9512_v19 = vld [vmem:[%s18395_s20 + $0x190] sm:$0xff] }
 0xb45   :  { %v4542_v4 = vsel %vm1250_vm3, %v4499_v18, %v4373_v21  ;;  %v14879_v28 = vpop.permute.xlu0 %4264  ;;  %v4497_v21 = vsel %vm113_vm0, %v9505_v9, %v14703_v44  ;;  %v9519_v44 = vld [vmem:[%s18395_s20 + $0x1c8] sm:$0xff] }
 0xb46   :  { %4587 = vst.msk [vmem:[#allocation10 + $0x1a8] sm:$0xff] %vm18382_vm1, %v4542_v4 }
 0xb4a   :  { %4442 = vrot.lane.b32.xlu2 %v4147_v1, %s12098_s0  ;;  %4440 = vrot.lane.b32.xlu1 %v4146_v55, %s12098_s0 }
 0xb4b   :  { %4438 = vrot.lane.b32.xlu0 %v4145_v10, %s12098_s0 }
 0xb4c   :  { %v4379_v5 = vpop.permute.xlu2 %4378  ;;  %v14890_v36 = vpop.permute.xlu1 %4272 }
 0xb4d   :  { %v4545_v30 = vsel %vm1250_vm3, %v4502_v60, %v4379_v5  ;;  %v14893_v58 = vpop.permute.xlu0 %4270  ;;  %v4511_v60 = vsel %vm113_vm0, %v9519_v44, %v14810_v2  ;;  %v9511_v2 = vld [vmem:[%s18395_s20 + $0x188] sm:$0xff] }
 0xb4e   :  { %4590 = vst.msk [vmem:[#allocation10 + $0x1c0] sm:$0xff] %vm18382_vm1, %v4545_v30  ;;  %v4503_v13 = vsel %vm113_vm0, %v9511_v2, %v14741_v27  ;;  %v9525_v27 = vld [vmem:[%s18395_s20 + $0x1f8] sm:$0xff] }
 0xb52   :  { %4448 = vrot.lane.b32.xlu2 %v4150_v6, %s12098_s0  ;;  %4446 = vrot.lane.b32.xlu1 %v4149_v46, %s12098_s0  ;;  %v4500_v6 = vsel %vm113_vm0, %v9508_v34, %v14722_v37  ;;  %v9522_v37 = vld [vmem:[%s18395_s20 + $0x1e0] sm:$0xff] }
 0xb53   :  { %4444 = vrot.lane.b32.xlu0 %v4148_v49, %s12098_s0 }
 0xb54   :  { %v4385_v47 = vpop.permute.xlu2 %4384  ;;  %v14904_v24 = vpop.permute.xlu1 %4278 }
 0xb55   :  { %v4548_v38 = vsel %vm1250_vm3, %v4505_v59, %v4385_v47  ;;  %v14907_v29 = vpop.permute.xlu0 %4276  ;;  %v4504_v47 = vsel %vm113_vm0, %v9512_v19, %v14794_v32  ;;  %v9515_v32 = vld [vmem:[%s18395_s20 + $0x1a8] sm:$0xff] }
 0xb56   :  { %4593 = vst.msk [vmem:[#allocation10 + $0x1d8] sm:$0xff] %vm18382_vm1, %v4548_v38  ;;  %v4514_v38 = vsel %vm113_vm0, %v9522_v37, %v14819_v23  ;;  %v9514_v23 = vld [vmem:[%s18395_s20 + $0x1a0] sm:$0xff] }
 0xb5b   :  { %4450 = vrot.lane.b32.xlu0 %v4151_v48, %s12098_s0 }
 0xb5c   :  { %v4391_v41 = vpop.permute.xlu2 %4390  ;;  %v4371_v18 = vpop.permute.xlu1 %4370 }
 0xb5d   :  { %v4551_v4 = vsel %vm1250_vm3, %v4508_v12, %v4391_v41  ;;  %v4541_v1 = vsel %vm1250_vm3, %v4498_v0, %v4371_v18  ;;  %v4369_v55 = vpop.permute.xlu0 %4368  ;;  %v4507_v18 = vsel %vm113_vm0, %v9515_v32, %v14803_v52  ;;  %v9518_v52 = vld [vmem:[%s18395_s20 + $0x1c0] sm:$0xff] }
 0xb5e   :  { %4596 = vst.msk [vmem:[#allocation10 + $0x1f0] sm:$0xff] %vm18382_vm1, %v4551_v4  ;;  %v4540_v10 = vsel %vm1250_vm3, %v4497_v21, %v4369_v55  ;;  %v4517_v21 = vsel %vm113_vm0, %v9525_v27, %v14828_v26  ;;  %v4506_v55 = vsel %vm113_vm0, %v9514_v23, %v14760_v17  ;;  %v9528_v17 = vld [vmem:[%s18395_s20 + $0x210] sm:$0xff]  ;;  %v9517_v26 = vld [vmem:[%s18395_s20 + $0x1b8] sm:$0xff] }
 0xb5f   :  { %4586 = vst.msk [vmem:[#allocation10 + $0x1a0] sm:$0xff] %vm18382_vm1, %v4541_v1 }
 0xb60   :  { %4585 = vst.msk [vmem:[#allocation10 + $0x198] sm:$0xff] %vm18382_vm1, %v4540_v10 }
 0xb64   :  { %v4397_v5 = vpop.permute.xlu2 %4396  ;;  %v4377_v30 = vpop.permute.xlu1 %4376 }
 0xb65   :  { %v4554_v46 = vsel %vm1250_vm3, %v4511_v60, %v4397_v5  ;;  %v4544_v49 = vsel %vm1250_vm3, %v4501_v43, %v4377_v30  ;;  %v4375_v51 = vpop.permute.xlu0 %4374  ;;  %v4510_v43 = vsel %vm113_vm0, %v9518_v52, %v14812_v33  ;;  %v4520_v60 = vsel %vm113_vm0, %v9528_v17, %v14837_v8  ;;  %v9521_v33 = vld [vmem:[%s18395_s20 + $0x1d8] sm:$0xff]  ;;  %v9520_v8 = vld [vmem:[%s18395_s20 + $0x1d0] sm:$0xff] }
 0xb66   :  { %4599 = vst.msk [vmem:[#allocation10 + $0x208] sm:$0xff] %vm18382_vm1, %v4554_v46  ;;  %v4543_v59 = vsel %vm1250_vm3, %v4500_v6, %v4375_v51  ;;  %v4509_v6 = vsel %vm113_vm0, %v9517_v26, %v14772_v14  ;;  %v9531_v14 = vld [vmem:[%s18395_s20 + $0x228] sm:$0xff]  ;;  %v4513_v19 = vsel %vm113_vm0, %v9521_v33, %v14821_v53  ;;  %v9524_v53 = vld [vmem:[%s18395_s20 + $0x1f0] sm:$0xff] }
 0xb67   :  { %4589 = vst.msk [vmem:[#allocation10 + $0x1b8] sm:$0xff] %vm18382_vm1, %v4544_v49  ;;  %v4523_v37 = vsel %vm113_vm0, %v9531_v14, %v14846_v61  ;;  %v9523_v61 = vld [vmem:[%s18395_s20 + $0x1e8] sm:$0xff] }
 0xb68   :  { %4588 = vst.msk [vmem:[#allocation10 + $0x1b0] sm:$0xff] %vm18382_vm1, %v4543_v59  ;;  %v4515_v27 = vsel %vm113_vm0, %v9523_v61, %v14790_v22  ;;  %v9536_v22 = vld [vmem:[%s18395_s20 + $0x250] sm:$0xff] }
 0xb6c   :  { %v4403_v48 = vpop.permute.xlu2 %4402  ;;  %v4383_v56 = vpop.permute.xlu1 %4382 }
 0xb6d   :  { %v4557_v9 = vsel %vm1250_vm3, %v4514_v38, %v4403_v48  ;;  %v4547_v0 = vsel %vm1250_vm3, %v4504_v47, %v4383_v56  ;;  %v4381_v12 = vpop.permute.xlu0 %4380  ;;  %v4512_v38 = vsel %vm113_vm0, %v9520_v8, %v14781_v50  ;;  %v9534_v50 = vld [vmem:[%s18395_s20 + $0x240] sm:$0xff] }
 0xb6e   :  { %4602 = vst.msk [vmem:[#allocation10 + $0x220] sm:$0xff] %vm18382_vm1, %v4557_v9  ;;  %v4546_v41 = vsel %vm1250_vm3, %v4503_v13, %v4381_v12  ;;  %v4526_v12 = vsel %vm113_vm0, %v9534_v50, %v14855_v45  ;;  %v9526_v45 = vld [vmem:[%s18395_s20 + $0x200] sm:$0xff] }
 0xb6f   :  { %4592 = vst.msk [vmem:[#allocation10 + $0x1d0] sm:$0xff] %vm18382_vm1, %v4547_v0  ;;  %v4516_v0 = vsel %vm113_vm0, %v9524_v53, %v14830_v25  ;;  %v9527_v25 = vld [vmem:[%s18395_s20 + $0x208] sm:$0xff] }
 0xb70   :  { %4591 = vst.msk [vmem:[#allocation10 + $0x1c8] sm:$0xff] %vm18382_vm1, %v4546_v41 }
 0xb74   :  { %v4409_v4 = vpop.permute.xlu2 %4408  ;;  %v4389_v1 = vpop.permute.xlu1 %4388 }
 0xb75   :  { %v4560_v10 = vsel %vm1250_vm3, %v4517_v21, %v4409_v4  ;;  %v4550_v42 = vsel %vm1250_vm3, %v4507_v18, %v4389_v1  ;;  %v4387_v44 = vpop.permute.xlu0 %4386  ;;  %v4519_v1 = vsel %vm113_vm0, %v9527_v25, %v14839_v54  ;;  %v9530_v54 = vld [vmem:[%s18395_s20 + $0x220] sm:$0xff] }
 0xb76   :  { %4605 = vst.msk [vmem:[#allocation10 + $0x238] sm:$0xff] %vm18382_vm1, %v4560_v10  ;;  %v4549_v34 = vsel %vm1250_vm3, %v4506_v55, %v4387_v44  ;;  %v4528_v55 = vsel %vm113_vm0, %v9536_v22, %v14866_v39  ;;  %v4518_v44 = vsel %vm113_vm0, %v9526_v45, %v14799_v7  ;;  %v9539_v7 = vld [vmem:[%s18395_s20 + $0x268] sm:$0xff]  ;;  %v9529_v39 = vld [vmem:[%s18395_s20 + $0x218] sm:$0xff]  ;;  %v15170_v25 = vld [vmem:[%s18368_s10] sm:$0x1] }
 0xb77   :  { %4595 = vst.msk [vmem:[#allocation10 + $0x1e8] sm:$0xff] %vm18382_vm1, %v4550_v42  ;;  %v15175_v22 = vld [vmem:[%s18370_s12] sm:$0x1] }
 0xb78   :  { %4594 = vst.msk [vmem:[#allocation10 + $0x1e0] sm:$0xff] %vm18382_vm1, %v4549_v34 }
 0xb7c   :  { %v4415_v5 = vpop.permute.xlu2 %4414  ;;  %v4395_v30 = vpop.permute.xlu1 %4394 }
 0xb7d   :  { %v4563_v46 = vsel %vm1250_vm3, %v4520_v60, %v4415_v5  ;;  %v4553_v49 = vsel %vm1250_vm3, %v4510_v43, %v4395_v30  ;;  %v4393_v51 = vpop.permute.xlu0 %4392  ;;  %v4522_v43 = vsel %vm113_vm0, %v9530_v54, %v14848_v16  ;;  %v4531_v60 = vsel %vm113_vm0, %v9539_v7, %v14879_v28  ;;  %v9533_v16 = vld [vmem:[%s18395_s20 + $0x238] sm:$0xff]  ;;  %v9532_v28 = vld [vmem:[%s18395_s20 + $0x230] sm:$0xff] }
 0xb7e   :  { %4608 = vst.msk [vmem:[#allocation10 + $0x250] sm:$0xff] %vm18382_vm1, %v4563_v46  ;;  %v4552_v59 = vsel %vm1250_vm3, %v4509_v6, %v4393_v51  ;;  %v4521_v6 = vsel %vm113_vm0, %v9529_v39, %v14808_v3  ;;  %v9542_v3 = vld [vmem:[%s18395_s20 + $0x280] sm:$0xff]  ;;  %v4525_v33 = vsel %vm113_vm0, %v9533_v16, %v14857_v63  ;;  %v9535_v63 = vld [vmem:[%s18395_s20 + $0x248] sm:$0xff] }
 0xb7f   :  { %4598 = vst.msk [vmem:[#allocation10 + $0x200] sm:$0xff] %vm18382_vm1, %v4553_v49  ;;  %v4534_v14 = vsel %vm113_vm0, %v9542_v3, %v14893_v58  ;;  %v9547_v58 = vld [vmem:[%s18395_s20 + $0x2a8] sm:$0xf] }
 0xb80   :  { %4597 = vst.msk [vmem:[#allocation10 + $0x1f8] sm:$0xff] %vm18382_vm1, %v4552_v59 }
 0xb84   :  { %v4421_v2 = vpop.permute.xlu2 %4420  ;;  %v4401_v47 = vpop.permute.xlu1 %4400 }
 0xb85   :  { %v4566_v48 = vsel %vm1250_vm3, %v4523_v37, %v4421_v2  ;;  %v4556_v56 = vsel %vm1250_vm3, %v4513_v19, %v4401_v47  ;;  %v4399_v13 = vpop.permute.xlu0 %4398  ;;  %v4524_v37 = vsel %vm113_vm0, %v9532_v28, %v14817_v31  ;;  %v9545_v31 = vld [vmem:[%s18395_s20 + $0x298] sm:$0xff] }
 0xb86   :  { %4611 = vst.msk [vmem:[#allocation10 + $0x268] sm:$0xff] %vm18382_vm1, %v4566_v48  ;;  %v4555_v9 = vsel %vm1250_vm3, %v4512_v38, %v4399_v13  ;;  %v4527_v13 = vsel %vm113_vm0, %v9535_v63, %v14826_v20 }
 0xb87   :  { %4601 = vst.msk [vmem:[#allocation10 + $0x218] sm:$0xff] %vm18382_vm1, %v4556_v56  ;;  %v4640_v56 = vlaneseq }
 0xb88   :  { %4600 = vst.msk [vmem:[#allocation10 + $0x210] sm:$0xff] %vm18382_vm1, %v4555_v9  ;;  %v4537_v9 = vsel %vm113_vm0, %v9545_v31, %v14907_v29 }
 0xb89   :  { %v15134_v61 = vshrl.u32 %v4640_v56, 7 }
 0xb8b   :  { %v15143_v20 = vadd.s32 8, %v15134_v61  ;;  %v15146_v29 = vadd.s32 16, %v15134_v61  ;;  %v15178_v45 = vadd.s32 40, %v15134_v61 }
 0xb8c   :  { %v4427_v41 = vpop.permute.xlu2 %4426  ;;  %v4407_v32 = vpop.permute.xlu1 %4406 }
 0xb8d   :  { %v4569_v23 = vsel %vm1250_vm3, %v4526_v12, %v4427_v41  ;;  %v4559_v18 = vsel %vm1250_vm3, %v4516_v0, %v4407_v32  ;;  %v4405_v21 = vpop.permute.xlu0 %4404  ;;  %v4539_v0 = vsel %vm113_vm0, %v9547_v58, %v14862_v11  ;;  %v15154_v11 = vld [vmem:[%s18369_s11] ss:$0 sm:$0xff] }
 0xb8e   :  { %4614 = vst.msk [vmem:[#allocation10 + $0x280] sm:$0xff] %vm18382_vm1, %v4569_v23  ;;  %v4558_v4 = vsel %vm1250_vm3, %v4515_v27, %v4405_v21  ;;  %v15149_v23 = vadd.s32 24, %v15134_v61  ;;  %v15161_v21 = vld [vmem:[%s18366_s8] sm:$0x1]  ;;  %vm4652_vm9 = vcmp.lt.s32.totalorder %v15134_v61, %v15154_v11  ;;  %vm4653_vm14 = vcmp.lt.s32.totalorder %v15143_v20, %v15154_v11 }
 0xb8f   :  { %4604 = vst.msk [vmem:[#allocation10 + $0x230] sm:$0xff] %vm18382_vm1, %v4559_v18  ;;  %vm4654_vm15 = vcmp.lt.s32.totalorder %v15146_v29, %v15154_v11  ;;  %vm4657_vm6 = vcmp.lt.s32.totalorder %v15178_v45, %v15154_v11 }
 0xb90   :  { %4603 = vst.msk [vmem:[#allocation10 + $0x228] sm:$0xff] %vm18382_vm1, %v4558_v4  ;;  %v15164_v4 = vadd.s32 32, %v15134_v61  ;;  %vm4655_vm4 = vcmp.lt.s32.totalorder %v15149_v23, %v15154_v11 }
 0xb92   :  { %vm4656_vm5 = vcmp.lt.s32.totalorder %v15164_v4, %v15154_v11 }
 0xb94   :  { %v4431_v10 = vpop.permute.xlu2 %4430  ;;  %v4413_v42 = vpop.permute.xlu1 %4412 }
 0xb95   :  { %v4571_v34 = vsel %vm1250_vm3, %v4528_v55, %v4431_v10  ;;  %v4562_v52 = vsel %vm1250_vm3, %v4519_v1, %v4413_v42  ;;  %v4411_v17 = vpop.permute.xlu0 %4410  ;;  %v9538_v1 = vld [vmem:[%s18395_s20 + $0x260] sm:$0xff]  ;;  %v12099_v55 = vmov 0.0   ;;  %v15192_v10 = vadd.s32 48, %v15134_v61 }
 0xb96   :  { %4616 = vst.msk [vmem:[#allocation10 + $0x290] sm:$0xff] %vm18382_vm1, %v4571_v34  ;;  %v4561_v26 = vsel %vm1250_vm3, %v4518_v44, %v4411_v17  ;;  %v15195_v42 = vadd.s32 56, %v15134_v61  ;;  %v15198_v44 = vadd.s32 64, %v15134_v61  ;;  %v15201_v34 = vadd.s32 72, %v15134_v61 }
 0xb97   :  { %4607 = vst.msk [vmem:[#allocation10 + $0x248] sm:$0xff] %vm18382_vm1, %v4562_v52  ;;  %v9537_v52 = vld [vmem:[%s18395_s20 + $0x258] sm:$0xff]  ;;  %vm4658_vm7 = vcmp.lt.s32.totalorder %v15192_v10, %v15154_v11  ;;  %v4530_v17 = vsel %vm113_vm0, %v9538_v1, %v14835_v35 }
 0xb98   :  { %4606 = vst.msk [vmem:[#allocation10 + $0x240] sm:$0xff] %vm18382_vm1, %v4561_v26  ;;  %vm18386_vm2 = vcmp.lt.s32.totalorder %v15195_v42, %v15154_v11  ;;  %vm18385_vm10 = vcmp.lt.s32.totalorder %v15198_v44, %v15154_v11  ;;  %vm18384_vm11 = vcmp.lt.s32.totalorder %v15201_v34, %v15154_v11  ;;  %v4529_v54 = vsel %vm113_vm0, %v9537_v52, %v14864_v15  ;;  %v9541_v35 = vld [vmem:[%s18395_s20 + $0x278] sm:$0xff]  ;;  %v9540_v15 = vld [vmem:[%s18395_s20 + $0x270] sm:$0xff] }
 0xb99   :  { %4014 = vst.msk [vmem:[#allocation10 + $0x158] sm:$0xff] %vm18382_vm1, %v12099_v55 }
 0xb9a   :  { %4015 = vst.msk [vmem:[#allocation10 + $0x160] sm:$0xff] %vm18382_vm1, %v12099_v55 }
 0xb9b   :  { %4016 = vst.msk [vmem:[#allocation10 + $0x168] sm:$0xff] %vm18382_vm1, %v12099_v55 }
 0xb9c   :  { %v4437_v5 = vpop.permute.xlu2 %4436  ;;  %v4419_v30 = vpop.permute.xlu1 %4418  ;;  %4017 = vst.msk [vmem:[#allocation10 + $0x170] sm:$0xff] %vm18382_vm1, %v12099_v55 }
 0xb9d   :  { %v4574_v46 = vsel %vm1250_vm3, %v4531_v60, %v4437_v5  ;;  %v4565_v49 = vsel %vm1250_vm3, %v4522_v43, %v4419_v30  ;;  %v4417_v51 = vpop.permute.xlu0 %4416  ;;  %4018 = vst.msk [vmem:[#allocation10 + $0x178] sm:$0xff] %vm18382_vm1, %v12099_v55  ;;  %v4533_v60 = vsel %vm113_vm0, %v9541_v35, %v14844_v57  ;;  %v4532_v30 = vsel %vm113_vm0, %v9540_v15, %v14876_v40  ;;  %v9544_v57 = vld [vmem:[%s18395_s20 + $0x290] sm:$0xff]  ;;  %v9543_v40 = vld [vmem:[%s18395_s20 + $0x288] sm:$0xff] }
 0xb9e   :  { %4619 = vst.msk [vmem:[#allocation10 + $0x2a8] sm:$0xff] %vm18382_vm1, %v4574_v46  ;;  %v4564_v59 = vsel %vm1250_vm3, %v4521_v6, %v4417_v51  ;;  %v4536_v51 = vsel %vm113_vm0, %v9544_v57, %v14853_v62  ;;  %v4535_v16 = vsel %vm113_vm0, %v9543_v40, %v14890_v36  ;;  %v9546_v62 = vld [vmem:[%s18395_s20 + $0x2a0] sm:$0xff]  ;;  %s15379_s20 = smov 0  }
 0xb9f   :  { %4610 = vst.msk [vmem:[#allocation10 + $0x260] sm:$0xff] %vm18382_vm1, %v4565_v49  ;;  %v4538_v36 = vsel %vm113_vm0, %v9546_v62, %v14904_v24  ;;  %vm4705_vm0 = vcmask 519168  }
 0xba0   :  { %4609 = vst.msk [vmem:[#allocation10 + $0x258] sm:$0xff] %vm18382_vm1, %v4564_v59 }
 0xba1   :  { %4019 = vst.msk [vmem:[#allocation10 + $0x180] sm:$0xff] %vm18382_vm1, %v12099_v55 }
 0xba2   :  { %4020 = vst.msk [vmem:[#allocation10 + $0x188] sm:$0xff] %vm18382_vm1, %v12099_v55 }
 0xba3   :  { %4021 = vst.msk [vmem:[#allocation10 + $0x190] sm:$0xff] %vm18382_vm1, %v12099_v55 }
 0xba4   :  { %v4443_v8 = vpop.permute.xlu2 %4442  ;;  %v4425_v19 = vpop.permute.xlu1 %4424  ;;  %4628 = vst.msk [vmem:[#allocation10 + $0x2f0] sm:$0xff] %vm18382_vm1, %v12099_v55 }
 0xba5   :  { %v4577_v2 = vsel %vm1250_vm3, %v4534_v14, %v4443_v8  ;;  %v4568_v47 = vsel %vm1250_vm3, %v4525_v33, %v4425_v19  ;;  %v4423_v38 = vpop.permute.xlu0 %4422  ;;  %4629 = vst.msk [vmem:[#allocation10 + $0x2f8] sm:$0xff] %vm18382_vm1, %v12099_v55 }
 0xba6   :  { %4622 = vst.msk [vmem:[#allocation10 + $0x2c0] sm:$0xff] %vm18382_vm1, %v4577_v2  ;;  %v4567_v48 = vsel %vm1250_vm3, %v4524_v37, %v4423_v38 }
 0xba7   :  { %4613 = vst.msk [vmem:[#allocation10 + $0x278] sm:$0xff] %vm18382_vm1, %v4568_v47 }
 0xba8   :  { %4612 = vst.msk [vmem:[#allocation10 + $0x270] sm:$0xff] %vm18382_vm1, %v4567_v48 }
 0xba9   :  { %4630 = vst.msk [vmem:[#allocation10 + $0x300] sm:$0xff] %vm18382_vm1, %v12099_v55 }
 0xbaa   :  { %4631 = vst.msk [vmem:[#allocation10 + $0x308] sm:$0xff] %vm18382_vm1, %v12099_v55 }
 0xbab   :  { %4632 = vst.msk [vmem:[#allocation10 + $0x310] sm:$0xff] %vm18382_vm1, %v12099_v55 }
 0xbac   :  { %v4449_v53 = vpop.permute.xlu2 %4448  ;;  %v4429_v50 = vpop.permute.xlu1 %4428  ;;  %4633 = vst.msk [vmem:[#allocation10 + $0x318] sm:$0xff] %vm18382_vm1, %v12099_v55 }
 0xbad   :  { %v4580_v12 = vsel %vm1250_vm3, %v4537_v9, %v4449_v53  ;;  %v4570_v41 = vsel %vm1250_vm3, %v4527_v13, %v4429_v50  ;;  %v4453_v32 = vpop.permute.xlu0 %4452  ;;  %4634 = vst.msk [vmem:[#allocation10 + $0x320] sm:$0xff] %vm18382_vm1, %v12099_v55 }
 0xbae   :  { %4625 = vst.msk [vmem:[#allocation10 + $0x2d8] sm:$0xff] %vm18382_vm1, %v4580_v12  ;;  %v4582_v27 = vsel %vm1250_vm3, %v4539_v0, %v4453_v32 }
 0xbaf   :  { %4615 = vst.msk [vmem:[#allocation10 + $0x288] sm:$0xff] %vm18382_vm1, %v4570_v41  ;;  %v4583_v18 = vsel %vm3969_vm8, %v4582_v27, 0.0 }
 0xbb0   :  { %4627 = vst.msk [vmem:[#allocation10 + $0x2e8] sm:$0xff] %vm18382_vm1, %v4583_v18 }
 0xbb1   :  { %4635 = vst.msk [vmem:[#allocation10 + $0x328] sm:$0xff] %vm18382_vm1, %v12099_v55 }
 0xbb2   :  { %4663 = vst.msk [vmem:[#allocation11] sm:$0xff] %vm4662_vm12, %v12099_v55 }
 0xbb3   :  { %4664 = vst.msk [vmem:[#allocation11 + $0x8] sm:$0xff] %vm4662_vm12, %v12099_v55 }
 0xbb4   :  { %v4435_v26 = vpop.permute.xlu1 %4434  ;;  %4665 = vst.msk [vmem:[#allocation11 + $0x10] sm:$0xff] %vm4662_vm12, %v12099_v55 }
 0xbb5   :  { %v4573_v7 = vsel %vm1250_vm3, %v4530_v17, %v4435_v26  ;;  %v4433_v39 = vpop.permute.xlu0 %4432  ;;  %4666 = vst.msk [vmem:[#allocation11 + $0x18] sm:$0xff] %vm4662_vm12, %v12099_v55 }
 0xbb6   :  { %4618 = vst.msk [vmem:[#allocation10 + $0x2a0] sm:$0xff] %vm18382_vm1, %v4573_v7  ;;  %v4572_v43 = vsel %vm1250_vm3, %v4529_v54, %v4433_v39 }
 0xbb7   :  { %4617 = vst.msk [vmem:[#allocation10 + $0x298] sm:$0xff] %vm18382_vm1, %v4572_v43 }
 0xbb8   :  { %4667 = vst.msk [vmem:[#allocation11 + $0x20] sm:$0xff] %vm4662_vm12, %v12099_v55 }
 0xbb9   :  { %4668 = vst.msk [vmem:[#allocation11 + $0x28] sm:$0xff] %vm4662_vm12, %v12099_v55 }
 0xbba   :  { %4669 = vst.msk [vmem:[#allocation11 + $0x30] sm:$0xff] %vm4662_vm12, %v12099_v55 }
 0xbbb   :  { %4670 = vst.msk [vmem:[#allocation11 + $0x38] sm:$0xff] %vm4662_vm12, %v12099_v55 }
 0xbbc   :  { %v4441_v5 = vpop.permute.xlu1 %4440  ;;  %4671 = vst.msk [vmem:[#allocation11 + $0x40] sm:$0xff] %vm4662_vm12, %v12099_v55 }
 0xbbd   :  { %v4576_v6 = vsel %vm1250_vm3, %v4533_v60, %v4441_v5  ;;  %v4439_v46 = vpop.permute.xlu0 %4438  ;;  %4672 = vst.msk [vmem:[#allocation11 + $0x48] sm:$0xff] %vm4662_vm12, %v12099_v55 }
 0xbbe   :  { %4621 = vst.msk [vmem:[#allocation10 + $0x2b8] sm:$0xff] %vm18382_vm1, %v4576_v6  ;;  %v4575_v49 = vsel %vm1250_vm3, %v4532_v30, %v4439_v46 }
 0xbbf   :  { %4620 = vst.msk [vmem:[#allocation10 + $0x2b0] sm:$0xff] %vm18382_vm1, %v4575_v49 }
 0xbc0   :  { %4673 = vst.msk [vmem:[#allocation11 + $0x50] sm:$0xff] %vm4662_vm12, %v12099_v55 }
 0xbc1   :  { %4674 = vst.msk [vmem:[#allocation11 + $0x58] sm:$0xff] %vm4662_vm12, %v12099_v55 }
 0xbc2   :  { %4675 = vst.msk [vmem:[#allocation11 + $0x60] sm:$0xff] %vm4662_vm12, %v12099_v55 }
 0xbc3   :  { %4676 = vst.msk [vmem:[#allocation11 + $0x68] sm:$0xff] %vm4662_vm12, %v12099_v55 }
 0xbc4   :  { %v4447_v59 = vpop.permute.xlu1 %4446  ;;  %4677 = vst.msk [vmem:[#allocation11 + $0x70] sm:$0xff] %vm4662_vm12, %v12099_v55 }
 0xbc5   :  { %v4579_v3 = vsel %vm1250_vm3, %v4536_v51, %v4447_v59  ;;  %v4445_v28 = vpop.permute.xlu0 %4444  ;;  %4678 = vst.msk [vmem:[#allocation11 + $0x78] sm:$0xff] %vm4662_vm12, %v12099_v55 }
 0xbc6   :  { %4624 = vst.msk [vmem:[#allocation10 + $0x2d0] sm:$0xff] %vm18382_vm1, %v4579_v3  ;;  %v4578_v33 = vsel %vm1250_vm3, %v4535_v16, %v4445_v28 }
 0xbc7   :  { %4623 = vst.msk [vmem:[#allocation10 + $0x2c8] sm:$0xff] %vm18382_vm1, %v4578_v33 }
 0xbc8   :  { %4679 = vst.msk [vmem:[#allocation11 + $0x80] sm:$0xff] %vm4662_vm12, %v12099_v55 }
 0xbc9   :  { %4680 = vst.msk [vmem:[#allocation11 + $0x88] sm:$0xff] %vm4662_vm12, %v12099_v55 }
 0xbca   :  { %4681 = vst.msk [vmem:[#allocation11 + $0x90] sm:$0xff] %vm4662_vm12, %v12099_v55 }
 0xbcb   :  { %4682 = vst.msk [vmem:[#allocation11 + $0x98] sm:$0xff] %vm4662_vm12, %v12099_v55 }
 0xbcc   :  { %4683 = vst.msk [vmem:[#allocation11 + $0xa0] sm:$0xff] %vm4662_vm12, %v12099_v55 }
 0xbcd   :  { %v4451_v14 = vpop.permute.xlu0 %4450  ;;  %4684 = vst.msk [vmem:[#allocation11 + $0xa8] sm:$0xff] %vm4662_vm12, %v12099_v55 }
 0xbce   :  { %v4581_v8 = vsel %vm1250_vm3, %v4538_v36, %v4451_v14  ;;  %4685 = vst.msk [vmem:[#allocation11 + $0xb0] sm:$0xff] %vm4662_vm12, %v12099_v55 }
 0xbcf   :  { %4626 = vst.msk [vmem:[#allocation10 + $0x2e0] sm:$0xff] %vm18382_vm1, %v4581_v8 }
 0xbd0   :  { %4686 = vst.msk [vmem:[#allocation11 + $0xb8] sm:$0xff] %vm4662_vm12, %v12099_v55 }
 0xbd1   :  { %4687 = vst.msk [vmem:[#allocation11 + $0xc0] sm:$0xff] %vm4662_vm12, %v12099_v55 }
 0xbd2   :  { %4688 = vst.msk [vmem:[#allocation11 + $0xc8] sm:$0xff] %vm4662_vm12, %v12099_v55 }
 0xbd3   :  { %4689 = vst.msk [vmem:[#allocation11 + $0xd0] sm:$0xff] %vm4662_vm12, %v12099_v55 }
 0xbd4   :  { %4690 = vst.msk [vmem:[#allocation11 + $0xd8] sm:$0xff] %vm4662_vm12, %v12099_v55 }
 0xbd5   :  { %4691 = vst.msk [vmem:[#allocation11 + $0xe0] sm:$0xff] %vm4662_vm12, %v12099_v55 }
 0xbd6   :  { %4692 = vst.msk [vmem:[#allocation11 + $0xe8] sm:$0xff] %vm4662_vm12, %v12099_v55 }
 0xbd7   :  { %4693 = vst.msk [vmem:[#allocation11 + $0xf0] sm:$0xff] %vm4662_vm12, %v12099_v55 }
 0xbd8   :  { %4694 = vst.msk [vmem:[#allocation11 + $0xf8] sm:$0xff] %vm4662_vm12, %v12099_v55 }
 0xbd9   :  { %4695 = vst.msk [vmem:[#allocation11 + $0x100] sm:$0xff] %vm4662_vm12, %v12099_v55 }
 0xbda   :  { %4696 = vst.msk [vmem:[#allocation11 + $0x108] sm:$0xff] %vm4662_vm12, %v12099_v55 }
 0xbdb   :  { %4697 = vst.msk [vmem:[#allocation11 + $0x110] sm:$0xff] %vm4662_vm12, %v12099_v55 }
 0xbdc   :  { %4698 = vst.msk [vmem:[#allocation11 + $0x118] sm:$0xff] %vm4662_vm12, %v12099_v55 }
 0xbdd   :  { %4699 = vst.msk [vmem:[#allocation11 + $0x120] sm:$0xff] %vm4662_vm12, %v12099_v55 }
 0xbde   :  { %4700 = vst.msk [vmem:[#allocation11 + $0x128] sm:$0xff] %vm4662_vm12, %v12099_v55 }
 0xbdf   :  { %4701 = vst.msk [vmem:[#allocation11 + $0x130] sm:$0xff] %vm4662_vm12, %v12099_v55 }
 0xbe0   :  { %4702 = vst.msk [vmem:[#allocation11 + $0x138] sm:$0xff] %vm4662_vm12, %v12099_v55 }
 0xbe1   :  { %4703 = vst.msk [vmem:[#allocation11 + $0x140] sm:$0xff] %vm4662_vm12, %v12099_v55 }
 0xbe2   :  { %4704 = vst.msk [vmem:[#allocation11 + $0x148] sm:$0xff] %vm4662_vm12, %v12099_v55 }
 0xbe3   :  { %4706 = vst.msk [vmem:[#allocation11 + $0x150] sm:$0xf] %vm4705_vm0, %v12099_v55 }
 0xbe4 LB: > { %s11115_s30 = smul.u32 24, %s11990_s20  ;;  %s15389_s6 = scalar_lea.vmem [#allocation10], %s11990_s20  ;;  %s11990_s20 = sphi %s15379_s20, %s4712_s20  }
 0xbe5   : > { %v4714_v37 = vld [vmem:[%s15389_s6] sm:$0xff]  ;;  %v4715_v2 = vld [vmem:[%s15389_s6 + $0x8] sm:$0xff]  ;;  %v4716_v0 = vld [vmem:[%s15389_s6 + $0x10] sm:$0xff]  ;;  %s4712_s20 = sadd.s32 1, %s11990_s20  }
 0xbe6   : > { %s4824_s5 = scalar_lea.vmem %s18365_s7, %s11115_s30  ;;  %v4726_v47 = vld [vmem:[%s15389_s6 + $0x60] sm:$0xff]  ;;  %v4727_v48 = vld [vmem:[%s15389_s6 + $0x68] sm:$0xff]  ;;  %v4757_v13 = vpack.c.bf16 %v4715_v2, %v4714_v37  ;;  %v4717_v12 = vld [vmem:[%s15389_s6 + $0x18] sm:$0xff]  ;;  %p4709_p2 = scmp.ge.s32.totalorder %s4712_s20, 65  }
 0xbe7   : > { %v11118_v24 = vld [vmem:[%s4824_s5 + $0x10] sm:$0xff]  ;;  %v11117_v19 = vld [vmem:[%s4824_s5 + $0x8] sm:$0xff]  ;;  %v11116_v38 = vld [vmem:[%s4824_s5] sm:$0xff]  ;;  %v4763_v9 = vpack.c.bf16 %v4727_v48, %v4726_v47  ;;  %v4758_v17 = vpack.c.bf16 %v4717_v12, %v4716_v0  ;;  %5299 = vst.msk [vmem:[#allocation12 + $0x58] sm:$0xff] (%p4709_p2), %vm4662_vm12, %v12099_v55  ;;  %s15562_s11 = smov (%p4709_p2), 0  }
 0xbe8   : > { %4920 = vmatpush.bf16.msra.mxu0 %v11118_v24  ;;  %11497 = vmatpush.bf16.msra.mxu1 %v11118_v24  ;;  %v4738_v63 = vld [vmem:[%s15389_s6 + $0xc0] sm:$0xff]  ;;  %v4739_v31 = vld [vmem:[%s15389_s6 + $0xc8] sm:$0xff]  ;;  %v4728_v41 = vld [vmem:[%s15389_s6 + $0x70] sm:$0xff]  ;;  %5300 = vst.msk [vmem:[#allocation12 + $0x60] sm:$0xff] (%p4709_p2), %vm4662_vm12, %v12099_v55 }
 0xbe9   : > { %11498 = vmatpush.bf16.msra.mxu2 %v11118_v24  ;;  %11499 = vmatpush.bf16.msra.mxu3 %v11118_v24  ;;  %v4750_v58 = vld [vmem:[%s15389_s6 + $0x120] sm:$0xff]  ;;  %v4751_v56 = vld [vmem:[%s15389_s6 + $0x128] sm:$0xff]  ;;  %v4769_v53 = vpack.c.bf16 %v4739_v31, %v4738_v63  ;;  %v4729_v32 = vld [vmem:[%s15389_s6 + $0x78] sm:$0xff]  ;;  %5301 = vst.msk [vmem:[#allocation12 + $0x68] sm:$0xff] (%p4709_p2), %vm4662_vm12, %v12099_v55 }
 0xbea   : > { %v4775_v50 = vpack.c.bf16 %v4751_v56, %v4750_v58  ;;  %v4740_v27 = vld [vmem:[%s15389_s6 + $0xd0] sm:$0xff]  ;;  %v4741_v18 = vld [vmem:[%s15389_s6 + $0xd8] sm:$0xff]  ;;  %v4764_v26 = vpack.c.bf16 %v4729_v32, %v4728_v41  ;;  %v4718_v39 = vld [vmem:[%s15389_s6 + $0x20] sm:$0xff]  ;;  %5302 = vst.msk [vmem:[#allocation12 + $0x70] sm:$0xff] (%p4709_p2), %vm4662_vm12, %v12099_v55 }
 0xbeb   : > { %v4752_v1 = vld [vmem:[%s15389_s6 + $0x130] sm:$0xff]  ;;  %v4753_v52 = vld [vmem:[%s15389_s6 + $0x138] sm:$0xff]  ;;  %v4770_v54 = vpack.c.bf16 %v4741_v18, %v4740_v27  ;;  %v4719_v43 = vld [vmem:[%s15389_s6 + $0x28] sm:$0xff]  ;;  %5303 = vst.msk [vmem:[#allocation12 + $0x78] sm:$0xff] (%p4709_p2), %vm4662_vm12, %v12099_v55 }
 0xbec   : > { %4921 = vmatpush.bf16.msra.mxu0 %v11117_v19  ;;  %11500 = vmatpush.bf16.msra.mxu1 %v11117_v19  ;;  %v4776_v7 = vpack.c.bf16 %v4753_v52, %v4752_v1  ;;  %v4730_v35 = vld [vmem:[%s15389_s6 + $0x80] sm:$0xff]  ;;  %v4731_v15 = vld [vmem:[%s15389_s6 + $0x88] sm:$0xff]  ;;  %v4759_v46 = vpack.c.bf16 %v4719_v43, %v4718_v39  ;;  %v4720_v51 = vld [vmem:[%s15389_s6 + $0x30] sm:$0xff]  ;;  %5304 = vst.msk [vmem:[#allocation12 + $0x80] sm:$0xff] (%p4709_p2), %vm4662_vm12, %v12099_v55 }
 0xbed   : > { %11501 = vmatpush.bf16.msra.mxu2 %v11117_v19  ;;  %11502 = vmatpush.bf16.msra.mxu3 %v11117_v19  ;;  %v4742_v60 = vld [vmem:[%s15389_s6 + $0xe0] sm:$0xff]  ;;  %v4743_v5 = vld [vmem:[%s15389_s6 + $0xe8] sm:$0xff]  ;;  %v4765_v49 = vpack.c.bf16 %v4731_v15, %v4730_v35  ;;  %v4721_v59 = vld [vmem:[%s15389_s6 + $0x38] sm:$0xff]  ;;  %5305 = vst.msk [vmem:[#allocation12 + $0x88] sm:$0xff] (%p4709_p2), %vm4662_vm12, %v12099_v55 }
 0xbee   : > { %v4754_v30 = vld [vmem:[%s15389_s6 + $0x140] sm:$0xff]  ;;  %v4755_v6 = vld [vmem:[%s15389_s6 + $0x148] sm:$0xff]  ;;  %v4771_v57 = vpack.c.bf16 %v4743_v5, %v4742_v60  ;;  %v4732_v16 = vld [vmem:[%s15389_s6 + $0x90] sm:$0xff]  ;;  %v4760_v36 = vpack.c.bf16 %v4721_v59, %v4720_v51 }
 0xbef   : > { %v4777_v40 = vpack.c.bf16 %v4755_v6, %v4754_v30  ;;  %v4733_v3 = vld [vmem:[%s15389_s6 + $0x98] sm:$0xff]  ;;  %v4744_v28 = vld [vmem:[%s15389_s6 + $0xf0] sm:$0xff]  ;;  %v4722_v19 = vld [vmem:[%s15389_s6 + $0x40] sm:$0xff] }
 0xbf0   : > { %4922 = vmatpush.bf16.msra.mxu0 %v11116_v38  ;;  %11503 = vmatpush.bf16.msra.mxu1 %v11116_v38  ;;  %v4745_v33 = vld [vmem:[%s15389_s6 + $0xf8] sm:$0xff]  ;;  %v4756_v62 = vld [vmem:[%s15389_s6 + $0x150] sm:$0xf]  ;;  %v4766_v14 = vpack.c.bf16 %v4733_v3, %v4732_v16  ;;  %v4723_v37 = vld [vmem:[%s15389_s6 + $0x48] sm:$0xff] }
 0xbf1   : > { %11504 = vmatpush.bf16.msra.mxu2 %v11116_v38  ;;  %11505 = vmatpush.bf16.msra.mxu3 %v11116_v38  ;;  %v4772_v8 = vpack.c.bf16 %v4745_v33, %v4744_v28  ;;  %v4778_v24 = vpack.c.bf16 %v4756_v62, %v4756_v62  ;;  %v4734_v2 = vld [vmem:[%s15389_s6 + $0xa0] sm:$0xff]  ;;  %v4735_v47 = vld [vmem:[%s15389_s6 + $0xa8] sm:$0xff]  ;;  %v4761_v63 = vpack.c.bf16 %v4723_v37, %v4722_v19  ;;  %v4724_v56 = vld [vmem:[%s15389_s6 + $0x50] sm:$0xff] }
 0xbf2   : > { %v4746_v38 = vld [vmem:[%s15389_s6 + $0x100] sm:$0xff]  ;;  %v4747_v48 = vld [vmem:[%s15389_s6 + $0x108] sm:$0xff]  ;;  %v4767_v31 = vpack.c.bf16 %v4735_v47, %v4734_v2  ;;  %v4749_v0 = vld [vmem:[%s15389_s6 + $0x118] sm:$0xff] }
 0xbf3   : > { %9561 = vmatmul.msk.bf16.vlgmr.msra.gmra.mxu0 %vm18382_vm1, %v4757_v13  ;;  %9567 = vmatmul.msk.bf16.vlgmr.msra.gmra.mxu1 %vm18382_vm1, %v4763_v9  ;;  %v4773_v58 = vpack.c.bf16 %v4747_v48, %v4746_v38  ;;  %v4725_v13 = vld [vmem:[%s15389_s6 + $0x58] sm:$0xff]  ;;  %v4736_v9 = vld [vmem:[%s15389_s6 + $0xb0] sm:$0xff]  ;;  %v4793_v51 = vld [vmem:[#allocation11 + $0x70] sm:$0xff] }
 0xbf4   : > { %9573 = vmatmul.msk.bf16.vlgmr.msra.gmra.mxu2 %vm18382_vm1, %v4769_v53  ;;  %9579 = vmatmul.msk.bf16.vlgmr.msra.gmra.mxu3 %vm18382_vm1, %v4775_v50  ;;  %v4737_v53 = vld [vmem:[%s15389_s6 + $0xb8] sm:$0xff]  ;;  %v4748_v50 = vld [vmem:[%s15389_s6 + $0x110] sm:$0xff]  ;;  %v4762_v12 = vpack.c.bf16 %v4725_v13, %v4724_v56  ;;  %v4782_v19 = vld [vmem:[#allocation11 + $0x18] sm:$0xff] }
 0xbf5   : > { %v4768_v41 = vpack.c.bf16 %v4737_v53, %v4736_v9  ;;  %v4774_v32 = vpack.c.bf16 %v4749_v0, %v4748_v50  ;;  %v4779_v27 = vld [vmem:[#allocation11] sm:$0xff]  ;;  %v4792_v39 = vld [vmem:[#allocation11 + $0x68] sm:$0xff]  ;;  %v4794_v37 = vld [vmem:[#allocation11 + $0x78] sm:$0xff] }
 0xbf6   : > { %v4791_v18 = vld [vmem:[#allocation11 + $0x60] sm:$0xff]  ;;  %v4816_v59 = vld [vmem:[#allocation11 + $0x128] sm:$0xff]  ;;  %v4817_v2 = vld [vmem:[#allocation11 + $0x130] sm:$0xff] }
 0xbf7   : > { %v4815_v43 = vld [vmem:[#allocation11 + $0x120] sm:$0xff]  ;;  %v4806_v9 = vld [vmem:[#allocation11 + $0xd8] sm:$0xff] }
 0xbf8   : > { %v4783_v53 = vld [vmem:[#allocation11 + $0x20] sm:$0xff]  ;;  %v4818_v0 = vld [vmem:[#allocation11 + $0x138] sm:$0xff] }
 0xbf9   : > { %v4795_v50 = vld [vmem:[#allocation11 + $0x80] sm:$0xff] }
 0xc03   : > { %9562 = vmatmul.msk.bf16.gmra.mxu0 %vm18382_vm1, %v4758_v17  ;;  %9568 = vmatmul.msk.bf16.gmra.mxu1 %vm18382_vm1, %v4764_v26 }
 0xc04   : > { %9574 = vmatmul.msk.bf16.gmra.mxu2 %vm18382_vm1, %v4770_v54  ;;  %9580 = vmatmul.msk.bf16.gmra.mxu3 %vm18382_vm1, %v4776_v7  ;;  %v4803_v54 = vld [vmem:[#allocation11 + $0xc0] sm:$0xff]  ;;  %v4780_v7 = vld [vmem:[#allocation11 + $0x8] sm:$0xff] }
 0xc13   : > { %9563 = vmatmul.msk.bf16.gmra.mxu0 %vm18382_vm1, %v4759_v46  ;;  %9569 = vmatmul.msk.bf16.gmra.mxu1 %vm18382_vm1, %v4765_v49 }
 0xc14   : > { %9575 = vmatmul.msk.bf16.gmra.mxu2 %vm18382_vm1, %v4771_v57  ;;  %9581 = vmatmul.msk.bf16.gmra.mxu3 %vm18382_vm1, %v4777_v40  ;;  %v4804_v57 = vld [vmem:[#allocation11 + $0xc8] sm:$0xff]  ;;  %v4781_v40 = vld [vmem:[#allocation11 + $0x10] sm:$0xff] }
 0xc23   : > { %9564 = vmatmul.msk.bf16.gmra.mxu0 %vm18382_vm1, %v4760_v36  ;;  %9570 = vmatmul.msk.bf16.gmra.mxu1 %vm18382_vm1, %v4766_v14 }
 0xc24   : > { %9576 = vmatmul.msk.bf16.gmra.mxu2 %vm18382_vm1, %v4772_v8  ;;  %9582 = vmatmul.msk.bf16.gmra.mxu3 %vm18382_vm1, %v4778_v24  ;;  %v4805_v24 = vld [vmem:[#allocation11 + $0xd0] sm:$0xff] }
 0xc33   : > { %9565 = vmatmul.msk.bf16.gmra.mxu0 %vm18382_vm1, %v4761_v63  ;;  %9571 = vmatmul.msk.bf16.gmra.mxu1 %vm18382_vm1, %v4767_v31 }
 0xc34   : > { %9577 = vmatmul.msk.bf16.gmra.mxu2 %vm18382_vm1, %v4773_v58 }
 0xc43   : > { %9566 = vmatmul.msk.bf16.gmra.mxu0 %vm18382_vm1, %v4762_v12  ;;  %9572 = vmatmul.msk.bf16.gmra.mxu1 %vm18382_vm1, %v4768_v41 }
 0xc44   : > { %9578 = vmatmul.msk.bf16.gmra.mxu2 %vm18382_vm1, %v4774_v32 }
 0xc70   : > { %v4924_v1 = vpop.f32.mrf.mxu0  ;;  %v4954_v52 = vpop.f32.mrf.mxu1 }
 0xc71   : > { %v5033_v17 = vadd.f32 %v4924_v1, %v4779_v27  ;;  %v5045_v26 = vadd.f32 %v4954_v52, %v4791_v18 }
 0xc73   : > { %5076 = vst.msk [vmem:[#allocation11] sm:$0xff] %vm4662_vm12, %v5033_v17 }
 0xc74   : > { %5088 = vst.msk [vmem:[#allocation11 + $0x60] sm:$0xff] %vm4662_vm12, %v5045_v26  ;;  %v4807_v26 = vld [vmem:[#allocation11 + $0xe0] sm:$0xff] }
 0xc77   : > { %v4984_v35 = vpop.f32.mrf.mxu2  ;;  %v5014_v15 = vpop.f32.mrf.mxu3 }
 0xc78   : > { %v5057_v60 = vadd.f32 %v4984_v35, %v4803_v54  ;;  %v4926_v5 = vpop.f32.mrf.mxu0  ;;  %v4956_v30 = vpop.f32.mrf.mxu1  ;;  %v5069_v49 = vadd.f32 %v5014_v15, %v4815_v43  ;;  %v4784_v54 = vld [vmem:[#allocation11 + $0x28] sm:$0xff] }
 0xc79   : > { %v5034_v6 = vadd.f32 %v4926_v5, %v4780_v7  ;;  %v5046_v46 = vadd.f32 %v4956_v30, %v4792_v39  ;;  %v4796_v7 = vld [vmem:[#allocation11 + $0x88] sm:$0xff]  ;;  %v4819_v39 = vld [vmem:[#allocation11 + $0x140] sm:$0xff] }
 0xc7a   : > { %5100 = vst.msk [vmem:[#allocation11 + $0xc0] sm:$0xff] %vm4662_vm12, %v5057_v60 }
 0xc7b   : > { %5077 = vst.msk [vmem:[#allocation11 + $0x8] sm:$0xff] %vm4662_vm12, %v5034_v6 }
 0xc7c   : > { %5089 = vst.msk [vmem:[#allocation11 + $0x68] sm:$0xff] %vm4662_vm12, %v5046_v46 }
 0xc7d   : > { %5112 = vst.msk [vmem:[#allocation11 + $0x120] sm:$0xff] %vm4662_vm12, %v5069_v49  ;;  %v4808_v49 = vld [vmem:[#allocation11 + $0xe8] sm:$0xff] }
 0xc7f   : > { %v4986_v16 = vpop.f32.mrf.mxu2  ;;  %v5016_v3 = vpop.f32.mrf.mxu3 }
 0xc80   : > { %v5058_v28 = vadd.f32 %v4986_v16, %v4804_v57  ;;  %v4929_v33 = vpop.f32.mrf.mxu0  ;;  %v4959_v62 = vpop.f32.mrf.mxu1  ;;  %v5070_v8 = vadd.f32 %v5016_v3, %v4816_v59  ;;  %v4785_v57 = vld [vmem:[#allocation11 + $0x30] sm:$0xff] }
 0xc81   : > { %v5035_v36 = vadd.f32 %v4929_v33, %v4781_v40  ;;  %v5047_v14 = vadd.f32 %v4959_v62, %v4793_v51  ;;  %v4797_v40 = vld [vmem:[#allocation11 + $0x90] sm:$0xff]  ;;  %v4820_v51 = vld [vmem:[#allocation11 + $0x148] sm:$0xff] }
 0xc82   : > { %5101 = vst.msk [vmem:[#allocation11 + $0xc8] sm:$0xff] %vm4662_vm12, %v5058_v28 }
 0xc83   : > { %5078 = vst.msk [vmem:[#allocation11 + $0x10] sm:$0xff] %vm4662_vm12, %v5035_v36 }
 0xc84   : > { %5090 = vst.msk [vmem:[#allocation11 + $0x70] sm:$0xff] %vm4662_vm12, %v5047_v14 }
 0xc85   : > { %5113 = vst.msk [vmem:[#allocation11 + $0x128] sm:$0xff] %vm4662_vm12, %v5070_v8  ;;  %v4809_v8 = vld [vmem:[#allocation11 + $0xf0] sm:$0xff] }
 0xc87   : > { %v4989_v47 = vpop.f32.mrf.mxu2  ;;  %v5019_v38 = vpop.f32.mrf.mxu3 }
 0xc88   : > { %v5059_v48 = vadd.f32 %v4989_v47, %v4805_v24  ;;  %v4931_v63 = vpop.f32.mrf.mxu0  ;;  %v4961_v31 = vpop.f32.mrf.mxu1  ;;  %v5071_v13 = vadd.f32 %v5019_v38, %v4817_v2  ;;  %v4786_v24 = vld [vmem:[#allocation11 + $0x38] sm:$0xff] }
 0xc89   : > { %v5036_v58 = vadd.f32 %v4931_v63, %v4782_v19  ;;  %v5048_v56 = vadd.f32 %v4961_v31, %v4794_v37  ;;  %v4798_v19 = vld [vmem:[#allocation11 + $0x98] sm:$0xff]  ;;  %v4821_v37 = vld [vmem:[#allocation11 + $0x150] sm:$0xf] }
 0xc8a   : > { %5102 = vst.msk [vmem:[#allocation11 + $0xd0] sm:$0xff] %vm4662_vm12, %v5059_v48 }
 0xc8b   : > { %5079 = vst.msk [vmem:[#allocation11 + $0x18] sm:$0xff] %vm4662_vm12, %v5036_v58 }
 0xc8c   : > { %5091 = vst.msk [vmem:[#allocation11 + $0x78] sm:$0xff] %vm4662_vm12, %v5048_v56 }
 0xc8d   : > { %5114 = vst.msk [vmem:[#allocation11 + $0x130] sm:$0xff] %vm4662_vm12, %v5071_v13  ;;  %v4810_v13 = vld [vmem:[#allocation11 + $0xf8] sm:$0xff] }
 0xc8f   : > { %v4991_v12 = vpop.f32.mrf.mxu2  ;;  %v5021_v41 = vpop.f32.mrf.mxu3 }
 0xc90   : > { %v5060_v32 = vadd.f32 %v4991_v12, %v4806_v9  ;;  %v4934_v27 = vpop.f32.mrf.mxu0  ;;  %v4964_v18 = vpop.f32.mrf.mxu1  ;;  %v5072_v17 = vadd.f32 %v5021_v41, %v4818_v0  ;;  %v4787_v9 = vld [vmem:[#allocation11 + $0x40] sm:$0xff] }
 0xc91   : > { %v5037_v1 = vadd.f32 %v4934_v27, %v4783_v53  ;;  %v5049_v52 = vadd.f32 %v4964_v18, %v4795_v50  ;;  %v4799_v53 = vld [vmem:[#allocation11 + $0xa0] sm:$0xff] }
 0xc92   : > { %5103 = vst.msk [vmem:[#allocation11 + $0xd8] sm:$0xff] %vm4662_vm12, %v5060_v32 }
 0xc93   : > { %5080 = vst.msk [vmem:[#allocation11 + $0x20] sm:$0xff] %vm4662_vm12, %v5037_v1  ;;  %v4811_v1 = vld [vmem:[#allocation11 + $0x100] sm:$0xff] }
 0xc94   : > { %5092 = vst.msk [vmem:[#allocation11 + $0x80] sm:$0xff] %vm4662_vm12, %v5049_v52  ;;  %v4788_v52 = vld [vmem:[#allocation11 + $0x48] sm:$0xff] }
 0xc95   : > { %5115 = vst.msk [vmem:[#allocation11 + $0x138] sm:$0xff] %vm4662_vm12, %v5072_v17  ;;  %v4800_v17 = vld [vmem:[#allocation11 + $0xa8] sm:$0xff] }
 0xc97   : > { %v4994_v43 = vpop.f32.mrf.mxu2  ;;  %v5024_v35 = vpop.f32.mrf.mxu3 }
 0xc98   : > { %v5061_v15 = vadd.f32 %v4994_v43, %v4807_v26  ;;  %v4936_v60 = vpop.f32.mrf.mxu0  ;;  %v4966_v5 = vpop.f32.mrf.mxu1  ;;  %v5073_v46 = vadd.f32 %v5024_v35, %v4819_v39 }
 0xc99   : > { %v5038_v30 = vadd.f32 %v4936_v60, %v4784_v54  ;;  %v5050_v6 = vadd.f32 %v4966_v5, %v4796_v7  ;;  %v4789_v60 = vld [vmem:[#allocation11 + $0x50] sm:$0xff] }
 0xc9a   : > { %5104 = vst.msk [vmem:[#allocation11 + $0xe0] sm:$0xff] %vm4662_vm12, %v5061_v15  ;;  %v4812_v15 = vld [vmem:[#allocation11 + $0x108] sm:$0xff]  ;;  %v4801_v5 = vld [vmem:[#allocation11 + $0xb0] sm:$0xff] }
 0xc9b   : > { %5081 = vst.msk [vmem:[#allocation11 + $0x28] sm:$0xff] %vm4662_vm12, %v5038_v30 }
 0xc9c   : > { %5093 = vst.msk [vmem:[#allocation11 + $0x88] sm:$0xff] %vm4662_vm12, %v5050_v6 }
 0xc9d   : > { %5116 = vst.msk [vmem:[#allocation11 + $0x140] sm:$0xff] %vm4662_vm12, %v5073_v46 }
 0xc9f   : > { %v4996_v59 = vpop.f32.mrf.mxu2  ;;  %v5026_v16 = vpop.f32.mrf.mxu3 }
 0xca0   : > { %v5062_v3 = vadd.f32 %v4996_v59, %v4808_v49  ;;  %v4939_v28 = vpop.f32.mrf.mxu0  ;;  %v4969_v33 = vpop.f32.mrf.mxu1  ;;  %v5074_v14 = vadd.f32 %v5026_v16, %v4820_v51  ;;  %v4813_v51 = vld [vmem:[#allocation11 + $0x110] sm:$0xff]  ;;  %v4790_v59 = vld [vmem:[#allocation11 + $0x58] sm:$0xff] }
 0xca1   : > { %v5039_v62 = vadd.f32 %v4939_v28, %v4785_v57  ;;  %v5051_v36 = vadd.f32 %v4969_v33, %v4797_v40  ;;  %v4802_v16 = vld [vmem:[#allocation11 + $0xb8] sm:$0xff] }
 0xca2   : > { %5105 = vst.msk [vmem:[#allocation11 + $0xe8] sm:$0xff] %vm4662_vm12, %v5062_v3 }
 0xca3   : > { %5082 = vst.msk [vmem:[#allocation11 + $0x30] sm:$0xff] %vm4662_vm12, %v5039_v62 }
 0xca4   : > { %5094 = vst.msk [vmem:[#allocation11 + $0x90] sm:$0xff] %vm4662_vm12, %v5051_v36 }
 0xca5   : > { %5117 = vst.msk [vmem:[#allocation11 + $0x148] sm:$0xff] %vm4662_vm12, %v5074_v14 }
 0xca7   : > { %v4999_v2 = vpop.f32.mrf.mxu2  ;;  %v5029_v47 = vpop.f32.mrf.mxu3 }
 0xca8   : > { %v5063_v38 = vadd.f32 %v4999_v2, %v4809_v8  ;;  %v4941_v48 = vpop.f32.mrf.mxu0  ;;  %v4971_v63 = vpop.f32.mrf.mxu1  ;;  %v5075_v56 = vadd.f32 %v5029_v47, %v4821_v37  ;;  %v4814_v8 = vld [vmem:[#allocation11 + $0x118] sm:$0xff] }
 0xca9   : > { %v5040_v31 = vadd.f32 %v4941_v48, %v4786_v24  ;;  %v5052_v58 = vadd.f32 %v4971_v63, %v4798_v19  ;;  %v5119_v37 = vld [vmem:[#allocation11] ss:$4 sm:$0xff] (%p4709_p2)  ;;  %v5141_v2 = vld [vmem:[#allocation11 + $0x1] ss:$4 sm:$0xff] (%p4709_p2)  ;;  %v5174_v47 = vld [vmem:[#allocation11 + $0x2] ss:$4 sm:$0xff] (%p4709_p2) }
 0xcaa   : > { %5106 = vst.msk [vmem:[#allocation11 + $0xf0] sm:$0xff] %vm4662_vm12, %v5063_v38  ;;  %v5162_v38 = vmax.f32 (%p4709_p2), %v5119_v37, %v5141_v2  ;;  %v5196_v48 = vld [vmem:[#allocation11 + $0x3] ss:$4 sm:$0xff] (%p4709_p2)  ;;  %v15503_v63 = vperm.slane (%p4709_p2), %v15161_v21, 0  ;;  %v5180_v21 = vld [vmem:[#allocation11 + $0x62] ss:$4 sm:$0xff] (%p4709_p2) }
 0xcab   : > { %5083 = vst.msk [vmem:[#allocation11 + $0x38] sm:$0xff] %vm4662_vm12, %v5040_v31  ;;  %v5153_v37 = vld [vmem:[#allocation11 + $0xc1] ss:$4 sm:$0xff] (%p4709_p2)  ;;  %v5186_v2 = vld [vmem:[#allocation11 + $0xc2] ss:$4 sm:$0xff] (%p4709_p2) }
 0xcac   : > { %5095 = vst.msk [vmem:[#allocation11 + $0x98] sm:$0xff] %vm4662_vm12, %v5052_v58  ;;  %v5217_v58 = vmax.f32 (%p4709_p2), %v5174_v47, %v5196_v48  ;;  %v5208_v47 = vld [vmem:[#allocation11 + $0xc3] ss:$4 sm:$0xff] (%p4709_p2) }
 0xcad   : > { %5118 = vst.msk [vmem:[#allocation11 + $0x150] sm:$0xf] %vm4705_vm0, %v5075_v56 }
 0xcaf   : > { %v5001_v50 = vpop.f32.mrf.mxu2  ;;  %v5031_v0 = vpop.f32.mrf.mxu3 }
 0xcb0   : > { %v5064_v12 = vadd.f32 %v5001_v50, %v4810_v13  ;;  %v4944_v41 = vpop.f32.mrf.mxu0  ;;  %v4974_v32 = vpop.f32.mrf.mxu1 }
 0xcb1   : > { %v5041_v27 = vadd.f32 %v4944_v41, %v4787_v9  ;;  %v5053_v18 = vadd.f32 %v4974_v32, %v4799_v53  ;;  %v5228_v32 = vmax.f32 (%p4709_p2), %v5162_v38, %v5217_v58 }
 0xcb2   : > { %5107 = vst.msk [vmem:[#allocation11 + $0xf8] sm:$0xff] %vm4662_vm12, %v5064_v12  ;;  %v5121_v31 = vld [vmem:[#allocation11 + $0x20] ss:$4 sm:$0xff] (%p4709_p2)  ;;  %v5143_v56 = vld [vmem:[#allocation11 + $0x21] ss:$4 sm:$0xff] (%p4709_p2) }
 0xcb3   : > { %5084 = vst.msk [vmem:[#allocation11 + $0x40] sm:$0xff] %vm4662_vm12, %v5041_v27  ;;  %v5176_v13 = vld [vmem:[#allocation11 + $0x22] ss:$4 sm:$0xff] (%p4709_p2)  ;;  %v5198_v9 = vld [vmem:[#allocation11 + $0x23] ss:$4 sm:$0xff] (%p4709_p2)  ;;  %v5163_v53 = vmax.f32 (%p4709_p2), %v5121_v31, %v5143_v56 }
 0xcb4   : > { %5096 = vst.msk [vmem:[#allocation11 + $0xa0] sm:$0xff] %vm4662_vm12, %v5053_v18  ;;  %v5218_v50 = vmax.f32 (%p4709_p2), %v5176_v13, %v5198_v9 }
 0xcb7   : > { %v5004_v26 = vpop.f32.mrf.mxu2 }
 0xcb8   : > { %v5065_v54 = vadd.f32 %v5004_v26, %v4811_v1  ;;  %v4946_v7 = vpop.f32.mrf.mxu0  ;;  %v4976_v39 = vpop.f32.mrf.mxu1  ;;  %v5125_v1 = vld [vmem:[#allocation11 + $0x60] ss:$4 sm:$0xff] (%p4709_p2) }
 0xcb9   : > { %v5042_v43 = vadd.f32 %v4946_v7, %v4788_v52  ;;  %v5054_v35 = vadd.f32 %v4976_v39, %v4800_v17  ;;  %v5147_v52 = vld [vmem:[#allocation11 + $0x61] ss:$4 sm:$0xff] (%p4709_p2)  ;;  %v5229_v17 = vmax.f32 (%p4709_p2), %v5163_v53, %v5218_v50  ;;  %v5202_v7 = vld [vmem:[#allocation11 + $0x63] ss:$4 sm:$0xff] (%p4709_p2)  ;;  %v5127_v39 = vld [vmem:[#allocation11 + $0x80] ss:$4 sm:$0xff] (%p4709_p2) }
 0xcba   : > { %5108 = vst.msk [vmem:[#allocation11 + $0x100] sm:$0xff] %vm4662_vm12, %v5065_v54  ;;  %v5165_v54 = vmax.f32 (%p4709_p2), %v5125_v1, %v5147_v52  ;;  %v5133_v58 = vld [vmem:[#allocation11 + $0xe0] ss:$4 sm:$0xff] (%p4709_p2)  ;;  %v5155_v53 = vld [vmem:[#allocation11 + $0xe1] ss:$4 sm:$0xff] (%p4709_p2) }
 0xcbb   : > { %5085 = vst.msk [vmem:[#allocation11 + $0x48] sm:$0xff] %vm4662_vm12, %v5042_v43  ;;  %v5242_v43 = vadd.f32 (%p4709_p2), %v15503_v63, %v5228_v32  ;;  %v5210_v1 = vld [vmem:[#allocation11 + $0xe3] ss:$4 sm:$0xff] (%p4709_p2) }
 0xcbc   : > { %5097 = vst.msk [vmem:[#allocation11 + $0xa8] sm:$0xff] %vm4662_vm12, %v5054_v35  ;;  %v5220_v35 = vmax.f32 (%p4709_p2), %v5180_v21, %v5202_v7 }
 0xcbd   :  { %vm5253_vm3 = vcmp.gt.f32.partialorder (%p4709_p2), %v5242_v43, 0.0 }
 0xcbf   : > { %v5006_v30 = vpop.f32.mrf.mxu2 }
 0xcc0   : > { %v5066_v6 = vadd.f32 %v5006_v30, %v4812_v15  ;;  %v4949_v46 = vpop.f32.mrf.mxu0  ;;  %v4979_v49 = vpop.f32.mrf.mxu1  ;;  %v5149_v15 = vld [vmem:[#allocation11 + $0x81] ss:$4 sm:$0xff] (%p4709_p2)  ;;  %v5243_v30 = vadd.f32 (%p4709_p2), %v15503_v63, %v5229_v17 }
 0xcc1   : > { %v5043_v57 = vadd.f32 %v4949_v46, %v4789_v60  ;;  %v5055_v40 = vadd.f32 %v4979_v49, %v4801_v5  ;;  %v5182_v60 = vld [vmem:[#allocation11 + $0x82] ss:$4 sm:$0xff] (%p4709_p2)  ;;  %v5204_v5 = vld [vmem:[#allocation11 + $0x83] ss:$4 sm:$0xff] (%p4709_p2)  ;;  %v5166_v46 = vmax.f32 (%p4709_p2), %v5127_v39, %v5149_v15 }
 0xcc2   : > { %5109 = vst.msk [vmem:[#allocation11 + $0x108] sm:$0xff] %vm4662_vm12, %v5066_v6  ;;  %v5221_v49 = vmax.f32 (%p4709_p2), %v5182_v60, %v5204_v5  ;;  %vm5254_vm13 = vcmp.gt.f32.partialorder (%p4709_p2), %v5243_v30, 0.0 }
 0xcc3   : > { %5086 = vst.msk [vmem:[#allocation11 + $0x50] sm:$0xff] %vm4662_vm12, %v5043_v57 }
 0xcc4   : > { %5098 = vst.msk [vmem:[#allocation11 + $0xb0] sm:$0xff] %vm4662_vm12, %v5055_v40 }
 0xcc7   : > { %v5009_v3 = vpop.f32.mrf.mxu2 }
 0xcc8   : > { %v5067_v28 = vadd.f32 %v5009_v3, %v4813_v51  ;;  %v4951_v33 = vpop.f32.mrf.mxu0  ;;  %v4981_v62 = vpop.f32.mrf.mxu1 }
 0xcc9   : > { %v5044_v36 = vadd.f32 %v4951_v33, %v4790_v59  ;;  %v5056_v14 = vadd.f32 %v4981_v62, %v4802_v16  ;;  %v5264_v59 = vmul.f32 (%p4709_p2), 0.3, %v5242_v43  ;;  %v5231_v16 = vmax.f32 (%p4709_p2), %v5165_v54, %v5220_v35 }
 0xcca   : > { %5110 = vst.msk [vmem:[#allocation11 + $0x110] sm:$0xff] %vm4662_vm12, %v5067_v28  ;;  %v5265_v33 = vmul.f32 (%p4709_p2), 0.3, %v5243_v30 }
 0xccb   : > { %5087 = vst.msk [vmem:[#allocation11 + $0x58] sm:$0xff] %vm4662_vm12, %v5044_v36  ;;  %v5232_v36 = vmax.f32 (%p4709_p2), %v5166_v46, %v5221_v49  ;;  %v5192_v46 = vld [vmem:[#allocation11 + $0x122] ss:$4 sm:$0xff] (%p4709_p2) }
 0xccc   : > { %5099 = vst.msk [vmem:[#allocation11 + $0xb8] sm:$0xff] %vm4662_vm12, %v5056_v14  ;;  %v5131_v14 = vld [vmem:[#allocation11 + $0xc0] ss:$4 sm:$0xff] (%p4709_p2)  ;;  %v5276_v38 = vsel (%p4709_p2), %vm5254_vm13, %v5243_v30, %v5265_v33  ;;  %v5161_v33 = vld [vmem:[#allocation11 + $0x141] ss:$4 sm:$0x1f] (%p4709_p2) }
 0xccd   :  { %v5246_v31 = vadd.f32 (%p4709_p2), %v15503_v63, %v5232_v36  ;;  %5289 = vst.msk [vmem:[#allocation12 + $0x8] sm:$0xff] (%p4709_p2), %vm4662_vm12, %v5276_v38  ;;  %v5168_v9 = vmax.f32 (%p4709_p2), %v5131_v14, %v5153_v37  ;;  %v5137_v30 = vld [vmem:[#allocation11 + $0x120] ss:$4 sm:$0xff] (%p4709_p2) }
 0xcce   :  { %4711 = sbr.rel (!%p4709_p2) target bundleno = 3044 (0xbe4), region = 231 }
 0xccf   : > { %v5011_v24 = vpop.f32.mrf.mxu2 }
 0xcd0   : > { %v5068_v19 = vadd.f32 %v5011_v24, %v4814_v8  ;;  %v5275_v8 = vsel (%p4709_p2), %vm5253_vm3, %v5242_v43, %v5264_v59  ;;  %v5245_v24 = vadd.f32 (%p4709_p2), %v15503_v63, %v5231_v16  ;;  %vm5257_vm3 = vcmp.gt.f32.partialorder (%p4709_p2), %v5246_v31, 0.0 }
 0xcd1   :  { %5288 = vst.msk [vmem:[#allocation12] sm:$0xff] (%p4709_p2), %vm4662_vm12, %v5275_v8 }
 0xcd2   : > { %5111 = vst.msk [vmem:[#allocation11 + $0x118] sm:$0xff] %vm4662_vm12, %v5068_v19  ;;  %v5123_v0 = vld [vmem:[#allocation11 + $0x40] ss:$4 sm:$0xff] (%p4709_p2)  ;;  %v5145_v12 = vld [vmem:[#allocation11 + $0x41] ss:$4 sm:$0xff] (%p4709_p2)  ;;  %vm5256_vm1 = vcmp.gt.f32.partialorder (%p4709_p2), %v5245_v24, 0.0 }
 0xcd3   :  { %v5178_v41 = vld [vmem:[#allocation11 + $0x42] ss:$4 sm:$0xff]  ;;  %v5164_v27 = vmax.f32 %v5123_v0, %v5145_v12  ;;  %v5200_v18 = vld [vmem:[#allocation11 + $0x43] ss:$4 sm:$0xff]  ;;  %v5129_v57 = vld [vmem:[#allocation11 + $0xa0] ss:$4 sm:$0xff]  ;;  %v5223_v12 = vmax.f32 %v5186_v2, %v5208_v47 }
 0xcd4   :  { %v5219_v26 = vmax.f32 %v5178_v41, %v5200_v18  ;;  %v5151_v40 = vld [vmem:[#allocation11 + $0xa1] ss:$4 sm:$0xff]  ;;  %v5184_v51 = vld [vmem:[#allocation11 + $0xa2] ss:$4 sm:$0xff]  ;;  %v5206_v28 = vld [vmem:[#allocation11 + $0xa3] ss:$4 sm:$0xff]  ;;  %v5169_v18 = vmax.f32 %v5133_v58, %v5155_v53 }
 0xcd5   :  { %v5167_v3 = vmax.f32 %v5129_v57, %v5151_v40  ;;  %v5222_v19 = vmax.f32 %v5184_v51, %v5206_v28  ;;  %v5267_v56 = vmul.f32 0.3, %v5245_v24  ;;  %v5268_v0 = vmul.f32 0.3, %v5246_v31  ;;  %v5188_v41 = vld [vmem:[#allocation11 + $0xe2] ss:$4 sm:$0xff] }
 0xcd6   :  { %v5230_v6 = vmax.f32 %v5164_v27, %v5219_v26  ;;  %v5234_v26 = vmax.f32 %v5168_v9, %v5223_v12  ;;  %v5224_v54 = vmax.f32 %v5188_v41, %v5210_v1  ;;  %v5214_v40 = vld [vmem:[#allocation11 + $0x123] ss:$4 sm:$0xff]  ;;  %v5139_v51 = vld [vmem:[#allocation11 + $0x140] ss:$4 sm:$0x1f]  ;;  %v15542_v12 = vmov 0.0  }
 0xcd7   :  { %v5233_v13 = vmax.f32 %v5167_v3, %v5222_v19  ;;  %v5278_v32 = vsel %vm5256_vm1, %v5245_v24, %v5267_v56  ;;  %v5279_v17 = vsel %vm5257_vm3, %v5246_v31, %v5268_v0  ;;  %v5226_v28 = vmax.f32 %v5192_v46, %v5214_v40  ;;  %v5216_v24 = vld [vmem:[#allocation11 + $0x143] ss:$4 sm:$0x1f] }
 0xcd8   :  { %v5244_v62 = vadd.f32 %v15503_v63, %v5230_v6  ;;  %5291 = vst.msk [vmem:[#allocation12 + $0x18] sm:$0xff] %vm4662_vm12, %v5278_v32  ;;  %v5248_v15 = vadd.f32 %v15503_v63, %v5234_v26  ;;  %v5235_v60 = vmax.f32 %v5169_v18, %v5224_v54  ;;  %v5159_v6 = vld [vmem:[#allocation11 + $0x121] ss:$4 sm:$0xff]  ;;  %v5172_v37 = vmax.f32 %v5139_v51, %v5161_v33 }
 0xcd9   :  { %v5247_v27 = vadd.f32 %v15503_v63, %v5233_v13  ;;  %v5135_v52 = vld [vmem:[#allocation11 + $0x100] ss:$4 sm:$0xff]  ;;  %v5157_v21 = vld [vmem:[#allocation11 + $0x101] ss:$4 sm:$0xff]  ;;  %v5190_v7 = vld [vmem:[#allocation11 + $0x102] ss:$4 sm:$0xff]  ;;  %v5171_v57 = vmax.f32 %v5137_v30, %v5159_v6 }
 0xcda   :  { %vm5255_vm8 = vcmp.gt.f32.partialorder %v5244_v62, 0.0  ;;  %v5266_v48 = vmul.f32 0.3, %v5244_v62  ;;  %5292 = vst.msk [vmem:[#allocation12 + $0x20] sm:$0xff] %vm4662_vm12, %v5279_v17  ;;  %v5170_v43 = vmax.f32 %v5135_v52, %v5157_v21  ;;  %v5212_v35 = vld [vmem:[#allocation11 + $0x103] ss:$4 sm:$0xff]  ;;  %v5249_v16 = vadd.f32 %v15503_v63, %v5235_v60 }
 0xcdb   :  { %vm5258_vm13 = vcmp.gt.f32.partialorder %v5247_v27, 0.0  ;;  %v5269_v39 = vmul.f32 0.3, %v5247_v27  ;;  %v5225_v5 = vmax.f32 %v5190_v7, %v5212_v35  ;;  %vm5259_vm1 = vcmp.gt.f32.partialorder %v5248_v15, 0.0 }
 0xcdc   :  { %v5277_v50 = vsel %vm5255_vm8, %v5244_v62, %v5266_v48  ;;  %v5270_v59 = vmul.f32 0.3, %v5248_v15  ;;  %v5194_v62 = vld [vmem:[#allocation11 + $0x142] ss:$4 sm:$0x1f]  ;;  %vm5260_vm8 = vcmp.gt.f32.partialorder %v5249_v16, 0.0  ;;  %v5237_v19 = vmax.f32 %v5171_v57, %v5226_v28 }
 0xcdd   :  { %5290 = vst.msk [vmem:[#allocation12 + $0x10] sm:$0xff] %vm4662_vm12, %v5277_v50  ;;  %v5280_v49 = vsel %vm5258_vm13, %v5247_v27, %v5269_v39  ;;  %v5236_v3 = vmax.f32 %v5170_v43, %v5225_v5  ;;  %v5271_v14 = vmul.f32 0.3, %v5249_v16  ;;  %v5227_v2 = vmax.f32 %v5194_v62, %v5216_v24 }
 0xcde   :  { %5293 = vst.msk [vmem:[#allocation12 + $0x28] sm:$0xff] %vm4662_vm12, %v5280_v49  ;;  %v5281_v36 = vsel %vm5259_vm1, %v5248_v15, %v5270_v59  ;;  %v5251_v48 = vadd.f32 %v15503_v63, %v5237_v19  ;;  %v15544_v41 = vmov 0.0   ;;  %v15546_v32 = vmov 0.0  }
 0xcdf   :  { %v5250_v8 = vadd.f32 %v15503_v63, %v5236_v3  ;;  %5294 = vst.msk [vmem:[#allocation12 + $0x30] sm:$0xff] %vm4662_vm12, %v5281_v36  ;;  %v5282_v47 = vsel %vm5260_vm8, %v5249_v16, %v5271_v14  ;;  %v5238_v31 = vmax.f32 %v5172_v37, %v5227_v2  ;;  %vm5286_vm8 = vcmask 1044480  }
 0xce0   :  { %5295 = vst.msk [vmem:[#allocation12 + $0x38] sm:$0xff] %vm4662_vm12, %v5282_v47  ;;  %vm5262_vm13 = vcmp.gt.f32.partialorder %v5251_v48, 0.0  ;;  %v5273_v56 = vmul.f32 0.3, %v5251_v48  ;;  %v15548_v27 = vmov 0.0   ;;  %v15550_v18 = vmov 0.0  }
 0xce1   :  { %vm5261_vm3 = vcmp.gt.f32.partialorder %v5250_v8, 0.0  ;;  %v5272_v38 = vmul.f32 0.3, %v5250_v8  ;;  %v5252_v13 = vadd.f32 %v15503_v63, %v5238_v31  ;;  %v15552_v1 = vmov 0.0  }
 0xce2   :  { %v5284_v9 = vsel %vm5262_vm13, %v5251_v48, %v5273_v56  ;;  %v15554_v52 = vmov 0.0   ;;  %v15556_v17 = vmov 0.0   ;;  %v15558_v26 = vmov 0.0  }
 0xce3   :  { %v5283_v58 = vsel %vm5261_vm3, %v5250_v8, %v5272_v38  ;;  %vm5263_vm1 = vcmp.gt.f32.partialorder %v5252_v13, 0.0  ;;  %v5274_v53 = vmul.f32 0.3, %v5252_v13  ;;  %5297 = vst.msk [vmem:[#allocation12 + $0x48] sm:$0xff] %vm4662_vm12, %v5284_v9  ;;  %v15560_v54 = vmov 0.0  }
 0xce4   :  { %5296 = vst.msk [vmem:[#allocation12 + $0x40] sm:$0xff] %vm4662_vm12, %v5283_v58 }
 0xce5   :  { %v5285_v50 = vsel %vm5263_vm1, %v5252_v13, %v5274_v53 }
 0xce6   :  { %v5287_v0 = vsel %vm5286_vm8, %v5285_v50, 0.0 }
 0xce7   :  { %5298 = vst.msk [vmem:[#allocation12 + $0x50] sm:$0xff] %vm4662_vm12, %v5287_v0 }
 0xce8 LB: > { %s11119_s1 = sshll.u32 %s12034_s11, 5  ;;  %s5322_s22 = scalar_lea.vmem [#allocation12], %s12034_s11  ;;  %s12034_s11 = sphi %s15562_s11, %s5311_s11   ;;  %v12030_v54 = vphi %v15560_v54, %v18405_v54   ;;  %v12026_v26 = vphi %v15558_v26, %v18404_v26   ;;  %v12022_v17 = vphi %v15556_v17, %v18403_v17   ;;  %v12018_v52 = vphi %v15554_v52, %v18402_v52   ;;  %v12014_v1 = vphi %v15552_v1, %v18401_v1   ;;  %v12010_v18 = vphi %v15550_v18, %v18400_v18   ;;  %v12006_v27 = vphi %v15548_v27, %v18399_v27   ;;  %v12002_v32 = vphi %v15546_v32, %v18398_v32   ;;  %v11998_v41 = vphi %v15544_v41, %v18397_v41   ;;  %v11994_v12 = vphi %v15542_v12, %v18396_v12  }
 0xce9   : > { %s5340_s12 = scalar_lea.vmem %s18367_s9, %s11119_s1  ;;  %s5311_s11 = sadd.s32 1, %s12034_s11  }
 0xcea   : > { %v11123_v21 = vld [vmem:[%s5340_s12 + $0x18] sm:$0xff]  ;;  %v11122_v7 = vld [vmem:[%s5340_s12 + $0x10] sm:$0xff]  ;;  %v11121_v39 = vld [vmem:[%s5340_s12 + $0x8] sm:$0xff]  ;;  %p5308_p3 = scmp.ge.s32.totalorder %s5311_s11, 65  }
 0xceb   : > { %11508 = vmatpush.bf16.msra.mxu3 %v11123_v21  ;;  %11507 = vmatpush.bf16.msra.mxu2 %v11123_v21  ;;  %v11120_v60 = vld [vmem:[%s5340_s12] sm:$0xff]  ;;  %5522 = vst.msk [vmem:[#allocation11] sm:$0xff] (%p5308_p3), %vm4662_vm12, %v12099_v55  ;;  %vm18383_vm3 = vcmask (%p5308_p3), 518144   ;;  %s12100_s0 = smov (%p5308_p3), 64   ;;  %s15818_s2 = smov (%p5308_p3), 0  }
 0xcec   : > { %5392 = vmatpush.bf16.msra.mxu0 %v11123_v21  ;;  %11506 = vmatpush.bf16.msra.mxu1 %v11123_v21  ;;  %5523 = vst.msk [vmem:[#allocation11 + $0x8] sm:$0xff] (%p5308_p3), %vm4662_vm12, %v12099_v55 }
 0xced   :  { %5524 = vst.msk [vmem:[#allocation11 + $0x10] sm:$0xff] (%p5308_p3), %vm4662_vm12, %v12099_v55 }
 0xcee   : > { %v5329_v43 = vld [vmem:[%s5322_s22 + $0x30] sm:$0xff]  ;;  %v5330_v35 = vld [vmem:[%s5322_s22 + $0x38] sm:$0xff]  ;;  %v5327_v15 = vld [vmem:[%s5322_s22 + $0x20] sm:$0xff]  ;;  %5525 = vst.msk [vmem:[#allocation11 + $0x18] sm:$0xff] (%p5308_p3), %vm4662_vm12, %v12099_v55 }
 0xcef   : > { %11511 = vmatpush.bf16.msra.mxu3 %v11122_v7  ;;  %11510 = vmatpush.bf16.msra.mxu2 %v11122_v7  ;;  %v5328_v5 = vld [vmem:[%s5322_s22 + $0x28] sm:$0xff]  ;;  %v5323_v30 = vld [vmem:[%s5322_s22] sm:$0xff]  ;;  %v5325_v46 = vld [vmem:[%s5322_s22 + $0x10] sm:$0xff]  ;;  %v5336_v57 = vpack.c.bf16 %v5330_v35, %v5329_v43  ;;  %5526 = vst.msk [vmem:[#allocation11 + $0x20] sm:$0xff] (%p5308_p3), %vm4662_vm12, %v12099_v55 }
 0xcf0   : > { %5393 = vmatpush.bf16.msra.mxu0 %v11122_v7  ;;  %11509 = vmatpush.bf16.msra.mxu1 %v11122_v7  ;;  %v5324_v6 = vld [vmem:[%s5322_s22 + $0x8] sm:$0xff]  ;;  %v5326_v49 = vld [vmem:[%s5322_s22 + $0x18] sm:$0xff]  ;;  %v5335_v40 = vpack.c.bf16 %v5328_v5, %v5327_v15  ;;  %v5331_v16 = vld [vmem:[%s5322_s22 + $0x40] sm:$0xff]  ;;  %5527 = vst.msk [vmem:[#allocation11 + $0x28] sm:$0xff] (%p5308_p3), %vm4662_vm12, %v12099_v55 }
 0xcf1   : > { %v5333_v51 = vpack.c.bf16 %v5324_v6, %v5323_v30  ;;  %v5334_v59 = vpack.c.bf16 %v5326_v49, %v5325_v46  ;;  %v5332_v3 = vld [vmem:[%s5322_s22 + $0x48] sm:$0x7]  ;;  %5528 = vst.msk [vmem:[#allocation11 + $0x30] sm:$0xff] (%p5308_p3), %vm4662_vm12, %v12099_v55 }
 0xcf2   : > { %v5337_v28 = vpack.c.bf16 %v5332_v3, %v5331_v16  ;;  %5529 = vst.msk [vmem:[#allocation11 + $0x38] sm:$0xff] (%p5308_p3), %vm4662_vm12, %v12099_v55 }
 0xcf3   : > { %11514 = vmatpush.bf16.msra.mxu3 %v11121_v39  ;;  %11513 = vmatpush.bf16.msra.mxu2 %v11121_v39  ;;  %5530 = vst.msk [vmem:[#allocation11 + $0x40] sm:$0xff] (%p5308_p3), %vm4662_vm12, %v12099_v55 }
 0xcf4   : > { %5394 = vmatpush.bf16.msra.mxu0 %v11121_v39  ;;  %11512 = vmatpush.bf16.msra.mxu1 %v11121_v39  ;;  %5531 = vst.msk [vmem:[#allocation11 + $0x48] sm:$0xff] (%p5308_p3), %vm4662_vm12, %v12099_v55 }
 0xcf5   :  { %5532 = vst.msk [vmem:[#allocation11 + $0x50] sm:$0xff] (%p5308_p3), %vm4662_vm12, %v12099_v55 }
 0xcf6   :  { %5533 = vst.msk [vmem:[#allocation11 + $0x58] sm:$0xff] (%p5308_p3), %vm4662_vm12, %v12099_v55 }
 0xcf7   : > { %11517 = vmatpush.bf16.msra.mxu3 %v11120_v60  ;;  %11516 = vmatpush.bf16.msra.mxu2 %v11120_v60  ;;  %5534 = vst.msk [vmem:[#allocation11 + $0x60] sm:$0xff] (%p5308_p3), %vm4662_vm12, %v12099_v55 }
 0xcf8   : > { %5395 = vmatpush.bf16.msra.mxu0 %v11120_v60  ;;  %11515 = vmatpush.bf16.msra.mxu1 %v11120_v60  ;;  %5535 = vst.msk [vmem:[#allocation11 + $0x68] sm:$0xff] (%p5308_p3), %vm4662_vm12, %v12099_v55 }
 0xcf9   :  { %5536 = vst.msk [vmem:[#allocation11 + $0x70] sm:$0xff] (%p5308_p3), %vm4662_vm12, %v12099_v55 }
 0xcfa   : > { %9604 = vmatmul.msk.bf16.vlgmr.msra.gmra.mxu3 %vm4662_vm12, %v5336_v57  ;;  %9603 = vmatmul.msk.bf16.vlgmr.msra.gmra.mxu2 %vm4662_vm12, %v5335_v40  ;;  %5537 = vst.msk [vmem:[#allocation11 + $0x78] sm:$0xff] (%p5308_p3), %vm4662_vm12, %v12099_v55 }
 0xcfb   : > { %9601 = vmatmul.msk.bf16.vlgmr.msra.gmra.mxu0 %vm4662_vm12, %v5333_v51  ;;  %9602 = vmatmul.msk.bf16.vlgmr.msra.gmra.mxu1 %vm4662_vm12, %v5334_v59  ;;  %5538 = vst.msk [vmem:[#allocation11 + $0x80] sm:$0xff] (%p5308_p3), %vm4662_vm12, %v12099_v55 }
 0xcfc   :  { %5539 = vst.msk [vmem:[#allocation11 + $0x88] sm:$0xff] (%p5308_p3), %vm4662_vm12, %v12099_v55 }
 0xcfd   :  { %5540 = vst.msk [vmem:[#allocation11 + $0x90] sm:$0xff] (%p5308_p3), %vm4662_vm12, %v12099_v55 }
 0xcfe   :  { %5541 = vst.msk [vmem:[#allocation11 + $0x98] sm:$0xff] (%p5308_p3), %vm4662_vm12, %v12099_v55 }
 0xcff   :  { %5542 = vst.msk [vmem:[#allocation11 + $0xa0] sm:$0xff] (%p5308_p3), %vm4662_vm12, %v12099_v55 }
 0xd00   :  { %5543 = vst.msk [vmem:[#allocation11 + $0xa8] sm:$0xff] (%p5308_p3), %vm4662_vm12, %v12099_v55 }
 0xd01   :  { %5544 = vst.msk [vmem:[#allocation11 + $0xb0] sm:$0xff] (%p5308_p3), %vm4662_vm12, %v12099_v55 }
 0xd02   :  { %5545 = vst.msk [vmem:[#allocation11 + $0xb8] sm:$0xff] (%p5308_p3), %vm4662_vm12, %v12099_v55 }
 0xd03   :  { %5546 = vst.msk [vmem:[#allocation11 + $0xc0] sm:$0xff] (%p5308_p3), %vm4662_vm12, %v12099_v55 }
 0xd04   :  { %5547 = vst.msk [vmem:[#allocation11 + $0xc8] sm:$0xff] (%p5308_p3), %vm4662_vm12, %v12099_v55 }
 0xd05   :  { %5548 = vst.msk [vmem:[#allocation11 + $0xd0] sm:$0xff] (%p5308_p3), %vm4662_vm12, %v12099_v55 }
 0xd06   :  { %5549 = vst.msk [vmem:[#allocation11 + $0xd8] sm:$0xff] (%p5308_p3), %vm4662_vm12, %v12099_v55 }
 0xd07   :  { %5550 = vst.msk [vmem:[#allocation11 + $0xe0] sm:$0xff] (%p5308_p3), %vm4662_vm12, %v12099_v55 }
 0xd08   :  { %5551 = vst.msk [vmem:[#allocation11 + $0xe8] sm:$0xff] (%p5308_p3), %vm4662_vm12, %v12099_v55 }
 0xd09   :  { %5552 = vst.msk [vmem:[#allocation11 + $0xf0] sm:$0xff] (%p5308_p3), %vm4662_vm12, %v12099_v55 }
 0xd0a   : > { %9605 = vmatmul.msk.bf16.gmra.mxu3 %vm4662_vm12, %v5337_v28  ;;  %5553 = vst.msk [vmem:[#allocation11 + $0xf8] sm:$0xff] (%p5308_p3), %vm4662_vm12, %v12099_v55 }
 0xd0b   :  { %5554 = vst.msk [vmem:[#allocation11 + $0x100] sm:$0xff] (%p5308_p3), %vm4662_vm12, %v12099_v55 }
 0xd0c   :  { %5555 = vst.msk [vmem:[#allocation11 + $0x108] sm:$0xff] (%p5308_p3), %vm4662_vm12, %v12099_v55 }
 0xd0d   :  { %5556 = vst.msk [vmem:[#allocation11 + $0x110] sm:$0xff] (%p5308_p3), %vm4662_vm12, %v12099_v55 }
 0xd0e   :  { %5557 = vst.msk [vmem:[#allocation11 + $0x118] sm:$0xff] (%p5308_p3), %vm4662_vm12, %v12099_v55 }
 0xd0f   :  { %5558 = vst.msk [vmem:[#allocation11 + $0x120] sm:$0xff] (%p5308_p3), %vm4662_vm12, %v12099_v55 }
 0xd10   :  { %5559 = vst.msk [vmem:[#allocation11 + $0x128] sm:$0xff] (%p5308_p3), %vm4662_vm12, %v12099_v55 }
 0xd11   :  { %5560 = vst.msk [vmem:[#allocation11 + $0x130] sm:$0xff] (%p5308_p3), %vm4662_vm12, %v12099_v55 }
 0xd12   :  { %5561 = vst.msk [vmem:[#allocation11 + $0x138] sm:$0xff] (%p5308_p3), %vm4662_vm12, %v12099_v55 }
 0xd13   :  { %5562 = vst.msk [vmem:[#allocation11 + $0x140] sm:$0xff] (%p5308_p3), %vm4662_vm12, %v12099_v55 }
 0xd14   :  { %5563 = vst.msk [vmem:[#allocation11 + $0x148] sm:$0xff] (%p5308_p3), %vm4662_vm12, %v12099_v55 }
 0xd15   :  { %5564 = vst.msk [vmem:[#allocation11 + $0x150] sm:$0xf] (%p5308_p3), %vm4705_vm0, %v12099_v55 }
 0xd78   : > { %v5397_v33 = vpop.f32.mrf.mxu0  ;;  %v5402_v62 = vpop.f32.mrf.mxu1 }
 0xd79   : > { %v5422_v36 = vadd.f32 %v12030_v54, %v5397_v33   ;;  %v5424_v14 = vadd.f32 %v12022_v17, %v5402_v62  }
 0xd7b   : > { %v18403_v17 = vmov %v5424_v14  ;;  %v18405_v54 = vmov %v5422_v36 }
 0xd7c   :  { %v15623_v54 = vperm.slane (%p5308_p3), %v15170_v25, 0 }
 0xd7d   : > { %v5412_v8 = vpop.f32.mrf.mxu3  ;;  %v5407_v24 = vpop.f32.mrf.mxu2 }
 0xd7e   : > { %v5428_v19 = vadd.f32 %v12006_v27, %v5412_v8   ;;  %v5426_v37 = vadd.f32 %v12014_v1, %v5407_v24   ;;  %v5435_v21 = vadd.f32 (%p5308_p3), %v15623_v54, %v5422_v36  ;;  %v5437_v39 = vadd.f32 (%p5308_p3), %v15623_v54, %v5424_v14 }
 0xd80   : > { %v5399_v2 = vpop.f32.mrf.mxu0  ;;  %v5404_v47 = vpop.f32.mrf.mxu1  ;;  %v18399_v27 = vmov %v5428_v19  ;;  %v18401_v1 = vmov %v5426_v37  ;;  %v5439_v25 = vadd.f32 (%p5308_p3), %v15623_v54, %v5426_v37  ;;  %v5447_v17 = vsel (%p5308_p3), %vm4654_vm15, %v5437_v39, -inf }
 0xd81   : > { %v5423_v38 = vadd.f32 %v12026_v26, %v5399_v2   ;;  %v5425_v48 = vadd.f32 %v12018_v52, %v5404_v47   ;;  %v5445_v1 = vsel (%p5308_p3), %vm4652_vm9, %v5435_v21, -inf  ;;  %v5457_v57 = vsel (%p5308_p3), %vm4662_vm12, %v5447_v17, -inf }
 0xd82   :  { %v5449_v35 = vsel (%p5308_p3), %vm4656_vm5, %v5439_v25, -inf  ;;  %v5455_v46 = vsel (%p5308_p3), %vm4662_vm12, %v5445_v1, -inf  ;;  %v5481_v24 = vsel (%p5308_p3), %vm4652_vm9, %v5435_v21, 0.0 }
 0xd83   : > { %v18402_v52 = vmov %v5425_v48  ;;  %v18404_v26 = vmov %v5423_v38  ;;  %v5436_v7 = vadd.f32 (%p5308_p3), %v15623_v54, %v5423_v38  ;;  %v5438_v43 = vadd.f32 (%p5308_p3), %v15623_v54, %v5425_v48 }
 0xd84   :  { %v5459_v51 = vsel (%p5308_p3), %vm4662_vm12, %v5449_v35, -inf  ;;  %v5483_v38 = vsel (%p5308_p3), %vm4654_vm15, %v5437_v39, 0.0 }
 0xd85   : > { %v5414_v31 = vpop.f32.mrf.mxu3  ;;  %v5409_v58 = vpop.f32.mrf.mxu2  ;;  %v5446_v52 = vsel (%p5308_p3), %vm4653_vm14, %v5436_v7, -inf  ;;  %v5448_v26 = vsel (%p5308_p3), %vm4655_vm4, %v5438_v43, -inf  ;;  %v5460_v28 = vmax.f32 (%p5308_p3), %v5455_v46, %v5459_v51 }
 0xd86   : > { %v5429_v56 = vadd.f32 %v12002_v32, %v5414_v31   ;;  %v5427_v13 = vadd.f32 %v12010_v18, %v5409_v58   ;;  %v5456_v49 = vsel (%p5308_p3), %vm4662_vm12, %v5446_v52, -inf  ;;  %v5458_v40 = vsel (%p5308_p3), %vm4662_vm12, %v5448_v26, -inf }
 0xd87   :  { %v5484_v31 = vsel (%p5308_p3), %vm4655_vm4, %v5438_v43, 0.0  ;;  %v5491_v58 = vsel (%p5308_p3), %vm4662_vm12, %v5481_v24, 0.0 }
 0xd88   : > { %v18398_v32 = vmov %v5429_v56  ;;  %v18400_v18 = vmov %v5427_v13 }
 0xd89   :  { %v15639_v32 = vadd.f32 (%p5308_p3), %v15623_v54, %v5429_v56 }
 0xd8b   :  { %v5452_v5 = vsel (%p5308_p3), %vm18386_vm2, %v15639_v32, -inf }
 0xd8c   :  { %v5465_v3 = vsel (%p5308_p3), %vm4662_vm12, %v5452_v5, -inf }
 0xd8d   : > { %v5417_v9 = vpop.f32.mrf.mxu3  ;;  %v5466_v36 = vmax.f32 (%p5308_p3), %v5458_v40, %v5465_v3 }
 0xd8e   : > { %v5430_v53 = vadd.f32 %v11998_v41, %v5417_v9  }
 0xd90   : > { %v18397_v41 = vmov %v5430_v53  ;;  %v15644_v27 = vadd.f32 (%p5308_p3), %v15623_v54, %v5430_v53  ;;  %v5485_v53 = vsel (%p5308_p3), %vm4656_vm5, %v5439_v25, 0.0 }
 0xd91   :  { %v5441_v41 = vadd.f32 (%p5308_p3), %v15623_v54, %v5428_v19  ;;  %v5482_v19 = vsel (%p5308_p3), %vm4653_vm14, %v5436_v7, 0.0  ;;  %v5498_v39 = vsel (%p5308_p3), %vm4662_vm12, %v5485_v53, 0.0 }
 0xd92   :  { %v5453_v30 = vsel (%p5308_p3), %vm18385_vm10, %v15644_v27, -inf  ;;  %v5492_v56 = vsel (%p5308_p3), %vm4662_vm12, %v5482_v19, 0.0  ;;  %v5489_v17 = vsel (%p5308_p3), %vm18385_vm10, %v15644_v27, 0.0 }
 0xd93   :  { %v5451_v60 = vsel (%p5308_p3), %vm4658_vm7, %v5441_v41, -inf  ;;  %v5467_v14 = vsel (%p5308_p3), %vm4662_vm12, %v5453_v30, -inf  ;;  %v5487_v43 = vsel (%p5308_p3), %vm4658_vm7, %v5441_v41, 0.0  ;;  %v5506_v27 = vsel (%p5308_p3), %vm4662_vm12, %v5489_v17, 0.0 }
 0xd94   :  { %5310 = sbr.rel (!%p5308_p3) target bundleno = 3304 (0xce8), region = 242  ;;  %v5463_v16 = vsel (%p5308_p3), %vm4662_vm12, %v5451_v60, -inf  ;;  %v5468_v37 = vmax.f32 (%p5308_p3), %v5460_v28, %v5467_v14  ;;  %v5502_v41 = vsel (%p5308_p3), %vm4662_vm12, %v5487_v43, 0.0 }
 0xd95   : > { %v5419_v50 = vpop.f32.mrf.mxu3  ;;  %v5464_v62 = vmax.f32 (%p5308_p3), %v5457_v57, %v5463_v16 }
 0xd96   : > { %v5431_v0 = vadd.f32 %v11994_v12, %v5419_v50   ;;  %v5493_v50 = vadd.f32 (%p5308_p3), %v5492_v56, %v5491_v58 }
 0xd97   :  { %v5473_v47 = vmax.f32 (%p5308_p3), %v5464_v62, %v5466_v36 }
 0xd98   : > { %v18396_v12 = vmov %v5431_v0  ;;  %v15647_v18 = vadd.f32 (%p5308_p3), %v15623_v54, %v5431_v0  ;;  %v5496_v0 = vsel (%p5308_p3), %vm4662_vm12, %v5484_v31, 0.0 }
 0xd99   :  { %v5440_v12 = vadd.f32 %v15623_v54, %v5427_v13  ;;  %v5494_v13 = vsel %vm4662_vm12, %v5483_v38, 0.0 }
 0xd9a   :  { %v5454_v6 = vsel %vm18384_vm11, %v15647_v18, -inf  ;;  %v5495_v7 = vadd.f32 %v5494_v13, %v5493_v50  ;;  %v5490_v35 = vsel %vm18384_vm11, %v15647_v18, 0.0 }
 0xd9b   :  { %v5450_v15 = vsel %vm4657_vm6, %v5440_v12, -inf  ;;  %v5470_v8 = vsel %vm18383_vm3, %v5454_v6, -inf  ;;  %v5486_v21 = vsel %vm4657_vm6, %v5440_v12, 0.0  ;;  %v5488_v12 = vsel %vm18386_vm2, %v15639_v32, 0.0 }
 0xd9c   :  { %v5461_v59 = vsel %vm4662_vm12, %v5450_v15, -inf  ;;  %v5497_v25 = vadd.f32 %v5496_v0, %v5495_v7  ;;  %v5500_v1 = vsel %vm4662_vm12, %v5486_v21, 0.0  ;;  %v5504_v32 = vsel %vm4662_vm12, %v5488_v12, 0.0 }
 0xd9d   :  { %v5462_v33 = vmax.f32 %v5456_v49, %v5461_v59  ;;  %v5508_v5 = vsel %vm18383_vm3, %v5490_v35, 0.0 }
 0xd9e   :  { %v5499_v52 = vadd.f32 %v5498_v39, %v5497_v25 }
 0xd9f   :  { %v5471_v2 = vmax.f32 %v5462_v33, %v5470_v8 }
 0xda0   :  { %v5501_v26 = vadd.f32 %v5500_v1, %v5499_v52 }
 0xda1   :  { %v5472_v48 = vmax.f32 %v5468_v37, %v5471_v2 }
 0xda2   :  { %v5503_v15 = vadd.f32 %v5502_v41, %v5501_v26 }
 0xda3   :  { %v5474_v9 = vmax.f32 %v5472_v48, %v5473_v47 }
 0xda4   :  { %v5505_v60 = vadd.f32 %v5504_v32, %v5503_v15 }
 0xda5   :  { %v5475_v16 = vrot.slane %v5474_v9, 4 }
 0xda6   :  { %v5507_v30 = vadd.f32 %v5506_v27, %v5505_v60 }
 0xda7   :  { %v5476_v3 = vmax.f32 %v5474_v9, %v5475_v16 }
 0xda8   :  { %v5509_v18 = vadd.f32 %v5508_v5, %v5507_v30 }
 0xda9   :  { %v5477_v28 = vrot.slane %v5476_v3, 2 }
 0xdaa   :  { %v5510_v6 = vrot.slane %v5509_v18, 4 }
 0xdab   :  { %v5478_v33 = vmax.f32 %v5476_v3, %v5477_v28 }
 0xdac   :  { %v5511_v46 = vadd.f32 %v5510_v6, %v5509_v18 }
 0xdad   :  { %v5479_v62 = vrot.slane %v5478_v33, 1 }
 0xdae   :  { %v5512_v49 = vrot.slane %v5511_v46, 2 }
 0xdaf   :  { %v5480_v36 = vmax.f32 %v5478_v33, %v5479_v62 }
 0xdb0   :  { %v5513_v57 = vadd.f32 %v5512_v49, %v5511_v46 }
 0xdb2   :  { %v5514_v40 = vrot.slane %v5513_v57, 1 }
 0xdb4   :  { %v5515_v51 = vadd.f32 %v5514_v40, %v5513_v57 }
 0xdb6   :  { %v5516_v59 = vmul.f32 %v5515_v51, %v15175_v22 }
 0xdb8   :  { %5518 = vrot.lane.b32.xlu0 %v5516_v59, %s12100_s0 }
 0xe2a   :  { %v5519_v14 = vpop.permute.xlu0 %5518 }
 0xe2b   :  { %v15816_v8 = vsel %vm4662_vm12, %v5480_v36, %v5519_v14 }
 0xe2c LB: > { %s11124_s24 = smul.u32 24, %s12038_s2  ;;  %s15828_s25 = scalar_lea.vmem [#allocation10], %s12038_s2  ;;  %vm18406_vm13 = vcmask 392192   ;;  %s12038_s2 = sphi %s15818_s2, %s5570_s2  }
 0xe2d   : > { %v9606_v37 = vld [vmem:[%s15828_s25 + $0x198] sm:$0xff]  ;;  %v9607_v2 = vld [vmem:[%s15828_s25 + $0x1a0] sm:$0xff]  ;;  %vm18407_vm1 = vmmov %vm18406_vm13  ;;  %s5570_s2 = sadd.s32 1, %s12038_s2  }
 0xe2e   : > { %s5683_s26 = scalar_lea.vmem %s18365_s7, %s11124_s24  ;;  %v9618_v47 = vld [vmem:[%s15828_s25 + $0x1f8] sm:$0xff]  ;;  %v9619_v48 = vld [vmem:[%s15828_s25 + $0x200] sm:$0xff]  ;;  %v5616_v9 = vpack.c.bf16 %v9607_v2, %v9606_v37  ;;  %vm18408_vm3 = vmmov %vm18407_vm1  ;;  %p5567_p4 = scmp.ge.s32.totalorder %s5570_s2, 65  }
 0xe2f   : > { %v11127_v24 = vld [vmem:[%s5683_s26 + $0x10] sm:$0xff]  ;;  %v11126_v19 = vld [vmem:[%s5683_s26 + $0x8] sm:$0xff]  ;;  %v11125_v38 = vld [vmem:[%s5683_s26] sm:$0xff]  ;;  %v5622_v53 = vpack.c.bf16 %v9619_v48, %v9618_v47  ;;  %6111 = vst.msk [vmem:[#allocation12 + $0x58] sm:$0xff] (%p5567_p4), %vm4662_vm12, %v12099_v55  ;;  %s15998_s7 = smov (%p5567_p4), 0  }
 0xe30   : > { %5779 = vmatpush.bf16.msra.mxu0 %v11127_v24  ;;  %11518 = vmatpush.bf16.msra.mxu1 %v11127_v24  ;;  %v9630_v31 = vld [vmem:[%s15828_s25 + $0x258] sm:$0xff]  ;;  %v9631_v58 = vld [vmem:[%s15828_s25 + $0x260] sm:$0xff]  ;;  %vm18409_vm11 = vmmov %vm18407_vm1  ;;  %6112 = vst.msk [vmem:[#allocation12 + $0x60] sm:$0xff] (%p5567_p4), %vm4662_vm12, %v12099_v55 }
 0xe31   : > { %11519 = vmatpush.bf16.msra.mxu2 %v11127_v24  ;;  %11520 = vmatpush.bf16.msra.mxu3 %v11127_v24  ;;  %v9642_v56 = vld [vmem:[%s15828_s25 + $0x2b8] sm:$0xff]  ;;  %v9643_v13 = vld [vmem:[%s15828_s25 + $0x2c0] sm:$0xff]  ;;  %v5628_v50 = vpack.c.bf16 %v9631_v58, %v9630_v31  ;;  %v9608_v21 = vld [vmem:[%s15828_s25 + $0x1a8] sm:$0xff]  ;;  %6113 = vst.msk [vmem:[#allocation12 + $0x68] sm:$0xff] (%p5567_p4), %vm4662_vm12, %v12099_v55 }
 0xe32   : > { %v5634_v0 = vpack.c.bf16 %v9643_v13, %v9642_v56  ;;  %v9609_v7 = vld [vmem:[%s15828_s25 + $0x1b0] sm:$0xff]  ;;  %v9620_v39 = vld [vmem:[%s15828_s25 + $0x208] sm:$0xff]  ;;  %v9610_v35 = vld [vmem:[%s15828_s25 + $0x1b8] sm:$0xff]  ;;  %6114 = vst.msk [vmem:[#allocation12 + $0x70] sm:$0xff] (%p5567_p4), %vm4662_vm12, %v12099_v55 }
 0xe33   : > { %v9621_v43 = vld [vmem:[%s15828_s25 + $0x210] sm:$0xff]  ;;  %v9632_v25 = vld [vmem:[%s15828_s25 + $0x268] sm:$0xff]  ;;  %v5617_v41 = vpack.c.bf16 %v9609_v7, %v9608_v21  ;;  %v9611_v15 = vld [vmem:[%s15828_s25 + $0x1c0] sm:$0xff]  ;;  %6115 = vst.msk [vmem:[#allocation12 + $0x78] sm:$0xff] (%p5567_p4), %vm4662_vm12, %v12099_v55 }
 0xe34   : > { %5780 = vmatpush.bf16.msra.mxu0 %v11126_v19  ;;  %11521 = vmatpush.bf16.msra.mxu1 %v11126_v19  ;;  %v9633_v1 = vld [vmem:[%s15828_s25 + $0x270] sm:$0xff]  ;;  %v9644_v12 = vld [vmem:[%s15828_s25 + $0x2c8] sm:$0xff]  ;;  %v5623_v17 = vpack.c.bf16 %v9621_v43, %v9620_v39  ;;  %v9622_v27 = vld [vmem:[%s15828_s25 + $0x218] sm:$0xff]  ;;  %v5618_v46 = vpack.c.bf16 %v9611_v15, %v9610_v35  ;;  %6116 = vst.msk [vmem:[#allocation12 + $0x80] sm:$0xff] (%p5567_p4), %vm4662_vm12, %v12099_v55 }
 0xe35   : > { %11522 = vmatpush.bf16.msra.mxu2 %v11126_v19  ;;  %11523 = vmatpush.bf16.msra.mxu3 %v11126_v19  ;;  %v9645_v52 = vld [vmem:[%s15828_s25 + $0x2d0] sm:$0xff]  ;;  %v5629_v26 = vpack.c.bf16 %v9633_v1, %v9632_v25  ;;  %v9623_v60 = vld [vmem:[%s15828_s25 + $0x220] sm:$0xff]  ;;  %v9634_v5 = vld [vmem:[%s15828_s25 + $0x278] sm:$0xff]  ;;  %6117 = vst.msk [vmem:[#allocation12 + $0x88] sm:$0xff] (%p5567_p4), %vm4662_vm12, %v12099_v55  ;;  %v15986_v55 = vmov (%p5567_p4), 0.0  }
 0xe36   : > { %v5635_v32 = vpack.c.bf16 %v9645_v52, %v9644_v12  ;;  %v9635_v30 = vld [vmem:[%s15828_s25 + $0x280] sm:$0xff]  ;;  %v9646_v18 = vld [vmem:[%s15828_s25 + $0x2d8] sm:$0xff]  ;;  %v5624_v49 = vpack.c.bf16 %v9623_v60, %v9622_v27  ;;  %v9612_v51 = vld [vmem:[%s15828_s25 + $0x1c8] sm:$0xff] }
 0xe37   : > { %v9647_v6 = vld [vmem:[%s15828_s25 + $0x2e0] sm:$0xff]  ;;  %v5630_v57 = vpack.c.bf16 %v9635_v30, %v9634_v5  ;;  %v9613_v59 = vld [vmem:[%s15828_s25 + $0x1d0] sm:$0xff]  ;;  %v9624_v16 = vld [vmem:[%s15828_s25 + $0x228] sm:$0xff] }
 0xe38   : > { %5781 = vmatpush.bf16.msra.mxu0 %v11125_v38  ;;  %11524 = vmatpush.bf16.msra.mxu1 %v11125_v38  ;;  %v5636_v40 = vpack.c.bf16 %v9647_v6, %v9646_v18  ;;  %v9625_v3 = vld [vmem:[%s15828_s25 + $0x230] sm:$0xff]  ;;  %v9636_v28 = vld [vmem:[%s15828_s25 + $0x288] sm:$0xff]  ;;  %v5619_v36 = vpack.c.bf16 %v9613_v59, %v9612_v51  ;;  %v9614_v37 = vld [vmem:[%s15828_s25 + $0x1d8] sm:$0xff] }
 0xe39   : > { %11525 = vmatpush.bf16.msra.mxu2 %v11125_v38  ;;  %11526 = vmatpush.bf16.msra.mxu3 %v11125_v38  ;;  %v9637_v33 = vld [vmem:[%s15828_s25 + $0x290] sm:$0xff]  ;;  %v9648_v62 = vld [vmem:[%s15828_s25 + $0x2e8] sm:$0xf]  ;;  %v5625_v14 = vpack.c.bf16 %v9625_v3, %v9624_v16  ;;  %v9615_v2 = vld [vmem:[%s15828_s25 + $0x1e0] sm:$0xff] }
 0xe3a   : > { %v5631_v24 = vpack.c.bf16 %v9637_v33, %v9636_v28  ;;  %v5637_v19 = vpack.c.bf16 %v9648_v62, %v9648_v62  ;;  %v9626_v47 = vld [vmem:[%s15828_s25 + $0x238] sm:$0xff]  ;;  %v9627_v38 = vld [vmem:[%s15828_s25 + $0x240] sm:$0xff]  ;;  %v5620_v58 = vpack.c.bf16 %v9615_v2, %v9614_v37  ;;  %v9640_v21 = vld [vmem:[%s15828_s25 + $0x2a8] sm:$0xff] }
 0xe3b   : > { %9662 = vmatmul.msk.bf16.vlgmr.msra.gmra.mxu0 %vm18406_vm13, %v5616_v9  ;;  %9668 = vmatmul.msk.bf16.vlgmr.msra.gmra.mxu1 %vm18407_vm1, %v5622_v53  ;;  %vm18412_vm13 = vmmov %vm18407_vm1  ;;  %v9638_v48 = vld [vmem:[%s15828_s25 + $0x298] sm:$0xff]  ;;  %v9639_v31 = vld [vmem:[%s15828_s25 + $0x2a0] sm:$0xff]  ;;  %v5626_v56 = vpack.c.bf16 %v9627_v38, %v9626_v47 }
 0xe3c   : > { %9674 = vmatmul.msk.bf16.vlgmr.msra.gmra.mxu2 %vm18408_vm3, %v5628_v50  ;;  %9680 = vmatmul.msk.bf16.vlgmr.msra.gmra.mxu3 %vm18409_vm11, %v5634_v0  ;;  %vm18410_vm11 = vmmov %vm18407_vm1  ;;  %v5632_v13 = vpack.c.bf16 %v9639_v31, %v9638_v48  ;;  %v9616_v9 = vld [vmem:[%s15828_s25 + $0x1e8] sm:$0xff]  ;;  %v9617_v53 = vld [vmem:[%s15828_s25 + $0x1f0] sm:$0xff] }
 0xe3d   : > { %vm18411_vm3 = vmmov %vm18407_vm1  ;;  %v9628_v50 = vld [vmem:[%s15828_s25 + $0x248] sm:$0xff]  ;;  %v9629_v0 = vld [vmem:[%s15828_s25 + $0x250] sm:$0xff]  ;;  %v5621_v39 = vpack.c.bf16 %v9617_v53, %v9616_v9 }
 0xe3e   : > { %v9641_v7 = vld [vmem:[%s15828_s25 + $0x2b0] sm:$0xff]  ;;  %v5627_v43 = vpack.c.bf16 %v9629_v0, %v9628_v50  ;;  %vm18422_vm10 = vmmov %vm18407_vm1  ;;  %v5639_v35 = vld [vmem:[#allocation11 + $0x8] sm:$0xff] }
 0xe3f   : > { %v5633_v25 = vpack.c.bf16 %v9641_v7, %v9640_v21  ;;  %vm18423_vm2 = vmmov %vm18407_vm1  ;;  %v5638_v1 = vld [vmem:[#allocation11] sm:$0xff]  ;;  %v5651_v15 = vld [vmem:[#allocation11 + $0x68] sm:$0xff] }
 0xe40   : > { %v5650_v12 = vld [vmem:[#allocation11 + $0x60] sm:$0xff]  ;;  %v5640_v51 = vld [vmem:[#allocation11 + $0x10] sm:$0xff]  ;;  %v5675_v16 = vld [vmem:[#allocation11 + $0x128] sm:$0xff] }
 0xe41   : > { %v5674_v27 = vld [vmem:[#allocation11 + $0x120] sm:$0xff]  ;;  %v5652_v59 = vld [vmem:[#allocation11 + $0x70] sm:$0xff]  ;;  %v5641_v2 = vld [vmem:[#allocation11 + $0x18] sm:$0xff] }
 0xe42   : > { %v5664_v37 = vld [vmem:[#allocation11 + $0xd0] sm:$0xff]  ;;  %v5653_v47 = vld [vmem:[#allocation11 + $0x78] sm:$0xff]  ;;  %v5642_v21 = vld [vmem:[#allocation11 + $0x20] sm:$0xff] }
 0xe43   : > { %v5676_v38 = vld [vmem:[#allocation11 + $0x130] sm:$0xff]  ;;  %v5665_v0 = vld [vmem:[#allocation11 + $0xd8] sm:$0xff]  ;;  %v5654_v7 = vld [vmem:[#allocation11 + $0x80] sm:$0xff] }
 0xe4b   : > { %9663 = vmatmul.msk.bf16.gmra.mxu0 %vm18410_vm11, %v5617_v41  ;;  %9669 = vmatmul.msk.bf16.gmra.mxu1 %vm18411_vm3, %v5623_v17  ;;  %vm18413_vm11 = vmmov %vm18407_vm1 }
 0xe4c   : > { %9675 = vmatmul.msk.bf16.gmra.mxu2 %vm18412_vm13, %v5629_v26  ;;  %9681 = vmatmul.msk.bf16.gmra.mxu3 %vm18407_vm1, %v5635_v32  ;;  %vm18414_vm3 = vmmov %vm18407_vm1  ;;  %v5662_v32 = vld [vmem:[#allocation11 + $0xc0] sm:$0xff] }
 0xe4d   : > { %vm18415_vm13 = vmmov %vm18407_vm1 }
 0xe5b   : > { %9664 = vmatmul.msk.bf16.gmra.mxu0 %vm18413_vm11, %v5618_v46  ;;  %9670 = vmatmul.msk.bf16.gmra.mxu1 %vm18414_vm3, %v5624_v49  ;;  %vm18416_vm11 = vmmov %vm18407_vm1 }
 0xe5c   : > { %9676 = vmatmul.msk.bf16.gmra.mxu2 %vm18415_vm13, %v5630_v57  ;;  %9682 = vmatmul.msk.bf16.gmra.mxu3 %vm18407_vm1, %v5636_v40  ;;  %vm18417_vm3 = vmmov %vm18407_vm1  ;;  %v5663_v40 = vld [vmem:[#allocation11 + $0xc8] sm:$0xff] }
 0xe5d   : > { %vm18418_vm13 = vmmov %vm18407_vm1 }
 0xe6b   : > { %9665 = vmatmul.msk.bf16.gmra.mxu0 %vm18416_vm11, %v5619_v36  ;;  %9671 = vmatmul.msk.bf16.gmra.mxu1 %vm18417_vm3, %v5625_v14  ;;  %vm18419_vm11 = vmmov %vm18407_vm1 }
 0xe6c   : > { %9677 = vmatmul.msk.bf16.gmra.mxu2 %vm18418_vm13, %v5631_v24  ;;  %9683 = vmatmul.msk.bf16.gmra.mxu3 %vm18407_vm1, %v5637_v19  ;;  %vm18420_vm3 = vmmov %vm18407_vm1 }
 0xe6d   : > { %vm18421_vm13 = vmmov %vm18407_vm1 }
 0xe7b   : > { %9666 = vmatmul.msk.bf16.gmra.mxu0 %vm18419_vm11, %v5620_v58  ;;  %9672 = vmatmul.msk.bf16.gmra.mxu1 %vm18420_vm3, %v5626_v56 }
 0xe7c   : > { %9678 = vmatmul.msk.bf16.gmra.mxu2 %vm18421_vm13, %v5632_v13 }
 0xe8b   : > { %9667 = vmatmul.msk.bf16.gmra.mxu0 %vm18407_vm1, %v5621_v39  ;;  %9673 = vmatmul.msk.bf16.gmra.mxu1 %vm18422_vm10, %v5627_v43  ;;  %v5677_v39 = vld [vmem:[#allocation11 + $0x138] sm:$0xff] }
 0xe8c   : > { %9679 = vmatmul.msk.bf16.gmra.mxu2 %vm18423_vm2, %v5633_v25 }
 0xeb8   : > { %v5783_v52 = vpop.f32.mrf.mxu0  ;;  %v5813_v41 = vpop.f32.mrf.mxu1 }
 0xeb9   : > { %v5892_v17 = vadd.f32 %v5783_v52, %v5638_v1  ;;  %v5904_v26 = vadd.f32 %v5813_v41, %v5650_v12 }
 0xebb   : > { %5935 = vst.msk [vmem:[#allocation11] sm:$0xff] %vm4662_vm12, %v5892_v17 }
 0xebc   : > { %5947 = vst.msk [vmem:[#allocation11 + $0x60] sm:$0xff] %vm4662_vm12, %v5904_v26 }
 0xebf   : > { %v5843_v60 = vpop.f32.mrf.mxu2  ;;  %v5873_v5 = vpop.f32.mrf.mxu3 }
 0xec0   : > { %v5916_v30 = vadd.f32 %v5843_v60, %v5662_v32  ;;  %v5785_v18 = vpop.f32.mrf.mxu0  ;;  %v5815_v6 = vpop.f32.mrf.mxu1  ;;  %v5928_v57 = vadd.f32 %v5873_v5, %v5674_v27  ;;  %v5666_v32 = vld [vmem:[#allocation11 + $0xe0] sm:$0xff] }
 0xec1   : > { %v5893_v46 = vadd.f32 %v5785_v18, %v5639_v35  ;;  %v5905_v49 = vadd.f32 %v5815_v6, %v5651_v15  ;;  %v5643_v35 = vld [vmem:[#allocation11 + $0x28] sm:$0xff]  ;;  %v5678_v27 = vld [vmem:[#allocation11 + $0x140] sm:$0xff] }
 0xec2   : > { %5959 = vst.msk [vmem:[#allocation11 + $0xc0] sm:$0xff] %vm4662_vm12, %v5916_v30  ;;  %v5655_v15 = vld [vmem:[#allocation11 + $0x88] sm:$0xff] }
 0xec3   : > { %5936 = vst.msk [vmem:[#allocation11 + $0x8] sm:$0xff] %vm4662_vm12, %v5893_v46 }
 0xec4   : > { %5948 = vst.msk [vmem:[#allocation11 + $0x68] sm:$0xff] %vm4662_vm12, %v5905_v49 }
 0xec5   : > { %5971 = vst.msk [vmem:[#allocation11 + $0x120] sm:$0xff] %vm4662_vm12, %v5928_v57 }
 0xec7   : > { %v5845_v3 = vpop.f32.mrf.mxu2  ;;  %v5875_v28 = vpop.f32.mrf.mxu3 }
 0xec8   : > { %v5917_v33 = vadd.f32 %v5845_v3, %v5663_v40  ;;  %v5788_v62 = vpop.f32.mrf.mxu0  ;;  %v5818_v36 = vpop.f32.mrf.mxu1  ;;  %v5929_v19 = vadd.f32 %v5875_v28, %v5675_v16  ;;  %v5667_v40 = vld [vmem:[#allocation11 + $0xe8] sm:$0xff] }
 0xec9   : > { %v5894_v14 = vadd.f32 %v5788_v62, %v5640_v51  ;;  %v5906_v24 = vadd.f32 %v5818_v36, %v5652_v59  ;;  %v5644_v51 = vld [vmem:[#allocation11 + $0x30] sm:$0xff]  ;;  %v5679_v16 = vld [vmem:[#allocation11 + $0x148] sm:$0xff] }
 0xeca   : > { %5960 = vst.msk [vmem:[#allocation11 + $0xc8] sm:$0xff] %vm4662_vm12, %v5917_v33  ;;  %v5656_v59 = vld [vmem:[#allocation11 + $0x90] sm:$0xff] }
 0xecb   : > { %5937 = vst.msk [vmem:[#allocation11 + $0x10] sm:$0xff] %vm4662_vm12, %v5894_v14 }
 0xecc   : > { %5949 = vst.msk [vmem:[#allocation11 + $0x70] sm:$0xff] %vm4662_vm12, %v5906_v24 }
 0xecd   : > { %5972 = vst.msk [vmem:[#allocation11 + $0x128] sm:$0xff] %vm4662_vm12, %v5929_v19 }
 0xecf   : > { %v5848_v48 = vpop.f32.mrf.mxu2  ;;  %v5878_v31 = vpop.f32.mrf.mxu3 }
 0xed0   : > { %v5918_v58 = vadd.f32 %v5848_v48, %v5664_v37  ;;  %v5790_v56 = vpop.f32.mrf.mxu0  ;;  %v5820_v13 = vpop.f32.mrf.mxu1  ;;  %v5930_v50 = vadd.f32 %v5878_v31, %v5676_v38  ;;  %v5668_v37 = vld [vmem:[#allocation11 + $0xf0] sm:$0xff] }
 0xed1   : > { %v5895_v9 = vadd.f32 %v5790_v56, %v5641_v2  ;;  %v5907_v53 = vadd.f32 %v5820_v13, %v5653_v47  ;;  %v5645_v2 = vld [vmem:[#allocation11 + $0x38] sm:$0xff]  ;;  %v5680_v38 = vld [vmem:[#allocation11 + $0x150] sm:$0xf] }
 0xed2   : > { %5961 = vst.msk [vmem:[#allocation11 + $0xd0] sm:$0xff] %vm4662_vm12, %v5918_v58  ;;  %v5657_v47 = vld [vmem:[#allocation11 + $0x98] sm:$0xff] }
 0xed3   : > { %5938 = vst.msk [vmem:[#allocation11 + $0x18] sm:$0xff] %vm4662_vm12, %v5895_v9 }
 0xed4   : > { %5950 = vst.msk [vmem:[#allocation11 + $0x78] sm:$0xff] %vm4662_vm12, %v5907_v53 }
 0xed5   : > { %5973 = vst.msk [vmem:[#allocation11 + $0x130] sm:$0xff] %vm4662_vm12, %v5930_v50 }
 0xed7   : > { %v5850_v43 = vpop.f32.mrf.mxu2  ;;  %v5880_v25 = vpop.f32.mrf.mxu3 }
 0xed8   : > { %v5919_v1 = vadd.f32 %v5850_v43, %v5665_v0  ;;  %v5793_v12 = vpop.f32.mrf.mxu0  ;;  %v5823_v52 = vpop.f32.mrf.mxu1  ;;  %v5931_v26 = vadd.f32 %v5880_v25, %v5677_v39  ;;  %v5669_v0 = vld [vmem:[#allocation11 + $0xf8] sm:$0xff] }
 0xed9   : > { %v5896_v41 = vadd.f32 %v5793_v12, %v5642_v21  ;;  %v5908_v17 = vadd.f32 %v5823_v52, %v5654_v7  ;;  %v5646_v21 = vld [vmem:[#allocation11 + $0x40] sm:$0xff] }
 0xeda   : > { %5962 = vst.msk [vmem:[#allocation11 + $0xd8] sm:$0xff] %vm4662_vm12, %v5919_v1  ;;  %v5658_v7 = vld [vmem:[#allocation11 + $0xa0] sm:$0xff] }
 0xedb   : > { %5939 = vst.msk [vmem:[#allocation11 + $0x20] sm:$0xff] %vm4662_vm12, %v5896_v41 }
 0xedc   : > { %5951 = vst.msk [vmem:[#allocation11 + $0x80] sm:$0xff] %vm4662_vm12, %v5908_v17  ;;  %v5670_v17 = vld [vmem:[#allocation11 + $0x100] sm:$0xff] }
 0xedd   : > { %5974 = vst.msk [vmem:[#allocation11 + $0x138] sm:$0xff] %vm4662_vm12, %v5931_v26  ;;  %v5647_v26 = vld [vmem:[#allocation11 + $0x48] sm:$0xff] }
 0xedf   : > { %v5853_v60 = vpop.f32.mrf.mxu2  ;;  %v5883_v5 = vpop.f32.mrf.mxu3 }
 0xee0   : > { %v5920_v30 = vadd.f32 %v5853_v60, %v5666_v32  ;;  %v5795_v18 = vpop.f32.mrf.mxu0  ;;  %v5825_v6 = vpop.f32.mrf.mxu1  ;;  %v5932_v57 = vadd.f32 %v5883_v5, %v5678_v27  ;;  %v5659_v32 = vld [vmem:[#allocation11 + $0xa8] sm:$0xff] }
 0xee1   : > { %v5897_v46 = vadd.f32 %v5795_v18, %v5643_v35  ;;  %v5909_v49 = vadd.f32 %v5825_v6, %v5655_v15  ;;  %v5671_v18 = vld [vmem:[#allocation11 + $0x108] sm:$0xff]  ;;  %v5648_v6 = vld [vmem:[#allocation11 + $0x50] sm:$0xff] }
 0xee2   : > { %5963 = vst.msk [vmem:[#allocation11 + $0xe0] sm:$0xff] %vm4662_vm12, %v5920_v30 }
 0xee3   : > { %5940 = vst.msk [vmem:[#allocation11 + $0x28] sm:$0xff] %vm4662_vm12, %v5897_v46  ;;  %v5660_v46 = vld [vmem:[#allocation11 + $0xb0] sm:$0xff] }
 0xee4   : > { %5952 = vst.msk [vmem:[#allocation11 + $0x88] sm:$0xff] %vm4662_vm12, %v5909_v49 }
 0xee5   : > { %5975 = vst.msk [vmem:[#allocation11 + $0x140] sm:$0xff] %vm4662_vm12, %v5932_v57 }
 0xee7   : > { %v5855_v3 = vpop.f32.mrf.mxu2  ;;  %v5885_v28 = vpop.f32.mrf.mxu3 }
 0xee8   : > { %v5921_v33 = vadd.f32 %v5855_v3, %v5667_v40  ;;  %v5798_v62 = vpop.f32.mrf.mxu0  ;;  %v5828_v36 = vpop.f32.mrf.mxu1  ;;  %v5933_v19 = vadd.f32 %v5885_v28, %v5679_v16  ;;  %v5672_v3 = vld [vmem:[#allocation11 + $0x110] sm:$0xff]  ;;  %v5649_v28 = vld [vmem:[#allocation11 + $0x58] sm:$0xff] }
 0xee9   : > { %v5898_v14 = vadd.f32 %v5798_v62, %v5644_v51  ;;  %v5910_v24 = vadd.f32 %v5828_v36, %v5656_v59 }
 0xeea   : > { %5964 = vst.msk [vmem:[#allocation11 + $0xe8] sm:$0xff] %vm4662_vm12, %v5921_v33  ;;  %v5661_v33 = vld [vmem:[#allocation11 + $0xb8] sm:$0xff] }
 0xeeb   : > { %5941 = vst.msk [vmem:[#allocation11 + $0x30] sm:$0xff] %vm4662_vm12, %v5898_v14 }
 0xeec   : > { %5953 = vst.msk [vmem:[#allocation11 + $0x90] sm:$0xff] %vm4662_vm12, %v5910_v24 }
 0xeed   : > { %5976 = vst.msk [vmem:[#allocation11 + $0x148] sm:$0xff] %vm4662_vm12, %v5933_v19 }
 0xeef   : > { %v5858_v48 = vpop.f32.mrf.mxu2  ;;  %v5888_v31 = vpop.f32.mrf.mxu3 }
 0xef0   : > { %v5922_v58 = vadd.f32 %v5858_v48, %v5668_v37  ;;  %v5800_v56 = vpop.f32.mrf.mxu0  ;;  %v5830_v13 = vpop.f32.mrf.mxu1  ;;  %v5934_v50 = vadd.f32 %v5888_v31, %v5680_v38  ;;  %v5978_v48 = vld [vmem:[#allocation11] ss:$4 sm:$0xff] (%p5567_p4)  ;;  %v5989_v31 = vld [vmem:[#allocation11 + $0x1] ss:$4 sm:$0xff] (%p5567_p4) }
 0xef1   : > { %v5899_v9 = vadd.f32 %v5800_v56, %v5645_v2  ;;  %v5911_v53 = vadd.f32 %v5830_v13, %v5657_v47  ;;  %v5673_v2 = vld [vmem:[#allocation11 + $0x118] sm:$0xff]  ;;  %v6000_v56 = vmax.f32 (%p5567_p4), %v5978_v48, %v5989_v31 }
 0xef2   : > { %5965 = vst.msk [vmem:[#allocation11 + $0xf0] sm:$0xff] %vm4662_vm12, %v5922_v58  ;;  %v6011_v58 = vld [vmem:[#allocation11 + $0x2] ss:$4 sm:$0xff] (%p5567_p4)  ;;  %v6022_v13 = vld [vmem:[#allocation11 + $0x3] ss:$4 sm:$0xff] (%p5567_p4) }
 0xef3   : > { %5942 = vst.msk [vmem:[#allocation11 + $0x38] sm:$0xff] %vm4662_vm12, %v5899_v9 }
 0xef4   : > { %5954 = vst.msk [vmem:[#allocation11 + $0x98] sm:$0xff] %vm4662_vm12, %v5911_v53 }
 0xef5   : > { %5977 = vst.msk [vmem:[#allocation11 + $0x150] sm:$0xf] %vm4705_vm0, %v5934_v50  ;;  %v6033_v50 = vmax.f32 (%p5567_p4), %v6011_v58, %v6022_v13  ;;  %v6017_v58 = vld [vmem:[#allocation11 + $0xc2] ss:$4 sm:$0xff] (%p5567_p4) }
 0xef7   : > { %v5860_v39 = vpop.f32.mrf.mxu2  ;;  %v5890_v43 = vpop.f32.mrf.mxu3 }
 0xef8   : > { %v5923_v25 = vadd.f32 %v5860_v39, %v5669_v0  ;;  %v5803_v1 = vpop.f32.mrf.mxu0  ;;  %v5833_v12 = vpop.f32.mrf.mxu1 }
 0xef9   : > { %v5900_v52 = vadd.f32 %v5803_v1, %v5646_v21  ;;  %v5912_v41 = vadd.f32 %v5833_v12, %v5658_v7 }
 0xefa   : > { %5966 = vst.msk [vmem:[#allocation11 + $0xf8] sm:$0xff] %vm4662_vm12, %v5923_v25  ;;  %v5979_v9 = vld [vmem:[#allocation11 + $0x20] ss:$4 sm:$0xff] (%p5567_p4)  ;;  %v5990_v53 = vld [vmem:[#allocation11 + $0x21] ss:$4 sm:$0xff] (%p5567_p4) }
 0xefb   : > { %5943 = vst.msk [vmem:[#allocation11 + $0x40] sm:$0xff] %vm4662_vm12, %v5900_v52  ;;  %v6001_v0 = vmax.f32 (%p5567_p4), %v5979_v9, %v5990_v53  ;;  %v6012_v21 = vld [vmem:[#allocation11 + $0x22] ss:$4 sm:$0xff] (%p5567_p4)  ;;  %v6023_v7 = vld [vmem:[#allocation11 + $0x23] ss:$4 sm:$0xff] (%p5567_p4)  ;;  %v6044_v52 = vmax.f32 (%p5567_p4), %v6000_v56, %v6033_v50 }
 0xefc   : > { %5955 = vst.msk [vmem:[#allocation11 + $0xa0] sm:$0xff] %vm4662_vm12, %v5912_v41  ;;  %v6034_v43 = vmax.f32 (%p5567_p4), %v6012_v21, %v6023_v7  ;;  %v6028_v50 = vld [vmem:[#allocation11 + $0xc3] ss:$4 sm:$0xff] (%p5567_p4) }
 0xeff   : > { %v5863_v35 = vpop.f32.mrf.mxu2 }
 0xf00   : > { %v5924_v15 = vadd.f32 %v5863_v35, %v5670_v17  ;;  %v5805_v27 = vpop.f32.mrf.mxu0  ;;  %v5835_v60 = vpop.f32.mrf.mxu1  ;;  %v6014_v35 = vld [vmem:[#allocation11 + $0x62] ss:$4 sm:$0xff] (%p5567_p4) }
 0xf01   : > { %v5901_v5 = vadd.f32 %v5805_v27, %v5647_v26  ;;  %v5913_v30 = vadd.f32 %v5835_v60, %v5659_v32  ;;  %v5981_v26 = vld [vmem:[#allocation11 + $0x60] ss:$4 sm:$0xff] (%p5567_p4)  ;;  %v5992_v32 = vld [vmem:[#allocation11 + $0x61] ss:$4 sm:$0xff] (%p5567_p4)  ;;  %v6025_v60 = vld [vmem:[#allocation11 + $0x63] ss:$4 sm:$0xff] (%p5567_p4) }
 0xf02   : > { %5967 = vst.msk [vmem:[#allocation11 + $0x100] sm:$0xff] %vm4662_vm12, %v5924_v15  ;;  %v6045_v15 = vmax.f32 (%p5567_p4), %v6001_v0, %v6034_v43  ;;  %v6003_v27 = vmax.f32 (%p5567_p4), %v5981_v26, %v5992_v32  ;;  %v5985_v0 = vld [vmem:[#allocation11 + $0xe0] ss:$4 sm:$0xff] (%p5567_p4)  ;;  %v5996_v43 = vld [vmem:[#allocation11 + $0xe1] ss:$4 sm:$0xff] (%p5567_p4) }
 0xf03   : > { %5944 = vst.msk [vmem:[#allocation11 + $0x48] sm:$0xff] %vm4662_vm12, %v5901_v5  ;;  %v5982_v5 = vld [vmem:[#allocation11 + $0x80] ss:$4 sm:$0xff] (%p5567_p4)  ;;  %v6029_v26 = vld [vmem:[#allocation11 + $0xe3] ss:$4 sm:$0xff] (%p5567_p4) }
 0xf04   : > { %5956 = vst.msk [vmem:[#allocation11 + $0xa8] sm:$0xff] %vm4662_vm12, %v5913_v30  ;;  %v5993_v30 = vld [vmem:[#allocation11 + $0x81] ss:$4 sm:$0xff] (%p5567_p4) }
 0xf07   : > { %v5865_v49 = vpop.f32.mrf.mxu2 }
 0xf08   : > { %v5925_v57 = vadd.f32 %v5865_v49, %v5671_v18  ;;  %v5808_v40 = vpop.f32.mrf.mxu0  ;;  %v5838_v51 = vpop.f32.mrf.mxu1  ;;  %v6055_v18 = vadd.f32 (%p5567_p4), %v6044_v52, %v15503_v63  ;;  %v6004_v49 = vmax.f32 (%p5567_p4), %v5982_v5, %v5993_v30  ;;  %v6018_v52 = vld [vmem:[#allocation11 + $0xe2] ss:$4 sm:$0xff] (%p5567_p4) }
 0xf09   : > { %v5902_v59 = vadd.f32 %v5808_v40, %v5648_v6  ;;  %v5914_v16 = vadd.f32 %v5838_v51, %v5660_v46  ;;  %v6036_v46 = vmax.f32 (%p5567_p4), %v6014_v35, %v6025_v60  ;;  %v6026_v40 = vld [vmem:[#allocation11 + $0x83] ss:$4 sm:$0xff] (%p5567_p4)  ;;  %v6040_v60 = vmax.f32 (%p5567_p4), %v6018_v52, %v6029_v26 }
 0xf0a   : > { %5968 = vst.msk [vmem:[#allocation11 + $0x108] sm:$0xff] %vm4662_vm12, %v5925_v57  ;;  %v6015_v57 = vld [vmem:[#allocation11 + $0x82] ss:$4 sm:$0xff] (%p5567_p4)  ;;  %vm6066_vm2 = vcmp.gt.f32.partialorder (%p5567_p4), %v6055_v18, 0.0  ;;  %v15980_v52 = vmov (%p5567_p4), 0.0   ;;  %v15990_v26 = vmov (%p5567_p4), 0.0  }
 0xf0b   : > { %5945 = vst.msk [vmem:[#allocation11 + $0x50] sm:$0xff] %vm4662_vm12, %v5902_v59  ;;  %v6056_v59 = vadd.f32 (%p5567_p4), %v6045_v15, %v15503_v63 }
 0xf0c   : > { %5957 = vst.msk [vmem:[#allocation11 + $0xb0] sm:$0xff] %vm4662_vm12, %v5914_v16  ;;  %v6037_v16 = vmax.f32 (%p5567_p4), %v6015_v57, %v6026_v40  ;;  %v5998_v57 = vld [vmem:[#allocation11 + $0x121] ss:$4 sm:$0xff] (%p5567_p4) }
 0xf0d   :  { %vm6067_vm10 = vcmp.gt.f32.partialorder (%p5567_p4), %v6056_v59, 0.0 }
 0xf0f   : > { %v5868_v62 = vpop.f32.mrf.mxu2 }
 0xf10   : > { %v5926_v36 = vadd.f32 %v5868_v62, %v5672_v3  ;;  %v5810_v14 = vpop.f32.mrf.mxu0  ;;  %v5840_v24 = vpop.f32.mrf.mxu1  ;;  %v6077_v62 = vmul.f32 (%p5567_p4), 0.3, %v6055_v18 }
 0xf11   : > { %v5903_v19 = vadd.f32 %v5810_v14, %v5649_v28  ;;  %v5915_v37 = vadd.f32 %v5840_v24, %v5661_v33  ;;  %v6047_v14 = vmax.f32 (%p5567_p4), %v6003_v27, %v6036_v46  ;;  %v5984_v24 = vld [vmem:[#allocation11 + $0xc0] ss:$4 sm:$0xff] (%p5567_p4) }
 0xf12   : > { %5969 = vst.msk [vmem:[#allocation11 + $0x110] sm:$0xff] %vm4662_vm12, %v5926_v36 }
 0xf13   : > { %5946 = vst.msk [vmem:[#allocation11 + $0x58] sm:$0xff] %vm4662_vm12, %v5903_v19  ;;  %v6078_v19 = vmul.f32 (%p5567_p4), 0.3, %v6056_v59  ;;  %v6058_v31 = vadd.f32 (%p5567_p4), %v6047_v14, %v15503_v63 }
 0xf14   : > { %5958 = vst.msk [vmem:[#allocation11 + $0xb8] sm:$0xff] %vm4662_vm12, %v5915_v37  ;;  %v6048_v37 = vmax.f32 (%p5567_p4), %v6004_v49, %v6037_v16  ;;  %v5987_v49 = vld [vmem:[#allocation11 + $0x120] ss:$4 sm:$0xff] (%p5567_p4)  ;;  %v6020_v16 = vld [vmem:[#allocation11 + $0x122] ss:$4 sm:$0xff] (%p5567_p4) }
 0xf15   :  { %v6089_v56 = vsel (%p5567_p4), %vm6067_vm10, %v6056_v59, %v6078_v19  ;;  %vm6069_vm11 = vcmp.gt.f32.partialorder (%p5567_p4), %v6058_v31, 0.0  ;;  %v6080_v7 = vmul.f32 (%p5567_p4), 0.3, %v6058_v31  ;;  %v6009_v59 = vmax.f32 (%p5567_p4), %v5987_v49, %v5998_v57  ;;  %v5999_v19 = vld [vmem:[#allocation11 + $0x141] ss:$4 sm:$0x1f] (%p5567_p4) }
 0xf16   :  { %5569 = sbr.rel (!%p5567_p4) target bundleno = 3628 (0xe2c), region = 253  ;;  %v6059_v13 = vadd.f32 (%p5567_p4), %v6048_v37, %v15503_v63  ;;  %6101 = vst.msk [vmem:[#allocation12 + $0x8] sm:$0xff] (%p5567_p4), %vm4662_vm12, %v6089_v56  ;;  %v6032_v56 = vld [vmem:[#allocation11 + $0x143] ss:$4 sm:$0x1f] (%p5567_p4) }
 0xf17   : > { %v5870_v47 = vpop.f32.mrf.mxu2 }
 0xf18   : > { %v5927_v38 = vadd.f32 %v5870_v47, %v5673_v2  ;;  %v5995_v47 = vld [vmem:[#allocation11 + $0xc1] ss:$4 sm:$0xff] (%p5567_p4)  ;;  %vm6070_vm3 = vcmp.gt.f32.partialorder (%p5567_p4), %v6059_v13, 0.0 }
 0xf19   :  { %v6006_v53 = vmax.f32 (%p5567_p4), %v5984_v24, %v5995_v47  ;;  %v5988_v24 = vld [vmem:[#allocation11 + $0x140] ss:$4 sm:$0x1f] (%p5567_p4)  ;;  %v6021_v47 = vld [vmem:[#allocation11 + $0x142] ss:$4 sm:$0x1f] (%p5567_p4) }
 0xf1a   : > { %5970 = vst.msk [vmem:[#allocation11 + $0x118] sm:$0xff] %vm4662_vm12, %v5927_v38  ;;  %v5980_v39 = vld [vmem:[#allocation11 + $0x40] ss:$4 sm:$0xff] (%p5567_p4)  ;;  %v5991_v25 = vld [vmem:[#allocation11 + $0x41] ss:$4 sm:$0xff] (%p5567_p4)  ;;  %v6088_v38 = vsel (%p5567_p4), %vm6066_vm2, %v6055_v18, %v6077_v62 }
 0xf1b   :  { %v6013_v1 = vld [vmem:[#allocation11 + $0x42] ss:$4 sm:$0xff]  ;;  %v6024_v12 = vld [vmem:[#allocation11 + $0x43] ss:$4 sm:$0xff]  ;;  %v6002_v41 = vmax.f32 %v5980_v39, %v5991_v25  ;;  %v5983_v51 = vld [vmem:[#allocation11 + $0xa0] ss:$4 sm:$0xff]  ;;  %v6039_v39 = vmax.f32 %v6017_v58, %v6028_v50 }
 0xf1c   :  { %v6035_v17 = vmax.f32 %v6013_v1, %v6024_v12  ;;  %v5994_v3 = vld [vmem:[#allocation11 + $0xa1] ss:$4 sm:$0xff]  ;;  %v6016_v28 = vld [vmem:[#allocation11 + $0xa2] ss:$4 sm:$0xff]  ;;  %v6027_v33 = vld [vmem:[#allocation11 + $0xa3] ss:$4 sm:$0xff]  ;;  %v6007_v12 = vmax.f32 %v5985_v0, %v5996_v43 }
 0xf1d   :  { %v6005_v2 = vmax.f32 %v5983_v51, %v5994_v3  ;;  %6100 = vst.msk [vmem:[#allocation12] sm:$0xff] %vm4662_vm12, %v6088_v38  ;;  %v6038_v9 = vmax.f32 %v6016_v28, %v6027_v33  ;;  %v6081_v25 = vmul.f32 0.3, %v6059_v13  ;;  %v6031_v33 = vld [vmem:[#allocation11 + $0x123] ss:$4 sm:$0xff] }
 0xf1e   :  { %v6046_v6 = vmax.f32 %v6002_v41, %v6035_v17  ;;  %v6091_v41 = vsel %vm6069_vm11, %v6058_v31, %v6080_v7  ;;  %v6050_v17 = vmax.f32 %v6006_v53, %v6039_v39  ;;  %v6051_v51 = vmax.f32 %v6007_v12, %v6040_v60 }
 0xf1f   :  { %v6049_v1 = vmax.f32 %v6005_v2, %v6038_v9  ;;  %6103 = vst.msk [vmem:[#allocation12 + $0x18] sm:$0xff] %vm4662_vm12, %v6091_v41  ;;  %v6092_v15 = vsel %vm6070_vm3, %v6059_v13, %v6081_v25  ;;  %v6042_v14 = vmax.f32 %v6020_v16, %v6031_v33  ;;  %v6010_v31 = vmax.f32 %v5988_v24, %v5999_v19 }
 0xf20   :  { %v6057_v36 = vadd.f32 %v6046_v6, %v15503_v63  ;;  %6104 = vst.msk [vmem:[#allocation12 + $0x20] sm:$0xff] %vm4662_vm12, %v6092_v15  ;;  %v6061_v6 = vadd.f32 %v6050_v17, %v15503_v63  ;;  %v6043_v53 = vmax.f32 %v6021_v47, %v6032_v56  ;;  %v15978_v12 = vmov 0.0  }
 0xf21   :  { %v5986_v32 = vld [vmem:[#allocation11 + $0x100] ss:$4 sm:$0xff]  ;;  %v5997_v35 = vld [vmem:[#allocation11 + $0x101] ss:$4 sm:$0xff]  ;;  %v6060_v27 = vadd.f32 %v6049_v1, %v15503_v63  ;;  %v6019_v30 = vld [vmem:[#allocation11 + $0x102] ss:$4 sm:$0xff] }
 0xf22   :  { %vm6068_vm0 = vcmp.gt.f32.partialorder %v6057_v36, 0.0  ;;  %v6079_v48 = vmul.f32 0.3, %v6057_v36  ;;  %v6008_v5 = vmax.f32 %v5986_v32, %v5997_v35  ;;  %v6030_v18 = vld [vmem:[#allocation11 + $0x103] ss:$4 sm:$0xff]  ;;  %vm6072_vm1 = vcmp.gt.f32.partialorder %v6061_v6, 0.0 }
 0xf23   :  { %v6041_v46 = vmax.f32 %v6019_v30, %v6030_v18  ;;  %vm6071_vm13 = vcmp.gt.f32.partialorder %v6060_v27, 0.0  ;;  %v6082_v40 = vmul.f32 0.3, %v6060_v27  ;;  %v6083_v3 = vmul.f32 0.3, %v6061_v6 }
 0xf24   :  { %v6090_v21 = vsel %vm6068_vm0, %v6057_v36, %v6079_v48  ;;  %v6062_v36 = vadd.f32 %v6051_v51, %v15503_v63  ;;  %v6053_v48 = vmax.f32 %v6009_v59, %v6042_v14  ;;  %v15982_v41 = vmov 0.0  }
 0xf25   :  { %6102 = vst.msk [vmem:[#allocation12 + $0x10] sm:$0xff] %vm4662_vm12, %v6090_v21  ;;  %v6052_v28 = vmax.f32 %v6008_v5, %v6041_v46  ;;  %v6093_v62 = vsel %vm6071_vm13, %v6060_v27, %v6082_v40  ;;  %v6094_v37 = vsel %vm6072_vm1, %v6061_v6, %v6083_v3  ;;  %v6054_v21 = vmax.f32 %v6010_v31, %v6043_v53 }
 0xf26   :  { %6105 = vst.msk [vmem:[#allocation12 + $0x28] sm:$0xff] %vm4662_vm12, %v6093_v62  ;;  %vm6073_vm2 = vcmp.gt.f32.partialorder %v6062_v36, 0.0  ;;  %v6084_v38 = vmul.f32 0.3, %v6062_v36  ;;  %v6064_v9 = vadd.f32 %v6053_v48, %v15503_v63  ;;  %v15984_v17 = vmov 0.0  }
 0xf27   :  { %v6063_v2 = vadd.f32 %v6052_v28, %v15503_v63  ;;  %6106 = vst.msk [vmem:[#allocation12 + $0x30] sm:$0xff] %vm4662_vm12, %v6094_v37  ;;  %v6065_v39 = vadd.f32 %v6054_v21, %v15503_v63  ;;  %v15988_v63 = vmov 0.0   ;;  %v15992_v32 = vmov 0.0  }
 0xf28   :  { %v6095_v13 = vsel %vm6073_vm2, %v6062_v36, %v6084_v38  ;;  %vm6075_vm0 = vcmp.gt.f32.partialorder %v6064_v9, 0.0  ;;  %v6086_v0 = vmul.f32 0.3, %v6064_v9  ;;  %v15994_v35 = vmov 0.0  }
 0xf29   :  { %vm6074_vm10 = vcmp.gt.f32.partialorder %v6063_v2, 0.0  ;;  %v6085_v58 = vmul.f32 0.3, %v6063_v2  ;;  %6107 = vst.msk [vmem:[#allocation12 + $0x38] sm:$0xff] %vm4662_vm12, %v6095_v13  ;;  %vm6076_vm11 = vcmp.gt.f32.partialorder %v6065_v39, 0.0  ;;  %v15996_v15 = vmov 0.0  }
 0xf2a   :  { %v6097_v7 = vsel %vm6075_vm0, %v6064_v9, %v6086_v0  ;;  %v6087_v43 = vmul.f32 0.3, %v6065_v39 }
 0xf2b   :  { %v6096_v50 = vsel %vm6074_vm10, %v6063_v2, %v6085_v58  ;;  %6109 = vst.msk [vmem:[#allocation12 + $0x48] sm:$0xff] %vm4662_vm12, %v6097_v7 }
 0xf2c   :  { %6108 = vst.msk [vmem:[#allocation12 + $0x40] sm:$0xff] %vm4662_vm12, %v6096_v50  ;;  %v6098_v25 = vsel %vm6076_vm11, %v6065_v39, %v6087_v43 }
 0xf2d   :  { %v6099_v1 = vsel %vm5286_vm8, %v6098_v25, 0.0 }
 0xf2e   :  { %6110 = vst.msk [vmem:[#allocation12 + $0x50] sm:$0xff] %vm4662_vm12, %v6099_v1 }
 0xf2f LB: > { %s11128_s27 = sshll.u32 %s12082_s7, 5  ;;  %s6134_s30 = scalar_lea.vmem [#allocation12], %s12082_s7  ;;  %s12082_s7 = sphi %s15998_s7, %s6123_s7   ;;  %v12078_v15 = vphi %v15996_v15, %v18433_v15   ;;  %v12074_v35 = vphi %v15994_v35, %v18432_v35   ;;  %v12070_v32 = vphi %v15992_v32, %v18431_v32   ;;  %v12066_v26 = vphi %v15990_v26, %v18430_v26   ;;  %v12062_v63 = vphi %v15988_v63, %v18429_v63   ;;  %v12058_v55 = vphi %v15986_v55, %v18428_v55   ;;  %v12054_v17 = vphi %v15984_v17, %v18427_v17   ;;  %v12050_v41 = vphi %v15982_v41, %v18426_v41   ;;  %v12046_v52 = vphi %v15980_v52, %v18425_v52   ;;  %v12042_v12 = vphi %v15978_v12, %v18424_v12  }
 0xf30   : > { %s6152_s20 = scalar_lea.vmem %s18367_s9, %s11128_s27  ;;  %s6123_s7 = sadd.s32 1, %s12082_s7  }
 0xf31   : > { %v11132_v27 = vld [vmem:[%s6152_s20 + $0x18] sm:$0xff]  ;;  %v11131_v60 = vld [vmem:[%s6152_s20 + $0x10] sm:$0xff]  ;;  %v11130_v5 = vld [vmem:[%s6152_s20 + $0x8] sm:$0xff]  ;;  %p6120_p5 = scmp.ge.s32.totalorder %s6123_s7, 65  }
 0xf32   : > { %11529 = vmatpush.bf16.msra.mxu3 %v11132_v27  ;;  %11528 = vmatpush.bf16.msra.mxu2 %v11132_v27  ;;  %v11129_v46 = vld [vmem:[%s6152_s20] sm:$0xff]  ;;  %vm18434_vm8 = vcmp.lt.s32.totalorder (%p6120_p5), %v15195_v42, %v15154_v11  ;;  %vm18435_vm3 = vcmp.lt.s32.totalorder (%p6120_p5), %v15198_v44, %v15154_v11  ;;  %vm18436_vm13 = vcmp.lt.s32.totalorder (%p6120_p5), %v15201_v34, %v15154_v11  ;;  %vm18437_vm1 = vcmask (%p6120_p5), 518144   ;;  %v11162_v34 = vld [vmem:[%s18371_s13 + $0xe4] sm:$0xf0] (%p6120_p5)  ;;  %v9919_v23 = vld [vmem:[%s18371_s13 + $0x1b0] sm:$0xf0] (%p6120_p5) }
 0xf33   : > { %6204 = vmatpush.bf16.msra.mxu0 %v11132_v27  ;;  %11527 = vmatpush.bf16.msra.mxu1 %v11132_v27  ;;  %vm18438_vm2 = vmmov (%p6120_p5), %vm18436_vm13  ;;  %v9925_v45 = vld [vmem:[%s18371_s13 + $0x198] sm:$0xf] (%p6120_p5)  ;;  %s12101_s28 = smov (%p6120_p5), [#allocation13]   ;;  %s9149_s20 = sshll.u32 (%p6120_p5), %s18377_s19, 4  ;;  %s9150_s20 = int_to_ptr.hbm [resolvable:$true] %s9149_s20 }
 0xf34   :  { %vm18439_vm10 = vmmov (%p6120_p5), %vm18437_vm1  ;;  %v11188_v42 = vld [vmem:[%s18371_s13 + $0x1b4] sm:$0xf0] (%p6120_p5) }
 0xf35   : > { %v6141_v30 = vld [vmem:[%s6134_s30 + $0x30] sm:$0xff]  ;;  %v6142_v18 = vld [vmem:[%s6134_s30 + $0x38] sm:$0xff]  ;;  %v6139_v6 = vld [vmem:[%s6134_s30 + $0x20] sm:$0xff] }
 0xf36   : > { %11532 = vmatpush.bf16.msra.mxu3 %v11131_v60  ;;  %11531 = vmatpush.bf16.msra.mxu2 %v11131_v60  ;;  %v6140_v49 = vld [vmem:[%s6134_s30 + $0x28] sm:$0xff]  ;;  %v6135_v57 = vld [vmem:[%s6134_s30] sm:$0xff]  ;;  %v6137_v51 = vld [vmem:[%s6134_s30 + $0x10] sm:$0xff]  ;;  %v6148_v16 = vpack.c.bf16 %v6142_v18, %v6141_v30 }
 0xf37   : > { %6205 = vmatpush.bf16.msra.mxu0 %v11131_v60  ;;  %11530 = vmatpush.bf16.msra.mxu1 %v11131_v60  ;;  %v6136_v40 = vld [vmem:[%s6134_s30 + $0x8] sm:$0xff]  ;;  %v6138_v59 = vld [vmem:[%s6134_s30 + $0x18] sm:$0xff]  ;;  %v6147_v3 = vpack.c.bf16 %v6140_v49, %v6139_v6  ;;  %v6143_v62 = vld [vmem:[%s6134_s30 + $0x40] sm:$0xff] }
 0xf38   : > { %v6145_v28 = vpack.c.bf16 %v6136_v40, %v6135_v57  ;;  %v6146_v33 = vpack.c.bf16 %v6138_v59, %v6137_v51  ;;  %v6144_v36 = vld [vmem:[%s6134_s30 + $0x48] sm:$0x7]  ;;  %v9933_v59 = vld [vmem:[%s18371_s13 + $0x1c0] sm:$0xf] (%p6120_p5) }
 0xf39   : > { %v6149_v14 = vpack.c.bf16 %v6144_v36, %v6143_v62  ;;  %v11193_v62 = vld [vmem:[%s18371_s13 + $0x1dc] sm:$0xf0] (%p6120_p5) }
 0xf3a   : > { %11535 = vmatpush.bf16.msra.mxu3 %v11130_v5  ;;  %11534 = vmatpush.bf16.msra.mxu2 %v11130_v5 }
 0xf3b   : > { %6206 = vmatpush.bf16.msra.mxu0 %v11130_v5  ;;  %11533 = vmatpush.bf16.msra.mxu1 %v11130_v5 }
 0xf3e   : > { %11538 = vmatpush.bf16.msra.mxu3 %v11129_v46  ;;  %11537 = vmatpush.bf16.msra.mxu2 %v11129_v46 }
 0xf3f   : > { %6207 = vmatpush.bf16.msra.mxu0 %v11129_v46  ;;  %11536 = vmatpush.bf16.msra.mxu1 %v11129_v46 }
 0xf41   : > { %9705 = vmatmul.msk.bf16.vlgmr.msra.gmra.mxu3 %vm4662_vm12, %v6148_v16  ;;  %9704 = vmatmul.msk.bf16.vlgmr.msra.gmra.mxu2 %vm4662_vm12, %v6147_v3 }
 0xf42   : > { %9702 = vmatmul.msk.bf16.vlgmr.msra.gmra.mxu0 %vm4662_vm12, %v6145_v28  ;;  %9703 = vmatmul.msk.bf16.vlgmr.msra.gmra.mxu1 %vm4662_vm12, %v6146_v33 }
 0xf51   : > { %9706 = vmatmul.msk.bf16.gmra.mxu3 %vm4662_vm12, %v6149_v14 }
 0xfbf   : > { %v6209_v24 = vpop.f32.mrf.mxu0  ;;  %v6214_v19 = vpop.f32.mrf.mxu1 }
 0xfc0   : > { %v6234_v37 = vadd.f32 %v12078_v15, %v6209_v24   ;;  %v6236_v2 = vadd.f32 %v12070_v32, %v6214_v19   ;;  %v9934_v19 = vor.u32 (%p6120_p5), %v11193_v62, %v9933_v59  ;;  %v11178_v59 = vld [vmem:[%s18371_s13 + $0x164] sm:$0xf0] (%p6120_p5)  ;;  %v9837_v62 = vld [vmem:[%s18371_s13 + $0x100] sm:$0xf] (%p6120_p5) }
 0xfc2   : > { %v18431_v32 = vmov %v6236_v2  ;;  %v18433_v15 = vmov %v6234_v37  ;;  %v16059_v1 = vadd.f32 (%p6120_p5), %v6234_v37, %v15623_v54  ;;  %v16065_v27 = vadd.f32 (%p6120_p5), %v6236_v2, %v15623_v54  ;;  %v11189_v37 = vld [vmem:[%s18371_s13 + $0x1c4] sm:$0xf] (%p6120_p5)  ;;  %6738 = vmatpush.bf16.msra.mxu0 (%p6120_p5), %v9934_v19 }
 0xfc3   :  { %v9935_v2 = vld [vmem:[%s18371_s13 + $0x1e0] sm:$0xf0] (%p6120_p5) }
 0xfc4   : > { %v6224_v47 = vpop.f32.mrf.mxu3  ;;  %v6219_v38 = vpop.f32.mrf.mxu2 }
 0xfc5   : > { %v6240_v48 = vadd.f32 %v12054_v17, %v6224_v47   ;;  %v6238_v31 = vadd.f32 %v12062_v63, %v6219_v38   ;;  %v9938_v47 = vor.u32 (%p6120_p5), %v11189_v37, %v9935_v2  ;;  %v9941_v38 = vld [vmem:[%s18371_s13 + $0x1c8] sm:$0xf] (%p6120_p5)  ;;  %v11169_v37 = vld [vmem:[%s18371_s13 + $0x11c] sm:$0xf0] (%p6120_p5)  ;;  %v11165_v2 = vld [vmem:[%s18371_s13 + $0x104] sm:$0xf] (%p6120_p5) }
 0xfc7   : > { %v6211_v58 = vpop.f32.mrf.mxu0  ;;  %v6216_v56 = vpop.f32.mrf.mxu1  ;;  %v18427_v17 = vmov %v6240_v48  ;;  %v18429_v63 = vmov %v6238_v31  ;;  %v16071_v5 = vadd.f32 (%p6120_p5), %v6238_v31, %v15623_v54  ;;  %v16077_v18 = vadd.f32 (%p6120_p5), %v6240_v48, %v15623_v54  ;;  %v11194_v48 = vld [vmem:[%s18371_s13 + $0x1e4] sm:$0xf0] (%p6120_p5)  ;;  %v11190_v31 = vld [vmem:[%s18371_s13 + $0x1cc] sm:$0xf] (%p6120_p5)  ;;  %6751 = vmatpush.bf16.msra.mxu1 (%p6120_p5), %v9938_v47  ;;  %v9839_v47 = vld [vmem:[%s18371_s13 + $0x120] sm:$0xf0] (%p6120_p5) }
 0xfc8   : > { %v6235_v13 = vadd.f32 %v12074_v35, %v6211_v58   ;;  %v6237_v9 = vadd.f32 %v12066_v26, %v6216_v56   ;;  %v6291_v63 = vsel (%p6120_p5), %vm4654_vm15, %v16065_v27, 0.0  ;;  %v9942_v56 = vor.u32 (%p6120_p5), %v11194_v48, %v9941_v38 }
 0xfc9   :  { %v6293_v32 = vsel (%p6120_p5), %vm4656_vm5, %v16071_v5, 0.0  ;;  %v6302_v51 = vsel (%p6120_p5), %vm4662_vm12, %v6291_v63, 0.0  ;;  %v9911_v63 = vld [vmem:[%s18371_s13 + $0x1a8] sm:$0xf0] (%p6120_p5)  ;;  %v6258_v20 = vsel (%p6120_p5), %vm4656_vm5, %v16071_v5, -inf  ;;  %v6260_v4 = vsel (%p6120_p5), %vm4658_vm7, %v16077_v18, -inf }
 0xfca   : > { %v18430_v26 = vmov %v6237_v9  ;;  %v18432_v35 = vmov %v6235_v13  ;;  %v16062_v15 = vadd.f32 (%p6120_p5), %v6235_v13, %v15623_v54  ;;  %v16068_v60 = vadd.f32 (%p6120_p5), %v6237_v9, %v15623_v54  ;;  %v9943_v13 = vld [vmem:[%s18371_s13 + $0x1e8] sm:$0xf0] (%p6120_p5)  ;;  %v9901_v9 = vld [vmem:[%s18371_s13 + $0x180] sm:$0xf] (%p6120_p5)  ;;  %6764 = vmatpush.bf16.msra.mxu2 (%p6120_p5), %v9942_v56 }
 0xfcb   :  { %v6295_v35 = vsel (%p6120_p5), %vm4658_vm7, %v16077_v18, 0.0  ;;  %v6306_v28 = vsel (%p6120_p5), %vm4662_vm12, %v6293_v32, 0.0  ;;  %v9838_v56 = vor.u32 (%p6120_p5), %v11169_v37, %v9837_v62  ;;  %v9741_v62 = vld [vmem:[%s18371_s13 + $0x40] sm:$0xf] (%p6120_p5)  ;;  %v6272_v44 = vsel (%p6120_p5), %vm4662_vm12, %v6260_v4, -inf }
 0xfcc   : > { %v6226_v53 = vpop.f32.mrf.mxu3  ;;  %v6221_v50 = vpop.f32.mrf.mxu2  ;;  %v6290_v17 = vsel (%p6120_p5), %vm4653_vm14, %v16062_v15, 0.0  ;;  %v6292_v26 = vsel (%p6120_p5), %vm4655_vm4, %v16068_v60, 0.0  ;;  %v6310_v14 = vsel (%p6120_p5), %vm4662_vm12, %v6295_v35, 0.0  ;;  %v11177_v35 = vld [vmem:[%s18371_s13 + $0x15c] sm:$0xf0] (%p6120_p5) }
 0xfcd   : > { %v6241_v0 = vadd.f32 %v12050_v41, %v6226_v53   ;;  %v6239_v21 = vadd.f32 %v12058_v55, %v6221_v50   ;;  %v6300_v49 = vsel (%p6120_p5), %vm4662_vm12, %v6290_v17, 0.0  ;;  %v6304_v3 = vsel (%p6120_p5), %vm4662_vm12, %v6292_v26, 0.0  ;;  %v11185_v53 = vld [vmem:[%s18371_s13 + $0x19c] sm:$0xf0] (%p6120_p5)  ;;  %v11182_v17 = vld [vmem:[%s18371_s13 + $0x18c] sm:$0xf] (%p6120_p5) }
 0xfce   :  { %v9946_v50 = vor.u32 (%p6120_p5), %v11190_v31, %v9943_v13  ;;  %v9914_v32 = vor.u32 (%p6120_p5), %v11182_v17, %v9911_v63  ;;  %v11170_v31 = vld [vmem:[%s18371_s13 + $0x124] sm:$0xf0] (%p6120_p5)  ;;  %v11166_v13 = vld [vmem:[%s18371_s13 + $0x10c] sm:$0xf] (%p6120_p5)  ;;  %v9831_v4 = vld [vmem:[%s18371_s13 + $0xf8] sm:$0xf0] (%p6120_p5) }
 0xfcf   : > { %v18426_v41 = vmov %v6241_v0  ;;  %v18428_v55 = vmov %v6239_v21  ;;  %v16074_v30 = vadd.f32 (%p6120_p5), %v6239_v21, %v15623_v54  ;;  %v11181_v21 = vld [vmem:[%s18371_s13 + $0x184] sm:$0xf] (%p6120_p5)  ;;  %v9815_v63 = vld [vmem:[%s18371_s13 + $0xe8] sm:$0xf0] (%p6120_p5) }
 0xfd0   :  { %v6289_v41 = vsel (%p6120_p5), %vm4652_vm9, %v16059_v1, 0.0  ;;  %6777 = vmatpush.bf16.msra.mxu3 (%p6120_p5), %v9946_v50  ;;  %v9805_v50 = vld [vmem:[%s18371_s13 + $0xc0] sm:$0xf] (%p6120_p5) }
 0xfd1   :  { %v6299_v46 = vsel (%p6120_p5), %vm4662_vm12, %v6289_v41, 0.0  ;;  %v11186_v41 = vld [vmem:[%s18371_s13 + $0x1a4] sm:$0xf0] (%p6120_p5) }
 0xfd2   :  { %v6301_v40 = vadd.f32 (%p6120_p5), %v6300_v49, %v6299_v46 }
 0xfd4   : > { %v6229_v7 = vpop.f32.mrf.mxu3  ;;  %v6303_v36 = vadd.f32 (%p6120_p5), %v6302_v51, %v6301_v40  ;;  %v9871_v40 = vld [vmem:[%s18371_s13 + $0x160] sm:$0xf0] (%p6120_p5)  ;;  %v9877_v51 = vld [vmem:[%s18371_s13 + $0x148] sm:$0xf] (%p6120_p5)  ;;  %6778 = vmatpush.bf16.msra.mxu3 (%p6120_p5), %v9914_v32  ;;  %v11153_v32 = vld [vmem:[%s18371_s13 + $0x9c] sm:$0xf0] (%p6120_p5) }
 0xfd5   : > { %v6242_v39 = vadd.f32 %v12046_v52, %v6229_v7   ;;  %v9903_v7 = vld [vmem:[%s18371_s13 + $0x1a0] sm:$0xf0] (%p6120_p5)  ;;  %v9878_v19 = vor.u32 (%p6120_p5), %v11178_v59, %v9877_v51  ;;  %v11154_v59 = vld [vmem:[%s18371_s13 + $0xa4] sm:$0xf0] (%p6120_p5) }
 0xfd6   :  { %v6305_v58 = vadd.f32 (%p6120_p5), %v6304_v3, %v6303_v36 }
 0xfd7   : > { %v18425_v52 = vmov %v6242_v39 }
 0xfd8   :  { %v16083_v52 = vadd.f32 (%p6120_p5), %v6242_v39, %v15623_v54  ;;  %v9909_v39 = vld [vmem:[%s18371_s13 + $0x188] sm:$0xf] (%p6120_p5) }
 0xfd9   :  { %v9910_v26 = vor.u32 (%p6120_p5), %v11186_v41, %v9909_v39  ;;  %v9807_v39 = vld [vmem:[%s18371_s13 + $0xe0] sm:$0xf0] (%p6120_p5) }
 0xfda   :  { %v6297_v57 = vsel (%p6120_p5), %vm18435_vm3, %v16083_v52, 0.0 }
 0xfdb   :  { %6122 = sbr.rel (!%p6120_p5) target bundleno = 3887 (0xf2f), region = 264  ;;  %6765 = vmatpush.bf16.msra.mxu2 (%p6120_p5), %v9910_v26  ;;  %v6314_v38 = vsel (%p6120_p5), %vm4662_vm12, %v6297_v57, 0.0  ;;  %v9847_v57 = vld [vmem:[%s18371_s13 + $0x128] sm:$0xf0] (%p6120_p5)  ;;  %v9773_v26 = vld [vmem:[%s18371_s13 + $0x80] sm:$0xf] (%p6120_p5) }
 0xfdc   : > { %v6231_v43 = vpop.f32.mrf.mxu3  ;;  %v9774_v37 = vor.u32 (%p6120_p5), %v11153_v32, %v9773_v26  ;;  %v11196_v26 = vld [vmem:[%s18371_s13 + $0x1f4] sm:$0xf0] (%p6120_p5) }
 0xfdd   : > { %v6243_v25 = vadd.f32 %v12042_v12, %v6231_v43   ;;  %v6307_v43 = vadd.f32 (%p6120_p5), %v6306_v28, %v6305_v58  ;;  %v11174_v28 = vld [vmem:[%s18371_s13 + $0x14c] sm:$0xf] (%p6120_p5) }
 0xfdf   : > { %v18424_v12 = vmov %v6243_v25  ;;  %v16094_v55 = vadd.f32 (%p6120_p5), %v6243_v25, %v15623_v54  ;;  %v9906_v25 = vor.u32 (%p6120_p5), %v11181_v21, %v9903_v7  ;;  %6766 = vmatpush.bf16.msra.mxu2 (%p6120_p5), %v9878_v19 }
 0xfe0   :  { %v16080_v12 = vadd.f32 %v6241_v0, %v15623_v54  ;;  %v6294_v54 = vsel %vm4657_vm6, %v16074_v30, 0.0  ;;  %v9902_v0 = vor.u32 %v11185_v53, %v9901_v9  ;;  %v9842_v53 = vor.u32 %v11165_v2, %v9839_v47  ;;  %v11141_v2 = vld [vmem:[%s18371_s13 + $0x44] sm:$0xf] }
 0xfe1   :  { %v16134_v16 = vsel %vm18436_vm13, %v16094_v55, 0.0  ;;  %v6308_v33 = vsel %vm4662_vm12, %v6294_v54, 0.0  ;;  %v9869_v54 = vld [vmem:[%s18371_s13 + $0x140] sm:$0xf]  ;;  %6752 = vmatpush.bf16.msra.mxu1 %v9906_v25  ;;  %v9813_v25 = vld [vmem:[%s18371_s13 + $0xc8] sm:$0xf] }
 0xfe2   :  { %v6296_v6 = vsel %vm18434_vm8, %v16080_v12, 0.0  ;;  %v6309_v46 = vadd.f32 %v6308_v33, %v6307_v43  ;;  %6739 = vmatpush.bf16.msra.mxu0 %v9902_v0  ;;  %v9870_v49 = vor.u32 %v11177_v35, %v9869_v54  ;;  %v9879_v33 = vld [vmem:[%s18371_s13 + $0x168] sm:$0xf0]  ;;  %v6316_v9 = vsel %vm18437_vm1, %v16134_v16, 0.0  ;;  %v11157_v16 = vld [vmem:[%s18371_s13 + $0xc4] sm:$0xf] }
 0xfe3   :  { %v6312_v24 = vsel %vm4662_vm12, %v6296_v6, 0.0  ;;  %v11173_v6 = vld [vmem:[%s18371_s13 + $0x144] sm:$0xf]  ;;  %v9882_v48 = vor.u32 %v11174_v28, %v9879_v33  ;;  %v6263_v0 = vsel %vm18438_vm2, %v16094_v55, -inf  ;;  %v9850_v43 = vor.u32 %v11166_v13, %v9847_v57  ;;  %v11158_v55 = vld [vmem:[%s18371_s13 + $0xcc] sm:$0xf] }
 0xfe4   :  { %v9874_v3 = vor.u32 %v11173_v6, %v9871_v40  ;;  %v6311_v36 = vadd.f32 %v6310_v14, %v6309_v46  ;;  %v9845_v14 = vld [vmem:[%s18371_s13 + $0x108] sm:$0xf]  ;;  %v9810_v54 = vor.u32 %v11157_v16, %v9807_v39  ;;  %v11149_v35 = vld [vmem:[%s18371_s13 + $0x84] sm:$0xf]  ;;  %v9814_v51 = vor.u32 %v11162_v34, %v9813_v25  ;;  %v9783_v33 = vld [vmem:[%s18371_s13 + $0xa8] sm:$0xf0] }
 0xfe5   :  { %v9846_v7 = vor.u32 %v11170_v31, %v9845_v14  ;;  %6779 = vmatpush.bf16.msra.mxu3 %v9882_v48  ;;  %v9775_v6 = vld [vmem:[%s18371_s13 + $0xa0] sm:$0xf0]  ;;  %v9781_v46 = vld [vmem:[%s18371_s13 + $0x88] sm:$0xf]  ;;  %v9818_v28 = vor.u32 %v11158_v55, %v9815_v63  ;;  %v11142_v31 = vld [vmem:[%s18371_s13 + $0x4c] sm:$0xf] }
 0xfe6   :  { %v6313_v58 = vadd.f32 %v6312_v24, %v6311_v36  ;;  %6740 = vmatpush.bf16.msra.mxu0 %v9870_v49  ;;  %6753 = vmatpush.bf16.msra.mxu1 %v9874_v3  ;;  %v11161_v24 = vld [vmem:[%s18371_s13 + $0xdc] sm:$0xf0]  ;;  %v16281_v49 = vsel %vm18439_vm10, %v6263_v0, -inf  ;;  %v11150_v3 = vld [vmem:[%s18371_s13 + $0x8c] sm:$0xf]  ;;  %v9778_v14 = vor.u32 %v11149_v35, %v9775_v6  ;;  %v6254_v0 = vsel %vm4652_vm9, %v16059_v1, -inf  ;;  %vm18440_vm9 = vmmov %vm18434_vm8 }
 0xfe7   :  { %v9806_v17 = vor.u32 %v11161_v24, %v9805_v50  ;;  %6767 = vmatpush.bf16.msra.mxu2 %v9846_v7  ;;  %v11145_v36 = vld [vmem:[%s18371_s13 + $0x5c] sm:$0xf0]  ;;  %v9743_v47 = vld [vmem:[%s18371_s13 + $0x60] sm:$0xf0]  ;;  %v11146_v48 = vld [vmem:[%s18371_s13 + $0x64] sm:$0xf0] }
 0xfe8   :  { %v6315_v21 = vadd.f32 %v6314_v38, %v6313_v58  ;;  %v9749_v38 = vld [vmem:[%s18371_s13 + $0x48] sm:$0xf]  ;;  %v9751_v58 = vld [vmem:[%s18371_s13 + $0x68] sm:$0xf0]  ;;  %v16324_v13 = vld [vmem:[%s18371_s13 + $0x1c] sm:$0xf0]  ;;  %v9742_v61 = vor.u32 %v11145_v36, %v9741_v62  ;;  %v9746_v55 = vor.u32 %v11141_v2, %v9743_v47 }
 0xfe9   :  { %6780 = vmatpush.bf16.msra.mxu3 %v9850_v43  ;;  %v16329_v57 = vld [vmem:[%s18371_s13 + $0x4] sm:$0xf]  ;;  %v16339_v24 = vld [vmem:[%s18371_s13 + $0x8] sm:$0xf]  ;;  %v16353_v16 = vld [vmem:[%s18371_s13 + $0xc] sm:$0xf] }
 0xfea   :  { %v6317_v41 = vadd.f32 %v6316_v9, %v6315_v21  ;;  %6741 = vmatpush.bf16.msra.mxu0 %v9838_v56  ;;  %6754 = vmatpush.bf16.msra.mxu1 %v9842_v53  ;;  %v16319_v56 = vld [vmem:[%s18371_s13] sm:$0xf]  ;;  %v9782_v53 = vor.u32 %v11154_v59, %v9781_v46  ;;  %v16334_v50 = vld [vmem:[%s18371_s13 + $0x20] sm:$0xf0]  ;;  %v9786_v21 = vor.u32 %v11150_v3, %v9783_v33  ;;  %v16348_v7 = vld [vmem:[%s18371_s13 + $0x24] sm:$0xf0] }
 0xfeb   :  { %6768 = vmatpush.bf16.msra.mxu2 %v9814_v51  ;;  %v16358_v39 = vld [vmem:[%s18371_s13 + $0x28] sm:$0xf0]  ;;  %v9949_v1 = vld [vmem:[%s18371_s13 + $0x1d0] sm:$0xf]  ;;  %v11191_v34 = vld [vmem:[%s18371_s13 + $0x1d4] sm:$0xf]  ;;  %v9710_v35 = vor.u32 %v16324_v13, %v16319_v56  ;;  %v9714_v6 = vor.u32 %v16329_v57, %v16334_v50  ;;  %v9718_v51 = vor.u32 %v16348_v7, %v16339_v24  ;;  %v9926_v50 = vor.u32 %v11188_v42, %v9925_v45 }
 0xfec   :  { %v6318_v40 = vrot.slane %v6317_v41, 4  ;;  %v11195_v25 = vld [vmem:[%s18371_s13 + $0x1ec] sm:$0xf0]  ;;  %v9957_v63 = vld [vmem:[%s18371_s13 + $0x1d8] sm:$0xf]  ;;  %v9722_v59 = vor.u32 %v16353_v16, %v16358_v39  ;;  %v6255_v62 = vsel %vm4653_vm14, %v16062_v15, -inf  ;;  %vm18441_vm14 = vmmov %vm18435_vm3 }
 0xfed   :  { %6781 = vmatpush.bf16.msra.mxu3 %v9818_v28  ;;  %v11192_v46 = vld [vmem:[%s18371_s13 + $0x1dc] sm:$0xf]  ;;  %v9950_v3 = vor.u32 %v11195_v25, %v9949_v1  ;;  %v9917_v28 = vld [vmem:[%s18371_s13 + $0x190] sm:$0xf]  ;;  %v6256_v2 = vsel %vm4654_vm15, %v16065_v27, -inf  ;;  %v6259_v15 = vsel %vm4657_vm6, %v16074_v30, -inf }
 0xfee   :  { %v6319_v19 = vadd.f32 %v6318_v40, %v6317_v41  ;;  %6742 = vmatpush.bf16.msra.mxu0 %v9806_v17  ;;  %6755 = vmatpush.bf16.msra.mxu1 %v9810_v54  ;;  %v9750_v41 = vor.u32 %v11146_v48, %v9749_v38  ;;  %v9951_v17 = vld [vmem:[%s18371_s13 + $0x1f0] sm:$0xf0]  ;;  %v9754_v54 = vor.u32 %v11142_v31, %v9751_v58  ;;  %v9959_v40 = vld [vmem:[%s18371_s13 + $0x1f8] sm:$0xf0]  ;;  %v11187_v33 = vld [vmem:[%s18371_s13 + $0x1ac] sm:$0xf0] }
 0xfef   :  { %6769 = vmatpush.bf16.msra.mxu2 %v9782_v53  ;;  %v9962_v47 = vor.u32 %v11192_v46, %v9959_v40  ;;  %v6257_v38 = vsel %vm4655_vm4, %v16068_v60, -inf  ;;  %v9918_v27 = vor.u32 %v11187_v33, %v9917_v28  ;;  %v11183_v48 = vld [vmem:[%s18371_s13 + $0x194] sm:$0xf]  ;;  %v6262_v60 = vsel %vm18441_vm14, %v16083_v52, -inf  ;;  %v11184_v52 = vld [vmem:[%s18371_s13 + $0x19c] sm:$0xf] }
 0xff0   :  { %v6320_v9 = vrot.slane %v6319_v19, 2  ;;  %v6264_v5 = vsel %vm4662_vm12, %v6254_v0, -inf  ;;  %v6265_v10 = vsel %vm4662_vm12, %v6255_v62, -inf  ;;  %v6266_v30 = vsel %vm4662_vm12, %v6256_v2, -inf  ;;  %v9887_v25 = vld [vmem:[%s18371_s13 + $0x170] sm:$0xf0] }
 0xff1   :  { %6782 = vmatpush.bf16.msra.mxu3 %v9786_v21  ;;  %v6267_v18 = vsel %vm4662_vm12, %v6257_v38, -inf  ;;  %v6270_v11 = vsel %vm4662_vm12, %v6259_v15, -inf  ;;  %v6273_v56 = vmax.f32 %v6266_v30, %v6272_v44  ;;  %v9922_v57 = vor.u32 %v11183_v48, %v9919_v23  ;;  %v9855_v40 = vld [vmem:[%s18371_s13 + $0x130] sm:$0xf0]  ;;  %v11168_v28 = vld [vmem:[%s18371_s13 + $0x11c] sm:$0xf] }
 0xff2   :  { %v6321_v43 = vadd.f32 %v6320_v9, %v6319_v19  ;;  %6743 = vmatpush.bf16.msra.mxu0 %v9774_v37  ;;  %6756 = vmatpush.bf16.msra.mxu1 %v9778_v14  ;;  %v9954_v19 = vor.u32 %v11191_v34, %v9951_v17  ;;  %v9958_v37 = vor.u32 %v11196_v26, %v9957_v63  ;;  %v9927_v14 = vld [vmem:[%s18371_s13 + $0x1b8] sm:$0xf0]  ;;  %v6276_v53 = vsel %vm4662_vm12, %v6262_v60, -inf  ;;  %v9893_v34 = vld [vmem:[%s18371_s13 + $0x158] sm:$0xf] }
 0xff3   :  { %6770 = vmatpush.bf16.msra.mxu2 %v9750_v41  ;;  %v6271_v58 = vmax.f32 %v6265_v10, %v6270_v11  ;;  %v9930_v21 = vor.u32 %v11184_v52, %v9927_v14  ;;  %v11176_v63 = vld [vmem:[%s18371_s13 + $0x15c] sm:$0xf]  ;;  %v11163_v2 = vld [vmem:[%s18371_s13 + $0xec] sm:$0xf0]  ;;  %v9829_v15 = vld [vmem:[%s18371_s13 + $0xd8] sm:$0xf] }
 0xff4   :  { %v6322_v32 = vrot.slane %v6321_v43, 1  ;;  %v9895_v26 = vld [vmem:[%s18371_s13 + $0x178] sm:$0xf0]  ;;  %v11155_v60 = vld [vmem:[%s18371_s13 + $0xac] sm:$0xf0]  ;;  %vm6333_vm15 = vcmask 1040384  }
 0xff5   :  { %6783 = vmatpush.bf16.msra.mxu3 %v9754_v54  ;;  %v6279_v0 = vmax.f32 %v6271_v58, %v16281_v49  ;;  %v11175_v49 = vld [vmem:[%s18371_s13 + $0x154] sm:$0xf]  ;;  %v9853_v54 = vld [vmem:[%s18371_s13 + $0x110] sm:$0xf]  ;;  %v9863_v33 = vld [vmem:[%s18371_s13 + $0x138] sm:$0xf0] }
 0xff6   :  { %v6323_v36 = vadd.f32 %v6322_v32, %v6321_v43  ;;  %6744 = vmatpush.bf16.msra.mxu0 %v9742_v61  ;;  %6757 = vmatpush.bf16.msra.mxu1 %v9746_v55  ;;  %v9885_v43 = vld [vmem:[%s18371_s13 + $0x150] sm:$0xf]  ;;  %v11180_v55 = vld [vmem:[%s18371_s13 + $0x174] sm:$0xf0]  ;;  %v9890_v41 = vor.u32 %v11175_v49, %v9887_v25  ;;  %v9898_v32 = vor.u32 %v11176_v63, %v9895_v26  ;;  %v11160_v23 = vld [vmem:[%s18371_s13 + $0xdc] sm:$0xf] }
 0xff7   :  { %6771 = vmatpush.bf16.msra.mxu2 %v9718_v51  ;;  %v11179_v61 = vld [vmem:[%s18371_s13 + $0x16c] sm:$0xf0]  ;;  %v9894_v17 = vor.u32 %v11180_v55, %v9893_v34  ;;  %v9861_v51 = vld [vmem:[%s18371_s13 + $0x118] sm:$0xf]  ;;  %v9834_v45 = vor.u32 %v11160_v23, %v9831_v4  ;;  %v9791_v10 = vld [vmem:[%s18371_s13 + $0xb0] sm:$0xf0] }
 0xff8   :  { %v6324_v29 = vmul.f32 %v6323_v36, %v15175_v22  ;;  %v6261_v22 = vsel %vm18440_vm9, %v16080_v12, -inf  ;;  %v6268_v12 = vsel %vm4662_vm12, %v6258_v20, -inf  ;;  %v9886_v1 = vor.u32 %v11179_v61, %v9885_v43  ;;  %v9823_v20 = vld [vmem:[%s18371_s13 + $0xf0] sm:$0xf0]  ;;  %v11152_v11 = vld [vmem:[%s18371_s13 + $0x9c] sm:$0xf] }
 0xff9   :  { %v6269_v31 = vmax.f32 %v6264_v5, %v6268_v12  ;;  %v6274_v13 = vsel %vm4662_vm12, %v6261_v22, -inf  ;;  %6784 = vmatpush.bf16.msra.mxu3 %v9722_v59  ;;  %v9866_v36 = vor.u32 %v11168_v28, %v9863_v33  ;;  %v9789_v22 = vld [vmem:[%s18371_s13 + $0x90] sm:$0xf]  ;;  %v11151_v5 = vld [vmem:[%s18371_s13 + $0x94] sm:$0xf]  ;;  %vm9140_vm4 = vcmask 58368  }
 0xffa   :  { %6326 = vrot.lane.b32.xlu0 %v6324_v29, %s12100_s0  ;;  %6745 = vmatpush.bf16.msra.mxu0 %v9710_v35  ;;  %v6275_v9 = vmax.f32 %v6267_v18, %v6274_v13  ;;  %v11171_v35 = vld [vmem:[%s18371_s13 + $0x12c] sm:$0xf0]  ;;  %v11164_v29 = vld [vmem:[%s18371_s13 + $0xf4] sm:$0xf0]  ;;  %v9790_v30 = vor.u32 %v11155_v60, %v9789_v22  ;;  %v9794_v42 = vor.u32 %v11151_v5, %v9791_v10  ;;  %v9799_v52 = vld [vmem:[%s18371_s13 + $0xb8] sm:$0xf0] }
 0xffb   :  { %6758 = vmatpush.bf16.msra.mxu1 %v9714_v6  ;;  %6816 = vmatpush.bf16.msrb.mxu2 %v9958_v37  ;;  %v6277_v24 = vmax.f32 %v6269_v31, %v6276_v53  ;;  %v11167_v6 = vld [vmem:[%s18371_s13 + $0x114] sm:$0xf]  ;;  %v9854_v46 = vor.u32 %v11171_v35, %v9853_v54  ;;  %v9821_v37 = vld [vmem:[%s18371_s13 + $0xd0] sm:$0xf]  ;;  %v9830_v48 = vor.u32 %v11164_v29, %v9829_v15  ;;  %v9797_v18 = vld [vmem:[%s18371_s13 + $0x98] sm:$0xf] }
 0xffc   :  { %v6281_v7 = vmax.f32 %v6273_v56, %v6275_v9  ;;  %v9858_v59 = vor.u32 %v11167_v6, %v9855_v40  ;;  %v9822_v38 = vor.u32 %v11163_v2, %v9821_v37  ;;  %v11156_v12 = vld [vmem:[%s18371_s13 + $0xb4] sm:$0xf0]  ;;  %v9757_v14 = vld [vmem:[%s18371_s13 + $0x50] sm:$0xf]  ;;  %v9802_v58 = vor.u32 %v11152_v11, %v9799_v52  ;;  %v11143_v56 = vld [vmem:[%s18371_s13 + $0x54] sm:$0xf] }
 0xffd   :  { %6829 = vmatpush.bf16.msrb.mxu3 %v9962_v47  ;;  %v6280_v16 = vmax.f32 %v6277_v24, %v6279_v0  ;;  %v11159_v47 = vld [vmem:[%s18371_s13 + $0xd4] sm:$0xf]  ;;  %v9798_v44 = vor.u32 %v11156_v12, %v9797_v18  ;;  %v11147_v31 = vld [vmem:[%s18371_s13 + $0x6c] sm:$0xf0]  ;;  %v11144_v24 = vld [vmem:[%s18371_s13 + $0x5c] sm:$0xf] }
 0xffe   :  { %6790 = vmatpush.bf16.msrb.mxu0 %v9950_v3  ;;  %v11172_v3 = vld [vmem:[%s18371_s13 + $0x134] sm:$0xf0]  ;;  %v9759_v13 = vld [vmem:[%s18371_s13 + $0x70] sm:$0xf0]  ;;  %v9758_v53 = vor.u32 %v11147_v31, %v9757_v14  ;;  %v9767_v0 = vld [vmem:[%s18371_s13 + $0x78] sm:$0xf0] }
 0xfff   :  { %6803 = vmatpush.bf16.msrb.mxu1 %v9954_v19  ;;  %6817 = vmatpush.bf16.msrb.mxu2 %v9926_v50  ;;  %v16460_v39 = vmax.f32 %v6280_v16, %v6281_v7  ;;  %v9862_v62 = vor.u32 %v11172_v3, %v9861_v51  ;;  %v11148_v50 = vld [vmem:[%s18371_s13 + $0x74] sm:$0xf0]  ;;  %v9725_v16 = vld [vmem:[%s18371_s13 + $0x10] sm:$0xf]  ;;  %v11135_v43 = vld [vmem:[%s18371_s13 + $0x14] sm:$0xf]  ;;  %v9770_v61 = vor.u32 %v11144_v24, %v9767_v0 }
0x1000   :  { %v9727_v49 = vld [vmem:[%s18371_s13 + $0x30] sm:$0xf0]  ;;  %v11140_v25 = vld [vmem:[%s18371_s13 + $0x34] sm:$0xf0]  ;;  %v11136_v34 = vld [vmem:[%s18371_s13 + $0x1c] sm:$0xf] }
0x1001   :  { %6830 = vmatpush.bf16.msrb.mxu3 %v9930_v21  ;;  %v6283_v19 = vrot.slane %v16460_v39, 4  ;;  %v9762_v21 = vor.u32 %v11143_v56, %v9759_v13  ;;  %v9735_v55 = vld [vmem:[%s18371_s13 + $0x38] sm:$0xf0]  ;;  %v9730_v63 = vor.u32 %v11135_v43, %v9727_v49  ;;  %v10077_v51 = vld [vmem:[%s18373_s15 + $0xe0] sm:$0xf]  ;;  %s9147_s0 = sshll.u32 %s12101_s28, 4  ;;  %s9148_s0 = int_to_ptr.vmem [resolvable:$true] %s9147_s0 }
0x1002   :  { %6791 = vmatpush.bf16.msrb.mxu0 %v9918_v27  ;;  %v9826_v27 = vor.u32 %v11159_v47, %v9823_v20  ;;  %v10205_v3 = vld [vmem:[%s18373_s15 + $0x1e0] sm:$0xf]  ;;  %v11259_v33 = vld [vmem:[%s18373_s15 + $0x1ec] sm:$0xf0] }
0x1003   :  { %6804 = vmatpush.bf16.msrb.mxu1 %v9922_v57  ;;  %6818 = vmatpush.bf16.msrb.mxu2 %v9894_v17  ;;  %v9765_v57 = vld [vmem:[%s18371_s13 + $0x58] sm:$0xf]  ;;  %v6284_v9 = vmax.f32 %v16460_v39, %v6283_v19  ;;  %v11139_v39 = vld [vmem:[%s18371_s13 + $0x2c] sm:$0xf0]  ;;  %v10461_v19 = vld [vmem:[%s18373_s15 + $0x3e0] sm:$0xf]  ;;  %v10206_v20 = vor.u32 %v11259_v33, %v10205_v3 }
0x1004   :  { %v9766_v7 = vor.u32 %v11148_v50, %v9765_v57  ;;  %v9726_v17 = vor.u32 %v11139_v39, %v9725_v16  ;;  %v11323_v37 = vld [vmem:[%s18373_s15 + $0x3ec] sm:$0xf0]  ;;  %v10061_v15 = vld [vmem:[%s18373_s15 + $0xc0] sm:$0xf] }
0x1005   :  { %6831 = vmatpush.bf16.msrb.mxu3 %v9898_v32  ;;  %v9738_v32 = vor.u32 %v11136_v34, %v9735_v55  ;;  %v11223_v29 = vld [vmem:[%s18373_s15 + $0xcc] sm:$0xf0]  ;;  %v10462_v23 = vor.u32 %v11323_v37, %v10461_v19  ;;  %v10317_v4 = vld [vmem:[%s18373_s15 + $0x2c0] sm:$0xf] }
0x1006   :  { %6792 = vmatpush.bf16.msrb.mxu0 %v9886_v1  ;;  %v9733_v1 = vld [vmem:[%s18371_s13 + $0x18] sm:$0xf]  ;;  %v11287_v22 = vld [vmem:[%s18373_s15 + $0x2cc] sm:$0xf0]  ;;  %v10062_v5 = vor.u32 %v11223_v29, %v10061_v15  ;;  %v10173_v18 = vld [vmem:[%s18373_s15 + $0x1a0] sm:$0xf] }
0x1007   :  { %6805 = vmatpush.bf16.msrb.mxu1 %v9890_v41  ;;  %6819 = vmatpush.bf16.msrb.mxu2 %v9862_v62  ;;  %v6285_v41 = vrot.slane %v6284_v9, 2  ;;  %v9734_v26 = vor.u32 %v11140_v25, %v9733_v1  ;;  %v10333_v62 = vld [vmem:[%s18373_s15 + $0x2e0] sm:$0xf]  ;;  %v11319_v60 = vld [vmem:[%s18373_s15 + $0x3cc] sm:$0xf0]  ;;  %v10318_v11 = vor.u32 %v11287_v22, %v10317_v4 }
0x1008   :  { %v11251_v12 = vld [vmem:[%s18373_s15 + $0x1ac] sm:$0xf0]  ;;  %v10301_v52 = vld [vmem:[%s18373_s15 + $0x2a0] sm:$0xf] }
0x1009   :  { %6832 = vmatpush.bf16.msrb.mxu3 %v9866_v36  ;;  %v6286_v54 = vmax.f32 %v6284_v9, %v6285_v41  ;;  %v11291_v36 = vld [vmem:[%s18373_s15 + $0x2ec] sm:$0xf0]  ;;  %v10429_v31 = vld [vmem:[%s18373_s15 + $0x3a0] sm:$0xf]  ;;  %v10174_v13 = vor.u32 %v11251_v12, %v10173_v18 }
0x100a   :  { %6793 = vmatpush.bf16.msrb.mxu0 %v9854_v46  ;;  %v11283_v14 = vld [vmem:[%s18373_s15 + $0x2ac] sm:$0xf0]  ;;  %v10029_v57 = vld [vmem:[%s18373_s15 + $0x80] sm:$0xf] }
0x100b   :  { %6806 = vmatpush.bf16.msrb.mxu1 %v9858_v59  ;;  %6820 = vmatpush.bf16.msrb.mxu2 %v9830_v48  ;;  %v6287_v35 = vrot.slane %v6286_v54, 1  ;;  %v11227_v59 = vld [vmem:[%s18373_s15 + $0xec] sm:$0xf0]  ;;  %v10334_v48 = vor.u32 %v11291_v36, %v10333_v62  ;;  %v10302_v24 = vor.u32 %v11283_v14, %v10301_v52  ;;  %v10413_v16 = vld [vmem:[%s18373_s15 + $0x380] sm:$0xf] }
0x100c   :  { %v11215_v9 = vld [vmem:[%s18373_s15 + $0x8c] sm:$0xf0]  ;;  %v10013_v49 = vld [vmem:[%s18373_s15 + $0x60] sm:$0xf] }
0x100d   :  { %6833 = vmatpush.bf16.msrb.mxu3 %v9834_v45  ;;  %v6288_v6 = vmax.f32 %v6286_v54, %v6287_v35  ;;  %v10445_v45 = vld [vmem:[%s18373_s15 + $0x3c0] sm:$0xf]  ;;  %v11247_v50 = vld [vmem:[%s18373_s15 + $0x18c] sm:$0xf0]  ;;  %v10030_v43 = vor.u32 %v11215_v9, %v10029_v57 }
0x100e   :  { %6794 = vmatpush.bf16.msrb.mxu0 %v9822_v38  ;;  %v10078_v38 = vor.u32 %v11227_v59, %v10077_v51  ;;  %v11311_v39 = vld [vmem:[%s18373_s15 + $0x38c] sm:$0xf0]  ;;  %v10141_v25 = vld [vmem:[%s18373_s15 + $0x160] sm:$0xf] }
0x100f   :  { %6807 = vmatpush.bf16.msrb.mxu1 %v9826_v27  ;;  %6821 = vmatpush.bf16.msrb.mxu2 %v9798_v44  ;;  %v10189_v27 = vld [vmem:[%s18373_s15 + $0x1c0] sm:$0xf]  ;;  %v10446_v44 = vor.u32 %v11319_v60, %v10445_v45  ;;  %v11211_v1 = vld [vmem:[%s18373_s15 + $0x6c] sm:$0xf0]  ;;  %v10414_v41 = vor.u32 %v11311_v39, %v10413_v16 }
0x1010   :  { %v11243_v34 = vld [vmem:[%s18373_s15 + $0x16c] sm:$0xf0]  ;;  %v10014_v54 = vor.u32 %v11211_v1, %v10013_v49  ;;  %v10381_v62 = vld [vmem:[%s18373_s15 + $0x340] sm:$0xf] }
0x1011   :  { %6834 = vmatpush.bf16.msrb.mxu3 %v9802_v58  ;;  %v11315_v58 = vld [vmem:[%s18373_s15 + $0x3ac] sm:$0xf0]  ;;  %v10142_v35 = vor.u32 %v11243_v34, %v10141_v25  ;;  %v9965_v4 = vld [vmem:[%s18373_s15] sm:$0xf] }
0x1012   :  { %6795 = vmatpush.bf16.msrb.mxu0 %v9790_v30  ;;  %v10045_v30 = vld [vmem:[%s18373_s15 + $0xa0] sm:$0xf]  ;;  %v10430_v0 = vor.u32 %v11315_v58, %v10429_v31  ;;  %v11239_v51 = vld [vmem:[%s18373_s15 + $0x14c] sm:$0xf0] }
0x1013   :  { %6808 = vmatpush.bf16.msrb.mxu1 %v9794_v42  ;;  %6822 = vmatpush.bf16.msrb.mxu2 %v9766_v7  ;;  %v11219_v42 = vld [vmem:[%s18373_s15 + $0xac] sm:$0xf0]  ;;  %v10717_v18 = vld [vmem:[%s18373_s15 + $0x5e0] sm:$0xf] }
0x1014   :  { %v10046_v56 = vor.u32 %v11219_v42, %v10045_v30  ;;  %v11279_v7 = vld [vmem:[%s18373_s15 + $0x28c] sm:$0xf0]  ;;  %v10589_v30 = vld [vmem:[%s18373_s15 + $0x4e0] sm:$0xf] }
0x1015   :  { %6835 = vmatpush.bf16.msrb.mxu3 %v9770_v61  ;;  %v11271_v33 = vld [vmem:[%s18373_s15 + $0x24c] sm:$0xf0]  ;;  %v10221_v52 = vld [vmem:[%s18373_s15 + $0x200] sm:$0xf] }
0x1016   :  { %6796 = vmatpush.bf16.msrb.mxu0 %v9758_v53  ;;  %v10157_v53 = vld [vmem:[%s18373_s15 + $0x180] sm:$0xf]  ;;  %v11303_v36 = vld [vmem:[%s18373_s15 + $0x34c] sm:$0xf0] }
0x1017   :  { %6809 = vmatpush.bf16.msrb.mxu1 %v9762_v21  ;;  %6823 = vmatpush.bf16.msrb.mxu2 %v9734_v26  ;;  %v10285_v21 = vld [vmem:[%s18373_s15 + $0x280] sm:$0xf]  ;;  %v10158_v61 = vor.u32 %v11247_v50, %v10157_v53  ;;  %v10382_v29 = vor.u32 %v11303_v36, %v10381_v62  ;;  %v11199_v60 = vld [vmem:[%s18373_s15 + $0xc] sm:$0xf0] }
0x1018   :  { %v10286_v55 = vor.u32 %v11279_v7, %v10285_v21  ;;  %v10397_v26 = vld [vmem:[%s18373_s15 + $0x360] sm:$0xf]  ;;  %v11355_v42 = vld [vmem:[%s18373_s15 + $0x4ec] sm:$0xf0] }
0x1019   :  { %6836 = vmatpush.bf16.msrb.mxu3 %v9738_v32  ;;  %v11307_v32 = vld [vmem:[%s18373_s15 + $0x36c] sm:$0xf0]  ;;  %v10349_v31 = vld [vmem:[%s18373_s15 + $0x300] sm:$0xf] }
0x101a   :  { %6797 = vmatpush.bf16.msrb.mxu0 %v9726_v17  ;;  %v10269_v17 = vld [vmem:[%s18373_s15 + $0x260] sm:$0xf]  ;;  %v10398_v3 = vor.u32 %v11307_v32, %v10397_v26  ;;  %v11263_v14 = vld [vmem:[%s18373_s15 + $0x20c] sm:$0xf0] }
0x101b   :  { %6810 = vmatpush.bf16.msrb.mxu1 %v9730_v63  ;;  %v11275_v63 = vld [vmem:[%s18373_s15 + $0x26c] sm:$0xf0]  ;;  %v10973_v53 = vld [vmem:[%s18373_s15 + $0x7e0] sm:$0xf] }
0x101c   :  { %v10270_v59 = vor.u32 %v11275_v63, %v10269_v17  ;;  %v11295_v58 = vld [vmem:[%s18373_s15 + $0x30c] sm:$0xf0]  ;;  %v10573_v21 = vld [vmem:[%s18373_s15 + $0x4c0] sm:$0xf] }
0x101d   :  { %v11419_v9 = vld [vmem:[%s18373_s15 + $0x6ec] sm:$0xf0]  ;;  %v10701_v16 = vld [vmem:[%s18373_s15 + $0x5c0] sm:$0xf] }
0x101e   :  { %v11451_v50 = vld [vmem:[%s18373_s15 + $0x7ec] sm:$0xf0]  ;;  %v10829_v25 = vld [vmem:[%s18373_s15 + $0x6c0] sm:$0xf] }
0x101f   :  { %v11351_v7 = vld [vmem:[%s18373_s15 + $0x4cc] sm:$0xf0]  ;;  %v10974_v1 = vor.u32 %v11451_v50, %v10973_v53  ;;  %v10557_v26 = vld [vmem:[%s18373_s15 + $0x4a0] sm:$0xf] }
0x1020   :  { %v11383_v39 = vld [vmem:[%s18373_s15 + $0x5cc] sm:$0xf0]  ;;  %v10574_v17 = vor.u32 %v11351_v7, %v10573_v21  ;;  %v10541_v62 = vld [vmem:[%s18373_s15 + $0x480] sm:$0xf] }
0x1021   :  { %v11415_v34 = vld [vmem:[%s18373_s15 + $0x6cc] sm:$0xf0]  ;;  %v10702_v63 = vor.u32 %v11383_v39, %v10701_v16  ;;  %v10621_v50 = vld [vmem:[%s18373_s15 + $0x520] sm:$0xf] }
0x1022   :  { %v11347_v32 = vld [vmem:[%s18373_s15 + $0x4ac] sm:$0xf0]  ;;  %v10765_v21 = vld [vmem:[%s18373_s15 + $0x640] sm:$0xf] }
0x1023   :  { %v11343_v36 = vld [vmem:[%s18373_s15 + $0x48c] sm:$0xf0]  ;;  %v10893_v16 = vld [vmem:[%s18373_s15 + $0x740] sm:$0xf] }
0x1024   :  { %v11399_v7 = vld [vmem:[%s18373_s15 + $0x64c] sm:$0xf0] }
0x1025   :  { %v10766_v39 = vor.u32 %v11399_v7, %v10765_v21 }
0x106c   :  { %v6327_v46 = vpop.permute.xlu0 %6326 }
0x106d   :  { %v6329_v40 = vsel %vm4662_vm12, %v6288_v6, %v6327_v46  ;;  %v9997_v6 = vld [vmem:[%s18373_s15 + $0x40] sm:$0xf]  ;;  %v11207_v46 = vld [vmem:[%s18373_s15 + $0x4c] sm:$0xf0] }
0x106e   :  { %v6331_v28 = vrot.slane %v6329_v40, 7  ;;  %v10125_v40 = vld [vmem:[%s18373_s15 + $0x140] sm:$0xf]  ;;  %v9998_v19 = vor.u32 %v11207_v46, %v9997_v6  ;;  %v10830_v6 = vor.u32 %v11415_v34, %v10829_v25 }
0x106f   :  { %v10126_v37 = vor.u32 %v11239_v51, %v10125_v40  ;;  %v10813_v40 = vld [vmem:[%s18373_s15 + $0x6a0] sm:$0xf]  ;;  %v11411_v51 = vld [vmem:[%s18373_s15 + $0x6ac] sm:$0xf0] }
0x1070   :  { %v6334_v2 = vsel %vm6333_vm15, %v15816_v8, %v6331_v28  ;;  %v11255_v8 = vld [vmem:[%s18373_s15 + $0x1cc] sm:$0xf0]  ;;  %v10253_v28 = vld [vmem:[%s18373_s15 + $0x240] sm:$0xf] }
0x1071   :  { %v16634_v47 = vpack.c.bf16 %v6334_v2, %v6334_v2  ;;  %v10190_v10 = vor.u32 %v11255_v8, %v10189_v27  ;;  %v9981_v2 = vld [vmem:[%s18373_s15 + $0x20] sm:$0xf]  ;;  %v10254_v15 = vor.u32 %v11271_v33, %v10253_v28  ;;  %v11267_v8 = vld [vmem:[%s18373_s15 + $0x22c] sm:$0xf0]  ;;  %v10558_v28 = vor.u32 %v11347_v32, %v10557_v26 }
0x1072   :  { %v10237_v27 = vld [vmem:[%s18373_s15 + $0x220] sm:$0xf] }
0x1073   :  { %6746 = vmatmul.bf16.vlgmr.msra.gmra.mxu0 %v16634_v47  ;;  %6759 = vmatmul.bf16.vlgmr.msra.gmra.mxu1 %v16634_v47  ;;  %v10238_v12 = vor.u32 %v11267_v8, %v10237_v27  ;;  %v10542_v27 = vor.u32 %v11343_v36, %v10541_v62  ;;  %v10605_v25 = vld [vmem:[%s18373_s15 + $0x500] sm:$0xf] }
0x1074   :  { %6772 = vmatmul.bf16.vlgmr.msra.gmra.mxu2 %v16634_v47  ;;  %6785 = vmatmul.bf16.vlgmr.msra.gmra.mxu3 %v16634_v47  ;;  %v10877_v32 = vld [vmem:[%s18373_s15 + $0x720] sm:$0xf] }
0x1075   :  { %8404 = vmatpush.bf16.msra.mxu0 %v10078_v38  ;;  %8417 = vmatpush.bf16.msra.mxu1 %v10206_v20  ;;  %v11203_v38 = vld [vmem:[%s18373_s15 + $0x2c] sm:$0xf0]  ;;  %v10109_v20 = vld [vmem:[%s18373_s15 + $0x120] sm:$0xf] }
0x1076   :  { %8430 = vmatpush.bf16.msra.mxu2 %v10334_v48  ;;  %8443 = vmatpush.bf16.msra.mxu3 %v10462_v23  ;;  %v10365_v48 = vld [vmem:[%s18373_s15 + $0x320] sm:$0xf]  ;;  %v11299_v23 = vld [vmem:[%s18373_s15 + $0x32c] sm:$0xf0]  ;;  %v9982_v22 = vor.u32 %v11203_v38, %v9981_v2  ;;  %v10814_v2 = vor.u32 %v11411_v51, %v10813_v40 }
0x1077   :  { %v10861_v51 = vld [vmem:[%s18373_s15 + $0x700] sm:$0xf] }
0x1079   :  { %8405 = vmatpush.bf16.msra.mxu0 %v10062_v5  ;;  %8418 = vmatpush.bf16.msra.mxu1 %v10190_v10  ;;  %v10093_v5 = vld [vmem:[%s18373_s15 + $0x100] sm:$0xf]  ;;  %v11231_v10 = vld [vmem:[%s18373_s15 + $0x10c] sm:$0xf0] }
0x107a   :  { %8431 = vmatpush.bf16.msra.mxu2 %v10318_v11  ;;  %8444 = vmatpush.bf16.msra.mxu3 %v10446_v44  ;;  %v10366_v11 = vor.u32 %v11299_v23, %v10365_v48  ;;  %v11387_v44 = vld [vmem:[%s18373_s15 + $0x5ec] sm:$0xf0]  ;;  %v10094_v57 = vor.u32 %v11231_v10, %v10093_v5  ;;  %v10525_v48 = vld [vmem:[%s18373_s15 + $0x460] sm:$0xf] }
0x107b   :  { %v11339_v23 = vld [vmem:[%s18373_s15 + $0x46c] sm:$0xf0] }
0x107c   :  { %v10526_v5 = vor.u32 %v11339_v23, %v10525_v48 }
0x107d   :  { %8406 = vmatpush.bf16.msra.mxu0 %v10046_v56  ;;  %8419 = vmatpush.bf16.msra.mxu1 %v10174_v13  ;;  %v10845_v56 = vld [vmem:[%s18373_s15 + $0x6e0] sm:$0xf]  ;;  %v9966_v13 = vor.u32 %v11199_v60, %v9965_v4 }
0x107e   :  { %8432 = vmatpush.bf16.msra.mxu2 %v10302_v24  ;;  %8445 = vmatpush.bf16.msra.mxu3 %v10430_v0  ;;  %v10590_v24 = vor.u32 %v11355_v42, %v10589_v30  ;;  %v10718_v0 = vor.u32 %v11387_v44, %v10717_v18  ;;  %v10846_v49 = vor.u32 %v11419_v9, %v10845_v56  ;;  %v10653_v4 = vld [vmem:[%s18373_s15 + $0x560] sm:$0xf]  ;;  %v11335_v42 = vld [vmem:[%s18373_s15 + $0x44c] sm:$0xf0] }
0x107f   :  { %v10509_v30 = vld [vmem:[%s18373_s15 + $0x440] sm:$0xf]  ;;  %v11435_v56 = vld [vmem:[%s18373_s15 + $0x76c] sm:$0xf0] }
0x1080   :  { %v10637_v18 = vld [vmem:[%s18373_s15 + $0x540] sm:$0xf]  ;;  %v11331_v9 = vld [vmem:[%s18373_s15 + $0x42c] sm:$0xf0] }
0x1081   :  { %8407 = vmatpush.bf16.msra.mxu0 %v10030_v43  ;;  %8420 = vmatpush.bf16.msra.mxu1 %v10158_v61  ;;  %v10222_v43 = vor.u32 %v11263_v14, %v10221_v52  ;;  %v10350_v61 = vor.u32 %v11295_v58, %v10349_v31  ;;  %v10781_v52 = vld [vmem:[%s18373_s15 + $0x660] sm:$0xf]  ;;  %v11403_v14 = vld [vmem:[%s18373_s15 + $0x66c] sm:$0xf0] }
0x1082   :  { %8433 = vmatpush.bf16.msra.mxu2 %v10286_v55  ;;  %8446 = vmatpush.bf16.msra.mxu3 %v10414_v41  ;;  %v10957_v55 = vld [vmem:[%s18373_s15 + $0x7c0] sm:$0xf]  ;;  %v11447_v41 = vld [vmem:[%s18373_s15 + $0x7cc] sm:$0xf0]  ;;  %v10782_v58 = vor.u32 %v11403_v14, %v10781_v52  ;;  %v11321_v52 = vld [vmem:[%s18373_s15 + $0x3e4] sm:$0xf] }
0x1083   :  { %6798 = vmatmul.bf16.vlgmr.msrb.gmra.mxu0 %v16634_v47  ;;  %6811 = vmatmul.bf16.vlgmr.msrb.gmra.mxu1 %v16634_v47  ;;  %v10958_v46 = vor.u32 %v11447_v41, %v10957_v55  ;;  %v10909_v31 = vld [vmem:[%s18373_s15 + $0x760] sm:$0xf]  ;;  %v11359_v55 = vld [vmem:[%s18373_s15 + $0x50c] sm:$0xf0] }
0x1084   :  { %6824 = vmatmul.bf16.vlgmr.msrb.gmra.mxu2 %v16634_v47  ;;  %6837 = vmatmul.bf16.vlgmr.msrb.gmra.mxu3 %v16634_v47  ;;  %v11235_v47 = vld [vmem:[%s18373_s15 + $0x12c] sm:$0xf0]  ;;  %v10606_v41 = vor.u32 %v11359_v55, %v10605_v25 }
0x1085   :  { %8408 = vmatpush.bf16.msra.mxu0 %v10014_v54  ;;  %8421 = vmatpush.bf16.msra.mxu1 %v10142_v35  ;;  %v10110_v45 = vor.u32 %v11235_v47, %v10109_v20  ;;  %v10685_v54 = vld [vmem:[%s18373_s15 + $0x5a0] sm:$0xf]  ;;  %v11379_v35 = vld [vmem:[%s18373_s15 + $0x5ac] sm:$0xf0] }
0x1086   :  { %8434 = vmatpush.bf16.msra.mxu2 %v10270_v59  ;;  %8447 = vmatpush.bf16.msra.mxu3 %v10398_v3  ;;  %v10941_v59 = vld [vmem:[%s18373_s15 + $0x7a0] sm:$0xf]  ;;  %v11443_v3 = vld [vmem:[%s18373_s15 + $0x7ac] sm:$0xf0]  ;;  %v10686_v33 = vor.u32 %v11379_v35, %v10685_v54 }
0x1087   :  { %v10942_v38 = vor.u32 %v11443_v3, %v10941_v59  ;;  %v10797_v20 = vld [vmem:[%s18373_s15 + $0x680] sm:$0xf]  ;;  %v11407_v47 = vld [vmem:[%s18373_s15 + $0x68c] sm:$0xf0] }
0x1088   :  { %v11427_v54 = vld [vmem:[%s18373_s15 + $0x72c] sm:$0xf0] }
0x1089   :  { %8409 = vmatpush.bf16.msra.mxu0 %v9998_v19  ;;  %8422 = vmatpush.bf16.msra.mxu1 %v10126_v37  ;;  %v10669_v19 = vld [vmem:[%s18373_s15 + $0x580] sm:$0xf]  ;;  %v11375_v37 = vld [vmem:[%s18373_s15 + $0x58c] sm:$0xf0]  ;;  %v10878_v35 = vor.u32 %v11427_v54, %v10877_v32  ;;  %v11245_v32 = vld [vmem:[%s18373_s15 + $0x184] sm:$0xf] }
0x108a   :  { %8435 = vmatpush.bf16.msra.mxu2 %v10254_v15  ;;  %8448 = vmatpush.bf16.msra.mxu3 %v10382_v29  ;;  %v10925_v15 = vld [vmem:[%s18373_s15 + $0x780] sm:$0xf]  ;;  %v11439_v29 = vld [vmem:[%s18373_s15 + $0x78c] sm:$0xf0]  ;;  %v10670_v8 = vor.u32 %v11375_v37, %v10669_v19  ;;  %v11225_v37 = vld [vmem:[%s18373_s15 + $0xe4] sm:$0xf] }
0x108b   :  { %v10926_v60 = vor.u32 %v11439_v29, %v10925_v15  ;;  %v11423_v59 = vld [vmem:[%s18373_s15 + $0x70c] sm:$0xf0]  ;;  %v10207_v15 = vld [vmem:[%s18373_s15 + $0x1f0] sm:$0xf0] }
0x108c   :  { %v10862_v3 = vor.u32 %v11423_v59, %v10861_v51  ;;  %v10159_v54 = vld [vmem:[%s18373_s15 + $0x190] sm:$0xf0] }
0x108d   :  { %8410 = vmatpush.bf16.msra.mxu0 %v9982_v22  ;;  %8423 = vmatpush.bf16.msra.mxu1 %v10110_v45  ;;  %v11371_v22 = vld [vmem:[%s18373_s15 + $0x56c] sm:$0xf0]  ;;  %v10798_v45 = vor.u32 %v11407_v47, %v10797_v20  ;;  %v10079_v20 = vld [vmem:[%s18373_s15 + $0xf0] sm:$0xf0]  ;;  %v11257_v47 = vld [vmem:[%s18373_s15 + $0x1e4] sm:$0xf] }
0x108e   :  { %8436 = vmatpush.bf16.msra.mxu2 %v10238_v12  ;;  %8449 = vmatpush.bf16.msra.mxu3 %v10366_v11  ;;  %v10654_v10 = vor.u32 %v11371_v22, %v10653_v4  ;;  %v11367_v12 = vld [vmem:[%s18373_s15 + $0x54c] sm:$0xf0]  ;;  %v10510_v11 = vor.u32 %v11335_v42, %v10509_v30  ;;  %v10082_v23 = vor.u32 %v11225_v37, %v10079_v20  ;;  %v11221_v22 = vld [vmem:[%s18373_s15 + $0xc4] sm:$0xf]  ;;  %v10191_v30 = vld [vmem:[%s18373_s15 + $0x1d0] sm:$0xf0] }
0x108f   :  { %v10638_v44 = vor.u32 %v11367_v12, %v10637_v18  ;;  %v10210_v4 = vor.u32 %v11257_v47, %v10207_v15  ;;  %v10303_v59 = vld [vmem:[%s18373_s15 + $0x2b0] sm:$0xf0]  ;;  %v10162_v37 = vor.u32 %v11245_v32, %v10159_v54  ;;  %v11209_v20 = vld [vmem:[%s18373_s15 + $0x64] sm:$0xf] }
0x1090   :  { %v11269_v32 = vld [vmem:[%s18373_s15 + $0x244] sm:$0xf] }
0x1091   :  { %8411 = vmatpush.bf16.msra.mxu0 %v9966_v13  ;;  %8424 = vmatpush.bf16.msra.mxu1 %v10094_v57  ;;  %v10910_v13 = vor.u32 %v11435_v56, %v10909_v31  ;;  %v10493_v57 = vld [vmem:[%s18373_s15 + $0x420] sm:$0xf] }
0x1092   :  { %8437 = vmatpush.bf16.msra.mxu2 %v10222_v43  ;;  %8450 = vmatpush.bf16.msra.mxu3 %v10350_v61  ;;  %v10494_v53 = vor.u32 %v11331_v9, %v10493_v57  ;;  %v11431_v43 = vld [vmem:[%s18373_s15 + $0x74c] sm:$0xf0]  ;;  %v10463_v57 = vld [vmem:[%s18373_s15 + $0x3f0] sm:$0xf0]  ;;  %v11217_v9 = vld [vmem:[%s18373_s15 + $0xa4] sm:$0xf] }
0x1093   :  { %v10894_v61 = vor.u32 %v11431_v43, %v10893_v16  ;;  %v10466_v16 = vor.u32 %v11321_v52, %v10463_v57  ;;  %v9999_v52 = vld [vmem:[%s18373_s15 + $0x50] sm:$0xf0] }
0x1095   :  { %8456 = vmatpush.bf16.msrb.mxu0 %v10590_v24  ;;  %8469 = vmatpush.bf16.msrb.mxu1 %v10718_v0  ;;  %v11363_v24 = vld [vmem:[%s18373_s15 + $0x52c] sm:$0xf0] }
0x1096   :  { %8482 = vmatpush.bf16.msrb.mxu2 %v10846_v49  ;;  %8495 = vmatpush.bf16.msrb.mxu3 %v10974_v1  ;;  %v10622_v0 = vor.u32 %v11363_v24, %v10621_v50  ;;  %v10477_v49 = vld [vmem:[%s18373_s15 + $0x400] sm:$0xf]  ;;  %v11327_v1 = vld [vmem:[%s18373_s15 + $0x40c] sm:$0xf0]  ;;  %v11249_v50 = vld [vmem:[%s18373_s15 + $0x1a4] sm:$0xf] }
0x1097   :  { %v10478_v34 = vor.u32 %v11327_v1, %v10477_v49  ;;  %v10175_v24 = vld [vmem:[%s18373_s15 + $0x1b0] sm:$0xf0]  ;;  %v11285_v49 = vld [vmem:[%s18373_s15 + $0x2c4] sm:$0xf] }
0x1098   :  { %v10319_v1 = vld [vmem:[%s18373_s15 + $0x2d0] sm:$0xf0]  ;;  %v10178_v55 = vor.u32 %v11249_v50, %v10175_v24 }
0x1099   :  { %8457 = vmatpush.bf16.msrb.mxu0 %v10574_v17  ;;  %8470 = vmatpush.bf16.msrb.mxu1 %v10702_v63  ;;  %v10749_v17 = vld [vmem:[%s18373_s15 + $0x620] sm:$0xf]  ;;  %v11395_v63 = vld [vmem:[%s18373_s15 + $0x62c] sm:$0xf0] }
0x109a   :  { %8483 = vmatpush.bf16.msrb.mxu2 %v10830_v6  ;;  %8496 = vmatpush.bf16.msrb.mxu3 %v10958_v46  ;;  %v10750_v26 = vor.u32 %v11395_v63, %v10749_v17  ;;  %v10733_v6 = vld [vmem:[%s18373_s15 + $0x600] sm:$0xf]  ;;  %v11391_v46 = vld [vmem:[%s18373_s15 + $0x60c] sm:$0xf0]  ;;  %v10447_v17 = vld [vmem:[%s18373_s15 + $0x3d0] sm:$0xf0] }
0x109b   :  { %v10734_v40 = vor.u32 %v11391_v46, %v10733_v6  ;;  %v11213_v63 = vld [vmem:[%s18373_s15 + $0x84] sm:$0xf] }
0x109d   :  { %8458 = vmatpush.bf16.msrb.mxu0 %v10558_v28  ;;  %8471 = vmatpush.bf16.msrb.mxu1 %v10686_v33  ;;  %v17007_v28 = vld [vmem:[%s18372_s14] sm:$0xff] }
0x109e   :  { %8484 = vmatpush.bf16.msrb.mxu2 %v10814_v2  ;;  %8497 = vmatpush.bf16.msrb.mxu3 %v10942_v38  ;;  %v6402_v33 = vperm.slane %v17007_v28, 0  ;;  %v6403_v62 = vperm.slane %v17007_v28, 1  ;;  %v6405_v48 = vperm.slane %v17007_v28, 3  ;;  %v6406_v43 = vperm.slane %v17007_v28, 4 }
0x10a1   :  { %8459 = vmatpush.bf16.msrb.mxu0 %v10542_v27  ;;  %8472 = vmatpush.bf16.msrb.mxu1 %v10670_v8  ;;  %v6404_v8 = vperm.slane %v17007_v28, 2 }
0x10a2   :  { %8485 = vmatpush.bf16.msrb.mxu2 %v10798_v45  ;;  %8498 = vmatpush.bf16.msrb.mxu3 %v10926_v60  ;;  %v10063_v45 = vld [vmem:[%s18373_s15 + $0xd0] sm:$0xf0] }
0x10a3   :  { %v10066_v12 = vor.u32 %v11221_v22, %v10063_v45  ;;  %v6409_v22 = vperm.slane %v17007_v28, 7  ;;  %v11277_v45 = vld [vmem:[%s18373_s15 + $0x284] sm:$0xf] }
0x10a5   :  { %8460 = vmatpush.bf16.msrb.mxu0 %v10526_v5  ;;  %8473 = vmatpush.bf16.msrb.mxu1 %v10654_v10  ;;  %v11253_v10 = vld [vmem:[%s18373_s15 + $0x1c4] sm:$0xf] }
0x10a6   :  { %8486 = vmatpush.bf16.msrb.mxu2 %v10782_v58  ;;  %8499 = vmatpush.bf16.msrb.mxu3 %v10910_v13  ;;  %v10194_v13 = vor.u32 %v11253_v10, %v10191_v30  ;;  %v10287_v10 = vld [vmem:[%s18373_s15 + $0x290] sm:$0xf0]  ;;  %v11309_v30 = vld [vmem:[%s18373_s15 + $0x384] sm:$0xf] }
0x10a9   :  { %8461 = vmatpush.bf16.msrb.mxu0 %v10510_v11  ;;  %8474 = vmatpush.bf16.msrb.mxu1 %v10638_v44  ;;  %v11289_v11 = vld [vmem:[%s18373_s15 + $0x2e4] sm:$0xf]  ;;  %v10335_v44 = vld [vmem:[%s18373_s15 + $0x2f0] sm:$0xf0] }
0x10aa   :  { %8487 = vmatpush.bf16.msrb.mxu2 %v10766_v39  ;;  %8500 = vmatpush.bf16.msrb.mxu3 %v10894_v61  ;;  %v10338_v7 = vor.u32 %v11289_v11, %v10335_v44  ;;  %v6407_v61 = vperm.slane %v17007_v28, 5  ;;  %v11205_v44 = vld [vmem:[%s18373_s15 + $0x44] sm:$0xf] }
0x10ad   :  { %8462 = vmatpush.bf16.msrb.mxu0 %v10494_v53  ;;  %8475 = vmatpush.bf16.msrb.mxu1 %v10622_v0  ;;  %v10047_v53 = vld [vmem:[%s18373_s15 + $0xb0] sm:$0xf0] }
0x10ae   :  { %8488 = vmatpush.bf16.msrb.mxu2 %v10750_v26  ;;  %8501 = vmatpush.bf16.msrb.mxu3 %v10878_v35  ;;  %v10050_v39 = vor.u32 %v11217_v9, %v10047_v53  ;;  %v10031_v26 = vld [vmem:[%s18373_s15 + $0x90] sm:$0xf0]  ;;  %v11281_v35 = vld [vmem:[%s18373_s15 + $0x2a4] sm:$0xf] }
0x10af   :  { %v10306_v47 = vor.u32 %v11281_v35, %v10303_v59  ;;  %v11273_v9 = vld [vmem:[%s18373_s15 + $0x264] sm:$0xf] }
0x10b1   :  { %8463 = vmatpush.bf16.msrb.mxu0 %v10478_v34  ;;  %8476 = vmatpush.bf16.msrb.mxu1 %v10606_v41  ;;  %v11317_v41 = vld [vmem:[%s18373_s15 + $0x3c4] sm:$0xf] }
0x10b2   :  { %8489 = vmatpush.bf16.msrb.mxu2 %v10734_v40  ;;  %8502 = vmatpush.bf16.msrb.mxu3 %v10862_v3  ;;  %v10322_v40 = vor.u32 %v11285_v49, %v10319_v1  ;;  %v10450_v51 = vor.u32 %v11317_v41, %v10447_v17  ;;  %v11313_v3 = vld [vmem:[%s18373_s15 + $0x3a4] sm:$0xf]  ;;  %v9983_v49 = vld [vmem:[%s18373_s15 + $0x30] sm:$0xf0] }
0x10b3   :  { %v11233_v41 = vld [vmem:[%s18373_s15 + $0x124] sm:$0xf]  ;;  %v10111_v17 = vld [vmem:[%s18373_s15 + $0x130] sm:$0xf0] }
0x10b4   :  { %v10114_v59 = vor.u32 %v11233_v41, %v10111_v17  ;;  %v11445_v41 = vld [vmem:[%s18373_s15 + $0x7c4] sm:$0xf]  ;;  %v10959_v17 = vld [vmem:[%s18373_s15 + $0x7d0] sm:$0xf0] }
0x10f0   :  { %v6747_v36 = vpop.f32.mrf.mxu0  ;;  %v6760_v19 = vpop.f32.mrf.mxu1 }
0x10f1   :  { %v6748_v2 = vadd.f32 %v6747_v36, %v6402_v33  ;;  %v6761_v38 = vadd.f32 %v6760_v19, %v6403_v62  ;;  %v10431_v33 = vld [vmem:[%s18373_s15 + $0x3b0] sm:$0xf0]  ;;  %v10034_v19 = vor.u32 %v11213_v63, %v10031_v26 }
0x10f2   :  { %v10434_v15 = vor.u32 %v11313_v3, %v10431_v33  ;;  %v11197_v3 = vld [vmem:[%s18373_s15 + $0x4] sm:$0xf]  ;;  %v9967_v33 = vld [vmem:[%s18373_s15 + $0x10] sm:$0xf0] }
0x10f3   :  { %v6842_v29 = vmax.f32 %v6748_v2, 0.0  ;;  %v6843_v27 = vmax.f32 %v6761_v38, 0.0 }
0x10f5   :  { %v17031_v60 = vpack.c.bf16 %v6842_v29, %v6842_v29  ;;  %v17033_v5 = vpack.c.bf16 %v6843_v27, %v6843_v27  ;;  %v10015_v29 = vld [vmem:[%s18373_s15 + $0x70] sm:$0xf0]  ;;  %v11241_v27 = vld [vmem:[%s18373_s15 + $0x164] sm:$0xf] }
0x10f7   :  { %v6773_v42 = vpop.f32.mrf.mxu2  ;;  %v6786_v18 = vpop.f32.mrf.mxu3  ;;  %8412 = vmatmul.bf16.vlgmr.msra.gmra.mxu0 %v17031_v60  ;;  %8425 = vmatmul.bf16.vlgmr.msra.gmra.mxu1 %v17033_v5 }
0x10f8   :  { %v6774_v14 = vadd.f32 %v6773_v42, %v6404_v8  ;;  %v6787_v31 = vadd.f32 %v6786_v18, %v6405_v48  ;;  %8508 = vmatpush.bf16.msra.mxu0 %v10082_v23  ;;  %8521 = vmatpush.bf16.msra.mxu1 %v10210_v4  ;;  %v6749_v58 = vpop.f32.mrf.mxu0  ;;  %v6762_v56 = vpop.f32.mrf.mxu1  ;;  %v10143_v8 = vld [vmem:[%s18373_s15 + $0x170] sm:$0xf0]  ;;  %v6408_v4 = vperm.slane %v17007_v28, 6 }
0x10f9   :  { %v10415_v42 = vld [vmem:[%s18373_s15 + $0x390] sm:$0xf0]  ;;  %v10146_v11 = vor.u32 %v11241_v27, %v10143_v8  ;;  %v11265_v27 = vld [vmem:[%s18373_s15 + $0x224] sm:$0xf] }
0x10fa   :  { %v6844_v0 = vmax.f32 %v6774_v14, 0.0  ;;  %v6845_v21 = vmax.f32 %v6787_v31, 0.0  ;;  %v11237_v14 = vld [vmem:[%s18373_s15 + $0x144] sm:$0xf]  ;;  %v10127_v31 = vld [vmem:[%s18373_s15 + $0x150] sm:$0xf0]  ;;  %v10418_v57 = vor.u32 %v11309_v30, %v10415_v42 }
0x10fb   :  { %v10239_v8 = vld [vmem:[%s18373_s15 + $0x230] sm:$0xf0]  ;;  %v11349_v30 = vld [vmem:[%s18373_s15 + $0x4c4] sm:$0xf] }
0x10fc   :  { %v17075_v25 = vpack.c.bf16 %v6844_v0, %v6844_v0  ;;  %v17077_v34 = vpack.c.bf16 %v6845_v21, %v6845_v21  ;;  %8509 = vmatpush.bf16.msra.mxu0 %v10066_v12  ;;  %8522 = vmatpush.bf16.msra.mxu1 %v10194_v13  ;;  %v10018_v12 = vor.u32 %v11209_v20, %v10015_v29  ;;  %v10271_v21 = vld [vmem:[%s18373_s15 + $0x270] sm:$0xf0] }
0x10fd   :  { %v10290_v13 = vor.u32 %v11277_v45, %v10287_v10  ;;  %v10274_v63 = vor.u32 %v11273_v9, %v10271_v21  ;;  %v10719_v29 = vld [vmem:[%s18373_s15 + $0x5f0] sm:$0xf0]  ;;  %v11449_v9 = vld [vmem:[%s18373_s15 + $0x7e4] sm:$0xf] }
0x10fe   :  { %8438 = vmatmul.bf16.vlgmr.msra.gmra.mxu2 %v17075_v25  ;;  %8451 = vmatmul.bf16.vlgmr.msra.gmra.mxu3 %v17077_v34  ;;  %v10575_v42 = vld [vmem:[%s18373_s15 + $0x4d0] sm:$0xf0] }
0x10ff   :  { %8534 = vmatpush.bf16.msra.mxu2 %v10338_v7  ;;  %8547 = vmatpush.bf16.msra.mxu3 %v10466_v16  ;;  %v6775_v6 = vpop.f32.mrf.mxu2  ;;  %v6788_v46 = vpop.f32.mrf.mxu3  ;;  %v11305_v7 = vld [vmem:[%s18373_s15 + $0x364] sm:$0xf]  ;;  %v10399_v16 = vld [vmem:[%s18373_s15 + $0x370] sm:$0xf0] }
0x1100   :  { %8510 = vmatpush.bf16.msra.mxu0 %v10050_v39  ;;  %8523 = vmatpush.bf16.msra.mxu1 %v10178_v55  ;;  %v6799_v62 = vpop.f32.mrf.mxu0  ;;  %v6812_v36 = vpop.f32.mrf.mxu1  ;;  %v10002_v39 = vor.u32 %v11205_v44, %v9999_v52  ;;  %v10402_v26 = vor.u32 %v11305_v7, %v10399_v16  ;;  %v10255_v6 = vld [vmem:[%s18373_s15 + $0x250] sm:$0xf0]  ;;  %v11301_v46 = vld [vmem:[%s18373_s15 + $0x344] sm:$0xf] }
0x1101   :  { %v6800_v2 = vadd.f32 %v6799_v62, %v6406_v43  ;;  %v6813_v38 = vadd.f32 %v6812_v36, %v6407_v61  ;;  %v10130_v43 = vor.u32 %v11237_v14, %v10127_v31  ;;  %v11201_v61 = vld [vmem:[%s18373_s15 + $0x24] sm:$0xf]  ;;  %v10095_v36 = vld [vmem:[%s18373_s15 + $0x110] sm:$0xf0]  ;;  %v10258_v20 = vor.u32 %v11269_v32, %v10255_v6 }
0x1102   :  { %v11229_v62 = vld [vmem:[%s18373_s15 + $0x104] sm:$0xf]  ;;  %v10703_v52 = vld [vmem:[%s18373_s15 + $0x5d0] sm:$0xf0] }
0x1103   :  { %v6846_v48 = vmax.f32 %v6800_v2, 0.0  ;;  %v6847_v23 = vmax.f32 %v6813_v38, 0.0  ;;  %8535 = vmatpush.bf16.msra.mxu2 %v10322_v40  ;;  %8548 = vmatpush.bf16.msra.mxu3 %v10450_v51  ;;  %v10383_v40 = vld [vmem:[%s18373_s15 + $0x350] sm:$0xf0]  ;;  %v9986_v51 = vor.u32 %v11201_v61, %v9983_v49  ;;  %v11261_v14 = vld [vmem:[%s18373_s15 + $0x204] sm:$0xf] }
0x1104   :  { %8511 = vmatpush.bf16.msra.mxu0 %v10034_v19  ;;  %8524 = vmatpush.bf16.msra.mxu1 %v10162_v37  ;;  %v11353_v19 = vld [vmem:[%s18373_s15 + $0x4e4] sm:$0xf]  ;;  %v10591_v37 = vld [vmem:[%s18373_s15 + $0x4f0] sm:$0xf0] }
0x1105   :  { %v17137_v18 = vpack.c.bf16 %v6846_v48, %v6846_v48  ;;  %v17139_v28 = vpack.c.bf16 %v6847_v23, %v6847_v23  ;;  %v11297_v48 = vld [vmem:[%s18373_s15 + $0x324] sm:$0xf]  ;;  %v10367_v23 = vld [vmem:[%s18373_s15 + $0x330] sm:$0xf0]  ;;  %v10594_v45 = vor.u32 %v11353_v19, %v10591_v37 }
0x1106   :  { %v10370_v44 = vor.u32 %v11297_v48, %v10367_v23  ;;  %v10223_v31 = vld [vmem:[%s18373_s15 + $0x210] sm:$0xf0]  ;;  %v11341_v32 = vld [vmem:[%s18373_s15 + $0x484] sm:$0xf] }
0x1107   :  { %8536 = vmatpush.bf16.msra.mxu2 %v10306_v47  ;;  %8549 = vmatpush.bf16.msra.mxu3 %v10434_v15  ;;  %v6825_v58 = vpop.f32.mrf.mxu2  ;;  %v6838_v56 = vpop.f32.mrf.mxu3  ;;  %v10386_v47 = vor.u32 %v11301_v46, %v10383_v40  ;;  %v11385_v15 = vld [vmem:[%s18373_s15 + $0x5e4] sm:$0xf]  ;;  %v10226_v21 = vor.u32 %v11261_v14, %v10223_v31  ;;  %v10559_v16 = vld [vmem:[%s18373_s15 + $0x4b0] sm:$0xf0] }
0x1108   :  { %v6826_v53 = vadd.f32 %v6825_v58, %v6408_v4  ;;  %v6839_v50 = vadd.f32 %v6838_v56, %v6409_v22  ;;  %8464 = vmatmul.bf16.vlgmr.msrb.gmra.mxu0 %v17137_v18  ;;  %8477 = vmatmul.bf16.vlgmr.msrb.gmra.mxu1 %v17139_v28  ;;  %v6801_v24 = vpop.f32.mrf.mxu0  ;;  %v6814_v0 = vpop.f32.mrf.mxu1  ;;  %v9970_v4 = vor.u32 %v11197_v3, %v9967_v33  ;;  %v11293_v58 = vld [vmem:[%s18373_s15 + $0x304] sm:$0xf]  ;;  %v10351_v56 = vld [vmem:[%s18373_s15 + $0x310] sm:$0xf0] }
0x1109   :  { %8512 = vmatpush.bf16.msra.mxu0 %v10018_v12  ;;  %8525 = vmatpush.bf16.msra.mxu1 %v10146_v11  ;;  %v10098_v22 = vor.u32 %v11229_v62, %v10095_v36  ;;  %v10722_v10 = vor.u32 %v11385_v15, %v10719_v29  ;;  %v11381_v12 = vld [vmem:[%s18373_s15 + $0x5c4] sm:$0xf]  ;;  %v10242_v11 = vor.u32 %v11265_v27, %v10239_v8  ;;  %v10543_v6 = vld [vmem:[%s18373_s15 + $0x490] sm:$0xf0] }
0x110a   :  { %v6848_v1 = vmax.f32 %v6826_v53, 0.0  ;;  %v6849_v55 = vmax.f32 %v6839_v50, 0.0  ;;  %v10975_v53 = vld [vmem:[%s18373_s15 + $0x7f0] sm:$0xf0]  ;;  %v10578_v50 = vor.u32 %v11349_v30, %v10575_v42  ;;  %v10706_v24 = vor.u32 %v11381_v12, %v10703_v52  ;;  %v11345_v0 = vld [vmem:[%s18373_s15 + $0x4a4] sm:$0xf] }
0x110b   :  { %8537 = vmatpush.bf16.msra.mxu2 %v10290_v13  ;;  %8550 = vmatpush.bf16.msra.mxu3 %v10418_v57  ;;  %v11417_v13 = vld [vmem:[%s18373_s15 + $0x6e4] sm:$0xf]  ;;  %v10847_v57 = vld [vmem:[%s18373_s15 + $0x6f0] sm:$0xf0]  ;;  %v10354_v7 = vor.u32 %v11293_v58, %v10351_v56  ;;  %v10978_v49 = vor.u32 %v11449_v9, %v10975_v53  ;;  %v10546_v19 = vor.u32 %v11341_v32, %v10543_v6  ;;  %v10213_v32 = vld [vmem:[%s18373_s15 + $0x1e8] sm:$0xf] }
0x110c   :  { %v17182_v54 = vpack.c.bf16 %v6848_v1, %v6848_v1  ;;  %v17184_v35 = vpack.c.bf16 %v6849_v55, %v6849_v55  ;;  %v10850_v61 = vor.u32 %v11417_v13, %v10847_v57  ;;  %v11413_v1 = vld [vmem:[%s18373_s15 + $0x6c4] sm:$0xf]  ;;  %v10831_v55 = vld [vmem:[%s18373_s15 + $0x6d0] sm:$0xf0]  ;;  %v11260_v6 = vld [vmem:[%s18373_s15 + $0x1f4] sm:$0xf0] }
0x110d   :  { %8513 = vmatpush.bf16.msra.mxu0 %v10002_v39  ;;  %8526 = vmatpush.bf16.msra.mxu1 %v10130_v43  ;;  %v11377_v39 = vld [vmem:[%s18373_s15 + $0x5a4] sm:$0xf]  ;;  %v10687_v43 = vld [vmem:[%s18373_s15 + $0x5b0] sm:$0xf0] }
0x110e   :  { %8490 = vmatmul.bf16.vlgmr.msrb.gmra.mxu2 %v17182_v54  ;;  %8503 = vmatmul.bf16.vlgmr.msrb.gmra.mxu3 %v17184_v35  ;;  %v11373_v46 = vld [vmem:[%s18373_s15 + $0x584] sm:$0xf]  ;;  %v10671_v40 = vld [vmem:[%s18373_s15 + $0x590] sm:$0xf0] }
0x110f   :  { %8538 = vmatpush.bf16.msra.mxu2 %v10274_v63  ;;  %8551 = vmatpush.bf16.msra.mxu3 %v10402_v26  ;;  %v6827_v2 = vpop.f32.mrf.mxu2  ;;  %v6840_v38 = vpop.f32.mrf.mxu3  ;;  %v10562_v63 = vor.u32 %v11345_v0, %v10559_v16  ;;  %v10690_v26 = vor.u32 %v11377_v39, %v10687_v43  ;;  %v11409_v3 = vld [vmem:[%s18373_s15 + $0x6a4] sm:$0xf]  ;;  %v10815_v33 = vld [vmem:[%s18373_s15 + $0x6b0] sm:$0xf0]  ;;  %v10674_v37 = vor.u32 %v11373_v46, %v10671_v40 }
0x1110   :  { %v11441_v62 = vld [vmem:[%s18373_s15 + $0x7a4] sm:$0xf]  ;;  %v10943_v36 = vld [vmem:[%s18373_s15 + $0x7b0] sm:$0xf0]  ;;  %v10818_v15 = vor.u32 %v11409_v3, %v10815_v33 }
0x1111   :  { %8514 = vmatpush.bf16.msra.mxu0 %v9986_v51  ;;  %8527 = vmatpush.bf16.msra.mxu1 %v10114_v59  ;;  %v10834_v51 = vor.u32 %v11413_v1, %v10831_v55  ;;  %v10962_v59 = vor.u32 %v11445_v41, %v10959_v17  ;;  %v11337_v2 = vld [vmem:[%s18373_s15 + $0x464] sm:$0xf]  ;;  %v10527_v38 = vld [vmem:[%s18373_s15 + $0x470] sm:$0xf0]  ;;  %v10946_v29 = vor.u32 %v11441_v62, %v10943_v36  ;;  %v10085_v41 = vld [vmem:[%s18373_s15 + $0xe8] sm:$0xf] }
0x1112   :  { %v11405_v27 = vld [vmem:[%s18373_s15 + $0x684] sm:$0xf]  ;;  %v10799_v8 = vld [vmem:[%s18373_s15 + $0x690] sm:$0xf0]  ;;  %v11228_v17 = vld [vmem:[%s18373_s15 + $0xf4] sm:$0xf0]  ;;  %v10214_v36 = vor.u32 %v11260_v6, %v10213_v32 }
0x1113   :  { %8539 = vmatpush.bf16.msra.mxu2 %v10258_v20  ;;  %8552 = vmatpush.bf16.msra.mxu3 %v10386_v47  ;;  %v11369_v20 = vld [vmem:[%s18373_s15 + $0x564] sm:$0xf]  ;;  %v10655_v47 = vld [vmem:[%s18373_s15 + $0x570] sm:$0xf0]  ;;  %v10802_v12 = vor.u32 %v11405_v27, %v10799_v8  ;;  %v10086_v62 = vor.u32 %v11228_v17, %v10085_v41  ;;  %v10021_v41 = vld [vmem:[%s18373_s15 + $0x68] sm:$0xf] }
0x1114   :  { %v11437_v48 = vld [vmem:[%s18373_s15 + $0x784] sm:$0xf]  ;;  %v10927_v23 = vld [vmem:[%s18373_s15 + $0x790] sm:$0xf0]  ;;  %v11212_v17 = vld [vmem:[%s18373_s15 + $0x74] sm:$0xf0] }
0x1115   :  { %8515 = vmatpush.bf16.msra.mxu0 %v9970_v4  ;;  %8528 = vmatpush.bf16.msra.mxu1 %v10098_v22  ;;  %v10530_v4 = vor.u32 %v11337_v2, %v10527_v38  ;;  %v10658_v22 = vor.u32 %v11369_v20, %v10655_v47  ;;  %v11365_v30 = vld [vmem:[%s18373_s15 + $0x544] sm:$0xf]  ;;  %v10639_v42 = vld [vmem:[%s18373_s15 + $0x550] sm:$0xf0]  ;;  %v10197_v2 = vld [vmem:[%s18373_s15 + $0x1c8] sm:$0xf] }
0x1116   :  { %v10783_v52 = vld [vmem:[%s18373_s15 + $0x670] sm:$0xf0]  ;;  %v11433_v14 = vld [vmem:[%s18373_s15 + $0x764] sm:$0xf]  ;;  %v10642_v56 = vor.u32 %v11365_v30, %v10639_v42  ;;  %v11256_v47 = vld [vmem:[%s18373_s15 + $0x1d4] sm:$0xf0] }
0x1117   :  { %8540 = vmatpush.bf16.msra.mxu2 %v10242_v11  ;;  %8553 = vmatpush.bf16.msra.mxu3 %v10370_v44  ;;  %v10930_v11 = vor.u32 %v11437_v48, %v10927_v23  ;;  %v11401_v44 = vld [vmem:[%s18373_s15 + $0x664] sm:$0xf]  ;;  %v10911_v31 = vld [vmem:[%s18373_s15 + $0x770] sm:$0xf0]  ;;  %v10341_v48 = vld [vmem:[%s18373_s15 + $0x2e8] sm:$0xf] }
0x1118   :  { %8516 = vmatmul.bf16.vlgmr.msra.gmra.mxu0 %v17031_v60  ;;  %8529 = vmatmul.bf16.vlgmr.msra.gmra.mxu1 %v17033_v5  ;;  %v11329_v13 = vld [vmem:[%s18373_s15 + $0x424] sm:$0xf]  ;;  %v10495_v57 = vld [vmem:[%s18373_s15 + $0x430] sm:$0xf0]  ;;  %v11292_v23 = vld [vmem:[%s18373_s15 + $0x2f4] sm:$0xf0] }
0x1119   :  { %8560 = vmatpush.bf16.msrb.mxu0 %v10594_v45  ;;  %8573 = vmatpush.bf16.msrb.mxu1 %v10722_v10  ;;  %v11333_v45 = vld [vmem:[%s18373_s15 + $0x444] sm:$0xf]  ;;  %v10511_v10 = vld [vmem:[%s18373_s15 + $0x450] sm:$0xf0]  ;;  %v10498_v39 = vor.u32 %v11329_v13, %v10495_v57  ;;  %v10453_v13 = vld [vmem:[%s18373_s15 + $0x3c8] sm:$0xf] }
0x111a   :  { %v10514_v58 = vor.u32 %v11333_v45, %v10511_v10  ;;  %v11361_v9 = vld [vmem:[%s18373_s15 + $0x524] sm:$0xf]  ;;  %v10623_v53 = vld [vmem:[%s18373_s15 + $0x530] sm:$0xf0]  ;;  %v10198_v10 = vor.u32 %v11256_v47, %v10197_v2  ;;  %v11320_v57 = vld [vmem:[%s18373_s15 + $0x3d4] sm:$0xf0] }
0x111b   :  { %8541 = vmatpush.bf16.msra.mxu2 %v10226_v21  ;;  %8554 = vmatpush.bf16.msra.mxu3 %v10354_v7  ;;  %v11397_v0 = vld [vmem:[%s18373_s15 + $0x644] sm:$0xf]  ;;  %v10767_v21 = vld [vmem:[%s18373_s15 + $0x650] sm:$0xf0]  ;;  %v10626_v43 = vor.u32 %v11361_v9, %v10623_v53  ;;  %v10149_v32 = vld [vmem:[%s18373_s15 + $0x168] sm:$0xf] }
0x111c   :  { %v11429_v7 = vld [vmem:[%s18373_s15 + $0x744] sm:$0xf]  ;;  %v10895_v16 = vld [vmem:[%s18373_s15 + $0x750] sm:$0xf0]  ;;  %v11244_v6 = vld [vmem:[%s18373_s15 + $0x174] sm:$0xf0] }
0x111d   :  { %8561 = vmatpush.bf16.msrb.mxu0 %v10578_v50  ;;  %8574 = vmatpush.bf16.msrb.mxu1 %v10706_v24  ;;  %v10786_v50 = vor.u32 %v11401_v44, %v10783_v52  ;;  %v10914_v24 = vor.u32 %v11433_v14, %v10911_v31  ;;  %v11357_v1 = vld [vmem:[%s18373_s15 + $0x504] sm:$0xf]  ;;  %v10607_v55 = vld [vmem:[%s18373_s15 + $0x510] sm:$0xf0]  ;;  %v10342_v44 = vor.u32 %v11292_v23, %v10341_v48  ;;  %v10181_v14 = vld [vmem:[%s18373_s15 + $0x1a8] sm:$0xf] }
0x111e   :  { %8542 = vmatmul.bf16.vlgmr.msra.gmra.mxu2 %v17075_v25  ;;  %8555 = vmatmul.bf16.vlgmr.msra.gmra.mxu3 %v17077_v34  ;;  %v11393_v46 = vld [vmem:[%s18373_s15 + $0x624] sm:$0xf]  ;;  %v10751_v40 = vld [vmem:[%s18373_s15 + $0x630] sm:$0xf0]  ;;  %v10610_v33 = vor.u32 %v11357_v1, %v10607_v55  ;;  %v11252_v31 = vld [vmem:[%s18373_s15 + $0x1b4] sm:$0xf0] }
0x111f   :  { %8586 = vmatpush.bf16.msrb.mxu2 %v10850_v61  ;;  %8599 = vmatpush.bf16.msrb.mxu3 %v10978_v49  ;;  %v11325_v61 = vld [vmem:[%s18373_s15 + $0x404] sm:$0xf]  ;;  %v10479_v49 = vld [vmem:[%s18373_s15 + $0x410] sm:$0xf0]  ;;  %v10754_v38 = vor.u32 %v11393_v46, %v10751_v40  ;;  %v10182_v53 = vor.u32 %v11252_v31, %v10181_v14  ;;  %v10293_v46 = vld [vmem:[%s18373_s15 + $0x288] sm:$0xf] }
0x1120   :  { %v10482_v3 = vor.u32 %v11325_v61, %v10479_v49  ;;  %v11421_v27 = vld [vmem:[%s18373_s15 + $0x704] sm:$0xf]  ;;  %v10863_v8 = vld [vmem:[%s18373_s15 + $0x710] sm:$0xf0]  ;;  %v10437_v61 = vld [vmem:[%s18373_s15 + $0x3a8] sm:$0xf] }
0x1121   :  { %8562 = vmatpush.bf16.msrb.mxu0 %v10562_v63  ;;  %8575 = vmatpush.bf16.msrb.mxu1 %v10690_v26  ;;  %v10770_v63 = vor.u32 %v11397_v0, %v10767_v21  ;;  %v10898_v26 = vor.u32 %v11429_v7, %v10895_v16  ;;  %v10866_v42 = vor.u32 %v11421_v27, %v10863_v8  ;;  %v10165_v7 = vld [vmem:[%s18373_s15 + $0x188] sm:$0xf]  ;;  %v11248_v16 = vld [vmem:[%s18373_s15 + $0x194] sm:$0xf0] }
0x1122   :  { %v10454_v21 = vor.u32 %v11320_v57, %v10453_v13  ;;  %v11316_v49 = vld [vmem:[%s18373_s15 + $0x3b4] sm:$0xf0]  ;;  %v10166_v55 = vor.u32 %v11248_v16, %v10165_v7  ;;  %v10133_v2 = vld [vmem:[%s18373_s15 + $0x148] sm:$0xf] }
0x1123   :  { %8587 = vmatpush.bf16.msrb.mxu2 %v10834_v51  ;;  %8600 = vmatpush.bf16.msrb.mxu3 %v10962_v59  ;;  %v11425_v51 = vld [vmem:[%s18373_s15 + $0x724] sm:$0xf]  ;;  %v10879_v59 = vld [vmem:[%s18373_s15 + $0x730] sm:$0xf0]  ;;  %v11280_v40 = vld [vmem:[%s18373_s15 + $0x294] sm:$0xf0] }
0x1124   :  { %v10882_v20 = vor.u32 %v11425_v51, %v10879_v59  ;;  %v10421_v51 = vld [vmem:[%s18373_s15 + $0x388] sm:$0xf]  ;;  %v11312_v59 = vld [vmem:[%s18373_s15 + $0x394] sm:$0xf0] }
0x1125   :  { %8563 = vmatpush.bf16.msrb.mxu0 %v10546_v19  ;;  %8576 = vmatpush.bf16.msrb.mxu1 %v10674_v37  ;;  %v10069_v19 = vld [vmem:[%s18373_s15 + $0xc8] sm:$0xf]  ;;  %v11224_v37 = vld [vmem:[%s18373_s15 + $0xd4] sm:$0xf0] }
0x1126   :  { %v10070_v45 = vor.u32 %v11224_v37, %v10069_v19  ;;  %v10294_v19 = vor.u32 %v11280_v40, %v10293_v46  ;;  %v10422_v37 = vor.u32 %v11312_v59, %v10421_v51  ;;  %v11276_v47 = vld [vmem:[%s18373_s15 + $0x274] sm:$0xf0]  ;;  %v9989_v48 = vld [vmem:[%s18373_s15 + $0x28] sm:$0xf] }
0x1127   :  { %8588 = vmatpush.bf16.msrb.mxu2 %v10818_v15  ;;  %8601 = vmatpush.bf16.msrb.mxu3 %v10946_v29  ;;  %v11389_v15 = vld [vmem:[%s18373_s15 + $0x604] sm:$0xf]  ;;  %v10735_v29 = vld [vmem:[%s18373_s15 + $0x610] sm:$0xf0]  ;;  %v11204_v23 = vld [vmem:[%s18373_s15 + $0x34] sm:$0xf0] }
0x1128   :  { %v10738_v30 = vor.u32 %v11389_v15, %v10735_v29  ;;  %v10405_v15 = vld [vmem:[%s18373_s15 + $0x368] sm:$0xf]  ;;  %v11308_v29 = vld [vmem:[%s18373_s15 + $0x374] sm:$0xf0] }
0x1129   :  { %8564 = vmatpush.bf16.msrb.mxu0 %v10530_v4  ;;  %8577 = vmatpush.bf16.msrb.mxu1 %v10658_v22  ;;  %v10469_v4 = vld [vmem:[%s18373_s15 + $0x3e8] sm:$0xf]  ;;  %v11324_v22 = vld [vmem:[%s18373_s15 + $0x3f4] sm:$0xf0] }
0x112a   :  { %v10470_v52 = vor.u32 %v11324_v22, %v10469_v4  ;;  %v10406_v22 = vor.u32 %v11308_v29, %v10405_v15  ;;  %v9973_v14 = vld [vmem:[%s18373_s15 + $0x8] sm:$0xf]  ;;  %v11200_v31 = vld [vmem:[%s18373_s15 + $0x14] sm:$0xf0] }
0x112b   :  { %8589 = vmatpush.bf16.msrb.mxu2 %v10802_v12  ;;  %8602 = vmatpush.bf16.msrb.mxu3 %v10930_v11  ;;  %v10053_v12 = vld [vmem:[%s18373_s15 + $0xa8] sm:$0xf]  ;;  %v11220_v11 = vld [vmem:[%s18373_s15 + $0xb4] sm:$0xf0] }
0x112c   :  { %v10054_v9 = vor.u32 %v11220_v11, %v10053_v12  ;;  %v10389_v12 = vld [vmem:[%s18373_s15 + $0x348] sm:$0xf]  ;;  %v11304_v11 = vld [vmem:[%s18373_s15 + $0x354] sm:$0xf0] }
0x112d   :  { %8565 = vmatpush.bf16.msrb.mxu0 %v10514_v58  ;;  %8578 = vmatpush.bf16.msrb.mxu1 %v10642_v56  ;;  %v10325_v58 = vld [vmem:[%s18373_s15 + $0x2c8] sm:$0xf]  ;;  %v11288_v56 = vld [vmem:[%s18373_s15 + $0x2d4] sm:$0xf0]  ;;  %v10390_v13 = vor.u32 %v11304_v11, %v10389_v12 }
0x112e   :  { %v10326_v0 = vor.u32 %v11288_v56, %v10325_v58  ;;  %v10101_v58 = vld [vmem:[%s18373_s15 + $0x108] sm:$0xf]  ;;  %v11232_v57 = vld [vmem:[%s18373_s15 + $0x114] sm:$0xf0] }
0x112f   :  { %8590 = vmatpush.bf16.msrb.mxu2 %v10786_v50  ;;  %8603 = vmatpush.bf16.msrb.mxu3 %v10914_v24  ;;  %v10037_v50 = vld [vmem:[%s18373_s15 + $0x88] sm:$0xf]  ;;  %v11216_v24 = vld [vmem:[%s18373_s15 + $0x94] sm:$0xf0] }
0x1130   :  { %v10038_v1 = vor.u32 %v11216_v24, %v10037_v50  ;;  %v10725_v50 = vld [vmem:[%s18373_s15 + $0x5e8] sm:$0xf]  ;;  %v11388_v24 = vld [vmem:[%s18373_s15 + $0x5f4] sm:$0xf0] }
0x1131   :  { %8566 = vmatpush.bf16.msrb.mxu0 %v10498_v39  ;;  %8579 = vmatpush.bf16.msrb.mxu1 %v10626_v43  ;;  %v10309_v39 = vld [vmem:[%s18373_s15 + $0x2a8] sm:$0xf]  ;;  %v11284_v43 = vld [vmem:[%s18373_s15 + $0x2b4] sm:$0xf0] }
0x1132   :  { %v10373_v7 = vld [vmem:[%s18373_s15 + $0x328] sm:$0xf]  ;;  %v11300_v16 = vld [vmem:[%s18373_s15 + $0x334] sm:$0xf0] }
0x1133   :  { %8591 = vmatpush.bf16.msrb.mxu2 %v10770_v63  ;;  %8604 = vmatpush.bf16.msrb.mxu3 %v10898_v26  ;;  %v10310_v63 = vor.u32 %v11284_v43, %v10309_v39  ;;  %v10438_v26 = vor.u32 %v11316_v49, %v10437_v61  ;;  %v9974_v39 = vor.u32 %v11200_v31, %v9973_v14  ;;  %v10357_v46 = vld [vmem:[%s18373_s15 + $0x308] sm:$0xf]  ;;  %v11296_v40 = vld [vmem:[%s18373_s15 + $0x314] sm:$0xf0] }
0x1134   :  { %v10102_v43 = vor.u32 %v11232_v57, %v10101_v58  ;;  %v10726_v49 = vor.u32 %v11388_v24, %v10725_v50  ;;  %v10853_v51 = vld [vmem:[%s18373_s15 + $0x6e8] sm:$0xf]  ;;  %v11420_v59 = vld [vmem:[%s18373_s15 + $0x6f4] sm:$0xf0] }
0x1135   :  { %8567 = vmatpush.bf16.msrb.mxu0 %v10482_v3  ;;  %8580 = vmatpush.bf16.msrb.mxu1 %v10610_v33  ;;  %v10022_v3 = vor.u32 %v11212_v17, %v10021_v41  ;;  %v10150_v33 = vor.u32 %v11244_v6, %v10149_v32  ;;  %v10709_v41 = vld [vmem:[%s18373_s15 + $0x5c8] sm:$0xf]  ;;  %v11264_v6 = vld [vmem:[%s18373_s15 + $0x214] sm:$0xf0] }
0x1136   :  { %v10229_v32 = vld [vmem:[%s18373_s15 + $0x208] sm:$0xf]  ;;  %v11380_v29 = vld [vmem:[%s18373_s15 + $0x5b4] sm:$0xf0] }
0x1137   :  { %8592 = vmatpush.bf16.msrb.mxu2 %v10754_v38  ;;  %8605 = vmatpush.bf16.msrb.mxu3 %v10882_v20  ;;  %v11240_v38 = vld [vmem:[%s18373_s15 + $0x154] sm:$0xf0]  ;;  %v10277_v20 = vld [vmem:[%s18373_s15 + $0x268] sm:$0xf] }
0x1138   :  { %8568 = vmatmul.bf16.vlgmr.msrb.gmra.mxu0 %v17137_v18  ;;  %8581 = vmatmul.bf16.vlgmr.msrb.gmra.mxu1 %v17139_v28  ;;  %v10134_v8 = vor.u32 %v11240_v38, %v10133_v2  ;;  %v10278_v4 = vor.u32 %v11276_v47, %v10277_v20  ;;  %v10565_v2 = vld [vmem:[%s18373_s15 + $0x4a8] sm:$0xf]  ;;  %v11348_v38 = vld [vmem:[%s18373_s15 + $0x4b4] sm:$0xf0]  ;;  %v10854_v20 = vor.u32 %v11420_v59, %v10853_v51 }
0x1139   :  { %8612 = vmatpush.bf16.msra.mxu0 %v10086_v62  ;;  %8625 = vmatpush.bf16.msra.mxu1 %v10214_v36  ;;  %v10005_v62 = vld [vmem:[%s18373_s15 + $0x48] sm:$0xf]  ;;  %v11208_v36 = vld [vmem:[%s18373_s15 + $0x54] sm:$0xf0] }
0x113a   :  { %v10006_v27 = vor.u32 %v11208_v36, %v10005_v62  ;;  %v10693_v15 = vld [vmem:[%s18373_s15 + $0x5a8] sm:$0xf]  ;;  %v11376_v11 = vld [vmem:[%s18373_s15 + $0x594] sm:$0xf0] }
0x113b   :  { %8593 = vmatpush.bf16.msrb.mxu2 %v10738_v30  ;;  %8606 = vmatpush.bf16.msrb.mxu3 %v10866_v42  ;;  %v10261_v30 = vld [vmem:[%s18373_s15 + $0x248] sm:$0xf]  ;;  %v11272_v42 = vld [vmem:[%s18373_s15 + $0x254] sm:$0xf0] }
0x113c   :  { %v10262_v56 = vor.u32 %v11272_v42, %v10261_v30  ;;  %v10677_v12 = vld [vmem:[%s18373_s15 + $0x588] sm:$0xf]  ;;  %v11444_v31 = vld [vmem:[%s18373_s15 + $0x7b4] sm:$0xf0] }
0x113d   :  { %8613 = vmatpush.bf16.msra.mxu0 %v10070_v45  ;;  %8626 = vmatpush.bf16.msra.mxu1 %v10198_v10  ;;  %v10117_v45 = vld [vmem:[%s18373_s15 + $0x128] sm:$0xf]  ;;  %v11236_v10 = vld [vmem:[%s18373_s15 + $0x134] sm:$0xf0] }
0x113e   :  { %8594 = vmatmul.bf16.vlgmr.msrb.gmra.mxu2 %v17182_v54  ;;  %8607 = vmatmul.bf16.vlgmr.msrb.gmra.mxu3 %v17184_v35  ;;  %v10949_v14 = vld [vmem:[%s18373_s15 + $0x7a8] sm:$0xf]  ;;  %v11340_v57 = vld [vmem:[%s18373_s15 + $0x474] sm:$0xf0] }
0x113f   :  { %8638 = vmatpush.bf16.msra.mxu2 %v10342_v44  ;;  %8651 = vmatpush.bf16.msra.mxu3 %v10470_v52  ;;  %v9990_v44 = vor.u32 %v11204_v23, %v9989_v48  ;;  %v10118_v52 = vor.u32 %v11236_v10, %v10117_v45  ;;  %v10965_v48 = vld [vmem:[%s18373_s15 + $0x7c8] sm:$0xf]  ;;  %v11448_v23 = vld [vmem:[%s18373_s15 + $0x7d4] sm:$0xf0] }
0x1140   :  { %v10549_v45 = vld [vmem:[%s18373_s15 + $0x488] sm:$0xf]  ;;  %v11344_v10 = vld [vmem:[%s18373_s15 + $0x494] sm:$0xf0]  ;;  %v10966_v42 = vor.u32 %v11448_v23, %v10965_v48 }
0x1141   :  { %8614 = vmatpush.bf16.msra.mxu0 %v10054_v9  ;;  %8627 = vmatpush.bf16.msra.mxu1 %v10182_v53  ;;  %v10597_v9 = vld [vmem:[%s18373_s15 + $0x4e8] sm:$0xf]  ;;  %v11356_v53 = vld [vmem:[%s18373_s15 + $0x4f4] sm:$0xf0]  ;;  %v10550_v58 = vor.u32 %v11344_v10, %v10549_v45  ;;  %v11258_v45 = vld [vmem:[%s18373_s15 + $0x1ec] sm:$0xf] }
0x1142   :  { %v10598_v61 = vor.u32 %v11356_v53, %v10597_v9  ;;  %v10950_v53 = vor.u32 %v11444_v31, %v10949_v14  ;;  %v10661_v50 = vld [vmem:[%s18373_s15 + $0x568] sm:$0xf]  ;;  %v11372_v24 = vld [vmem:[%s18373_s15 + $0x574] sm:$0xf0]  ;;  %v10215_v10 = vld [vmem:[%s18373_s15 + $0x1f8] sm:$0xf0] }
0x1143   :  { %8639 = vmatpush.bf16.msra.mxu2 %v10326_v0  ;;  %8652 = vmatpush.bf16.msra.mxu3 %v10454_v21  ;;  %v10245_v0 = vld [vmem:[%s18373_s15 + $0x228] sm:$0xf]  ;;  %v11268_v21 = vld [vmem:[%s18373_s15 + $0x234] sm:$0xf0]  ;;  %v11222_v14 = vld [vmem:[%s18373_s15 + $0xcc] sm:$0xf] }
0x1144   :  { %v10246_v17 = vor.u32 %v11268_v21, %v10245_v0  ;;  %v10805_v0 = vld [vmem:[%s18373_s15 + $0x688] sm:$0xf]  ;;  %v11408_v21 = vld [vmem:[%s18373_s15 + $0x694] sm:$0xf0] }
0x1145   :  { %8615 = vmatpush.bf16.msra.mxu0 %v10038_v1  ;;  %8628 = vmatpush.bf16.msra.mxu1 %v10166_v55  ;;  %v10581_v1 = vld [vmem:[%s18373_s15 + $0x4c8] sm:$0xf]  ;;  %v11352_v55 = vld [vmem:[%s18373_s15 + $0x4d4] sm:$0xf0] }
0x1146   :  { %v10582_v62 = vor.u32 %v11352_v55, %v10581_v1  ;;  %v10806_v1 = vor.u32 %v11408_v21, %v10805_v0  ;;  %v10501_v51 = vld [vmem:[%s18373_s15 + $0x428] sm:$0xf]  ;;  %v11332_v59 = vld [vmem:[%s18373_s15 + $0x434] sm:$0xf0] }
0x1147   :  { %8640 = vmatpush.bf16.msra.mxu2 %v10310_v63  ;;  %8653 = vmatpush.bf16.msra.mxu3 %v10438_v26  ;;  %v10374_v63 = vor.u32 %v11300_v16, %v10373_v7  ;;  %v11384_v26 = vld [vmem:[%s18373_s15 + $0x5d4] sm:$0xf0]  ;;  %v10933_v7 = vld [vmem:[%s18373_s15 + $0x788] sm:$0xf] }
0x1148   :  { %v10710_v36 = vor.u32 %v11384_v26, %v10709_v41  ;;  %v11440_v16 = vld [vmem:[%s18373_s15 + $0x794] sm:$0xf0]  ;;  %v10645_v41 = vld [vmem:[%s18373_s15 + $0x548] sm:$0xf] }
0x1149   :  { %8616 = vmatpush.bf16.msra.mxu0 %v10022_v3  ;;  %8629 = vmatpush.bf16.msra.mxu1 %v10150_v33  ;;  %v10981_v3 = vld [vmem:[%s18373_s15 + $0x7e8] sm:$0xf]  ;;  %v11452_v33 = vld [vmem:[%s18373_s15 + $0x7f4] sm:$0xf0]  ;;  %v10934_v55 = vor.u32 %v11440_v16, %v10933_v7  ;;  %v11290_v7 = vld [vmem:[%s18373_s15 + $0x2ec] sm:$0xf] }
0x114a   :  { %v10982_v47 = vor.u32 %v11452_v33, %v10981_v3  ;;  %v11404_v26 = vld [vmem:[%s18373_s15 + $0x674] sm:$0xf0]  ;;  %v10869_v0 = vld [vmem:[%s18373_s15 + $0x708] sm:$0xf]  ;;  %v10343_v16 = vld [vmem:[%s18373_s15 + $0x2f8] sm:$0xf0] }
0x114b   :  { %8641 = vmatpush.bf16.msra.mxu2 %v10294_v19  ;;  %8654 = vmatpush.bf16.msra.mxu3 %v10422_v37  ;;  %v10230_v19 = vor.u32 %v11264_v6, %v10229_v32  ;;  %v10358_v37 = vor.u32 %v11296_v40, %v10357_v46  ;;  %v10917_v32 = vld [vmem:[%s18373_s15 + $0x768] sm:$0xf]  ;;  %v11436_v6 = vld [vmem:[%s18373_s15 + $0x774] sm:$0xf0] }
0x114c   :  { %v10918_v33 = vor.u32 %v11436_v6, %v10917_v32  ;;  %v11360_v23 = vld [vmem:[%s18373_s15 + $0x514] sm:$0xf0]  ;;  %v10346_v32 = vor.u32 %v11290_v7, %v10343_v16  ;;  %v11238_v7 = vld [vmem:[%s18373_s15 + $0x14c] sm:$0xf]  ;;  %v10135_v16 = vld [vmem:[%s18373_s15 + $0x158] sm:$0xf0] }
0x114d   :  { %8617 = vmatpush.bf16.msra.mxu0 %v10006_v27  ;;  %8630 = vmatpush.bf16.msra.mxu1 %v10134_v8  ;;  %v10837_v27 = vld [vmem:[%s18373_s15 + $0x6c8] sm:$0xf]  ;;  %v11416_v8 = vld [vmem:[%s18373_s15 + $0x6d4] sm:$0xf0] }
0x114e   :  { %v10838_v30 = vor.u32 %v11416_v8, %v10837_v27  ;;  %v10613_v27 = vld [vmem:[%s18373_s15 + $0x508] sm:$0xf]  ;;  %v11424_v21 = vld [vmem:[%s18373_s15 + $0x714] sm:$0xf0] }
0x114f   :  { %8642 = vmatpush.bf16.msra.mxu2 %v10278_v4  ;;  %8655 = vmatpush.bf16.msra.mxu3 %v10406_v22  ;;  %v10566_v4 = vor.u32 %v11348_v38, %v10565_v2  ;;  %v10694_v22 = vor.u32 %v11380_v29, %v10693_v15  ;;  %v10901_v2 = vld [vmem:[%s18373_s15 + $0x748] sm:$0xf]  ;;  %v11432_v38 = vld [vmem:[%s18373_s15 + $0x754] sm:$0xf0] }
0x1150   :  { %v10485_v15 = vld [vmem:[%s18373_s15 + $0x408] sm:$0xf]  ;;  %v11328_v29 = vld [vmem:[%s18373_s15 + $0x414] sm:$0xf0]  ;;  %v10902_v48 = vor.u32 %v11432_v38, %v10901_v2  ;;  %v11214_v2 = vld [vmem:[%s18373_s15 + $0x8c] sm:$0xf] }
0x1151   :  { %8618 = vmatpush.bf16.msra.mxu0 %v9990_v44  ;;  %8631 = vmatpush.bf16.msra.mxu1 %v10118_v52  ;;  %v10821_v44 = vld [vmem:[%s18373_s15 + $0x6a8] sm:$0xf]  ;;  %v11412_v52 = vld [vmem:[%s18373_s15 + $0x6b4] sm:$0xf0]  ;;  %v10039_v38 = vld [vmem:[%s18373_s15 + $0x98] sm:$0xf0] }
0x1152   :  { %v10822_v9 = vor.u32 %v11412_v52, %v10821_v44  ;;  %v10486_v44 = vor.u32 %v11328_v29, %v10485_v15  ;;  %v10614_v52 = vor.u32 %v11360_v23, %v10613_v27  ;;  %v11246_v29 = vld [vmem:[%s18373_s15 + $0x18c] sm:$0xf]  ;;  %v10167_v27 = vld [vmem:[%s18373_s15 + $0x198] sm:$0xf0] }
0x1153   :  { %8643 = vmatpush.bf16.msra.mxu2 %v10262_v56  ;;  %8656 = vmatpush.bf16.msra.mxu3 %v10390_v13  ;;  %v10678_v56 = vor.u32 %v11376_v11, %v10677_v12  ;;  %v10533_v13 = vld [vmem:[%s18373_s15 + $0x468] sm:$0xf]  ;;  %v11428_v11 = vld [vmem:[%s18373_s15 + $0x734] sm:$0xf0]  ;;  %v11314_v23 = vld [vmem:[%s18373_s15 + $0x3ac] sm:$0xf] }
0x1154   :  { %v10885_v12 = vld [vmem:[%s18373_s15 + $0x728] sm:$0xf] }
0x1155   :  { %8619 = vmatpush.bf16.msra.mxu0 %v9974_v39  ;;  %8632 = vmatpush.bf16.msra.mxu1 %v10102_v43  ;;  %v10534_v39 = vor.u32 %v11340_v57, %v10533_v13  ;;  %v10662_v43 = vor.u32 %v11372_v24, %v10661_v50  ;;  %v11254_v13 = vld [vmem:[%s18373_s15 + $0x1cc] sm:$0xf]  ;;  %v10199_v57 = vld [vmem:[%s18373_s15 + $0x1d8] sm:$0xf0]  ;;  %v10741_v50 = vld [vmem:[%s18373_s15 + $0x608] sm:$0xf] }
0x1156   :  { %v11392_v24 = vld [vmem:[%s18373_s15 + $0x614] sm:$0xf0] }
0x1157   :  { %8644 = vmatpush.bf16.msra.mxu2 %v10246_v17  ;;  %8657 = vmatpush.bf16.msra.mxu3 %v10374_v63  ;;  %v11368_v17 = vld [vmem:[%s18373_s15 + $0x554] sm:$0xf0]  ;;  %v10789_v63 = vld [vmem:[%s18373_s15 + $0x668] sm:$0xf] }
0x1158   :  { %8620 = vmatmul.bf16.vlgmr.msra.gmra.mxu0 %v17031_v60  ;;  %8633 = vmatmul.bf16.vlgmr.msra.gmra.mxu1 %v17033_v5  ;;  %v10646_v40 = vor.u32 %v11368_v17, %v10645_v41  ;;  %v10790_v3 = vor.u32 %v11404_v26, %v10789_v63  ;;  %v10870_v41 = vor.u32 %v11424_v21, %v10869_v0  ;;  %v11218_v17 = vld [vmem:[%s18373_s15 + $0xac] sm:$0xf]  ;;  %v10055_v63 = vld [vmem:[%s18373_s15 + $0xb8] sm:$0xf0] }
0x1159   :  { %8664 = vmatpush.bf16.msrb.mxu0 %v10598_v61  ;;  %8677 = vmatpush.bf16.msrb.mxu1 %v10726_v49  ;;  %v10517_v61 = vld [vmem:[%s18373_s15 + $0x448] sm:$0xf]  ;;  %v11336_v49 = vld [vmem:[%s18373_s15 + $0x454] sm:$0xf0]  ;;  %v11250_v26 = vld [vmem:[%s18373_s15 + $0x1ac] sm:$0xf] }
0x115a   :  { %v10518_v46 = vor.u32 %v11336_v49, %v10517_v61  ;;  %v17860_v61 = vld [vmem:[%s18374_s16] sm:$0xf] }
0x115b   :  { %8645 = vmatpush.bf16.msra.mxu2 %v10230_v19  ;;  %8658 = vmatpush.bf16.msra.mxu3 %v10358_v37  ;;  %v10773_v19 = vld [vmem:[%s18373_s15 + $0x648] sm:$0xf]  ;;  %v11400_v37 = vld [vmem:[%s18373_s15 + $0x654] sm:$0xf0] }
0x115c   :  { %v10774_v8 = vor.u32 %v11400_v37, %v10773_v19 }
0x115d   :  { %8665 = vmatpush.bf16.msrb.mxu0 %v10582_v62  ;;  %8678 = vmatpush.bf16.msrb.mxu1 %v10710_v36  ;;  %v10629_v62 = vld [vmem:[%s18373_s15 + $0x528] sm:$0xf]  ;;  %v11364_v36 = vld [vmem:[%s18373_s15 + $0x534] sm:$0xf0] }
0x115e   :  { %8646 = vmatmul.bf16.vlgmr.msra.gmra.mxu2 %v17075_v25  ;;  %8659 = vmatmul.bf16.vlgmr.msra.gmra.mxu3 %v17077_v34 }
0x115f   :  { %8690 = vmatpush.bf16.msrb.mxu2 %v10854_v20  ;;  %8703 = vmatpush.bf16.msrb.mxu3 %v10982_v47  ;;  %v10502_v20 = vor.u32 %v11332_v59, %v10501_v51  ;;  %v10630_v47 = vor.u32 %v11364_v36, %v10629_v62  ;;  %v11286_v51 = vld [vmem:[%s18373_s15 + $0x2cc] sm:$0xf]  ;;  %v10327_v59 = vld [vmem:[%s18373_s15 + $0x2d8] sm:$0xf0]  ;;  %v10058_v62 = vor.u32 %v11218_v17, %v10055_v63 }
0x1160   :  { %v11202_v17 = vld [vmem:[%s18373_s15 + $0x2c] sm:$0xf]  ;;  %v9991_v63 = vld [vmem:[%s18373_s15 + $0x38] sm:$0xf0] }
0x1161   :  { %8666 = vmatpush.bf16.msrb.mxu0 %v10566_v4  ;;  %8679 = vmatpush.bf16.msrb.mxu1 %v10694_v22  ;;  %v11226_v4 = vld [vmem:[%s18373_s15 + $0xec] sm:$0xf]  ;;  %v10087_v22 = vld [vmem:[%s18373_s15 + $0xf8] sm:$0xf0] }
0x1162   :  { %v10090_v31 = vor.u32 %v11226_v4, %v10087_v22  ;;  %v10439_v4 = vld [vmem:[%s18373_s15 + $0x3b8] sm:$0xf0] }
0x1163   :  { %8691 = vmatpush.bf16.msrb.mxu2 %v10838_v30  ;;  %8704 = vmatpush.bf16.msrb.mxu3 %v10966_v42  ;;  %v10757_v30 = vld [vmem:[%s18373_s15 + $0x628] sm:$0xf]  ;;  %v11396_v42 = vld [vmem:[%s18373_s15 + $0x634] sm:$0xf0] }
0x1165   :  { %8667 = vmatpush.bf16.msrb.mxu0 %v10550_v58  ;;  %8680 = vmatpush.bf16.msrb.mxu1 %v10678_v56  ;;  %v10218_v58 = vor.u32 %v11258_v45, %v10215_v10  ;;  %v10071_v56 = vld [vmem:[%s18373_s15 + $0xd8] sm:$0xf0]  ;;  %v10042_v45 = vor.u32 %v11214_v2, %v10039_v38  ;;  %v10170_v10 = vor.u32 %v11246_v29, %v10167_v27  ;;  %v11230_v38 = vld [vmem:[%s18373_s15 + $0x10c] sm:$0xf] }
0x1166   :  { %v10074_v49 = vor.u32 %v11222_v14, %v10071_v56  ;;  %v11278_v14 = vld [vmem:[%s18373_s15 + $0x28c] sm:$0xf]  ;;  %v10423_v56 = vld [vmem:[%s18373_s15 + $0x398] sm:$0xf0] }
0x1167   :  { %8692 = vmatpush.bf16.msrb.mxu2 %v10822_v9  ;;  %8705 = vmatpush.bf16.msrb.mxu3 %v10950_v53  ;;  %v10758_v9 = vor.u32 %v11396_v42, %v10757_v30  ;;  %v10886_v53 = vor.u32 %v11428_v11, %v10885_v12  ;;  %v11210_v30 = vld [vmem:[%s18373_s15 + $0x6c] sm:$0xf]  ;;  %v10023_v42 = vld [vmem:[%s18373_s15 + $0x78] sm:$0xf0]  ;;  %v10442_v11 = vor.u32 %v11314_v23, %v10439_v4 }
0x1168   :  { %v9975_v2 = vld [vmem:[%s18373_s15 + $0x18] sm:$0xf0]  ;;  %v11386_v23 = vld [vmem:[%s18373_s15 + $0x5ec] sm:$0xf] }
0x1169   :  { %8668 = vmatpush.bf16.msrb.mxu0 %v10534_v39  ;;  %8681 = vmatpush.bf16.msrb.mxu1 %v10662_v43  ;;  %v11322_v39 = vld [vmem:[%s18373_s15 + $0x3ec] sm:$0xf]  ;;  %v10471_v43 = vld [vmem:[%s18373_s15 + $0x3f8] sm:$0xf0] }
0x116a   :  { %v10474_v6 = vor.u32 %v11322_v39, %v10471_v43  ;;  %v11274_v39 = vld [vmem:[%s18373_s15 + $0x26c] sm:$0xf]  ;;  %v10279_v43 = vld [vmem:[%s18373_s15 + $0x278] sm:$0xf0] }
0x116b   :  { %8693 = vmatpush.bf16.msrb.mxu2 %v10806_v1  ;;  %8706 = vmatpush.bf16.msrb.mxu3 %v10934_v55  ;;  %v10202_v1 = vor.u32 %v11254_v13, %v10199_v57  ;;  %v10742_v55 = vor.u32 %v11392_v24, %v10741_v50  ;;  %v10026_v13 = vor.u32 %v11210_v30, %v10023_v42  ;;  %v11206_v50 = vld [vmem:[%s18373_s15 + $0x4c] sm:$0xf]  ;;  %v10007_v24 = vld [vmem:[%s18373_s15 + $0x58] sm:$0xf0] }
0x116c   :  { %v10103_v27 = vld [vmem:[%s18373_s15 + $0x118] sm:$0xf0]  ;;  %v11298_v30 = vld [vmem:[%s18373_s15 + $0x32c] sm:$0xf] }
0x116d   :  { %8669 = vmatpush.bf16.msrb.mxu0 %v10518_v46  ;;  %8682 = vmatpush.bf16.msrb.mxu1 %v10646_v40  ;;  %v10183_v46 = vld [vmem:[%s18373_s15 + $0x1b8] sm:$0xf0]  ;;  %v7116_v40 = vperm.slane %v17860_v61, 0 }
0x116e   :  { %v10186_v36 = vor.u32 %v11250_v26, %v10183_v46  ;;  %v10727_v4 = vld [vmem:[%s18373_s15 + $0x5f8] sm:$0xf0] }
0x116f   :  { %8694 = vmatpush.bf16.msrb.mxu2 %v10790_v3  ;;  %8707 = vmatpush.bf16.msrb.mxu3 %v10918_v33  ;;  %v11318_v3 = vld [vmem:[%s18373_s15 + $0x3cc] sm:$0xf]  ;;  %v10455_v33 = vld [vmem:[%s18373_s15 + $0x3d8] sm:$0xf0] }
0x1170   :  { %v10458_v15 = vor.u32 %v11318_v3, %v10455_v33  ;;  %v10263_v3 = vld [vmem:[%s18373_s15 + $0x258] sm:$0xf0]  ;;  %v11302_v33 = vld [vmem:[%s18373_s15 + $0x34c] sm:$0xf] }
0x1171   :  { %8670 = vmatpush.bf16.msrb.mxu0 %v10502_v20  ;;  %8683 = vmatpush.bf16.msrb.mxu1 %v10630_v47  ;;  %v10330_v47 = vor.u32 %v11286_v51, %v10327_v59  ;;  %v10119_v51 = vld [vmem:[%s18373_s15 + $0x138] sm:$0xf0]  ;;  %v11270_v59 = vld [vmem:[%s18373_s15 + $0x24c] sm:$0xf] }
0x1172   :  { %v10375_v42 = vld [vmem:[%s18373_s15 + $0x338] sm:$0xf0] }
0x1173   :  { %8695 = vmatpush.bf16.msrb.mxu2 %v10774_v8  ;;  %8708 = vmatpush.bf16.msrb.mxu3 %v10902_v48  ;;  %v11282_v8 = vld [vmem:[%s18373_s15 + $0x2ac] sm:$0xf]  ;;  %v10311_v48 = vld [vmem:[%s18373_s15 + $0x2b8] sm:$0xf0] }
0x1174   :  { %v8413_v19 = vpop.f32.mrf.mxu0  ;;  %v8426_v37 = vpop.f32.mrf.mxu1  ;;  %v10314_v12 = vor.u32 %v11282_v8, %v10311_v48  ;;  %v11354_v8 = vld [vmem:[%s18373_s15 + $0x4ec] sm:$0xf]  ;;  %v10599_v48 = vld [vmem:[%s18373_s15 + $0x4f8] sm:$0xf0] }
0x1175   :  { %8671 = vmatpush.bf16.msrb.mxu0 %v10486_v44  ;;  %8684 = vmatpush.bf16.msrb.mxu1 %v10614_v52  ;;  %v8414_v20 = vadd.f32 %v8413_v19, %v7116_v40  ;;  %v11242_v44 = vld [vmem:[%s18373_s15 + $0x16c] sm:$0xf]  ;;  %v10151_v52 = vld [vmem:[%s18373_s15 + $0x178] sm:$0xf0] }
0x1176   :  { %v10154_v57 = vor.u32 %v11242_v44, %v10151_v52  ;;  %v11234_v40 = vld [vmem:[%s18373_s15 + $0x12c] sm:$0xf] }
0x1177   :  { %8696 = vmatpush.bf16.msrb.mxu2 %v10758_v9  ;;  %8709 = vmatpush.bf16.msrb.mxu3 %v10886_v53  ;;  %v17915_v22 = vadd.f32 %v8426_v37, %v8414_v20  ;;  %v10122_v19 = vor.u32 %v11234_v40, %v10119_v51  ;;  %v11198_v37 = vld [vmem:[%s18373_s15 + $0xc] sm:$0xf] }
0x1178   :  { %8672 = vmatmul.bf16.vlgmr.msrb.gmra.mxu0 %v17137_v18  ;;  %8685 = vmatmul.bf16.vlgmr.msrb.gmra.mxu1 %v17139_v28 }
0x1179   :  { %8716 = vmatpush.bf16.msra.mxu0 %v10090_v31  ;;  %8729 = vmatpush.bf16.msra.mxu1 %v10218_v58  ;;  %v10295_v31 = vld [vmem:[%s18373_s15 + $0x298] sm:$0xf0]  ;;  %v11310_v58 = vld [vmem:[%s18373_s15 + $0x38c] sm:$0xf] }
0x117a   :  { %v10298_v0 = vor.u32 %v11278_v14, %v10295_v31  ;;  %v10426_v21 = vor.u32 %v11310_v58, %v10423_v56  ;;  %v10602_v14 = vor.u32 %v11354_v8, %v10599_v48  ;;  %v10730_v31 = vor.u32 %v11386_v23, %v10727_v4  ;;  %v11350_v58 = vld [vmem:[%s18373_s15 + $0x4cc] sm:$0xf]  ;;  %v10583_v56 = vld [vmem:[%s18373_s15 + $0x4d8] sm:$0xf0] }
0x117b   :  { %8697 = vmatpush.bf16.msrb.mxu2 %v10742_v55  ;;  %8710 = vmatpush.bf16.msrb.mxu3 %v10870_v41  ;;  %v10010_v55 = vor.u32 %v11206_v50, %v10007_v24  ;;  %v10138_v41 = vor.u32 %v11238_v7, %v10135_v16  ;;  %v11262_v50 = vld [vmem:[%s18373_s15 + $0x20c] sm:$0xf]  ;;  %v10231_v24 = vld [vmem:[%s18373_s15 + $0x218] sm:$0xf0] }
0x117c   :  { %v8415_v9 = vpop.f32.mrf.mxu0  ;;  %v8428_v53 = vpop.f32.mrf.mxu1  ;;  %v11418_v7 = vld [vmem:[%s18373_s15 + $0x6ec] sm:$0xf]  ;;  %v10855_v16 = vld [vmem:[%s18373_s15 + $0x6f8] sm:$0xf0] }
0x117d   :  { %8717 = vmatpush.bf16.msra.mxu0 %v10074_v49  ;;  %8730 = vmatpush.bf16.msra.mxu1 %v10202_v1  ;;  %v11306_v49 = vld [vmem:[%s18373_s15 + $0x36c] sm:$0xf]  ;;  %v10407_v1 = vld [vmem:[%s18373_s15 + $0x378] sm:$0xf0]  ;;  %v10378_v9 = vor.u32 %v11298_v30, %v10375_v42  ;;  %v10858_v40 = vor.u32 %v11418_v7, %v10855_v16 }
0x117e   :  { %8698 = vmatmul.bf16.vlgmr.msrb.gmra.mxu2 %v17182_v54  ;;  %8711 = vmatmul.bf16.vlgmr.msrb.gmra.mxu3 %v17184_v35  ;;  %v10410_v46 = vor.u32 %v11306_v49, %v10407_v1  ;;  %v10711_v53 = vld [vmem:[%s18373_s15 + $0x5d8] sm:$0xf0]  ;;  %v11374_v8 = vld [vmem:[%s18373_s15 + $0x58c] sm:$0xf] }
0x117f   :  { %8742 = vmatpush.bf16.msra.mxu2 %v10346_v32  ;;  %8755 = vmatpush.bf16.msra.mxu3 %v10474_v6  ;;  %v10282_v6 = vor.u32 %v11274_v39, %v10279_v43  ;;  %v11450_v39 = vld [vmem:[%s18373_s15 + $0x7ec] sm:$0xf]  ;;  %v10983_v43 = vld [vmem:[%s18373_s15 + $0x7f8] sm:$0xf0] }
0x1180   :  { %v10986_v51 = vor.u32 %v11450_v39, %v10983_v43  ;;  %v10679_v48 = vld [vmem:[%s18373_s15 + $0x598] sm:$0xf0]  ;;  %v11410_v23 = vld [vmem:[%s18373_s15 + $0x6ac] sm:$0xf] }
0x1181   :  { %8718 = vmatpush.bf16.msra.mxu0 %v10058_v62  ;;  %8731 = vmatpush.bf16.msra.mxu1 %v10186_v36  ;;  %v17971_v26 = vpop.f32.mrf.mxu2  ;;  %v17973_v32 = vpop.f32.mrf.mxu3  ;;  %v10391_v62 = vld [vmem:[%s18373_s15 + $0x358] sm:$0xf0]  ;;  %v9994_v36 = vor.u32 %v11202_v17, %v9991_v63  ;;  %v10234_v17 = vor.u32 %v11262_v50, %v10231_v24  ;;  %v11366_v39 = vld [vmem:[%s18373_s15 + $0x54c] sm:$0xf] }
0x1182   :  { %v10394_v29 = vor.u32 %v11302_v33, %v10391_v62  ;;  %v11414_v33 = vld [vmem:[%s18373_s15 + $0x6cc] sm:$0xf]  ;;  %v10967_v62 = vld [vmem:[%s18373_s15 + $0x7d8] sm:$0xf0] }
0x1183   :  { %8743 = vmatpush.bf16.msra.mxu2 %v10330_v47  ;;  %8756 = vmatpush.bf16.msra.mxu3 %v10458_v15  ;;  %v10266_v15 = vor.u32 %v11270_v59, %v10263_v3  ;;  %v11378_v59 = vld [vmem:[%s18373_s15 + $0x5ac] sm:$0xf]  ;;  %v10695_v3 = vld [vmem:[%s18373_s15 + $0x5b8] sm:$0xf0] }
0x1184   :  { %v10823_v4 = vld [vmem:[%s18373_s15 + $0x6b8] sm:$0xf0] }
0x1185   :  { %8719 = vmatpush.bf16.msra.mxu0 %v10042_v45  ;;  %8732 = vmatpush.bf16.msra.mxu1 %v10170_v10  ;;  %v18002_v20 = vpop.f32.mrf.mxu0  ;;  %v18004_v47 = vpop.f32.mrf.mxu1  ;;  %v11266_v45 = vld [vmem:[%s18373_s15 + $0x22c] sm:$0xf]  ;;  %v10247_v10 = vld [vmem:[%s18373_s15 + $0x238] sm:$0xf0] }
0x1186   :  { %v10647_v43 = vld [vmem:[%s18373_s15 + $0x558] sm:$0xf0] }
0x1187   :  { %8744 = vmatpush.bf16.msra.mxu2 %v10314_v12  ;;  %8757 = vmatpush.bf16.msra.mxu3 %v10442_v11  ;;  %v9978_v12 = vor.u32 %v11198_v37, %v9975_v2  ;;  %v10106_v11 = vor.u32 %v11230_v38, %v10103_v27  ;;  %v10698_v2 = vor.u32 %v11378_v59, %v10695_v3  ;;  %v11342_v38 = vld [vmem:[%s18373_s15 + $0x48c] sm:$0xf] }
0x1189   :  { %8720 = vmatpush.bf16.msra.mxu0 %v10026_v13  ;;  %8733 = vmatpush.bf16.msra.mxu1 %v10154_v57  ;;  %v8441_v44 = vpop.f32.mrf.mxu2  ;;  %v8454_v52 = vpop.f32.mrf.mxu3  ;;  %v11382_v13 = vld [vmem:[%s18373_s15 + $0x5cc] sm:$0xf]  ;;  %v10250_v57 = vor.u32 %v11266_v45, %v10247_v10  ;;  %v10951_v10 = vld [vmem:[%s18373_s15 + $0x7b8] sm:$0xf0] }
0x118a   :  { %v11442_v45 = vld [vmem:[%s18373_s15 + $0x7ac] sm:$0xf]  ;;  %v10535_v52 = vld [vmem:[%s18373_s15 + $0x478] sm:$0xf0] }
0x118b   :  { %8745 = vmatpush.bf16.msra.mxu2 %v10298_v0  ;;  %8758 = vmatpush.bf16.msra.mxu3 %v10426_v21  ;;  %v11294_v0 = vld [vmem:[%s18373_s15 + $0x30c] sm:$0xf]  ;;  %v10359_v21 = vld [vmem:[%s18373_s15 + $0x318] sm:$0xf0] }
0x118c   :  { %v10362_v63 = vor.u32 %v11294_v0, %v10359_v21  ;;  %v11338_v44 = vld [vmem:[%s18373_s15 + $0x46c] sm:$0xf]  ;;  %v10519_v21 = vld [vmem:[%s18373_s15 + $0x458] sm:$0xf0] }
0x118d   :  { %8721 = vmatpush.bf16.msra.mxu0 %v10010_v55  ;;  %8734 = vmatpush.bf16.msra.mxu1 %v10138_v41  ;;  %v8467_v49 = vpop.f32.mrf.mxu0  ;;  %v8480_v1 = vpop.f32.mrf.mxu1  ;;  %v10586_v55 = vor.u32 %v11350_v58, %v10583_v56  ;;  %v10714_v41 = vor.u32 %v11382_v13, %v10711_v53  ;;  %v11406_v58 = vld [vmem:[%s18373_s15 + $0x68c] sm:$0xf]  ;;  %v10807_v56 = vld [vmem:[%s18373_s15 + $0x698] sm:$0xf0]  ;;  %v10538_v50 = vor.u32 %v11338_v44, %v10535_v52 }
0x118e   :  { %v11438_v13 = vld [vmem:[%s18373_s15 + $0x78c] sm:$0xf]  ;;  %v10810_v7 = vor.u32 %v11406_v58, %v10807_v56  ;;  %v10791_v1 = vld [vmem:[%s18373_s15 + $0x678] sm:$0xf0] }
0x118f   :  { %8746 = vmatpush.bf16.msra.mxu2 %v10282_v6  ;;  %8759 = vmatpush.bf16.msra.mxu3 %v10410_v46  ;;  %v11346_v6 = vld [vmem:[%s18373_s15 + $0x4ac] sm:$0xf]  ;;  %v10567_v46 = vld [vmem:[%s18373_s15 + $0x4b8] sm:$0xf0] }
0x1190   :  { %v10570_v37 = vor.u32 %v11346_v6, %v10567_v46  ;;  %v11334_v0 = vld [vmem:[%s18373_s15 + $0x44c] sm:$0xf]  ;;  %v10650_v46 = vor.u32 %v11366_v39, %v10647_v43  ;;  %v10887_v52 = vld [vmem:[%s18373_s15 + $0x738] sm:$0xf0]  ;;  %v11467_v39 = vld [vmem:[%s18375_s17 + $0x70] sm:$0xff] }
0x1191   :  { %8722 = vmatpush.bf16.msra.mxu0 %v9994_v36  ;;  %8735 = vmatpush.bf16.msra.mxu1 %v10122_v19  ;;  %v18095_v36 = vpop.f32.mrf.mxu2  ;;  %v18097_v19 = vpop.f32.mrf.mxu3  ;;  %v11402_v49 = vld [vmem:[%s18373_s15 + $0x66c] sm:$0xf]  ;;  %v10522_v6 = vor.u32 %v11334_v0, %v10519_v21  ;;  %v11468_v56 = vld [vmem:[%s18375_s17 + $0x78] sm:$0xff]  ;;  %v11459_v21 = vld [vmem:[%s18375_s17 + $0x30] sm:$0xff] }
0x1192   :  { %v10794_v59 = vor.u32 %v11402_v49, %v10791_v1  ;;  %v11426_v44 = vld [vmem:[%s18373_s15 + $0x72c] sm:$0xf]  ;;  %v8440_v49 = vadd.f32 %v17971_v26, %v17915_v22 }
0x1193   :  { %8747 = vmatpush.bf16.msra.mxu2 %v10266_v15  ;;  %8760 = vmatpush.bf16.msra.mxu3 %v10394_v29  ;;  %v10551_v15 = vld [vmem:[%s18373_s15 + $0x498] sm:$0xf0]  ;;  %v10890_v58 = vor.u32 %v11426_v44, %v10887_v52  ;;  %v11458_v1 = vld [vmem:[%s18375_s17 + $0x28] sm:$0xff]  ;;  %v11471_v52 = vld [vmem:[%s18375_s17 + $0x90] sm:$0xff] }
0x1194   :  { %v11472_v44 = vld [vmem:[%s18375_s17 + $0x98] sm:$0xff] }
0x1195   :  { %8723 = vmatpush.bf16.msra.mxu0 %v9978_v12  ;;  %8736 = vmatpush.bf16.msra.mxu1 %v10106_v11  ;;  %v18125_v30 = vpop.f32.mrf.mxu0  ;;  %v18127_v42 = vpop.f32.mrf.mxu1  ;;  %v10554_v12 = vor.u32 %v11342_v38, %v10551_v15  ;;  %v10682_v11 = vor.u32 %v11374_v8, %v10679_v48  ;;  %v11326_v8 = vld [vmem:[%s18373_s15 + $0x40c] sm:$0xf] }
0x1197   :  { %8748 = vmatpush.bf16.msra.mxu2 %v10250_v57  ;;  %8761 = vmatpush.bf16.msra.mxu3 %v10378_v9  ;;  %v10935_v57 = vld [vmem:[%s18373_s15 + $0x798] sm:$0xf0] }
0x1198   :  { %8724 = vmatmul.bf16.vlgmr.msra.gmra.mxu0 %v17031_v60  ;;  %8737 = vmatmul.bf16.vlgmr.msra.gmra.mxu1 %v17033_v5  ;;  %v10839_v60 = vld [vmem:[%s18373_s15 + $0x6d8] sm:$0xf0]  ;;  %v11446_v5 = vld [vmem:[%s18373_s15 + $0x7cc] sm:$0xf]  ;;  %v10938_v16 = vor.u32 %v11438_v13, %v10935_v57 }
0x1199   :  { %8768 = vmatpush.bf16.msrb.mxu0 %v10602_v14  ;;  %8781 = vmatpush.bf16.msrb.mxu1 %v10730_v31  ;;  %v10842_v29 = vor.u32 %v11414_v33, %v10839_v60  ;;  %v10970_v27 = vor.u32 %v11446_v5, %v10967_v62  ;;  %v11370_v14 = vld [vmem:[%s18373_s15 + $0x56c] sm:$0xf]  ;;  %v10663_v31 = vld [vmem:[%s18373_s15 + $0x578] sm:$0xf0]  ;;  %v8493_v9 = vpop.f32.mrf.mxu2  ;;  %v8506_v53 = vpop.f32.mrf.mxu3 }
0x119a   :  { %v10666_v24 = vor.u32 %v11370_v14, %v10663_v31  ;;  %v11362_v33 = vld [vmem:[%s18373_s15 + $0x52c] sm:$0xf]  ;;  %v10631_v60 = vld [vmem:[%s18373_s15 + $0x538] sm:$0xf0]  ;;  %v7117_v9 = vperm.slane %v17860_v61, 1 }
0x119b   :  { %8749 = vmatpush.bf16.msra.mxu2 %v10234_v17  ;;  %8762 = vmatpush.bf16.msra.mxu3 %v10362_v63  ;;  %v11398_v5 = vld [vmem:[%s18373_s15 + $0x64c] sm:$0xf]  ;;  %v10775_v62 = vld [vmem:[%s18373_s15 + $0x658] sm:$0xf0] }
0x119c   :  { %v10778_v48 = vor.u32 %v11398_v5, %v10775_v62  ;;  %v11460_v14 = vld [vmem:[%s18375_s17 + $0x38] sm:$0xff]  ;;  %v11390_v13 = vld [vmem:[%s18373_s15 + $0x60c] sm:$0xf]  ;;  %v8518_v43 = vadd.f32 %v18125_v30, %v7117_v9  ;;  %v7118_v9 = vperm.slane %v17860_v61, 2 }
0x119d   :  { %8769 = vmatpush.bf16.msrb.mxu0 %v10586_v55  ;;  %8782 = vmatpush.bf16.msrb.mxu1 %v10714_v41  ;;  %v11434_v55 = vld [vmem:[%s18373_s15 + $0x76c] sm:$0xf]  ;;  %v10919_v41 = vld [vmem:[%s18373_s15 + $0x778] sm:$0xf0]  ;;  %v8519_v17 = vpop.f32.mrf.mxu0  ;;  %v8532_v63 = vpop.f32.mrf.mxu1 }
0x119e   :  { %8750 = vmatmul.bf16.vlgmr.msra.gmra.mxu2 %v17075_v25  ;;  %8763 = vmatmul.bf16.vlgmr.msra.gmra.mxu3 %v17077_v34  ;;  %v10826_v25 = vor.u32 %v11410_v23, %v10823_v4  ;;  %v10954_v34 = vor.u32 %v11442_v45, %v10951_v10  ;;  %v10922_v3 = vor.u32 %v11434_v55, %v10919_v41  ;;  %v10487_v4 = vld [vmem:[%s18373_s15 + $0x418] sm:$0xf0]  ;;  %v11358_v45 = vld [vmem:[%s18373_s15 + $0x50c] sm:$0xf]  ;;  %v11457_v41 = vld [vmem:[%s18375_s17 + $0x20] sm:$0xff] }
0x119f   :  { %8794 = vmatpush.bf16.msrb.mxu2 %v10858_v40  ;;  %8807 = vmatpush.bf16.msrb.mxu3 %v10986_v51  ;;  %v11330_v40 = vld [vmem:[%s18373_s15 + $0x42c] sm:$0xf]  ;;  %v10503_v51 = vld [vmem:[%s18373_s15 + $0x438] sm:$0xf0]  ;;  %v8531_v30 = vadd.f32 %v18127_v42, %v8518_v43  ;;  %v11465_v17 = vld [vmem:[%s18375_s17 + $0x60] sm:$0xff] }
0x11a0   :  { %v10615_v10 = vld [vmem:[%s18373_s15 + $0x518] sm:$0xf0]  ;;  %v11422_v53 = vld [vmem:[%s18373_s15 + $0x70c] sm:$0xf] }
0x11a1   :  { %8770 = vmatpush.bf16.msrb.mxu0 %v10570_v37  ;;  %8783 = vmatpush.bf16.msrb.mxu1 %v10698_v2  ;;  %v11430_v37 = vld [vmem:[%s18373_s15 + $0x74c] sm:$0xf]  ;;  %v10903_v2 = vld [vmem:[%s18373_s15 + $0x758] sm:$0xf0]  ;;  %v8543_v38 = vpop.f32.mrf.mxu2  ;;  %v18201_v15 = vpop.f32.mrf.mxu3 }
0x11a2   :  { %v10906_v23 = vor.u32 %v11430_v37, %v10903_v2  ;;  %v10743_v57 = vld [vmem:[%s18373_s15 + $0x618] sm:$0xf0]  ;;  %v11466_v55 = vld [vmem:[%s18375_s17 + $0x68] sm:$0xff]  ;;  %v8544_v26 = vadd.f32 %v8543_v38, %v8531_v30 }
0x11a3   :  { %8795 = vmatpush.bf16.msrb.mxu2 %v10842_v29  ;;  %8808 = vmatpush.bf16.msrb.mxu3 %v10970_v27  ;;  %v10506_v29 = vor.u32 %v11330_v40, %v10503_v51  ;;  %v10634_v27 = vor.u32 %v11362_v33, %v10631_v60  ;;  %v11476_v62 = vld [vmem:[%s18375_s17 + $0xb8] sm:$0xff]  ;;  %v11462_v37 = vld [vmem:[%s18375_s17 + $0x48] sm:$0xff] }
0x11a5   :  { %8771 = vmatpush.bf16.msrb.mxu0 %v10554_v12  ;;  %8784 = vmatpush.bf16.msrb.mxu1 %v10682_v11  ;;  %v11394_v12 = vld [vmem:[%s18373_s15 + $0x62c] sm:$0xf]  ;;  %v10759_v11 = vld [vmem:[%s18373_s15 + $0x638] sm:$0xf0] }
0x11a6   :  { %v10762_v31 = vor.u32 %v11394_v12, %v10759_v11  ;;  %v11473_v11 = vld [vmem:[%s18375_s17 + $0xa0] sm:$0xff] }
0x11a7   :  { %8796 = vmatpush.bf16.msrb.mxu2 %v10826_v25  ;;  %8809 = vmatpush.bf16.msrb.mxu3 %v10954_v34  ;;  %v10490_v25 = vor.u32 %v11326_v8, %v10487_v4  ;;  %v10618_v34 = vor.u32 %v11358_v45, %v10615_v10 }
0x11a9   :  { %8772 = vmatpush.bf16.msrb.mxu0 %v10538_v50  ;;  %8785 = vmatpush.bf16.msrb.mxu1 %v10666_v24  ;;  %v10871_v50 = vld [vmem:[%s18373_s15 + $0x718] sm:$0xf0]  ;;  %v8545_v24 = vpop.f32.mrf.mxu2  ;;  %v8558_v0 = vpop.f32.mrf.mxu3 }
0x11ab   :  { %8797 = vmatpush.bf16.msrb.mxu2 %v10810_v7  ;;  %8810 = vmatpush.bf16.msrb.mxu3 %v10938_v16  ;;  %v10746_v7 = vor.u32 %v11390_v13, %v10743_v57  ;;  %v10874_v16 = vor.u32 %v11422_v53, %v10871_v50 }
0x11ad   :  { %8773 = vmatpush.bf16.msrb.mxu0 %v10522_v6  ;;  %8786 = vmatpush.bf16.msrb.mxu1 %v10650_v46 }
0x11af   :  { %8798 = vmatpush.bf16.msrb.mxu2 %v10794_v59  ;;  %8811 = vmatpush.bf16.msrb.mxu3 %v10922_v3  ;;  %v11463_v59 = vld [vmem:[%s18375_s17 + $0x50] sm:$0xff] }
0x11b1   :  { %8774 = vmatpush.bf16.msrb.mxu0 %v10506_v29  ;;  %8787 = vmatpush.bf16.msrb.mxu1 %v10634_v27  ;;  %v11461_v27 = vld [vmem:[%s18375_s17 + $0x40] sm:$0xff] }
0x11b3   :  { %8799 = vmatpush.bf16.msrb.mxu2 %v10778_v48  ;;  %8812 = vmatpush.bf16.msrb.mxu3 %v10906_v23  ;;  %v11474_v23 = vld [vmem:[%s18375_s17 + $0xa8] sm:$0xff] }
0x11b5   :  { %8775 = vmatpush.bf16.msrb.mxu0 %v10490_v25  ;;  %8788 = vmatpush.bf16.msrb.mxu1 %v10618_v34  ;;  %v8582_v22 = vpop.f32.mrf.mxu1 }
0x11b7   :  { %8800 = vmatpush.bf16.msrb.mxu2 %v10762_v31  ;;  %8813 = vmatpush.bf16.msrb.mxu3 %v10890_v58  ;;  %v11470_v58 = vld [vmem:[%s18375_s17 + $0x88] sm:$0xff] }
0x11b8   :  { %8776 = vmatmul.bf16.vlgmr.msrb.gmra.mxu0 %v17137_v18  ;;  %8789 = vmatmul.bf16.vlgmr.msrb.gmra.mxu1 %v17139_v28  ;;  %v8453_v18 = vadd.f32 %v17973_v32, %v8440_v49  ;;  %v8569_v28 = vpop.f32.mrf.mxu0  ;;  %v8557_v32 = vadd.f32 %v18201_v15, %v8544_v26  ;;  %v11453_v15 = vld [vmem:[%s18375_s17] sm:$0xff]  ;;  %v11483_v26 = vld [vmem:[%s18375_s17 + $0xf0] sm:$0xff] }
0x11b9   :  { %9088 = vmatpush.bf16.msra.mxu0 %v11460_v14  ;;  %9101 = vmatpush.bf16.msra.mxu1 %v11468_v56  ;;  %v11469_v56 = vld [vmem:[%s18375_s17 + $0x80] sm:$0xff] }
0x11ba   :  { %v8466_v42 = vadd.f32 %v18002_v20, %v8453_v18  ;;  %v8570_v63 = vadd.f32 %v8569_v28, %v8557_v32  ;;  %v11455_v20 = vld [vmem:[%s18375_s17 + $0x10] sm:$0xff]  ;;  %v11484_v18 = vld [vmem:[%s18375_s17 + $0xf8] sm:$0xff]  ;;  %v11482_v32 = vld [vmem:[%s18375_s17 + $0xe8] sm:$0xff] }
0x11bb   :  { %8801 = vmatpush.bf16.msrb.mxu2 %v10746_v7  ;;  %8814 = vmatpush.bf16.msrb.mxu3 %v10874_v16 }
0x11bc   :  { %v8479_v6 = vadd.f32 %v18004_v47, %v8466_v42  ;;  %v8583_v3 = vadd.f32 %v8582_v22, %v8570_v63  ;;  %v11454_v47 = vld [vmem:[%s18375_s17 + $0x8] sm:$0xff] }
0x11bd   :  { %9089 = vmatpush.bf16.msra.mxu0 %v11459_v21  ;;  %9102 = vmatpush.bf16.msra.mxu1 %v11467_v39  ;;  %v8584_v40 = vpop.f32.mrf.mxu1 }
0x11be   :  { %8802 = vmatmul.bf16.vlgmr.msrb.gmra.mxu2 %v17182_v54  ;;  %8815 = vmatmul.bf16.vlgmr.msrb.gmra.mxu3 %v17184_v35  ;;  %v11456_v54 = vld [vmem:[%s18375_s17 + $0x18] sm:$0xff]  ;;  %v8492_v51 = vadd.f32 %v18095_v36, %v8479_v6 }
0x11bf   :  { %v11464_v35 = vld [vmem:[%s18375_s17 + $0x58] sm:$0xff]  ;;  %9114 = vmatpush.bf16.msra.mxu2 %v11476_v62  ;;  %9127 = vmatpush.bf16.msra.mxu3 %v11484_v18 }
0x11c0   :  { %v8571_v46 = vpop.f32.mrf.mxu0  ;;  %v8505_v36 = vadd.f32 %v18097_v19, %v8492_v51  ;;  %v11475_v19 = vld [vmem:[%s18375_s17 + $0xb0] sm:$0xff]  ;;  %v11480_v6 = vld [vmem:[%s18375_s17 + $0xd8] sm:$0xff]  ;;  %v11478_v51 = vld [vmem:[%s18375_s17 + $0xc8] sm:$0xff] }
0x11c1   :  { %9090 = vmatpush.bf16.msra.mxu0 %v11458_v1  ;;  %9103 = vmatpush.bf16.msra.mxu1 %v11466_v55  ;;  %v8595_v33 = vpop.f32.mrf.mxu2  ;;  %v8608_v60 = vpop.f32.mrf.mxu3  ;;  %v11479_v46 = vld [vmem:[%s18375_s17 + $0xd0] sm:$0xff] }
0x11c2   :  { %v8596_v5 = vadd.f32 %v8595_v33, %v8583_v3  ;;  %v8820_v29 = vmax.f32 %v8505_v36, 0.0  ;;  %v11477_v33 = vld [vmem:[%s18375_s17 + $0xc0] sm:$0xff] }
0x11c3   :  { %9115 = vmatpush.bf16.msra.mxu2 %v11475_v19  ;;  %9128 = vmatpush.bf16.msra.mxu3 %v11483_v26 }
0x11c4   :  { %v8609_v2 = vadd.f32 %v8608_v60, %v8596_v5  ;;  %v8824_v45 = vpack.c.bf16 %v8820_v29, %v8820_v29  ;;  %v7119_v60 = vperm.slane %v17860_v61, 3 }
0x11c5   :  { %9091 = vmatpush.bf16.msra.mxu0 %v11457_v41  ;;  %9104 = vmatpush.bf16.msra.mxu1 %v11465_v17 }
0x11c6   :  { %v8821_v38 = vmax.f32 %v8609_v2, 0.0 }
0x11c7   :  { %9116 = vmatpush.bf16.msra.mxu2 %v11474_v23  ;;  %9129 = vmatpush.bf16.msra.mxu3 %v11482_v32 }
0x11c8   :  { %v8825_v4 = vpack.c.bf16 %v8821_v38, %v8821_v38 }
0x11c9   :  { %9092 = vmatpush.bf16.msra.mxu0 %v11456_v54  ;;  %9105 = vmatpush.bf16.msra.mxu1 %v11464_v35  ;;  %v8597_v8 = vpop.f32.mrf.mxu2  ;;  %v8610_v48 = vpop.f32.mrf.mxu3  ;;  %v11481_v54 = vld [vmem:[%s18375_s17 + $0xe0] sm:$0xff] }
0x11cb   :  { %9117 = vmatpush.bf16.msra.mxu2 %v11473_v11  ;;  %9130 = vmatpush.bf16.msra.mxu3 %v11481_v54 }
0x11cd   :  { %9093 = vmatpush.bf16.msra.mxu0 %v11455_v20  ;;  %9106 = vmatpush.bf16.msra.mxu1 %v11463_v59 }
0x11cf   :  { %9118 = vmatpush.bf16.msra.mxu2 %v11472_v44  ;;  %9131 = vmatpush.bf16.msra.mxu3 %v11480_v6  ;;  %v11833_v44 = vld [vmem:[%s18376_s18] ss:$0 sm:$0xff] }
0x11d1   :  { %9094 = vmatpush.bf16.msra.mxu0 %v11454_v47  ;;  %9107 = vmatpush.bf16.msra.mxu1 %v11462_v37 }
0x11d3   :  { %9119 = vmatpush.bf16.msra.mxu2 %v11471_v52  ;;  %9132 = vmatpush.bf16.msra.mxu3 %v11479_v46 }
0x11d5   :  { %9095 = vmatpush.bf16.msra.mxu0 %v11453_v15  ;;  %9108 = vmatpush.bf16.msra.mxu1 %v11461_v27  ;;  %v8621_v10 = vpop.f32.mrf.mxu0  ;;  %v8634_v12 = vpop.f32.mrf.mxu1 }
0x11d6   :  { %v8622_v53 = vadd.f32 %v8621_v10, %v7118_v9 }
0x11d7   :  { %9120 = vmatpush.bf16.msra.mxu2 %v11470_v58  ;;  %9133 = vmatpush.bf16.msra.mxu3 %v11478_v51 }
0x11d8   :  { %9096 = vmatmul.bf16.vlgmr.msra.gmra.mxu0 %v8824_v45  ;;  %9109 = vmatmul.bf16.vlgmr.msra.gmra.mxu1 %v8825_v4  ;;  %v8635_v50 = vadd.f32 %v8634_v12, %v8622_v53 }
0x11db   :  { %9121 = vmatpush.bf16.msra.mxu2 %v11469_v56  ;;  %9134 = vmatpush.bf16.msra.mxu3 %v11477_v33 }
0x11dd   :  { %v8623_v25 = vpop.f32.mrf.mxu0  ;;  %v8636_v34 = vpop.f32.mrf.mxu1 }
0x11e1   :  { %v8647_v14 = vpop.f32.mrf.mxu2  ;;  %v8660_v31 = vpop.f32.mrf.mxu3 }
0x11e2   :  { %v8648_v21 = vadd.f32 %v8647_v14, %v8635_v50 }
0x11e4   :  { %v8661_v7 = vadd.f32 %v8660_v31, %v8648_v21 }
0x11e9   :  { %v8649_v13 = vpop.f32.mrf.mxu2  ;;  %v8662_v57 = vpop.f32.mrf.mxu3 }
0x11f5   :  { %v8673_v24 = vpop.f32.mrf.mxu0  ;;  %v8686_v0 = vpop.f32.mrf.mxu1 }
0x11f6   :  { %v8674_v16 = vadd.f32 %v8673_v24, %v8661_v7 }
0x11f8   :  { %v8687_v49 = vadd.f32 %v8686_v0, %v8674_v16 }
0x11fd   :  { %v8675_v39 = vpop.f32.mrf.mxu0  ;;  %v8688_v43 = vpop.f32.mrf.mxu1 }
0x1201   :  { %v8699_v1 = vpop.f32.mrf.mxu2  ;;  %v8712_v55 = vpop.f32.mrf.mxu3 }
0x1202   :  { %v8700_v30 = vadd.f32 %v8699_v1, %v8687_v49 }
0x1204   :  { %v8713_v28 = vadd.f32 %v8712_v55, %v8700_v30 }
0x1206   :  { %v8822_v22 = vmax.f32 %v8713_v28, 0.0 }
0x1208   :  { %v8826_v41 = vpack.c.bf16 %v8822_v22, %v8822_v22 }
0x1209   :  { %v8701_v17 = vpop.f32.mrf.mxu2  ;;  %v8714_v42 = vpop.f32.mrf.mxu3 }
0x120a   :  { %9122 = vmatmul.bf16.vlgmr.msra.gmra.mxu2 %v8826_v41 }
0x1215   :  { %v8725_v35 = vpop.f32.mrf.mxu0  ;;  %v8738_v63 = vpop.f32.mrf.mxu1 }
0x1216   :  { %v8726_v62 = vadd.f32 %v8725_v35, %v7119_v60 }
0x1218   :  { %v8739_v36 = vadd.f32 %v8738_v63, %v8726_v62 }
0x121d   :  { %v8727_v40 = vpop.f32.mrf.mxu0  ;;  %v8740_v20 = vpop.f32.mrf.mxu1 }
0x1221   :  { %v8751_v59 = vpop.f32.mrf.mxu2  ;;  %v8764_v3 = vpop.f32.mrf.mxu3 }
0x1222   :  { %v8752_v37 = vadd.f32 %v8751_v59, %v8739_v36 }
0x1224   :  { %v8765_v15 = vadd.f32 %v8764_v3, %v8752_v37 }
0x1229   :  { %v8753_v5 = vpop.f32.mrf.mxu2  ;;  %v8766_v47 = vpop.f32.mrf.mxu3 }
0x1235   :  { %v8777_v2 = vpop.f32.mrf.mxu0  ;;  %v8790_v38 = vpop.f32.mrf.mxu1 }
0x1236   :  { %v8778_v29 = vadd.f32 %v8777_v2, %v8765_v15 }
0x1238   :  { %v8791_v8 = vadd.f32 %v8790_v38, %v8778_v29 }
0x123d   :  { %v8779_v27 = vpop.f32.mrf.mxu0  ;;  %v8792_v19 = vpop.f32.mrf.mxu1 }
0x1241   :  { %v8803_v48 = vpop.f32.mrf.mxu2  ;;  %v8816_v4 = vpop.f32.mrf.mxu3 }
0x1242   :  { %v8804_v23 = vadd.f32 %v8803_v48, %v8791_v8 }
0x1244   :  { %v8817_v45 = vadd.f32 %v8816_v4, %v8804_v23 }
0x1246   :  { %v8823_v10 = vmax.f32 %v8817_v45, 0.0 }
0x1248   :  { %v8827_v12 = vpack.c.bf16 %v8823_v10, %v8823_v10 }
0x1249   :  { %v8805_v11 = vpop.f32.mrf.mxu2  ;;  %v8818_v61 = vpop.f32.mrf.mxu3 }
0x124a   :  { %9135 = vmatmul.bf16.vlgmr.msra.gmra.mxu3 %v8827_v12 }
0x1255   :  { %v9097_v52 = vpop.f32.mrf.mxu0  ;;  %v9110_v34 = vpop.f32.mrf.mxu1 }
0x1256   :  { %v9098_v25 = vadd.f32 %v11833_v44, %v9097_v52 }
0x1258   :  { %v9111_v14 = vadd.f32 %v9110_v34, %v9098_v25 }
0x125d   :  { %v9099_v31 = vpop.f32.mrf.mxu0  ;;  %v9112_v58 = vpop.f32.mrf.mxu1 }
0x128d   :  { %v9123_v56 = vpop.f32.mrf.mxu2 }
0x128e   :  { %v9124_v57 = vadd.f32 %v9123_v56, %v9111_v14 }
0x1295   :  { %v9125_v13 = vpop.f32.mrf.mxu2 }
0x12cd   :  { %v9136_v9 = vpop.f32.mrf.mxu3 }
0x12ce   :  { %v9137_v53 = vadd.f32 %v9136_v9, %v9124_v57 }
0x12d0   :  { %9141 = vst.msk [vmem:[#allocation13] sm:$0x3] %vm9140_vm4, %v9137_v53 }
0x12d1   :  { %9152 = dma.vmem_to_hbm [thread:$0]  %s9148_s0, 32, %s9150_s20, [#allocation14]  }
0x12d5   :  { %v9138_v50 = vpop.f32.mrf.mxu3 }
0x12d6   :  { %11970 = dma.done.wait [#allocation14], 32  }
0x12d7   :  { %11971 = vsyncadd [#allocation14], 4294967264 }
0x12d8   :  { %9157 = vsyncpa [#allocation14], 1 }

</bundles_post_ra>
